<compile_context>
chip_gen: v7x
topology: tpu7x:2x2x1
jax: 0.10.0
libtpu: 0.0.40
codegen_flags: <defaults>
</compile_context>

<pallas_src>
import numpy as np
import jax
import jax.numpy as jnp
from jax.experimental import pallas as pl
from jax.experimental.pallas import tpu as pltpu

_LN_EPS = 1e-5


def _make_fused_kernel(depth: int, T: int, F: int, C: int):
    """One kernel computing all `depth` dense-block layers for a single batch element."""
    P = 2 ** (depth - 1)          # max dilation (only used implicitly via per-layer pads)
    Cin_max = C * depth           # channels of the last layer's input
    K = 6 * Cin_max               # fixed im2col contraction size for every layer
    del P

    def kernel(x_ref, w_ref, ca_ref, fg_ref, o_ref):
        # x_ref : (1, T, F, C)          input block
        # w_ref : (depth, K, C)         packed, Cin-zero-padded, block-reversed conv weights
        # ca_ref: (depth, 2, C)         [conv bias ; prelu alpha]
        # fg_ref: (depth, 2, F)         [ln gamma ; ln beta]
        # o_ref : (1, T, F, C)          last layer output
        x = x_ref[0]                                   # (T, F, C)
        ca = ca_ref[...]                               # (depth, 2, C)
        fg = fg_ref[...]                               # (depth, 2, F)

        # Skip feature map kept entirely on-chip, channels in kernel order [x, out_0, out_1, ...].
        # Unused (future) channels are zero so the zero-padded weights make every layer a K-sized dot.
        feats = jnp.concatenate(
            [x, jnp.zeros((T, F, Cin_max - C), jnp.float32)], axis=-1) if Cin_max > C else x

        out = None
        for i in range(depth):
            dil = 2 ** i

            # Causal pad in T (dil rows on top) and symmetric pad in F (1 each side), on-chip.
            zc = jnp.zeros((T, 1, Cin_max), jnp.float32)
            xp = jnp.concatenate([zc, feats, zc], axis=1)              # (T, F+2, Cmax)
            zr = jnp.zeros((dil, F + 2, Cin_max), jnp.float32)
            xp = jnp.concatenate([zr, xp], axis=0)                     # (T+dil, F+2, Cmax)

            # im2col: the 6 dilated taps stacked along channels -> one MXU matmul.
            cols = [xp[kt * dil: kt * dil + T, kf: kf + F, :]
                    for kt in range(2) for kf in range(3)]
            im = jnp.concatenate(cols, axis=-1).reshape(T * F, K)      # (T*F, 6*Cmax)

            y = jnp.dot(im, w_ref[i], preferred_element_type=jnp.float32)   # (T*F, C)
            y = (y + ca[i, 0:1, :]).reshape(T, F, C)                   # conv bias

            # LayerNorm over F (f32)
            mean = jnp.mean(y, axis=1, keepdims=True)
            var = jnp.mean(jnp.square(y - mean), axis=1, keepdims=True)
            yn = (y - mean) * jax.lax.rsqrt(var + _LN_EPS)
            yn = yn * fg[i, 0:1, :][:, :, None] + fg[i, 1:2, :][:, :, None]

            # per-channel PReLU
            alpha = ca[i, 1:2, :][:, None, :]                          # (1, 1, C)
            out = jnp.where(yn >= 0, yn, yn * alpha)

            if i < depth - 1:
                # "concat" = write the new C channels of the on-chip skip map.
                pieces = [feats[:, :, :C * (i + 1)], out]
                if C * (i + 2) < Cin_max:
                    pieces.append(feats[:, :, C * (i + 2):])
                feats = jnp.concatenate(pieces, axis=-1)

        o_ref[0] = out.astype(o_ref.dtype)

    return kernel


def _pack_params(params, depth: int, F: int, C: int):
    """Pack per-layer params into 3 arrays; reorder/zero-pad conv weights to the kernel layout."""
    Cin_max = C * depth
    K = 6 * Cin_max
    w_list, ca_list, fg_list = [], [], []
    for i, (w, b, gamma, beta, alpha) in enumerate(params):
        nblk = i + 1                                   # skip has (i+1) channel blocks of size C
        # PyTorch skip order is [out_{i-1}, ..., out_0, x]; kernel keeps [x, out_0, ..., out_{i-1}]
        # -> reverse the Cin blocks of the weight.
        w_scr = w.reshape(2, 3, nblk, C, C)[:, :, ::-1].reshape(2, 3, nblk * C, C)
        w_pad = jnp.pad(w_scr, ((0, 0), (0, 0), (0, Cin_max - nblk * C), (0, 0)))
        w_list.append(w_pad.reshape(K, C))
        ca_list.append(jnp.stack([b.reshape(C), alpha.reshape(C)], axis=0))
        fg_list.append(jnp.stack([gamma.reshape(F), beta.reshape(F)], axis=0))
    return (jnp.stack(w_list).astype(jnp.float32),
            jnp.stack(ca_list).astype(jnp.float32),
            jnp.stack(fg_list).astype(jnp.float32))


def dense_block_forward(x_bhwc, params, depth: int):
    """Fused Pallas DenseBlock forward. x_bhwc: (B, T, F, C). Returns last-layer output."""
    B, T, F, C = x_bhwc.shape
    Cin_max = C * depth
    K = 6 * Cin_max
    w_packed, ca, fg = _pack_params(params, depth, F, C)
    kernel = _make_fused_kernel(depth, T, F, C)
    return pl.pallas_call(
        kernel,
        out_shape=jax.ShapeDtypeStruct((B, T, F, C), jnp.float32),
        grid=(B,),
        in_specs=[
            pl.BlockSpec((1, T, F, C), lambda b: (b, 0, 0, 0)),
            pl.BlockSpec((depth, K, C), lambda b: (0, 0, 0)),
            pl.BlockSpec((depth, 2, C), lambda b: (0, 0, 0)),
            pl.BlockSpec((depth, 2, F), lambda b: (0, 0, 0)),
        ],
        out_specs=pl.BlockSpec((1, T, F, C), lambda b: (b, 0, 0, 0)),
        compiler_params=pltpu.CompilerParams(
            dimension_semantics=("parallel",)),   # lets v7x split batches across its 2 TCs
    )(x_bhwc, w_packed, ca, fg)


def dense_block_reference(x_bhwc, params, depth: int):
    """Pure-JAX reference mirroring the PyTorch module (channels-last layout)."""
    skip = x_bhwc
    out = None
    for i in range(depth):
        dil = 2 ** i
        w, b, gamma, beta, alpha = params[i]
        xp = jnp.pad(skip, ((0, 0), (dil, 0), (1, 1), (0, 0)))
        y = jax.lax.conv_general_dilated(
            xp, w, window_strides=(1, 1), padding="VALID",
            rhs_dilation=(dil, 1),
            dimension_numbers=("NHWC", "HWIO", "NHWC"))
        y = y + b.reshape(1, 1, 1, -1)
        mean = jnp.mean(y, axis=2, keepdims=True)
        var = jnp.mean(jnp.square(y - mean), axis=2, keepdims=True)
        yn = (y - mean) * jax.lax.rsqrt(var + _LN_EPS)
        yn = yn * gamma.reshape(1, 1, -1, 1) + beta.reshape(1, 1, -1, 1)
        out = jnp.where(yn >= 0, yn, yn * alpha.reshape(1, 1, 1, -1))
        skip = jnp.concatenate([out, skip], axis=-1)   # new channels first (PyTorch order)
    return out


if __name__ == "__main__":
    B, C, T, Fdim = 2, 4, 8, 16     # batch, in_channels, time, input_size
    depth = 5

    key = jax.random.PRNGKey(0)
    kx, *klayers = jax.random.split(key, 1 + depth)

    # PyTorch-style input (NCHW) -> kernel layout (B, T, F, C)
    x_nchw = jax.random.normal(kx, (B, C, T, Fdim), jnp.float32)
    x_bhwc = jnp.transpose(x_nchw, (0, 2, 3, 1))

    params = []
    for i in range(depth):
        Cin = C * (i + 1)
        kw, kb, kg, kbt, ka = jax.random.split(klayers[i], 5)
        w = 0.1 * jax.random.normal(kw, (2, 3, Cin, C), jnp.float32)   # (kH, kW, Cin, Cout)
        b = 0.1 * jax.random.normal(kb, (1, C), jnp.float32)
        gamma = 1.0 + 0.1 * jax.random.normal(kg, (1, Fdim), jnp.float32)
        beta = 0.1 * jax.random.normal(kbt, (1, Fdim), jnp.float32)
        alpha = 0.25 + 0.05 * jax.random.normal(ka, (1, C), jnp.float32)
        params.append((w, b, gamma, beta, alpha))

    out = dense_block_forward(x_bhwc, params, depth)
    out = jax.block_until_ready(out)
    assert out.shape == (B, T, Fdim, C)

    ref = dense_block_reference(x_bhwc, params, depth)
    np.testing.assert_allclose(np.asarray(out), np.asarray(ref), atol=2e-4, rtol=2e-4)

    print("KERNEL_OK")
</pallas_src>

<mosaic_0001>
module attributes {stable_mosaic.version = 11 : i64} {
  func.func @kernel(%arg0: i32, %arg1: memref<1x8x16x4xf32, #tpu.memory_space<vmem>>, %arg2: memref<5x120x4xf32, #tpu.memory_space<vmem>>, %arg3: memref<5x2x4xf32, #tpu.memory_space<vmem>>, %arg4: memref<5x2x16xf32, #tpu.memory_space<vmem>>, %arg5: memref<1x8x16x4xf32, #tpu.memory_space<vmem>>) attributes {dimension_semantics = [#tpu.dimension_semantics<parallel>], iteration_bounds = array<i64: 2>, scalar_prefetch = 0 : i64, scratch_operands = 0 : i64, tpu.core_type = #tpu.core_type<tc>, window_params = [{transform_indices = @transform_0, window_bounds = array<i64: 1, 8, 16, 4>}, {pipeline_mode = #tpu.pipeline_mode<synchronous>, transform_indices = @transform_1, window_bounds = array<i64: 5, 120, 4>}, {pipeline_mode = #tpu.pipeline_mode<synchronous>, transform_indices = @transform_2, window_bounds = array<i64: 5, 2, 4>}, {pipeline_mode = #tpu.pipeline_mode<synchronous>, transform_indices = @transform_3, window_bounds = array<i64: 5, 2, 16>}, {transform_indices = @transform_4, window_bounds = array<i64: 1, 8, 16, 4>}]} {
    %c0 = arith.constant 0 : index
    %c0_0 = arith.constant 0 : index
    %c0_1 = arith.constant 0 : index
    %c0_2 = arith.constant 0 : index
    %0 = vector.load %arg1[%c0, %c0_0, %c0_1, %c0_2] : memref<1x8x16x4xf32, #tpu.memory_space<vmem>>, vector<1x8x16x4xf32>
    %1 = vector.shape_cast %0 : vector<1x8x16x4xf32> to vector<8x16x4xf32>
    %c0_3 = arith.constant 0 : index
    %c0_4 = arith.constant 0 : index
    %c0_5 = arith.constant 0 : index
    %2 = vector.load %arg3[%c0_3, %c0_4, %c0_5] : memref<5x2x4xf32, #tpu.memory_space<vmem>>, vector<5x2x4xf32>
    %c0_6 = arith.constant 0 : index
    %c0_7 = arith.constant 0 : index
    %c0_8 = arith.constant 0 : index
    %3 = vector.load %arg4[%c0_6, %c0_7, %c0_8] : memref<5x2x16xf32, #tpu.memory_space<vmem>>, vector<5x2x16xf32>
    %cst = arith.constant 0.000000e+00 : f32
    %4 = vector.broadcast %cst : f32 to vector<8x16x16xf32>
    %5 = tpu.concatenate %1, %4 in 2 : vector<8x16x4xf32>, vector<8x16x16xf32> -> vector<8x16x20xf32>
    %cst_9 = arith.constant 0.000000e+00 : f32
    %6 = vector.broadcast %cst_9 : f32 to vector<8x1x20xf32>
    %7 = tpu.concatenate %6, %5, %6 in 1 : vector<8x1x20xf32>, vector<8x16x20xf32>, vector<8x1x20xf32> -> vector<8x18x20xf32>
    %cst_10 = arith.constant 0.000000e+00 : f32
    %8 = vector.broadcast %cst_10 : f32 to vector<1x18x20xf32>
    %9 = tpu.concatenate %8, %7 in 0 : vector<1x18x20xf32>, vector<8x18x20xf32> -> vector<9x18x20xf32>
    %10 = vector.extract_strided_slice %9 {offsets = [0, 0, 0], sizes = [8, 16, 20], strides = [1, 1, 1]} : vector<9x18x20xf32> to vector<8x16x20xf32>
    %11 = vector.extract_strided_slice %9 {offsets = [0, 1, 0], sizes = [8, 16, 20], strides = [1, 1, 1]} : vector<9x18x20xf32> to vector<8x16x20xf32>
    %12 = vector.extract_strided_slice %9 {offsets = [0, 2, 0], sizes = [8, 16, 20], strides = [1, 1, 1]} : vector<9x18x20xf32> to vector<8x16x20xf32>
    %13 = vector.extract_strided_slice %9 {offsets = [1, 0, 0], sizes = [8, 16, 20], strides = [1, 1, 1]} : vector<9x18x20xf32> to vector<8x16x20xf32>
    %14 = vector.extract_strided_slice %9 {offsets = [1, 1, 0], sizes = [8, 16, 20], strides = [1, 1, 1]} : vector<9x18x20xf32> to vector<8x16x20xf32>
    %15 = vector.extract_strided_slice %9 {offsets = [1, 2, 0], sizes = [8, 16, 20], strides = [1, 1, 1]} : vector<9x18x20xf32> to vector<8x16x20xf32>
    %16 = tpu.concatenate %10, %11, %12, %13, %14, %15 in 2 : vector<8x16x20xf32>, vector<8x16x20xf32>, vector<8x16x20xf32>, vector<8x16x20xf32>, vector<8x16x20xf32>, vector<8x16x20xf32> -> vector<8x16x120xf32>
    %17 = vector.shape_cast %16 : vector<8x16x120xf32> to vector<128x120xf32>
    %c0_11 = arith.constant 0 : index
    %c0_12 = arith.constant 0 : index
    %c0_13 = arith.constant 0 : index
    %18 = vector.load %arg2[%c0_11, %c0_12, %c0_13] : memref<5x120x4xf32, #tpu.memory_space<vmem>>, vector<1x120x4xf32>
    %19 = vector.shape_cast %18 : vector<1x120x4xf32> to vector<120x4xf32>
    %cst_14 = arith.constant dense<0.000000e+00> : vector<128x4xf32>
    %20 = tpu.matmul %17, %19, %cst_14 {dimension_numbers = #tpu.dot_dimension_numbers<[1], [0], [0], [1], [0, 0, 1, 1], [], []>} : vector<128x120xf32>, vector<120x4xf32>, vector<128x4xf32> -> vector<128x4xf32>
    %21 = vector.extract_strided_slice %2 {offsets = [0, 0, 0], sizes = [1, 1, 4], strides = [1, 1, 1]} : vector<5x2x4xf32> to vector<1x1x4xf32>
    %22 = vector.shape_cast %21 : vector<1x1x4xf32> to vector<1x4xf32>
    %23 = vector.broadcast %22 : vector<1x4xf32> to vector<128x4xf32>
    %24 = arith.addf %20, %23 : vector<128x4xf32>
    %25 = vector.shape_cast %24 : vector<128x4xf32> to vector<8x16x4xf32>
    %cst_15 = arith.constant dense<0.000000e+00> : vector<8x4xf32>
    %26 = vector.multi_reduction <add>, %25, %cst_15 [1] : vector<8x16x4xf32> to vector<8x4xf32>
    %27 = vector.shape_cast %26 : vector<8x4xf32> to vector<8x1x4xf32>
    %cst_16 = arith.constant 1.600000e+01 : f32
    %28 = vector.broadcast %cst_16 : f32 to vector<8x1x4xf32>
    %29 = arith.divf %27, %28 : vector<8x1x4xf32>
    %30 = vector.broadcast %29 : vector<8x1x4xf32> to vector<8x16x4xf32>
    %31 = arith.subf %25, %30 : vector<8x16x4xf32>
    %32 = arith.mulf %31, %31 : vector<8x16x4xf32>
    %cst_17 = arith.constant dense<0.000000e+00> : vector<8x4xf32>
    %33 = vector.multi_reduction <add>, %32, %cst_17 [1] : vector<8x16x4xf32> to vector<8x4xf32>
    %34 = vector.shape_cast %33 : vector<8x4xf32> to vector<8x1x4xf32>
    %cst_18 = arith.constant 1.600000e+01 : f32
    %35 = vector.broadcast %cst_18 : f32 to vector<8x1x4xf32>
    %36 = arith.divf %34, %35 : vector<8x1x4xf32>
    %37 = vector.broadcast %29 : vector<8x1x4xf32> to vector<8x16x4xf32>
    %38 = arith.subf %25, %37 : vector<8x16x4xf32>
    %cst_19 = arith.constant 9.99999974E-6 : f32
    %39 = vector.broadcast %cst_19 : f32 to vector<8x1x4xf32>
    %40 = arith.addf %36, %39 : vector<8x1x4xf32>
    %41 = math.rsqrt %40 : vector<8x1x4xf32>
    %42 = vector.broadcast %41 : vector<8x1x4xf32> to vector<8x16x4xf32>
    %43 = arith.mulf %38, %42 : vector<8x16x4xf32>
    %44 = vector.extract_strided_slice %3 {offsets = [0, 0, 0], sizes = [1, 1, 16], strides = [1, 1, 1]} : vector<5x2x16xf32> to vector<1x1x16xf32>
    %45 = vector.shape_cast %44 : vector<1x1x16xf32> to vector<1x16xf32>
    %46 = vector.shape_cast %45 : vector<1x16xf32> to vector<1x16x1xf32>
    %47 = vector.broadcast %46 : vector<1x16x1xf32> to vector<8x16x4xf32>
    %48 = arith.mulf %43, %47 : vector<8x16x4xf32>
    %49 = vector.extract_strided_slice %3 {offsets = [0, 1, 0], sizes = [1, 1, 16], strides = [1, 1, 1]} : vector<5x2x16xf32> to vector<1x1x16xf32>
    %50 = vector.shape_cast %49 : vector<1x1x16xf32> to vector<1x16xf32>
    %51 = vector.shape_cast %50 : vector<1x16xf32> to vector<1x16x1xf32>
    %52 = vector.broadcast %51 : vector<1x16x1xf32> to vector<8x16x4xf32>
    %53 = arith.addf %48, %52 : vector<8x16x4xf32>
    %54 = vector.extract_strided_slice %2 {offsets = [0, 1, 0], sizes = [1, 1, 4], strides = [1, 1, 1]} : vector<5x2x4xf32> to vector<1x1x4xf32>
    %55 = vector.shape_cast %54 : vector<1x1x4xf32> to vector<1x4xf32>
    %56 = vector.shape_cast %55 : vector<1x4xf32> to vector<1x1x4xf32>
    %cst_20 = arith.constant 0.000000e+00 : f32
    %57 = vector.broadcast %cst_20 : f32 to vector<8x16x4xf32>
    %58 = arith.cmpf oge, %53, %57 : vector<8x16x4xf32>
    %59 = vector.broadcast %56 : vector<1x1x4xf32> to vector<8x16x4xf32>
    %60 = arith.mulf %53, %59 : vector<8x16x4xf32>
    %61 = arith.select %58, %53, %60 : vector<8x16x4xi1>, vector<8x16x4xf32>
    %62 = vector.extract_strided_slice %5 {offsets = [0, 0, 0], sizes = [8, 16, 4], strides = [1, 1, 1]} : vector<8x16x20xf32> to vector<8x16x4xf32>
    %63 = vector.extract_strided_slice %5 {offsets = [0, 0, 8], sizes = [8, 16, 12], strides = [1, 1, 1]} : vector<8x16x20xf32> to vector<8x16x12xf32>
    %64 = tpu.concatenate %62, %61, %63 in 2 : vector<8x16x4xf32>, vector<8x16x4xf32>, vector<8x16x12xf32> -> vector<8x16x20xf32>
    %cst_21 = arith.constant 0.000000e+00 : f32
    %65 = vector.broadcast %cst_21 : f32 to vector<8x1x20xf32>
    %66 = tpu.concatenate %65, %64, %65 in 1 : vector<8x1x20xf32>, vector<8x16x20xf32>, vector<8x1x20xf32> -> vector<8x18x20xf32>
    %cst_22 = arith.constant 0.000000e+00 : f32
    %67 = vector.broadcast %cst_22 : f32 to vector<2x18x20xf32>
    %68 = tpu.concatenate %67, %66 in 0 : vector<2x18x20xf32>, vector<8x18x20xf32> -> vector<10x18x20xf32>
    %69 = vector.extract_strided_slice %68 {offsets = [0, 0, 0], sizes = [8, 16, 20], strides = [1, 1, 1]} : vector<10x18x20xf32> to vector<8x16x20xf32>
    %70 = vector.extract_strided_slice %68 {offsets = [0, 1, 0], sizes = [8, 16, 20], strides = [1, 1, 1]} : vector<10x18x20xf32> to vector<8x16x20xf32>
    %71 = vector.extract_strided_slice %68 {offsets = [0, 2, 0], sizes = [8, 16, 20], strides = [1, 1, 1]} : vector<10x18x20xf32> to vector<8x16x20xf32>
    %72 = vector.extract_strided_slice %68 {offsets = [2, 0, 0], sizes = [8, 16, 20], strides = [1, 1, 1]} : vector<10x18x20xf32> to vector<8x16x20xf32>
    %73 = vector.extract_strided_slice %68 {offsets = [2, 1, 0], sizes = [8, 16, 20], strides = [1, 1, 1]} : vector<10x18x20xf32> to vector<8x16x20xf32>
    %74 = vector.extract_strided_slice %68 {offsets = [2, 2, 0], sizes = [8, 16, 20], strides = [1, 1, 1]} : vector<10x18x20xf32> to vector<8x16x20xf32>
    %75 = tpu.concatenate %69, %70, %71, %72, %73, %74 in 2 : vector<8x16x20xf32>, vector<8x16x20xf32>, vector<8x16x20xf32>, vector<8x16x20xf32>, vector<8x16x20xf32>, vector<8x16x20xf32> -> vector<8x16x120xf32>
    %76 = vector.shape_cast %75 : vector<8x16x120xf32> to vector<128x120xf32>
    %c1 = arith.constant 1 : index
    %c0_23 = arith.constant 0 : index
    %c0_24 = arith.constant 0 : index
    %77 = vector.load %arg2[%c1, %c0_23, %c0_24] : memref<5x120x4xf32, #tpu.memory_space<vmem>>, vector<1x120x4xf32>
    %78 = vector.shape_cast %77 : vector<1x120x4xf32> to vector<120x4xf32>
    %cst_25 = arith.constant dense<0.000000e+00> : vector<128x4xf32>
    %79 = tpu.matmul %76, %78, %cst_25 {dimension_numbers = #tpu.dot_dimension_numbers<[1], [0], [0], [1], [0, 0, 1, 1], [], []>} : vector<128x120xf32>, vector<120x4xf32>, vector<128x4xf32> -> vector<128x4xf32>
    %80 = vector.extract_strided_slice %2 {offsets = [1, 0, 0], sizes = [1, 1, 4], strides = [1, 1, 1]} : vector<5x2x4xf32> to vector<1x1x4xf32>
    %81 = vector.shape_cast %80 : vector<1x1x4xf32> to vector<1x4xf32>
    %82 = vector.broadcast %81 : vector<1x4xf32> to vector<128x4xf32>
    %83 = arith.addf %79, %82 : vector<128x4xf32>
    %84 = vector.shape_cast %83 : vector<128x4xf32> to vector<8x16x4xf32>
    %cst_26 = arith.constant dense<0.000000e+00> : vector<8x4xf32>
    %85 = vector.multi_reduction <add>, %84, %cst_26 [1] : vector<8x16x4xf32> to vector<8x4xf32>
    %86 = vector.shape_cast %85 : vector<8x4xf32> to vector<8x1x4xf32>
    %cst_27 = arith.constant 1.600000e+01 : f32
    %87 = vector.broadcast %cst_27 : f32 to vector<8x1x4xf32>
    %88 = arith.divf %86, %87 : vector<8x1x4xf32>
    %89 = vector.broadcast %88 : vector<8x1x4xf32> to vector<8x16x4xf32>
    %90 = arith.subf %84, %89 : vector<8x16x4xf32>
    %91 = arith.mulf %90, %90 : vector<8x16x4xf32>
    %cst_28 = arith.constant dense<0.000000e+00> : vector<8x4xf32>
    %92 = vector.multi_reduction <add>, %91, %cst_28 [1] : vector<8x16x4xf32> to vector<8x4xf32>
    %93 = vector.shape_cast %92 : vector<8x4xf32> to vector<8x1x4xf32>
    %cst_29 = arith.constant 1.600000e+01 : f32
    %94 = vector.broadcast %cst_29 : f32 to vector<8x1x4xf32>
    %95 = arith.divf %93, %94 : vector<8x1x4xf32>
    %96 = vector.broadcast %88 : vector<8x1x4xf32> to vector<8x16x4xf32>
    %97 = arith.subf %84, %96 : vector<8x16x4xf32>
    %cst_30 = arith.constant 9.99999974E-6 : f32
    %98 = vector.broadcast %cst_30 : f32 to vector<8x1x4xf32>
    %99 = arith.addf %95, %98 : vector<8x1x4xf32>
    %100 = math.rsqrt %99 : vector<8x1x4xf32>
    %101 = vector.broadcast %100 : vector<8x1x4xf32> to vector<8x16x4xf32>
    %102 = arith.mulf %97, %101 : vector<8x16x4xf32>
    %103 = vector.extract_strided_slice %3 {offsets = [1, 0, 0], sizes = [1, 1, 16], strides = [1, 1, 1]} : vector<5x2x16xf32> to vector<1x1x16xf32>
    %104 = vector.shape_cast %103 : vector<1x1x16xf32> to vector<1x16xf32>
    %105 = vector.shape_cast %104 : vector<1x16xf32> to vector<1x16x1xf32>
    %106 = vector.broadcast %105 : vector<1x16x1xf32> to vector<8x16x4xf32>
    %107 = arith.mulf %102, %106 : vector<8x16x4xf32>
    %108 = vector.extract_strided_slice %3 {offsets = [1, 1, 0], sizes = [1, 1, 16], strides = [1, 1, 1]} : vector<5x2x16xf32> to vector<1x1x16xf32>
    %109 = vector.shape_cast %108 : vector<1x1x16xf32> to vector<1x16xf32>
    %110 = vector.shape_cast %109 : vector<1x16xf32> to vector<1x16x1xf32>
    %111 = vector.broadcast %110 : vector<1x16x1xf32> to vector<8x16x4xf32>
    %112 = arith.addf %107, %111 : vector<8x16x4xf32>
    %113 = vector.extract_strided_slice %2 {offsets = [1, 1, 0], sizes = [1, 1, 4], strides = [1, 1, 1]} : vector<5x2x4xf32> to vector<1x1x4xf32>
    %114 = vector.shape_cast %113 : vector<1x1x4xf32> to vector<1x4xf32>
    %115 = vector.shape_cast %114 : vector<1x4xf32> to vector<1x1x4xf32>
    %cst_31 = arith.constant 0.000000e+00 : f32
    %116 = vector.broadcast %cst_31 : f32 to vector<8x16x4xf32>
    %117 = arith.cmpf oge, %112, %116 : vector<8x16x4xf32>
    %118 = vector.broadcast %115 : vector<1x1x4xf32> to vector<8x16x4xf32>
    %119 = arith.mulf %112, %118 : vector<8x16x4xf32>
    %120 = arith.select %117, %112, %119 : vector<8x16x4xi1>, vector<8x16x4xf32>
    %121 = vector.extract_strided_slice %64 {offsets = [0, 0, 0], sizes = [8, 16, 8], strides = [1, 1, 1]} : vector<8x16x20xf32> to vector<8x16x8xf32>
    %122 = vector.extract_strided_slice %64 {offsets = [0, 0, 12], sizes = [8, 16, 8], strides = [1, 1, 1]} : vector<8x16x20xf32> to vector<8x16x8xf32>
    %123 = tpu.concatenate %121, %120, %122 in 2 : vector<8x16x8xf32>, vector<8x16x4xf32>, vector<8x16x8xf32> -> vector<8x16x20xf32>
    %cst_32 = arith.constant 0.000000e+00 : f32
    %124 = vector.broadcast %cst_32 : f32 to vector<8x1x20xf32>
    %125 = tpu.concatenate %124, %123, %124 in 1 : vector<8x1x20xf32>, vector<8x16x20xf32>, vector<8x1x20xf32> -> vector<8x18x20xf32>
    %cst_33 = arith.constant 0.000000e+00 : f32
    %126 = vector.broadcast %cst_33 : f32 to vector<4x18x20xf32>
    %127 = tpu.concatenate %126, %125 in 0 : vector<4x18x20xf32>, vector<8x18x20xf32> -> vector<12x18x20xf32>
    %128 = vector.extract_strided_slice %127 {offsets = [0, 0, 0], sizes = [8, 16, 20], strides = [1, 1, 1]} : vector<12x18x20xf32> to vector<8x16x20xf32>
    %129 = vector.extract_strided_slice %127 {offsets = [0, 1, 0], sizes = [8, 16, 20], strides = [1, 1, 1]} : vector<12x18x20xf32> to vector<8x16x20xf32>
    %130 = vector.extract_strided_slice %127 {offsets = [0, 2, 0], sizes = [8, 16, 20], strides = [1, 1, 1]} : vector<12x18x20xf32> to vector<8x16x20xf32>
    %131 = vector.extract_strided_slice %127 {offsets = [4, 0, 0], sizes = [8, 16, 20], strides = [1, 1, 1]} : vector<12x18x20xf32> to vector<8x16x20xf32>
    %132 = vector.extract_strided_slice %127 {offsets = [4, 1, 0], sizes = [8, 16, 20], strides = [1, 1, 1]} : vector<12x18x20xf32> to vector<8x16x20xf32>
    %133 = vector.extract_strided_slice %127 {offsets = [4, 2, 0], sizes = [8, 16, 20], strides = [1, 1, 1]} : vector<12x18x20xf32> to vector<8x16x20xf32>
    %134 = tpu.concatenate %128, %129, %130, %131, %132, %133 in 2 : vector<8x16x20xf32>, vector<8x16x20xf32>, vector<8x16x20xf32>, vector<8x16x20xf32>, vector<8x16x20xf32>, vector<8x16x20xf32> -> vector<8x16x120xf32>
    %135 = vector.shape_cast %134 : vector<8x16x120xf32> to vector<128x120xf32>
    %c2 = arith.constant 2 : index
    %c0_34 = arith.constant 0 : index
    %c0_35 = arith.constant 0 : index
    %136 = vector.load %arg2[%c2, %c0_34, %c0_35] : memref<5x120x4xf32, #tpu.memory_space<vmem>>, vector<1x120x4xf32>
    %137 = vector.shape_cast %136 : vector<1x120x4xf32> to vector<120x4xf32>
    %cst_36 = arith.constant dense<0.000000e+00> : vector<128x4xf32>
    %138 = tpu.matmul %135, %137, %cst_36 {dimension_numbers = #tpu.dot_dimension_numbers<[1], [0], [0], [1], [0, 0, 1, 1], [], []>} : vector<128x120xf32>, vector<120x4xf32>, vector<128x4xf32> -> vector<128x4xf32>
    %139 = vector.extract_strided_slice %2 {offsets = [2, 0, 0], sizes = [1, 1, 4], strides = [1, 1, 1]} : vector<5x2x4xf32> to vector<1x1x4xf32>
    %140 = vector.shape_cast %139 : vector<1x1x4xf32> to vector<1x4xf32>
    %141 = vector.broadcast %140 : vector<1x4xf32> to vector<128x4xf32>
    %142 = arith.addf %138, %141 : vector<128x4xf32>
    %143 = vector.shape_cast %142 : vector<128x4xf32> to vector<8x16x4xf32>
    %cst_37 = arith.constant dense<0.000000e+00> : vector<8x4xf32>
    %144 = vector.multi_reduction <add>, %143, %cst_37 [1] : vector<8x16x4xf32> to vector<8x4xf32>
    %145 = vector.shape_cast %144 : vector<8x4xf32> to vector<8x1x4xf32>
    %cst_38 = arith.constant 1.600000e+01 : f32
    %146 = vector.broadcast %cst_38 : f32 to vector<8x1x4xf32>
    %147 = arith.divf %145, %146 : vector<8x1x4xf32>
    %148 = vector.broadcast %147 : vector<8x1x4xf32> to vector<8x16x4xf32>
    %149 = arith.subf %143, %148 : vector<8x16x4xf32>
    %150 = arith.mulf %149, %149 : vector<8x16x4xf32>
    %cst_39 = arith.constant dense<0.000000e+00> : vector<8x4xf32>
    %151 = vector.multi_reduction <add>, %150, %cst_39 [1] : vector<8x16x4xf32> to vector<8x4xf32>
    %152 = vector.shape_cast %151 : vector<8x4xf32> to vector<8x1x4xf32>
    %cst_40 = arith.constant 1.600000e+01 : f32
    %153 = vector.broadcast %cst_40 : f32 to vector<8x1x4xf32>
    %154 = arith.divf %152, %153 : vector<8x1x4xf32>
    %155 = vector.broadcast %147 : vector<8x1x4xf32> to vector<8x16x4xf32>
    %156 = arith.subf %143, %155 : vector<8x16x4xf32>
    %cst_41 = arith.constant 9.99999974E-6 : f32
    %157 = vector.broadcast %cst_41 : f32 to vector<8x1x4xf32>
    %158 = arith.addf %154, %157 : vector<8x1x4xf32>
    %159 = math.rsqrt %158 : vector<8x1x4xf32>
    %160 = vector.broadcast %159 : vector<8x1x4xf32> to vector<8x16x4xf32>
    %161 = arith.mulf %156, %160 : vector<8x16x4xf32>
    %162 = vector.extract_strided_slice %3 {offsets = [2, 0, 0], sizes = [1, 1, 16], strides = [1, 1, 1]} : vector<5x2x16xf32> to vector<1x1x16xf32>
    %163 = vector.shape_cast %162 : vector<1x1x16xf32> to vector<1x16xf32>
    %164 = vector.shape_cast %163 : vector<1x16xf32> to vector<1x16x1xf32>
    %165 = vector.broadcast %164 : vector<1x16x1xf32> to vector<8x16x4xf32>
    %166 = arith.mulf %161, %165 : vector<8x16x4xf32>
    %167 = vector.extract_strided_slice %3 {offsets = [2, 1, 0], sizes = [1, 1, 16], strides = [1, 1, 1]} : vector<5x2x16xf32> to vector<1x1x16xf32>
    %168 = vector.shape_cast %167 : vector<1x1x16xf32> to vector<1x16xf32>
    %169 = vector.shape_cast %168 : vector<1x16xf32> to vector<1x16x1xf32>
    %170 = vector.broadcast %169 : vector<1x16x1xf32> to vector<8x16x4xf32>
    %171 = arith.addf %166, %170 : vector<8x16x4xf32>
    %172 = vector.extract_strided_slice %2 {offsets = [2, 1, 0], sizes = [1, 1, 4], strides = [1, 1, 1]} : vector<5x2x4xf32> to vector<1x1x4xf32>
    %173 = vector.shape_cast %172 : vector<1x1x4xf32> to vector<1x4xf32>
    %174 = vector.shape_cast %173 : vector<1x4xf32> to vector<1x1x4xf32>
    %cst_42 = arith.constant 0.000000e+00 : f32
    %175 = vector.broadcast %cst_42 : f32 to vector<8x16x4xf32>
    %176 = arith.cmpf oge, %171, %175 : vector<8x16x4xf32>
    %177 = vector.broadcast %174 : vector<1x1x4xf32> to vector<8x16x4xf32>
    %178 = arith.mulf %171, %177 : vector<8x16x4xf32>
    %179 = arith.select %176, %171, %178 : vector<8x16x4xi1>, vector<8x16x4xf32>
    %180 = vector.extract_strided_slice %123 {offsets = [0, 0, 0], sizes = [8, 16, 12], strides = [1, 1, 1]} : vector<8x16x20xf32> to vector<8x16x12xf32>
    %181 = vector.extract_strided_slice %123 {offsets = [0, 0, 16], sizes = [8, 16, 4], strides = [1, 1, 1]} : vector<8x16x20xf32> to vector<8x16x4xf32>
    %182 = tpu.concatenate %180, %179, %181 in 2 : vector<8x16x12xf32>, vector<8x16x4xf32>, vector<8x16x4xf32> -> vector<8x16x20xf32>
    %cst_43 = arith.constant 0.000000e+00 : f32
    %183 = vector.broadcast %cst_43 : f32 to vector<8x1x20xf32>
    %184 = tpu.concatenate %183, %182, %183 in 1 : vector<8x1x20xf32>, vector<8x16x20xf32>, vector<8x1x20xf32> -> vector<8x18x20xf32>
    %cst_44 = arith.constant 0.000000e+00 : f32
    %185 = vector.broadcast %cst_44 : f32 to vector<8x18x20xf32>
    %186 = tpu.concatenate %185, %184 in 0 : vector<8x18x20xf32>, vector<8x18x20xf32> -> vector<16x18x20xf32>
    %187 = vector.extract_strided_slice %186 {offsets = [0, 0, 0], sizes = [8, 16, 20], strides = [1, 1, 1]} : vector<16x18x20xf32> to vector<8x16x20xf32>
    %188 = vector.extract_strided_slice %186 {offsets = [0, 1, 0], sizes = [8, 16, 20], strides = [1, 1, 1]} : vector<16x18x20xf32> to vector<8x16x20xf32>
    %189 = vector.extract_strided_slice %186 {offsets = [0, 2, 0], sizes = [8, 16, 20], strides = [1, 1, 1]} : vector<16x18x20xf32> to vector<8x16x20xf32>
    %190 = vector.extract_strided_slice %186 {offsets = [8, 0, 0], sizes = [8, 16, 20], strides = [1, 1, 1]} : vector<16x18x20xf32> to vector<8x16x20xf32>
    %191 = vector.extract_strided_slice %186 {offsets = [8, 1, 0], sizes = [8, 16, 20], strides = [1, 1, 1]} : vector<16x18x20xf32> to vector<8x16x20xf32>
    %192 = vector.extract_strided_slice %186 {offsets = [8, 2, 0], sizes = [8, 16, 20], strides = [1, 1, 1]} : vector<16x18x20xf32> to vector<8x16x20xf32>
    %193 = tpu.concatenate %187, %188, %189, %190, %191, %192 in 2 : vector<8x16x20xf32>, vector<8x16x20xf32>, vector<8x16x20xf32>, vector<8x16x20xf32>, vector<8x16x20xf32>, vector<8x16x20xf32> -> vector<8x16x120xf32>
    %194 = vector.shape_cast %193 : vector<8x16x120xf32> to vector<128x120xf32>
    %c3 = arith.constant 3 : index
    %c0_45 = arith.constant 0 : index
    %c0_46 = arith.constant 0 : index
    %195 = vector.load %arg2[%c3, %c0_45, %c0_46] : memref<5x120x4xf32, #tpu.memory_space<vmem>>, vector<1x120x4xf32>
    %196 = vector.shape_cast %195 : vector<1x120x4xf32> to vector<120x4xf32>
    %cst_47 = arith.constant dense<0.000000e+00> : vector<128x4xf32>
    %197 = tpu.matmul %194, %196, %cst_47 {dimension_numbers = #tpu.dot_dimension_numbers<[1], [0], [0], [1], [0, 0, 1, 1], [], []>} : vector<128x120xf32>, vector<120x4xf32>, vector<128x4xf32> -> vector<128x4xf32>
    %198 = vector.extract_strided_slice %2 {offsets = [3, 0, 0], sizes = [1, 1, 4], strides = [1, 1, 1]} : vector<5x2x4xf32> to vector<1x1x4xf32>
    %199 = vector.shape_cast %198 : vector<1x1x4xf32> to vector<1x4xf32>
    %200 = vector.broadcast %199 : vector<1x4xf32> to vector<128x4xf32>
    %201 = arith.addf %197, %200 : vector<128x4xf32>
    %202 = vector.shape_cast %201 : vector<128x4xf32> to vector<8x16x4xf32>
    %cst_48 = arith.constant dense<0.000000e+00> : vector<8x4xf32>
    %203 = vector.multi_reduction <add>, %202, %cst_48 [1] : vector<8x16x4xf32> to vector<8x4xf32>
    %204 = vector.shape_cast %203 : vector<8x4xf32> to vector<8x1x4xf32>
    %cst_49 = arith.constant 1.600000e+01 : f32
    %205 = vector.broadcast %cst_49 : f32 to vector<8x1x4xf32>
    %206 = arith.divf %204, %205 : vector<8x1x4xf32>
    %207 = vector.broadcast %206 : vector<8x1x4xf32> to vector<8x16x4xf32>
    %208 = arith.subf %202, %207 : vector<8x16x4xf32>
    %209 = arith.mulf %208, %208 : vector<8x16x4xf32>
    %cst_50 = arith.constant dense<0.000000e+00> : vector<8x4xf32>
    %210 = vector.multi_reduction <add>, %209, %cst_50 [1] : vector<8x16x4xf32> to vector<8x4xf32>
    %211 = vector.shape_cast %210 : vector<8x4xf32> to vector<8x1x4xf32>
    %cst_51 = arith.constant 1.600000e+01 : f32
    %212 = vector.broadcast %cst_51 : f32 to vector<8x1x4xf32>
    %213 = arith.divf %211, %212 : vector<8x1x4xf32>
    %214 = vector.broadcast %206 : vector<8x1x4xf32> to vector<8x16x4xf32>
    %215 = arith.subf %202, %214 : vector<8x16x4xf32>
    %cst_52 = arith.constant 9.99999974E-6 : f32
    %216 = vector.broadcast %cst_52 : f32 to vector<8x1x4xf32>
    %217 = arith.addf %213, %216 : vector<8x1x4xf32>
    %218 = math.rsqrt %217 : vector<8x1x4xf32>
    %219 = vector.broadcast %218 : vector<8x1x4xf32> to vector<8x16x4xf32>
    %220 = arith.mulf %215, %219 : vector<8x16x4xf32>
    %221 = vector.extract_strided_slice %3 {offsets = [3, 0, 0], sizes = [1, 1, 16], strides = [1, 1, 1]} : vector<5x2x16xf32> to vector<1x1x16xf32>
    %222 = vector.shape_cast %221 : vector<1x1x16xf32> to vector<1x16xf32>
    %223 = vector.shape_cast %222 : vector<1x16xf32> to vector<1x16x1xf32>
    %224 = vector.broadcast %223 : vector<1x16x1xf32> to vector<8x16x4xf32>
    %225 = arith.mulf %220, %224 : vector<8x16x4xf32>
    %226 = vector.extract_strided_slice %3 {offsets = [3, 1, 0], sizes = [1, 1, 16], strides = [1, 1, 1]} : vector<5x2x16xf32> to vector<1x1x16xf32>
    %227 = vector.shape_cast %226 : vector<1x1x16xf32> to vector<1x16xf32>
    %228 = vector.shape_cast %227 : vector<1x16xf32> to vector<1x16x1xf32>
    %229 = vector.broadcast %228 : vector<1x16x1xf32> to vector<8x16x4xf32>
    %230 = arith.addf %225, %229 : vector<8x16x4xf32>
    %231 = vector.extract_strided_slice %2 {offsets = [3, 1, 0], sizes = [1, 1, 4], strides = [1, 1, 1]} : vector<5x2x4xf32> to vector<1x1x4xf32>
    %232 = vector.shape_cast %231 : vector<1x1x4xf32> to vector<1x4xf32>
    %233 = vector.shape_cast %232 : vector<1x4xf32> to vector<1x1x4xf32>
    %cst_53 = arith.constant 0.000000e+00 : f32
    %234 = vector.broadcast %cst_53 : f32 to vector<8x16x4xf32>
    %235 = arith.cmpf oge, %230, %234 : vector<8x16x4xf32>
    %236 = vector.broadcast %233 : vector<1x1x4xf32> to vector<8x16x4xf32>
    %237 = arith.mulf %230, %236 : vector<8x16x4xf32>
    %238 = arith.select %235, %230, %237 : vector<8x16x4xi1>, vector<8x16x4xf32>
    %239 = vector.extract_strided_slice %182 {offsets = [0, 0, 0], sizes = [8, 16, 16], strides = [1, 1, 1]} : vector<8x16x20xf32> to vector<8x16x16xf32>
    %240 = tpu.concatenate %239, %238 in 2 : vector<8x16x16xf32>, vector<8x16x4xf32> -> vector<8x16x20xf32>
    %cst_54 = arith.constant 0.000000e+00 : f32
    %241 = vector.broadcast %cst_54 : f32 to vector<8x1x20xf32>
    %242 = tpu.concatenate %241, %240, %241 in 1 : vector<8x1x20xf32>, vector<8x16x20xf32>, vector<8x1x20xf32> -> vector<8x18x20xf32>
    %cst_55 = arith.constant 0.000000e+00 : f32
    %243 = vector.broadcast %cst_55 : f32 to vector<16x18x20xf32>
    %244 = tpu.concatenate %243, %242 in 0 : vector<16x18x20xf32>, vector<8x18x20xf32> -> vector<24x18x20xf32>
    %245 = vector.extract_strided_slice %244 {offsets = [0, 0, 0], sizes = [8, 16, 20], strides = [1, 1, 1]} : vector<24x18x20xf32> to vector<8x16x20xf32>
    %246 = vector.extract_strided_slice %244 {offsets = [0, 1, 0], sizes = [8, 16, 20], strides = [1, 1, 1]} : vector<24x18x20xf32> to vector<8x16x20xf32>
    %247 = vector.extract_strided_slice %244 {offsets = [0, 2, 0], sizes = [8, 16, 20], strides = [1, 1, 1]} : vector<24x18x20xf32> to vector<8x16x20xf32>
    %248 = vector.extract_strided_slice %244 {offsets = [16, 0, 0], sizes = [8, 16, 20], strides = [1, 1, 1]} : vector<24x18x20xf32> to vector<8x16x20xf32>
    %249 = vector.extract_strided_slice %244 {offsets = [16, 1, 0], sizes = [8, 16, 20], strides = [1, 1, 1]} : vector<24x18x20xf32> to vector<8x16x20xf32>
    %250 = vector.extract_strided_slice %244 {offsets = [16, 2, 0], sizes = [8, 16, 20], strides = [1, 1, 1]} : vector<24x18x20xf32> to vector<8x16x20xf32>
    %251 = tpu.concatenate %245, %246, %247, %248, %249, %250 in 2 : vector<8x16x20xf32>, vector<8x16x20xf32>, vector<8x16x20xf32>, vector<8x16x20xf32>, vector<8x16x20xf32>, vector<8x16x20xf32> -> vector<8x16x120xf32>
    %252 = vector.shape_cast %251 : vector<8x16x120xf32> to vector<128x120xf32>
    %c4 = arith.constant 4 : index
    %c0_56 = arith.constant 0 : index
    %c0_57 = arith.constant 0 : index
    %253 = vector.load %arg2[%c4, %c0_56, %c0_57] : memref<5x120x4xf32, #tpu.memory_space<vmem>>, vector<1x120x4xf32>
    %254 = vector.shape_cast %253 : vector<1x120x4xf32> to vector<120x4xf32>
    %cst_58 = arith.constant dense<0.000000e+00> : vector<128x4xf32>
    %255 = tpu.matmul %252, %254, %cst_58 {dimension_numbers = #tpu.dot_dimension_numbers<[1], [0], [0], [1], [0, 0, 1, 1], [], []>} : vector<128x120xf32>, vector<120x4xf32>, vector<128x4xf32> -> vector<128x4xf32>
    %256 = vector.extract_strided_slice %2 {offsets = [4, 0, 0], sizes = [1, 1, 4], strides = [1, 1, 1]} : vector<5x2x4xf32> to vector<1x1x4xf32>
    %257 = vector.shape_cast %256 : vector<1x1x4xf32> to vector<1x4xf32>
    %258 = vector.broadcast %257 : vector<1x4xf32> to vector<128x4xf32>
    %259 = arith.addf %255, %258 : vector<128x4xf32>
    %260 = vector.shape_cast %259 : vector<128x4xf32> to vector<8x16x4xf32>
    %cst_59 = arith.constant dense<0.000000e+00> : vector<8x4xf32>
    %261 = vector.multi_reduction <add>, %260, %cst_59 [1] : vector<8x16x4xf32> to vector<8x4xf32>
    %262 = vector.shape_cast %261 : vector<8x4xf32> to vector<8x1x4xf32>
    %cst_60 = arith.constant 1.600000e+01 : f32
    %263 = vector.broadcast %cst_60 : f32 to vector<8x1x4xf32>
    %264 = arith.divf %262, %263 : vector<8x1x4xf32>
    %265 = vector.broadcast %264 : vector<8x1x4xf32> to vector<8x16x4xf32>
    %266 = arith.subf %260, %265 : vector<8x16x4xf32>
    %267 = arith.mulf %266, %266 : vector<8x16x4xf32>
    %cst_61 = arith.constant dense<0.000000e+00> : vector<8x4xf32>
    %268 = vector.multi_reduction <add>, %267, %cst_61 [1] : vector<8x16x4xf32> to vector<8x4xf32>
    %269 = vector.shape_cast %268 : vector<8x4xf32> to vector<8x1x4xf32>
    %cst_62 = arith.constant 1.600000e+01 : f32
    %270 = vector.broadcast %cst_62 : f32 to vector<8x1x4xf32>
    %271 = arith.divf %269, %270 : vector<8x1x4xf32>
    %272 = vector.broadcast %264 : vector<8x1x4xf32> to vector<8x16x4xf32>
    %273 = arith.subf %260, %272 : vector<8x16x4xf32>
    %cst_63 = arith.constant 9.99999974E-6 : f32
    %274 = vector.broadcast %cst_63 : f32 to vector<8x1x4xf32>
    %275 = arith.addf %271, %274 : vector<8x1x4xf32>
    %276 = math.rsqrt %275 : vector<8x1x4xf32>
    %277 = vector.broadcast %276 : vector<8x1x4xf32> to vector<8x16x4xf32>
    %278 = arith.mulf %273, %277 : vector<8x16x4xf32>
    %279 = vector.extract_strided_slice %3 {offsets = [4, 0, 0], sizes = [1, 1, 16], strides = [1, 1, 1]} : vector<5x2x16xf32> to vector<1x1x16xf32>
    %280 = vector.shape_cast %279 : vector<1x1x16xf32> to vector<1x16xf32>
    %281 = vector.shape_cast %280 : vector<1x16xf32> to vector<1x16x1xf32>
    %282 = vector.broadcast %281 : vector<1x16x1xf32> to vector<8x16x4xf32>
    %283 = arith.mulf %278, %282 : vector<8x16x4xf32>
    %284 = vector.extract_strided_slice %3 {offsets = [4, 1, 0], sizes = [1, 1, 16], strides = [1, 1, 1]} : vector<5x2x16xf32> to vector<1x1x16xf32>
    %285 = vector.shape_cast %284 : vector<1x1x16xf32> to vector<1x16xf32>
    %286 = vector.shape_cast %285 : vector<1x16xf32> to vector<1x16x1xf32>
    %287 = vector.broadcast %286 : vector<1x16x1xf32> to vector<8x16x4xf32>
    %288 = arith.addf %283, %287 : vector<8x16x4xf32>
    %289 = vector.extract_strided_slice %2 {offsets = [4, 1, 0], sizes = [1, 1, 4], strides = [1, 1, 1]} : vector<5x2x4xf32> to vector<1x1x4xf32>
    %290 = vector.shape_cast %289 : vector<1x1x4xf32> to vector<1x4xf32>
    %291 = vector.shape_cast %290 : vector<1x4xf32> to vector<1x1x4xf32>
    %cst_64 = arith.constant 0.000000e+00 : f32
    %292 = vector.broadcast %cst_64 : f32 to vector<8x16x4xf32>
    %293 = arith.cmpf oge, %288, %292 : vector<8x16x4xf32>
    %294 = vector.broadcast %291 : vector<1x1x4xf32> to vector<8x16x4xf32>
    %295 = arith.mulf %288, %294 : vector<8x16x4xf32>
    %296 = arith.select %293, %288, %295 : vector<8x16x4xi1>, vector<8x16x4xf32>
    %c0_65 = arith.constant 0 : index
    %c0_66 = arith.constant 0 : index
    %c0_67 = arith.constant 0 : index
    %c0_68 = arith.constant 0 : index
    %297 = vector.load %arg5[%c0_65, %c0_66, %c0_67, %c0_68] : memref<1x8x16x4xf32, #tpu.memory_space<vmem>>, vector<1x8x16x4xf32>
    %298 = vector.shape_cast %297 : vector<1x8x16x4xf32> to vector<8x16x4xf32>
    %299 = vector.shape_cast %296 : vector<8x16x4xf32> to vector<1x8x16x4xf32>
    tpu.vector_store %arg5[%c0_65, %c0_66, %c0_67, %c0_68], %299 {strides = array<i32>} : memref<1x8x16x4xf32, #tpu.memory_space<vmem>>, vector<1x8x16x4xf32>,
    return
  }
  func.func @transform_0(%arg0: i32) -> (i32, i32, i32, i32) {
    %c0_i32 = arith.constant 0 : i32
    %c0_i32_0 = arith.constant 0 : i32
    %c0_i32_1 = arith.constant 0 : i32
    %c0_i32_2 = arith.constant 0 : i32
    return %arg0, %c0_i32, %c0_i32_0, %c0_i32_1 : i32, i32, i32, i32
  }
  func.func @transform_1(%arg0: i32) -> (i32, i32, i32) {
    %c0_i32 = arith.constant 0 : i32
    %c0_i32_0 = arith.constant 0 : i32
    %c0_i32_1 = arith.constant 0 : i32
    %c0_i32_2 = arith.constant 0 : i32
    return %c0_i32, %c0_i32_0, %c0_i32_1 : i32, i32, i32
  }
  func.func @transform_2(%arg0: i32) -> (i32, i32, i32) {
    %c0_i32 = arith.constant 0 : i32
    %c0_i32_0 = arith.constant 0 : i32
    %c0_i32_1 = arith.constant 0 : i32
    %c0_i32_2 = arith.constant 0 : i32
    return %c0_i32, %c0_i32_0, %c0_i32_1 : i32, i32, i32
  }
  func.func @transform_3(%arg0: i32) -> (i32, i32, i32) {
    %c0_i32 = arith.constant 0 : i32
    %c0_i32_0 = arith.constant 0 : i32
    %c0_i32_1 = arith.constant 0 : i32
    %c0_i32_2 = arith.constant 0 : i32
    return %c0_i32, %c0_i32_0, %c0_i32_1 : i32, i32, i32
  }
  func.func @transform_4(%arg0: i32) -> (i32, i32, i32, i32) {
    %c0_i32 = arith.constant 0 : i32
    %c0_i32_0 = arith.constant 0 : i32
    %c0_i32_1 = arith.constant 0 : i32
    %c0_i32_2 = arith.constant 0 : i32
    return %arg0, %c0_i32, %c0_i32_0, %c0_i32_1 : i32, i32, i32, i32
  }
}

</mosaic_0001>

<bundles_post_ra>
// kernel: tpu_custom_call.1
= control target key start
LH: loop header
LB: loop body
LE: loop exit
PB: predicated region body
PF: predicated region fallthrough
CT: control target
= control target key end

     0   :  { %s6384_s15 = smov 0   ;;  %s9385_s0 = inlined_call_operand.vmem [shape: f32[2,8,16,4], index: 0, kind: input, shape index: {}]   ;;  %s9386_s1 = inlined_call_operand.vmem [shape: f32[5,120,4], index: 1, kind: input, shape index: {}]   ;;  %s9387_s2 = inlined_call_operand.vmem [shape: f32[5,2,4], index: 2, kind: input, shape index: {}]   ;;  %s9388_s3 = inlined_call_operand.vmem [shape: f32[5,2,16], index: 3, kind: input, shape index: {}]   ;;  %s9389_s4 = inlined_call_operand.vmem [shape: f32[2,8,16,4], index: 4, kind: output, shape index: {}]  }
   0x1 LB: > { %s5509_s16 = sadd.s32 4294967295, %s6347_s15   ;;  %p5513_p0 = scmp.ge.s32.totalorder %s6347_s15, 1  ;;  %s6347_s15 = sphi %s6384_s15, %s14_s15  }
   0x2   : > { %p162_p1 = scmp.lt.s32.totalorder %s6347_s15, 3 }
   0x4   : > { %p163_p2 = pnand %p5513_p0, %p162_p1 }
   0x5   : > { %v6349_v0 = vmov (!%p163_p2), 0.0   ;;  %p188_p3 = scmp.lt.s32.totalorder (!%p163_p2), %s5509_s16, 1  ;;  %v741_v2 = vld [vmem:[%s9386_s1] sm:$0xff] (!%p163_p2)  ;;  %v742_v3 = vld [vmem:[%s9386_s1 + $0x8] sm:$0xff] (!%p163_p2)  ;;  %v743_v4 = vld [vmem:[%s9386_s1 + $0x10] sm:$0xff] (!%p163_p2)  ;;  %s6350_s25 = smov (!%p163_p2), 20  }
   0x6   : > { %166 = sbr.rel (%p163_p2) target bundleno = 2719 (0xa9f), region = 36  ;;  %v337_v1 = vrot.slane (!%p163_p2), %v6349_v0, 1  ;;  %v744_v5 = vld [vmem:[%s9386_s1 + $0x18] sm:$0xff] (!%p163_p2)  ;;  %v420_v6 = vrot.slane (!%p163_p2), %v6349_v0, 2  ;;  %v6087_v7 = vpack.c.bf16 (!%p163_p2), %v742_v3, %v741_v2  ;;  %v745_v9 = vld [vmem:[%s9386_s1 + $0x20] sm:$0xff] (!%p163_p2)  ;;  %v746_v10 = vld [vmem:[%s9386_s1 + $0x28] sm:$0xff] (!%p163_p2) }
   0x7   : > { %v6091_v8 = vpack.c.bf16 (!%p163_p2), %v744_v5, %v743_v4  ;;  %vm224_vm0 = vcmask (!%p163_p2), 31744   ;;  %s6351_s8 = smov (!%p163_p2), 40   ;;  %v6095_v13 = vpack.c.bf16 (!%p163_p2), %v746_v10, %v745_v9  ;;  %vm257_vm1 = vcmask (!%p163_p2), 1040384   ;;  %v747_v16 = vld [vmem:[%s9386_s1 + $0x30] sm:$0xff] (!%p163_p2)  ;;  %v748_v17 = vld [vmem:[%s9386_s1 + $0x38] sm:$0xff] (!%p163_p2)  ;;  %s6352_s13 = smov (!%p163_p2), 60  }
   0x8   : > { %374 = vrot.lane.b32.xlu0 (!%p163_p2), %v337_v1, %s6350_s25  ;;  %6088 = vmatprep.subr.bf16.mxu0 (!%p163_p2), %v6087_v7  ;;  %vm336_vm2 = vcmask (!%p163_p2), 1046528   ;;  %v6099_v23 = vpack.c.bf16 (!%p163_p2), %v748_v17, %v747_v16  ;;  %v749_v27 = vld [vmem:[%s9386_s1 + $0x40] sm:$0xff] (!%p163_p2)  ;;  %v750_v28 = vld [vmem:[%s9386_s1 + $0x48] sm:$0xff] (!%p163_p2)  ;;  %s6353_s20 = smov (!%p163_p2), 80   ;;  %v751_v34 = vld [vmem:[%s9386_s1 + $0x50] sm:$0xff] (!%p163_p2)  ;;  %vm419_vm3 = vcmask (!%p163_p2), 1045504  }
   0x9   : > { %6090 = vmatpush3.bf16.msra.mxu0 (!%p163_p2), %v6087_v7  ;;  %v6103_v32 = vpack.c.bf16 (!%p163_p2), %v750_v28, %v749_v27  ;;  %v752_v35 = vld [vmem:[%s9386_s1 + $0x58] sm:$0xff] (!%p163_p2)  ;;  %v753_v42 = vld [vmem:[%s9386_s1 + $0x60] sm:$0xff] (!%p163_p2)  ;;  %v754_v43 = vld [vmem:[%s9386_s1 + $0x68] sm:$0xff] (!%p163_p2)  ;;  %s6354_s5 = smov (!%p163_p2), 100   ;;  %vm658_vm4 = vcmask (!%p163_p2), 162816   ;;  %vm674_vm5 = vcmask (!%p163_p2), 326656  }
   0xa   : > { %6092 = vmatprep.subr.bf16.mxu0 (!%p163_p2), %v6091_v8  ;;  %v6107_v40 = vpack.c.bf16 (!%p163_p2), %v752_v35, %v751_v34  ;;  %v6111_v47 = vpack.c.bf16 (!%p163_p2), %v754_v43, %v753_v42  ;;  %v755_v53 = vld [vmem:[%s9386_s1 + $0x70] sm:$0xff] (!%p163_p2)  ;;  %vm690_vm6 = vcmask (!%p163_p2), 490496   ;;  %vm707_vm7 = vcmask (!%p163_p2), 654336   ;;  %s6355_s14 = smov (!%p163_p2), 4   ;;  %s6356_s12 = smov (!%p163_p2), 8  }
   0xb   : > { %vm724_vm8 = vcmask (!%p163_p2), 818176   ;;  %vm760_vm9 = vcmask (!%p163_p2), 982016   ;;  %s6358_s9 = smov (!%p163_p2), 16  }
   0xc   : > { %457 = vrot.lane.b32.xlu0 (!%p163_p2), %v420_v6, %s6351_s8 }
   0xd   : > { %s9391_s16 = smov (!%p188_p3, %s5509_s16), 1  ;;  %6094 = vmatpush3.bf16.msra.mxu0 %v6091_v8 }
   0xe   : > { %s5660_s30 = sshll.u32 %s9391_s16, 7  ;;  %6096 = vmatprep.subr.bf16.mxu0 %v6095_v13 }
   0xf   : > { %s6419_s7 = scalar_lea.vmem %s9385_s0, %s5660_s30  ;;  %s9230_s26 = scalar_lea.vmem %s9389_s4, %s5660_s30 }
  0x10   : > { %v198_v11 = vld [vmem:[%s6419_s7] sm:$0xff]  ;;  %v199_v12 = vld [vmem:[%s6419_s7 + $0x8] sm:$0xff]  ;;  %v200_v30 = vld [vmem:[%s6419_s7 + $0x10] sm:$0xff] }
  0x11   : > { %v6425_v14 = vsel %vm224_vm0, %v198_v11, 0.0  ;;  %v6428_v15 = vsel %vm224_vm0, %v199_v12, 0.0  ;;  %6098 = vmatpush3.bf16.msra.mxu0 %v6095_v13  ;;  %v201_v31 = vld [vmem:[%s6419_s7 + $0x18] sm:$0xff]  ;;  %v6471_v38 = vsel %vm224_vm0, %v200_v30, 0.0  ;;  %v202_v57 = vld [vmem:[%s6419_s7 + $0x20] sm:$0xff]  ;;  %v203_v58 = vld [vmem:[%s6419_s7 + $0x28] sm:$0xff] }
  0x12   : > { %v258_v18 = vrot.slane %v6425_v14, 7  ;;  %v259_v19 = vrot.slane %v6428_v15, 7  ;;  %6100 = vmatprep.subr.bf16.mxu0 %v6099_v23  ;;  %v6474_v39 = vsel %vm224_vm0, %v201_v31, 0.0  ;;  %v261_v45 = vrot.slane %v6471_v38, 7  ;;  %v204_v12 = vld [vmem:[%s6419_s7 + $0x30] sm:$0xff]  ;;  %v205_v13 = vld [vmem:[%s6419_s7 + $0x38] sm:$0xff] }
  0x13   : > { %v262_v46 = vrot.slane %v6474_v39, 7  ;;  %v6517_v62 = vsel %vm224_vm0, %v202_v57, 0.0  ;;  %v6520_v63 = vsel %vm224_vm0, %v203_v58, 0.0  ;;  %v206_v35 = vld [vmem:[%s6419_s7 + $0x40] sm:$0xff]  ;;  %v208_v58 = vld [vmem:[%s6419_s7 + $0x50] sm:$0xff] }
  0x14   : > { %v6439_v20 = vsel %vm257_vm1, 0.0, %v258_v18  ;;  %v6442_v21 = vsel %vm257_vm1, %v258_v18, %v259_v19  ;;  %v313_v22 = vsel %vm257_vm1, %v259_v19, 0.0  ;;  %v6494_v50 = vsel %vm257_vm1, 0.0, %v261_v45 }
  0x15   : > { %503 = vrot.lane.b32.xlu1 %v6439_v20, %s6352_s13  ;;  %v339_v24 = vrot.slane %v6439_v20, 1  ;;  %v340_v25 = vrot.slane %v6442_v21, 1  ;;  %v342_v26 = vrot.slane %v313_v22, 1  ;;  %v422_v36 = vrot.slane %v6439_v20, 2  ;;  %6102 = vmatpush3.bf16.msra.mxu0 %v6099_v23 }
  0x16   : > { %v423_v37 = vrot.slane %v6442_v21, 2  ;;  %6104 = vmatprep.subr.bf16.mxu0 %v6103_v32  ;;  %v425_v41 = vrot.slane %v313_v22, 2  ;;  %v6491_v49 = vsel %vm257_vm1, %v261_v45, %v262_v46  ;;  %v344_v51 = vrot.slane %v6494_v50, 1 }
  0x17   : > { %v341_v29 = vsel %vm336_vm2, %v339_v24, %v340_v25  ;;  %v343_v33 = vsel %vm336_vm2, %v340_v25, %v342_v26  ;;  %v345_v52 = vrot.slane %v6491_v49, 1  ;;  %v314_v54 = vsel %vm257_vm1, %v262_v46, 0.0 }
  0x18   : > { %557 = vrot.lane.b32.xlu0 %v341_v29, %s6353_s20  ;;  %v424_v44 = vsel %vm419_vm3, %v422_v36, %v423_v37  ;;  %v426_v48 = vsel %vm419_vm3, %v423_v37, %v425_v41  ;;  %v347_v56 = vrot.slane %v314_v54, 1  ;;  %v427_v60 = vrot.slane %v6494_v50, 2  ;;  %v207_v36 = vld [vmem:[%s6419_s7 + $0x48] sm:$0xff] }
  0x19   : > { %505 = vrot.lane.b32.xlu1 %v6442_v21, %s6352_s13  ;;  %6106 = vmatpush3.bf16.msra.mxu0 %v6103_v32  ;;  %v346_v55 = vsel %vm336_vm2, %v344_v51, %v345_v52  ;;  %v428_v61 = vrot.slane %v6491_v49, 2  ;;  %v430_v0 = vrot.slane %v314_v54, 2  ;;  %v264_v2 = vrot.slane %v6517_v62, 7 }
  0x1a   : > { %6108 = vmatprep.subr.bf16.mxu0 %v6107_v40  ;;  %v348_v59 = vsel %vm336_vm2, %v345_v52, %v347_v56  ;;  %v265_v3 = vrot.slane %v6520_v63, 7  ;;  %v6554_v19 = vsel %vm224_vm0, %v204_v12, 0.0  ;;  %v6557_v22 = vsel %vm224_vm0, %v205_v13, 0.0 }
  0x1b   : > { %v429_v1 = vsel %vm419_vm3, %v427_v60, %v428_v61  ;;  %v431_v4 = vsel %vm419_vm3, %v428_v61, %v430_v0  ;;  %v6534_v6 = vsel %vm257_vm1, 0.0, %v264_v2  ;;  %v267_v25 = vrot.slane %v6554_v19, 7 }
  0x1c   : > { %559 = vrot.lane.b32.xlu0 %v343_v33, %s6353_s20  ;;  %v6531_v5 = vsel %vm257_vm1, %v264_v2, %v265_v3  ;;  %v349_v7 = vrot.slane %v6534_v6, 1  ;;  %v315_v9 = vsel %vm257_vm1, %v265_v3, 0.0  ;;  %v432_v17 = vrot.slane %v6534_v6, 2 }
  0x1d   : > { %376 = vrot.lane.b32.xlu1 %v341_v29, %s6350_s25  ;;  %6110 = vmatpush3.bf16.msra.mxu0 %v6107_v40  ;;  %v350_v8 = vrot.slane %v6531_v5, 1  ;;  %v352_v11 = vrot.slane %v315_v9, 1  ;;  %v433_v18 = vrot.slane %v6531_v5, 2  ;;  %v435_v23 = vrot.slane %v315_v9, 2 }
  0x1e   : > { %6112 = vmatprep.subr.bf16.mxu0 %v6111_v47  ;;  %v268_v26 = vrot.slane %v6557_v22, 7  ;;  %v6571_v29 = vsel %vm257_vm1, 0.0, %v267_v25  ;;  %v6591_v42 = vsel %vm224_vm0, %v206_v35, 0.0  ;;  %v6594_v43 = vsel %vm224_vm0, %v207_v36, 0.0 }
  0x1f   : > { %v351_v10 = vsel %vm336_vm2, %v349_v7, %v350_v8  ;;  %v353_v16 = vsel %vm336_vm2, %v350_v8, %v352_v11  ;;  %v434_v24 = vsel %vm419_vm3, %v432_v17, %v433_v18  ;;  %v436_v27 = vsel %vm419_vm3, %v433_v18, %v435_v23  ;;  %v210_v23 = vld [vmem:[%s6419_s7 + $0x60] sm:$0xff] }
  0x20   : > { %378 = vrot.lane.b32.xlu0 %v343_v33, %s6350_s25  ;;  %v6568_v28 = vsel %vm257_vm1, %v267_v25, %v268_v26  ;;  %v354_v30 = vrot.slane %v6571_v29, 1  ;;  %v316_v32 = vsel %vm257_vm1, %v268_v26, 0.0  ;;  %v437_v40 = vrot.slane %v6571_v29, 2 }
  0x21   : > { %610 = vrot.lane.b32.xlu1 %v424_v44, %s6354_s5  ;;  %6114 = vmatpush3.bf16.msra.mxu0 %v6111_v47  ;;  %v355_v31 = vrot.slane %v6568_v28, 1  ;;  %v357_v34 = vrot.slane %v316_v32, 1  ;;  %v438_v41 = vrot.slane %v6568_v28, 2  ;;  %v270_v46 = vrot.slane %v6591_v42, 7 }
  0x22   : > { %5845 = vmatprep.subr.mxu0 %v755_v53  ;;  %v271_v47 = vrot.slane %v6594_v43, 7 }
  0x23   : > { %v356_v33 = vsel %vm336_vm2, %v354_v30, %v355_v31  ;;  %v358_v37 = vsel %vm336_vm2, %v355_v31, %v357_v34  ;;  %v439_v45 = vsel %vm419_vm3, %v437_v40, %v438_v41  ;;  %v6608_v52 = vsel %vm257_vm1, 0.0, %v270_v46 }
  0x24   : > { %612 = vrot.lane.b32.xlu0 %v426_v48, %s6354_s5  ;;  %v6605_v51 = vsel %vm257_vm1, %v270_v46, %v271_v47  ;;  %v442_v61 = vrot.slane %v6608_v52, 2  ;;  %v6665_v31 = vsel %vm224_vm0, %v210_v23, 0.0 }
  0x25   : > { %459 = vrot.lane.b32.xlu1 %v424_v44, %s6351_s8  ;;  %5846 = vmatpush3.msra.mxu0 %v755_v53  ;;  %v440_v44 = vrot.slane %v316_v32, 2  ;;  %v359_v53 = vrot.slane %v6608_v52, 1  ;;  %v360_v54 = vrot.slane %v6605_v51, 1  ;;  %v443_v0 = vrot.slane %v6605_v51, 2 }
  0x26   : > { %v276_v35 = vrot.slane %v6665_v31, 7 }
  0x27   : > { %v361_v56 = vsel %vm336_vm2, %v359_v53, %v360_v54 }
  0x28   : > { %507 = vrot.lane.b32.xlu0 %v6494_v50, %s6352_s13 }
  0x29   : > { %461 = vrot.lane.b32.xlu1 %v426_v48, %s6351_s8  ;;  %v441_v48 = vsel %vm419_vm3, %v438_v41, %v440_v44  ;;  %v6682_v44 = vsel %vm257_vm1, 0.0, %v276_v35 }
  0x2a   : > { %v369_v46 = vrot.slane %v6682_v44, 1 }
  0x2c   : > { %561 = vrot.lane.b32.xlu0 %v346_v55, %s6353_s20 }
  0x2d   : > { %509 = vrot.lane.b32.xlu1 %v6491_v49, %s6352_s13 }
  0x30   : > { %563 = vrot.lane.b32.xlu0 %v348_v59, %s6353_s20 }
  0x31   : > { %380 = vrot.lane.b32.xlu1 %v346_v55, %s6350_s25  ;;  %v317_v55 = vsel %vm257_vm1, %v271_v47, 0.0 }
  0x32   : > { %v362_v57 = vrot.slane %v317_v55, 1  ;;  %v445_v3 = vrot.slane %v317_v55, 2 }
  0x34   : > { %382 = vrot.lane.b32.xlu0 %v348_v59, %s6350_s25  ;;  %v209_v59 = vld [vmem:[%s6419_s7 + $0x58] sm:$0xff]  ;;  %v363_v60 = vsel %vm336_vm2, %v360_v54, %v362_v57  ;;  %v446_v9 = vsel %vm419_vm3, %v443_v0, %v445_v3 }
  0x35   : > { %614 = vrot.lane.b32.xlu1 %v429_v1, %s6354_s5  ;;  %v6631_v2 = vsel %vm224_vm0, %v209_v59, 0.0 }
  0x36   : > { %v274_v8 = vrot.slane %v6631_v2, 7 }
  0x38   : > { %616 = vrot.lane.b32.xlu0 %v431_v4, %s6354_s5 }
  0x39   : > { %463 = vrot.lane.b32.xlu1 %v429_v1, %s6351_s8  ;;  %v6628_v1 = vsel %vm224_vm0, %v208_v58, 0.0 }
  0x3a   : > { %v273_v7 = vrot.slane %v6628_v1, 7 }
  0x3c   : > { %511 = vrot.lane.b32.xlu0 %v6534_v6, %s6352_s13  ;;  %v6645_v11 = vsel %vm257_vm1, 0.0, %v273_v7 }
  0x3d   : > { %465 = vrot.lane.b32.xlu1 %v431_v4, %s6351_s8  ;;  %v444_v4 = vsel %vm419_vm3, %v442_v61, %v443_v0  ;;  %v364_v12 = vrot.slane %v6645_v11, 1  ;;  %v212_v61 = vld [vmem:[%s6419_s7 + $0x70] sm:$0xff]  ;;  %v213_v0 = vld [vmem:[%s6419_s7 + $0x78] sm:$0xff] }
  0x40   : > { %565 = vrot.lane.b32.xlu0 %v351_v10, %s6353_s20 }
  0x41   : > { %513 = vrot.lane.b32.xlu1 %v6531_v5, %s6352_s13 }
  0x44   : > { %567 = vrot.lane.b32.xlu0 %v353_v16, %s6353_s20 }
  0x45   : > { %384 = vrot.lane.b32.xlu1 %v351_v10, %s6350_s25  ;;  %v6642_v10 = vsel %vm257_vm1, %v273_v7, %v274_v8 }
  0x46   : > { %v365_v13 = vrot.slane %v6642_v10, 1  ;;  %v448_v30 = vrot.slane %v6642_v10, 2 }
  0x48   : > { %386 = vrot.lane.b32.xlu0 %v353_v16, %s6350_s25  ;;  %v318_v16 = vsel %vm257_vm1, %v274_v8, 0.0  ;;  %v366_v17 = vsel %vm336_vm2, %v364_v12, %v365_v13  ;;  %v452_v8 = vrot.slane %v6682_v44, 2 }
  0x49   : > { %618 = vrot.lane.b32.xlu1 %v434_v24, %s6354_s5  ;;  %v367_v18 = vrot.slane %v318_v16, 1 }
  0x4b   : > { %v368_v25 = vsel %vm336_vm2, %v365_v13, %v367_v18 }
  0x4c   : > { %620 = vrot.lane.b32.xlu0 %v436_v27, %s6354_s5 }
  0x4d   : > { %467 = vrot.lane.b32.xlu1 %v434_v24, %s6351_s8  ;;  %v211_v24 = vld [vmem:[%s6419_s7 + $0x68] sm:$0xff]  ;;  %s6357_s7 = smov 12  }
  0x4e   : > { %v6668_v32 = vsel %vm224_vm0, %v211_v24, 0.0 }
  0x4f   : > { %v277_v36 = vrot.slane %v6668_v32, 7 }
  0x50   : > { %515 = vrot.lane.b32.xlu0 %v6571_v29, %s6352_s13 }
  0x51   : > { %469 = vrot.lane.b32.xlu1 %v436_v27, %s6351_s8  ;;  %v447_v27 = vrot.slane %v6645_v11, 2  ;;  %v6679_v41 = vsel %vm257_vm1, %v276_v35, %v277_v36  ;;  %v319_v53 = vsel %vm257_vm1, %v277_v36, 0.0 }
  0x52   : > { %v370_v47 = vrot.slane %v6679_v41, 1  ;;  %v372_v57 = vrot.slane %v319_v53, 1  ;;  %v455_v24 = vrot.slane %v319_v53, 2 }
  0x53   : > { %v449_v34 = vsel %vm419_vm3, %v447_v27, %v448_v30 }
  0x54   : > { %569 = vrot.lane.b32.xlu0 %v356_v33, %s6353_s20  ;;  %v373_v3 = vsel %vm336_vm2, %v370_v47, %v372_v57 }
  0x55   : > { %517 = vrot.lane.b32.xlu1 %v6568_v28, %s6352_s13 }
  0x58   : > { %571 = vrot.lane.b32.xlu0 %v358_v37, %s6353_s20 }
  0x59   : > { %388 = vrot.lane.b32.xlu1 %v356_v33, %s6350_s25  ;;  %v450_v33 = vrot.slane %v318_v16, 2  ;;  %v6709_v16 = vsel %vm224_vm0, %v212_v61, 0.0  ;;  %v756_v61 = vlaneseq }
  0x5b   : > { %v451_v40 = vsel %vm419_vm3, %v448_v30, %v450_v33  ;;  %v279_v30 = vrot.slane %v6709_v16, 7 }
  0x5c   : > { %390 = vrot.lane.b32.xlu0 %v358_v37, %s6350_s25 }
  0x5d   : > { %622 = vrot.lane.b32.xlu1 %v439_v45, %s6354_s5 }
  0x60   : > { %624 = vrot.lane.b32.xlu0 %v441_v48, %s6354_s5 }
  0x61   : > { %471 = vrot.lane.b32.xlu1 %v439_v45, %s6351_s8 }
  0x64   : > { %519 = vrot.lane.b32.xlu0 %v6608_v52, %s6352_s13 }
  0x65   : > { %473 = vrot.lane.b32.xlu1 %v441_v48, %s6351_s8 }
  0x68   : > { %573 = vrot.lane.b32.xlu0 %v361_v56, %s6353_s20 }
  0x69   : > { %521 = vrot.lane.b32.xlu1 %v6605_v51, %s6352_s13 }
  0x6c   : > { %575 = vrot.lane.b32.xlu0 %v363_v60, %s6353_s20 }
  0x6d   : > { %392 = vrot.lane.b32.xlu1 %v361_v56, %s6350_s25  ;;  %v371_v56 = vsel %vm336_vm2, %v369_v46, %v370_v47 }
  0x70   : > { %394 = vrot.lane.b32.xlu0 %v363_v60, %s6350_s25 }
  0x71   : > { %626 = vrot.lane.b32.xlu1 %v444_v4, %s6354_s5 }
  0x74   : > { %628 = vrot.lane.b32.xlu0 %v446_v9, %s6354_s5 }
  0x75   : > { %475 = vrot.lane.b32.xlu1 %v444_v4, %s6351_s8 }
  0x78   : > { %523 = vrot.lane.b32.xlu0 %v6645_v11, %s6352_s13 }
  0x79   : > { %477 = vrot.lane.b32.xlu1 %v446_v9, %s6351_s8  ;;  %v453_v9 = vrot.slane %v6679_v41, 2 }
  0x7a   : > { %v375_v26 = vpop.permute.xlu0 %374 }
  0x7b   : > { %v659_v55 = vsel %vm658_vm4, 0.0, %v375_v26  ;;  %v454_v27 = vsel %vm419_vm3, %v452_v8, %v453_v9  ;;  %v456_v36 = vsel %vm419_vm3, %v453_v9, %v455_v24  ;;  %v757_v8 = vshrl.u32 %v756_v61, 7 }
  0x7c   : > { %577 = vrot.lane.b32.xlu0 %v366_v17, %s6353_s20 }
  0x7d   : > { %525 = vrot.lane.b32.xlu1 %v6642_v10, %s6352_s13 }
  0x7e   : > { %v458_v37 = vpop.permute.xlu0 %457 }
  0x7f   : > { %v6695_v59 = vsel %vm674_vm5, %v659_v55, %v458_v37 }
  0x80   : > { %579 = vrot.lane.b32.xlu0 %v368_v25, %s6353_s20 }
  0x81   : > { %396 = vrot.lane.b32.xlu1 %v366_v17, %s6350_s25  ;;  %v6712_v17 = vsel %vm224_vm0, %v213_v0, 0.0 }
  0x82   : > { %v280_v33 = vrot.slane %v6712_v17, 7 }
  0x84   : > { %398 = vrot.lane.b32.xlu0 %v368_v25, %s6350_s25  ;;  %v320_v55 = vsel %vm257_vm1, %v280_v33, 0.0 }
  0x85   : > { %630 = vrot.lane.b32.xlu1 %v449_v34, %s6354_s5 }
  0x87   : > { %v504_v45 = vpop.permute.xlu1 %503 }
  0x88   : > { %632 = vrot.lane.b32.xlu0 %v451_v40, %s6354_s5  ;;  %v691_v4 = vsel %vm690_vm6, %v6695_v59, %v504_v45  ;;  %v312_v45 = vsel %vm257_vm1, 0.0, %v279_v30 }
  0x89   : > { %479 = vrot.lane.b32.xlu1 %v449_v34, %s6351_s8  ;;  %v552_v47 = vrot.slane %v312_v45, 1 }
  0x8a   : > { %v558_v48 = vpop.permute.xlu0 %557 }
  0x8b   : > { %v506_v54 = vpop.permute.xlu1 %505  ;;  %v708_v12 = vsel %vm707_vm7, %v691_v4, %v558_v48 }
  0x8c   : > { %527 = vrot.lane.b32.xlu0 %v6682_v44, %s6352_s13  ;;  %v692_v23 = vsel %vm690_vm6, %v6695_v59, %v506_v54 }
  0x8d   : > { %481 = vrot.lane.b32.xlu1 %v451_v40, %s6351_s8  ;;  %v281_v40 = vsel %vm257_vm1, %v279_v30, %v280_v33 }
  0x8e   : > { %v560_v58 = vpop.permute.xlu0 %559  ;;  %v553_v48 = vrot.slane %v281_v40, 1 }
  0x8f   : > { %v377_v60 = vpop.permute.xlu1 %376  ;;  %v709_v25 = vsel %vm707_vm7, %v692_v23, %v560_v58  ;;  %v606_v58 = vrot.slane %v281_v40, 2  ;;  %v6746_v23 = vsub.s32 0, %v757_v8 }
  0x90   : > { %581 = vrot.lane.b32.xlu0 %v371_v56, %s6353_s20  ;;  %v554_v57 = vsel %vm336_vm2, %v552_v47, %v553_v48  ;;  %v660_v9 = vsel %vm658_vm4, %v6439_v20, %v377_v60  ;;  %v608_v20 = vrot.slane %v320_v55, 2 }
  0x91   : > { %529 = vrot.lane.b32.xlu1 %v6679_v41, %s6352_s13 }
  0x92   : > { %v379_v7 = vpop.permute.xlu0 %378 }
  0x93   : > { %v611_v13 = vpop.permute.xlu1 %610  ;;  %v661_v60 = vsel %vm658_vm4, %v6442_v21, %v379_v7 }
  0x94   : > { %583 = vrot.lane.b32.xlu0 %v373_v3, %s6353_s20  ;;  %v725_v18 = vsel %vm724_vm8, %v708_v12, %v611_v13 }
  0x95   : > { %400 = vrot.lane.b32.xlu1 %v371_v56, %s6350_s25  ;;  %5847 = vmatprep.mubr.msk.f32.mxu0 %vm760_vm9, %v725_v18  ;;  %v605_v56 = vrot.slane %v312_v45, 2  ;;  %v219_v18 = vld [vmem:[%s9388_s3] sm:$0x3] }
  0x96   : > { %v613_v26 = vpop.permute.xlu0 %612 }
  0x97   : > { %v726_v34 = vsel %vm724_vm8, %v709_v25, %v613_v26  ;;  %v460_v35 = vpop.permute.xlu1 %459  ;;  %v607_v13 = vsel %vm419_vm3, %v605_v56, %v606_v58 }
  0x98   : > { %402 = vrot.lane.b32.xlu0 %v373_v3, %s6350_s25  ;;  %5848 = vmatmul.mubr.msk.f32.vlgmr.msra.gmra.mrb[0].mxu0 %vm760_vm9, %v726_v34  ;;  %v555_v3 = vrot.slane %v320_v55, 1  ;;  %v676_v12 = vsel %vm674_vm5, %v660_v9, %v460_v35  ;;  %v1182_v35 = vrot.slane %v219_v18, %v6746_v23 }
  0x99   : > { %634 = vrot.lane.b32.xlu1 %v454_v27, %s6354_s5 }
  0x9a   : > { %v508_v37 = vpop.permute.xlu0 %507  ;;  %v556_v26 = vsel %vm336_vm2, %v553_v48, %v555_v3 }
  0x9b   : > { %v462_v46 = vpop.permute.xlu1 %461  ;;  %v693_v24 = vsel %vm690_vm6, %v676_v12, %v508_v37 }
  0x9c   : > { %636 = vrot.lane.b32.xlu0 %v456_v36, %s6354_s5  ;;  %v677_v33 = vsel %vm674_vm5, %v661_v60, %v462_v46 }
  0x9d   : > { %483 = vrot.lane.b32.xlu1 %v454_v27, %s6351_s8 }
  0x9e   : > { %v562_v53 = vpop.permute.xlu0 %561 }
  0x9f   : > { %v510_v54 = vpop.permute.xlu1 %509  ;;  %v710_v27 = vsel %vm707_vm7, %v693_v24, %v562_v53 }
  0xa0   : > { %531 = vrot.lane.b32.xlu0 %v312_v45, %s6352_s13  ;;  %v694_v37 = vsel %vm690_vm6, %v677_v33, %v510_v54 }
  0xa1   : > { %485 = vrot.lane.b32.xlu1 %v456_v36, %s6351_s8  ;;  %v6757_v36 = vsub.s32 1, %v757_v8 }
  0xa2   : > { %v564_v0 = vpop.permute.xlu0 %563 }
  0xa3   : > { %v381_v4 = vpop.permute.xlu1 %380  ;;  %v711_v21 = vsel %vm707_vm7, %v694_v37, %v564_v0  ;;  %v1209_v47 = vrot.slane %v219_v18, %v6757_v36 }
  0xa4   : > { %585 = vrot.lane.b32.xlu0 %v554_v57, %s6353_s20 }
  0xa5   : > { %533 = vrot.lane.b32.xlu1 %v281_v40, %s6352_s13  ;;  %v609_v40 = vsel %vm419_vm3, %v606_v58, %v608_v20  ;;  %v662_v58 = vsel %vm658_vm4, %v6494_v50, %v381_v4 }
  0xa6   : > { %v383_v25 = vpop.permute.xlu0 %382 }
  0xa7   : > { %v615_v30 = vpop.permute.xlu1 %614  ;;  %v663_v8 = vsel %vm658_vm4, %v6491_v49, %v383_v25 }
  0xa8   : > { %v727_v34 = vsel %vm724_vm8, %v710_v27, %v615_v30  ;;  %638 = vrot.lane.b32.xlu0 %v607_v13, %s6354_s5 }
  0xa9   : > { %587 = vrot.lane.b32.xlu1 %v556_v26, %s6353_s20  ;;  %5850 = vmatprep.mubr.msk.f32.mxu0 %vm760_vm9, %v727_v34 }
  0xaa   : > { %v617_v7 = vpop.permute.xlu0 %616 }
  0xab   : > { %v728_v45 = vsel %vm724_vm8, %v711_v21, %v617_v7  ;;  %v464_v46 = vpop.permute.xlu1 %463 }
  0xac   : > { %5851 = vmatmul.mubr.msk.f32.gmra.mrb[2].mxu0 %vm760_vm9, %v728_v45  ;;  %1184 = vbcast.lane.b32.xlu0 %v1182_v35, 256  ;;  %v678_v61 = vsel %vm674_vm5, %v662_v58, %v464_v46 }
  0xad   : > { %640 = vrot.lane.b32.xlu1 %v609_v40, %s6354_s5 }
  0xae   : > { %v512_v48 = vpop.permute.xlu0 %511 }
  0xaf   : > { %v466_v53 = vpop.permute.xlu1 %465  ;;  %v695_v0 = vsel %vm690_vm6, %v678_v61, %v512_v48 }
  0xb0   : > { %1211 = vbcast.lane.b32.xlu0 %v1209_v47, 256  ;;  %v679_v13 = vsel %vm674_vm5, %v663_v8, %v466_v53 }
  0xb1   : > { %1188 = vbcast.lane.b32.xlu1 %v1182_v35, 264 }
  0xb2   : > { %v566_v54 = vpop.permute.xlu0 %565 }
  0xb3   : > { %v514_v55 = vpop.permute.xlu1 %513  ;;  %v712_v9 = vsel %vm707_vm7, %v695_v0, %v566_v54 }
  0xb4   : > { %v696_v24 = vsel %vm690_vm6, %v679_v13, %v514_v55 }
  0xb5   : > { %1215 = vbcast.lane.b32.xlu1 %v1209_v47, 264 }
  0xb6   : > { %v568_v56 = vpop.permute.xlu0 %567 }
  0xb7   : > { %v385_v57 = vpop.permute.xlu1 %384  ;;  %v713_v50 = vsel %vm707_vm7, %v696_v24, %v568_v56 }
  0xb8   : > { %v664_v34 = vsel %vm658_vm4, %v6534_v6, %v385_v57 }
  0xba   : > { %v387_v3 = vpop.permute.xlu0 %386 }
  0xbb   : > { %v619_v12 = vpop.permute.xlu1 %618  ;;  %v665_v7 = vsel %vm658_vm4, %v6531_v5, %v387_v3 }
  0xbc   : > { %v729_v18 = vsel %vm724_vm8, %v712_v9, %v619_v12 }
  0xbd   : > { %5853 = vmatprep.mubr.msk.f32.mxu0 %vm760_vm9, %v729_v18 }
  0xbe   : > { %v621_v4 = vpop.permute.xlu0 %620 }
  0xbf   : > { %v730_v26 = vsel %vm724_vm8, %v713_v50, %v621_v4  ;;  %v468_v20 = vpop.permute.xlu1 %467 }
  0xc0   : > { %5854 = vmatmul.mubr.msk.f32.gmra.mrb[4].mxu0 %vm760_vm9, %v730_v26  ;;  %v680_v35 = vsel %vm674_vm5, %v664_v34, %v468_v20 }
  0xc2   : > { %v516_v49 = vpop.permute.xlu0 %515 }
  0xc3   : > { %v470_v25 = vpop.permute.xlu1 %469  ;;  %v697_v37 = vsel %vm690_vm6, %v680_v35, %v516_v49 }
  0xc4   : > { %v681_v46 = vsel %vm674_vm5, %v665_v7, %v470_v25 }
  0xc6   : > { %v570_v60 = vpop.permute.xlu0 %569 }
  0xc7   : > { %v518_v27 = vpop.permute.xlu1 %517  ;;  %v714_v40 = vsel %vm707_vm7, %v697_v37, %v570_v60 }
  0xc8   : > { %v698_v48 = vsel %vm690_vm6, %v681_v46, %v518_v27 }
  0xca   : > { %v572_v30 = vpop.permute.xlu0 %571 }
  0xcb   : > { %v389_v33 = vpop.permute.xlu1 %388  ;;  %v715_v6 = vsel %vm707_vm7, %v698_v48, %v572_v30 }
  0xcc   : > { %v666_v3 = vsel %vm658_vm4, %v6571_v29, %v389_v33 }
  0xce   : > { %v391_v21 = vpop.permute.xlu0 %390 }
  0xcf   : > { %v623_v45 = vpop.permute.xlu1 %622  ;;  %v667_v13 = vsel %vm658_vm4, %v6568_v28, %v391_v21 }
  0xd0   : > { %v731_v47 = vsel %vm724_vm8, %v714_v40, %v623_v45 }
  0xd1   : > { %5856 = vmatprep.mubr.msk.f32.mxu0 %vm760_vm9, %v731_v47 }
  0xd2   : > { %v625_v53 = vpop.permute.xlu0 %624 }
  0xd3   : > { %v732_v54 = vsel %vm724_vm8, %v715_v6, %v625_v53  ;;  %v472_v55 = vpop.permute.xlu1 %471 }
  0xd4   : > { %5857 = vmatmul.mubr.msk.f32.gmra.mrb[6].mxu0 %vm760_vm9, %v732_v54  ;;  %v682_v8 = vsel %vm674_vm5, %v666_v3, %v472_v55 }
  0xd6   : > { %v520_v5 = vpop.permute.xlu0 %519 }
  0xd7   : > { %v474_v56 = vpop.permute.xlu1 %473  ;;  %v699_v9 = vsel %vm690_vm6, %v682_v8, %v520_v5 }
  0xd8   : > { %v683_v50 = vsel %vm674_vm5, %v667_v13, %v474_v56 }
  0xda   : > { %v574_v57 = vpop.permute.xlu0 %573 }
  0xdb   : > { %v522_v58 = vpop.permute.xlu1 %521  ;;  %v716_v18 = vsel %vm707_vm7, %v699_v9, %v574_v57 }
  0xdc   : > { %v700_v26 = vsel %vm690_vm6, %v683_v50, %v522_v58 }
  0xde   : > { %v576_v61 = vpop.permute.xlu0 %575 }
  0xdf   : > { %v393_v0 = vpop.permute.xlu1 %392  ;;  %v717_v29 = vsel %vm707_vm7, %v700_v26, %v576_v61 }
  0xe0   : > { %v668_v35 = vsel %vm658_vm4, %v6608_v52, %v393_v0 }
  0xe2   : > { %v395_v12 = vpop.permute.xlu0 %394 }
  0xe3   : > { %v627_v24 = vpop.permute.xlu1 %626  ;;  %v669_v40 = vsel %vm658_vm4, %v6605_v51, %v395_v12 }
  0xe4   : > { %v733_v4 = vsel %vm724_vm8, %v716_v18, %v627_v24 }
  0xe5   : > { %5859 = vmatprep.mubr.msk.f32.mxu0 %vm760_vm9, %v733_v4 }
  0xe6   : > { %v629_v20 = vpop.permute.xlu0 %628 }
  0xe7   : > { %v734_v49 = vsel %vm724_vm8, %v717_v29, %v629_v20  ;;  %v476_v25 = vpop.permute.xlu1 %475 }
  0xe8   : > { %5860 = vmatmul.mubr.msk.f32.gmra.mrb[8].mxu0 %vm760_vm9, %v734_v49  ;;  %v684_v37 = vsel %vm674_vm5, %v668_v35, %v476_v25 }
  0xea   : > { %v524_v28 = vpop.permute.xlu0 %523 }
  0xeb   : > { %v478_v60 = vpop.permute.xlu1 %477  ;;  %v701_v21 = vsel %vm690_vm6, %v684_v37, %v524_v28 }
  0xec   : > { %v685_v47 = vsel %vm674_vm5, %v669_v40, %v478_v60 }
  0xee   : > { %v578_v27 = vpop.permute.xlu0 %577 }
  0xef   : > { %v526_v30 = vpop.permute.xlu1 %525  ;;  %v718_v45 = vsel %vm707_vm7, %v701_v21, %v578_v27 }
  0xf0   : > { %v702_v6 = vsel %vm690_vm6, %v685_v47, %v526_v30  ;;  %v6855_v47 = vld [vmem:[%s9387_s2] sm:$0x3] }
  0xf2   : > { %v580_v33 = vpop.permute.xlu0 %579 }
  0xf3   : > { %v397_v34 = vpop.permute.xlu1 %396  ;;  %v719_v52 = vsel %vm707_vm7, %v702_v6, %v580_v33 }
  0xf4   : > { %v670_v0 = vsel %vm658_vm4, %v6645_v11, %v397_v34 }
  0xf6   : > { %v399_v7 = vpop.permute.xlu0 %398 }
  0xf7   : > { %v631_v46 = vpop.permute.xlu1 %630  ;;  %v671_v12 = vsel %vm658_vm4, %v6642_v10, %v399_v7 }
  0xf8   : > { %v735_v48 = vsel %vm724_vm8, %v718_v45, %v631_v46 }
  0xf9   : > { %5862 = vmatprep.mubr.msk.f32.mxu0 %vm760_vm9, %v735_v48 }
  0xfa   : > { %v633_v53 = vpop.permute.xlu0 %632 }
  0xfb   : > { %v736_v54 = vsel %vm724_vm8, %v719_v52, %v633_v53  ;;  %v480_v55 = vpop.permute.xlu1 %479 }
  0xfc   : > { %5863 = vmatmul.mubr.msk.f32.gmra.mrb[10].mxu0 %vm760_vm9, %v736_v54  ;;  %v686_v3 = vsel %vm674_vm5, %v670_v0, %v480_v55 }
  0xfe   : > { %v528_v51 = vpop.permute.xlu0 %527 }
  0xff   : > { %v482_v5 = vpop.permute.xlu1 %481  ;;  %v703_v8 = vsel %vm690_vm6, %v686_v3, %v528_v51 }
 0x100   : > { %v687_v24 = vsel %vm674_vm5, %v671_v12, %v482_v5 }
 0x102   : > { %v582_v56 = vpop.permute.xlu0 %581 }
 0x103   : > { %v530_v57 = vpop.permute.xlu1 %529  ;;  %v720_v13 = vsel %vm707_vm7, %v703_v8, %v582_v56 }
 0x104   : > { %v704_v4 = vsel %vm690_vm6, %v687_v24, %v530_v57 }
 0x106   : > { %v584_v58 = vpop.permute.xlu0 %583 }
 0x107   : > { %v401_v61 = vpop.permute.xlu1 %400  ;;  %v721_v11 = vsel %vm707_vm7, %v704_v4, %v584_v58 }
 0x108   : > { %v672_v28 = vsel %vm658_vm4, %v6682_v44, %v401_v61 }
 0x10a   : > { %v403_v9 = vpop.permute.xlu0 %402 }
 0x10b   : > { %v635_v18 = vpop.permute.xlu1 %634  ;;  %v673_v21 = vsel %vm658_vm4, %v6679_v41, %v403_v9  ;;  %v6859_v41 = vrot.slane %v6855_v47, %v6746_v23 }
 0x10c   : > { %v737_v50 = vsel %vm724_vm8, %v720_v13, %v635_v18 }
 0x10d   : > { %5865 = vmatprep.mubr.msk.f32.mxu0 %vm760_vm9, %v737_v50 }
 0x10e   : > { %v637_v26 = vpop.permute.xlu0 %636 }
 0x10f   : > { %v738_v29 = vsel %vm724_vm8, %v721_v11, %v637_v26  ;;  %v484_v20 = vpop.permute.xlu1 %483 }
 0x110   : > { %5866 = vmatmul.mubr.msk.f32.gmra.mrb[12].mxu0 %vm760_vm9, %v738_v29  ;;  %v688_v27 = vsel %vm674_vm5, %v672_v28, %v484_v20 }
 0x112   : > { %v532_v10 = vpop.permute.xlu0 %531 }
 0x113   : > { %v486_v49 = vpop.permute.xlu1 %485  ;;  %v705_v30 = vsel %vm690_vm6, %v688_v27, %v532_v10 }
 0x114   : > { %v689_v7 = vsel %vm674_vm5, %v673_v21, %v486_v49 }
 0x116   : > { %v586_v25 = vpop.permute.xlu0 %585 }
 0x117   : > { %v534_v60 = vpop.permute.xlu1 %533  ;;  %v722_v33 = vsel %vm707_vm7, %v705_v30, %v586_v25 }
 0x118   : > { %v706_v44 = vsel %vm690_vm6, %v689_v7, %v534_v60 }
 0x11a   : > { %v639_v34 = vpop.permute.xlu0 %638 }
 0x11b   : > { %v739_v35 = vsel %vm724_vm8, %v722_v33, %v639_v34  ;;  %v588_v37 = vpop.permute.xlu1 %587 }
 0x11c   : > { %5868 = vmatprep.mubr.msk.f32.mxu0 %vm760_vm9, %v739_v35  ;;  %v723_v40 = vsel %vm707_vm7, %v706_v44, %v588_v37 }
 0x11f   : > { %v641_v45 = vpop.permute.xlu1 %640 }
 0x120   : > { %v740_v46 = vsel %vm724_vm8, %v723_v40, %v641_v45 }
 0x121   : > { %5869 = vmatmul.mubr.msk.f32.gmra.mrb[14].mxu0 %vm760_vm9, %v740_v46 }
 0x16b   : > { %v5849_v48 = vpop.f32.mrb[0].mxu0 }
 0x16c   : > { %v881_v6 = vadd.f32 %v5849_v48, %v6859_v41  ;;  %v875_v52 = vpop.f32.mrb[1].mxu0 }
 0x16d   : > { %v876_v53 = vadd.f32 %v875_v52, %v6859_v41 }
 0x16e   : > { %v955_v54 = vsel %vm224_vm0, %v881_v6, 0.0 }
 0x16f   : > { %v954_v55 = vsel %vm224_vm0, %v876_v53, 0.0 }
 0x170   : > { %v956_v51 = vadd.f32 %v955_v54, %v954_v55 }
 0x172   : > { %v957_v5 = vrot.slane %v956_v51, 4 }
 0x174   : > { %v958_v56 = vadd.f32 %v957_v5, %v956_v51 }
 0x176   : > { %v959_v57 = vrot.slane %v958_v56, 2 }
 0x178   : > { %v960_v58 = vadd.f32 %v959_v57, %v958_v56 }
 0x17a   : > { %v961_v61 = vrot.slane %v960_v58, 1 }
 0x17c   : > { %v962_v0 = vadd.f32 %v961_v61, %v960_v58 }
 0x17e   : > { %v1027_v3 = vmul.f32 0.0625, %v962_v0 }
 0x17f   : > { %v5852_v8 = vpop.f32.mrb[2].mxu0 }
 0x180   : > { %v1035_v9 = vsub.f32 %v876_v53, %v1027_v3  ;;  %v1036_v12 = vsub.f32 %v881_v6, %v1027_v3  ;;  %v891_v13 = vadd.f32 %v5852_v8, %v6859_v41  ;;  %v885_v18 = vpop.f32.mrb[3].mxu0 }
 0x181   : > { %v886_v24 = vadd.f32 %v885_v18, %v6859_v41 }
 0x182   : > { %v1051_v50 = vmul.f32 %v1035_v9, %v1035_v9  ;;  %v1052_v4 = vmul.f32 %v1036_v12, %v1036_v12  ;;  %v964_v11 = vsel %vm224_vm0, %v891_v13, 0.0 }
 0x183   : > { %v963_v26 = vsel %vm224_vm0, %v886_v24, 0.0 }
 0x184   : > { %v1067_v29 = vsel %vm224_vm0, %v1051_v50, 0.0  ;;  %v1068_v20 = vsel %vm224_vm0, %v1052_v4, 0.0  ;;  %v965_v10 = vadd.f32 %v964_v11, %v963_v26  ;;  %v6885_v50 = vpop.permute.xlu1 %1188  ;;  %v6887_v4 = vpop.permute.xlu0 %1184 }
 0x185   : > { %v1069_v49 = vadd.f32 %v1068_v20, %v1067_v29 }
 0x186   : > { %v966_v25 = vrot.slane %v965_v10, 4 }
 0x187   : > { %v1070_v28 = vrot.slane %v1069_v49, 4 }
 0x188   : > { %v967_v60 = vadd.f32 %v966_v25, %v965_v10 }
 0x189   : > { %v1071_v27 = vadd.f32 %v1070_v28, %v1069_v49 }
 0x18a   : > { %v968_v30 = vrot.slane %v967_v60, 2 }
 0x18b   : > { %v1072_v33 = vrot.slane %v1071_v27, 2 }
 0x18c   : > { %v969_v34 = vadd.f32 %v968_v30, %v967_v60  ;;  %v6891_v30 = vpop.permute.xlu0 %1211 }
 0x18d   : > { %v1073_v35 = vadd.f32 %v1072_v33, %v1071_v27  ;;  %v6889_v27 = vpop.permute.xlu1 %1215 }
 0x18e   : > { %v970_v37 = vrot.slane %v969_v34, 1 }
 0x18f   : > { %v1074_v21 = vrot.slane %v1073_v35, 1 }
 0x190   : > { %v971_v7 = vadd.f32 %v970_v37, %v969_v34  ;;  %v6897_v37 = vrot.slane %v6855_v47, %v6757_v36 }
 0x191   : > { %v1075_v44 = vadd.f32 %v1074_v21, %v1073_v35 }
 0x192   : > { %v1028_v40 = vmul.f32 0.0625, %v971_v7 }
 0x193   : > { %v1139_v45 = vmul.f32 0.0625, %v1075_v44  ;;  %v5855_v46 = vpop.f32.mrb[4].mxu0 }
 0x194   : > { %v6871_v48 = vsub.f32 %v886_v24, %v1028_v40  ;;  %v6873_v6 = vsub.f32 %v891_v13, %v1028_v40  ;;  %v901_v52 = vadd.f32 %v5855_v46, %v6859_v41  ;;  %v895_v53 = vpop.f32.mrb[5].mxu0 }
 0x195   : > { %v1147_v54 = vadd.f32 1e-05, %v1139_v45  ;;  %v896_v55 = vadd.f32 %v895_v53, %v6859_v41 }
 0x196   : > { %v1053_v51 = vmul.f32 %v6871_v48, %v6871_v48  ;;  %v1054_v5 = vmul.f32 %v6873_v6, %v6873_v6  ;;  %v973_v56 = vsel %vm224_vm0, %v901_v52, 0.0 }
 0x197   : > { %6261 = vrsqrt.f32 %v1147_v54  ;;  %v972_v57 = vsel %vm224_vm0, %v896_v55, 0.0 }
 0x198   : > { %v1076_v58 = vsel %vm224_vm0, %v1053_v51, 0.0  ;;  %v1077_v61 = vsel %vm224_vm0, %v1054_v5, 0.0  ;;  %v974_v0 = vadd.f32 %v973_v56, %v972_v57 }
 0x199   : > { %v1078_v3 = vadd.f32 %v1077_v61, %v1076_v58 }
 0x19a   : > { %v975_v8 = vrot.slane %v974_v0, 4 }
 0x19b   : > { %v1079_v13 = vrot.slane %v1078_v3, 4 }
 0x19c   : > { %v976_v18 = vadd.f32 %v975_v8, %v974_v0 }
 0x19d   : > { %v1080_v24 = vadd.f32 %v1079_v13, %v1078_v3 }
 0x19e   : > { %v977_v11 = vrot.slane %v976_v18, 2 }
 0x19f   : > { %v1081_v26 = vrot.slane %v1080_v24, 2 }
 0x1a0   : > { %v978_v29 = vadd.f32 %v977_v11, %v976_v18 }
 0x1a1   : > { %v6262_v20 = vpop.eup %6261  ;;  %v1082_v10 = vadd.f32 %v1081_v26, %v1080_v24 }
 0x1a2   : > { %v1163_v49 = vmul.f32 %v6262_v20, %v1035_v9  ;;  %v1164_v25 = vmul.f32 %v6262_v20, %v1036_v12  ;;  %v979_v28 = vrot.slane %v978_v29, 1 }
 0x1a3   : > { %v1083_v60 = vrot.slane %v1082_v10, 1 }
 0x1a4   : > { %v980_v33 = vadd.f32 %v979_v28, %v978_v29  ;;  %v1191_v34 = vmul.f32 %v6885_v50, %v1164_v25  ;;  %v1190_v35 = vmul.f32 %v6887_v4, %v1163_v49 }
 0x1a5   : > { %v1084_v21 = vadd.f32 %v1083_v60, %v1082_v10 }
 0x1a6   : > { %v1029_v7 = vmul.f32 0.0625, %v980_v33  ;;  %v1218_v9 = vadd.f32 %v6889_v27, %v1191_v34  ;;  %v1217_v12 = vadd.f32 %v6891_v30, %v1190_v35 }
 0x1a7   : > { %v1140_v44 = vmul.f32 0.0625, %v1084_v21  ;;  %v5858_v40 = vpop.f32.mrb[6].mxu0 }
 0x1a8   : > { %v6901_v45 = vsub.f32 %v896_v55, %v1029_v7  ;;  %v6903_v46 = vsub.f32 %v901_v52, %v1029_v7  ;;  %v911_v53 = vadd.f32 %v5858_v40, %v6859_v41  ;;  %v905_v54 = vpop.f32.mrb[7].mxu0  ;;  %vm1234_vm10 = vcmp.ge.f32.partialorder %v1218_v9, 0.0 }
 0x1a9   : > { %v1148_v51 = vadd.f32 1e-05, %v1140_v44  ;;  %v906_v47 = vadd.f32 %v905_v54, %v6859_v41  ;;  %v1254_v5 = vmul.f32 %v6897_v37, %v1218_v9  ;;  %vm1233_vm11 = vcmp.ge.f32.partialorder %v1217_v12, 0.0 }
 0x1aa   : > { %v1055_v56 = vmul.f32 %v6901_v45, %v6901_v45  ;;  %v1056_v57 = vmul.f32 %v6903_v46, %v6903_v46  ;;  %v982_v55 = vsel %vm224_vm0, %v911_v53, 0.0  ;;  %v1253_v52 = vmul.f32 %v6897_v37, %v1217_v12 }
 0x1ab   : > { %6263 = vrsqrt.f32 %v1148_v51  ;;  %v981_v58 = vsel %vm224_vm0, %v906_v47, 0.0  ;;  %v1270_v61 = vsel %vm1234_vm10, %v1218_v9, %v1254_v5 }
 0x1ac   : > { %v1085_v0 = vsel %vm224_vm0, %v1055_v56, 0.0  ;;  %v1086_v3 = vsel %vm224_vm0, %v1056_v57, 0.0  ;;  %v983_v8 = vadd.f32 %v982_v55, %v981_v58  ;;  %1303 = vrot.lane.b32.xlu1 %v1270_v61, %s6355_s14  ;;  %v1269_v13 = vsel %vm1233_vm11, %v1217_v12, %v1253_v52 }
 0x1ad   : > { %v1087_v18 = vadd.f32 %v1086_v3, %v1085_v0  ;;  %1301 = vrot.lane.b32.xlu0 %v1269_v13, %s6355_s14 }
 0x1ae   : > { %v984_v24 = vrot.slane %v983_v8, 4 }
 0x1af   : > { %v1088_v11 = vrot.slane %v1087_v18, 4 }
 0x1b0   : > { %v985_v26 = vadd.f32 %v984_v24, %v983_v8 }
 0x1b1   : > { %v1089_v29 = vadd.f32 %v1088_v11, %v1087_v18 }
 0x1b2   : > { %v986_v20 = vrot.slane %v985_v26, 2 }
 0x1b3   : > { %v1090_v10 = vrot.slane %v1089_v29, 2 }
 0x1b4   : > { %v987_v49 = vadd.f32 %v986_v20, %v985_v26 }
 0x1b5   : > { %v6264_v25 = vpop.eup %6263  ;;  %v1091_v28 = vadd.f32 %v1090_v10, %v1089_v29 }
 0x1b6   : > { %v1165_v60 = vmul.f32 %v6264_v25, %v6871_v48  ;;  %v1166_v33 = vmul.f32 %v6264_v25, %v6873_v6  ;;  %v988_v34 = vrot.slane %v987_v49, 1 }
 0x1b7   : > { %v1092_v35 = vrot.slane %v1091_v28, 1 }
 0x1b8   : > { %v989_v21 = vadd.f32 %v988_v34, %v987_v49  ;;  %v1193_v7 = vmul.f32 %v6885_v50, %v1166_v33  ;;  %v1192_v9 = vmul.f32 %v6887_v4, %v1165_v60 }
 0x1b9   : > { %v1093_v12 = vadd.f32 %v1092_v35, %v1091_v28 }
 0x1ba   : > { %v1030_v44 = vmul.f32 0.0625, %v989_v21  ;;  %v1220_v40 = vadd.f32 %v6889_v27, %v1193_v7  ;;  %v1219_v54 = vadd.f32 %v6891_v30, %v1192_v9 }
 0x1bb   : > { %v1141_v51 = vmul.f32 0.0625, %v1093_v12  ;;  %v5861_v5 = vpop.f32.mrb[8].mxu0 }
 0x1bc   : > { %v6925_v56 = vsub.f32 %v906_v47, %v1030_v44  ;;  %v6927_v48 = vsub.f32 %v911_v53, %v1030_v44  ;;  %v921_v6 = vadd.f32 %v5861_v5, %v6859_v41  ;;  %v915_v57 = vpop.f32.mrb[9].mxu0  ;;  %vm1236_vm12 = vcmp.ge.f32.partialorder %v1220_v40, 0.0 }
 0x1bd   : > { %v1149_v55 = vadd.f32 1e-05, %v1141_v51  ;;  %v916_v52 = vadd.f32 %v915_v57, %v6859_v41  ;;  %v1256_v58 = vmul.f32 %v6897_v37, %v1220_v40  ;;  %vm1235_vm13 = vcmp.ge.f32.partialorder %v1219_v54, 0.0 }
 0x1be   : > { %v1057_v61 = vmul.f32 %v6925_v56, %v6925_v56  ;;  %v1058_v0 = vmul.f32 %v6927_v48, %v6927_v48  ;;  %v991_v47 = vsel %vm224_vm0, %v921_v6, 0.0  ;;  %v1255_v53 = vmul.f32 %v6897_v37, %v1219_v54 }
 0x1bf   : > { %6265 = vrsqrt.f32 %v1149_v55  ;;  %v990_v3 = vsel %vm224_vm0, %v916_v52, 0.0  ;;  %v1272_v8 = vsel %vm1236_vm12, %v1220_v40, %v1256_v58 }
 0x1c0   : > { %v1094_v13 = vsel %vm224_vm0, %v1057_v61, 0.0  ;;  %v1095_v18 = vsel %vm224_vm0, %v1058_v0, 0.0  ;;  %v992_v24 = vadd.f32 %v991_v47, %v990_v3  ;;  %1307 = vrot.lane.b32.xlu1 %v1272_v8, %s6355_s14  ;;  %v1271_v11 = vsel %vm1235_vm13, %v1219_v54, %v1255_v53 }
 0x1c1   : > { %v1096_v26 = vadd.f32 %v1095_v18, %v1094_v13  ;;  %1305 = vrot.lane.b32.xlu0 %v1271_v11, %s6355_s14 }
 0x1c2   : > { %v993_v29 = vrot.slane %v992_v24, 4 }
 0x1c3   : > { %v1097_v20 = vrot.slane %v1096_v26, 4 }
 0x1c4   : > { %v994_v10 = vadd.f32 %v993_v29, %v992_v24 }
 0x1c5   : > { %v1098_v49 = vadd.f32 %v1097_v20, %v1096_v26 }
 0x1c6   : > { %v995_v25 = vrot.slane %v994_v10, 2 }
 0x1c7   : > { %v1099_v28 = vrot.slane %v1098_v49, 2 }
 0x1c8   : > { %v996_v60 = vadd.f32 %v995_v25, %v994_v10 }
 0x1c9   : > { %v6266_v33 = vpop.eup %6265  ;;  %v1100_v34 = vadd.f32 %v1099_v28, %v1098_v49 }
 0x1ca   : > { %v1167_v35 = vmul.f32 %v6266_v33, %v6901_v45  ;;  %v1168_v21 = vmul.f32 %v6266_v33, %v6903_v46  ;;  %v997_v7 = vrot.slane %v996_v60, 1 }
 0x1cb   : > { %v1101_v9 = vrot.slane %v1100_v34, 1 }
 0x1cc   : > { %v998_v12 = vadd.f32 %v997_v7, %v996_v60  ;;  %v1195_v44 = vmul.f32 %v6885_v50, %v1168_v21  ;;  %v1194_v40 = vmul.f32 %v6887_v4, %v1167_v35 }
 0x1cd   : > { %v1102_v54 = vadd.f32 %v1101_v9, %v1100_v34 }
 0x1ce   : > { %v1031_v51 = vmul.f32 0.0625, %v998_v12  ;;  %v1222_v5 = vadd.f32 %v6889_v27, %v1195_v44  ;;  %v1221_v57 = vadd.f32 %v6891_v30, %v1194_v40 }
 0x1cf   : > { %v1142_v55 = vmul.f32 0.0625, %v1102_v54  ;;  %v5864_v58 = vpop.f32.mrb[10].mxu0 }
 0x1d0   : > { %v6949_v61 = vsub.f32 %v916_v52, %v1031_v51  ;;  %v6951_v45 = vsub.f32 %v921_v6, %v1031_v51  ;;  %v931_v46 = vadd.f32 %v5864_v58, %v6859_v41  ;;  %v925_v0 = vpop.f32.mrb[11].mxu0  ;;  %vm1238_vm14 = vcmp.ge.f32.partialorder %v1222_v5, 0.0 }
 0x1d1   : > { %v1150_v47 = vadd.f32 1e-05, %v1142_v55  ;;  %v926_v53 = vadd.f32 %v925_v0, %v6859_v41  ;;  %v1258_v3 = vmul.f32 %v6897_v37, %v1222_v5  ;;  %vm1237_vm15 = vcmp.ge.f32.partialorder %v1221_v57, 0.0 }
 0x1d2   : > { %v1059_v8 = vmul.f32 %v6949_v61, %v6949_v61  ;;  %v1060_v13 = vmul.f32 %v6951_v45, %v6951_v45  ;;  %v1000_v52 = vsel %vm224_vm0, %v931_v46, 0.0  ;;  %v1257_v6 = vmul.f32 %v6897_v37, %v1221_v57 }
 0x1d3   : > { %6267 = vrsqrt.f32 %v1150_v47  ;;  %v999_v18 = vsel %vm224_vm0, %v926_v53, 0.0  ;;  %v1274_v24 = vsel %vm1238_vm14, %v1222_v5, %v1258_v3 }
 0x1d4   : > { %v1103_v11 = vsel %vm224_vm0, %v1059_v8, 0.0  ;;  %v1104_v26 = vsel %vm224_vm0, %v1060_v13, 0.0  ;;  %v1001_v29 = vadd.f32 %v1000_v52, %v999_v18  ;;  %1311 = vrot.lane.b32.xlu1 %v1274_v24, %s6355_s14  ;;  %v1273_v20 = vsel %vm1237_vm15, %v1221_v57, %v1257_v6 }
 0x1d5   : > { %v1105_v10 = vadd.f32 %v1104_v26, %v1103_v11  ;;  %1309 = vrot.lane.b32.xlu0 %v1273_v20, %s6355_s14 }
 0x1d6   : > { %v1002_v49 = vrot.slane %v1001_v29, 4 }
 0x1d7   : > { %v1106_v25 = vrot.slane %v1105_v10, 4 }
 0x1d8   : > { %v1003_v28 = vadd.f32 %v1002_v49, %v1001_v29 }
 0x1d9   : > { %v1107_v60 = vadd.f32 %v1106_v25, %v1105_v10 }
 0x1da   : > { %v1004_v33 = vrot.slane %v1003_v28, 2 }
 0x1db   : > { %v1108_v34 = vrot.slane %v1107_v60, 2 }
 0x1dc   : > { %v1005_v35 = vadd.f32 %v1004_v33, %v1003_v28 }
 0x1dd   : > { %v6268_v21 = vpop.eup %6267  ;;  %v1109_v7 = vadd.f32 %v1108_v34, %v1107_v60 }
 0x1de   : > { %v1169_v9 = vmul.f32 %v6268_v21, %v6925_v56  ;;  %v1170_v12 = vmul.f32 %v6268_v21, %v6927_v48  ;;  %v1006_v44 = vrot.slane %v1005_v35, 1 }
 0x1df   : > { %v1110_v40 = vrot.slane %v1109_v7, 1 }
 0x1e0   : > { %v1196_v54 = vmul.f32 %v6887_v4, %v1169_v9  ;;  %v1007_v51 = vadd.f32 %v1006_v44, %v1005_v35  ;;  %v1197_v5 = vmul.f32 %v6885_v50, %v1170_v12 }
 0x1e1   : > { %v1111_v57 = vadd.f32 %v1110_v40, %v1109_v7 }
 0x1e2   : > { %v1032_v55 = vmul.f32 0.0625, %v1007_v51  ;;  %v1224_v58 = vadd.f32 %v6889_v27, %v1197_v5  ;;  %v1223_v0 = vadd.f32 %v6891_v30, %v1196_v54 }
 0x1e3   : > { %v1143_v47 = vmul.f32 0.0625, %v1111_v57  ;;  %v5867_v3 = vpop.f32.mrb[12].mxu0 }
 0x1e4   : > { %v6973_v8 = vsub.f32 %v926_v53, %v1032_v55  ;;  %v6975_v56 = vsub.f32 %v931_v46, %v1032_v55  ;;  %v941_v48 = vadd.f32 %v5867_v3, %v6859_v41  ;;  %v935_v13 = vpop.f32.mrb[13].mxu0  ;;  %vm1240_vm10 = vcmp.ge.f32.partialorder %v1224_v58, 0.0 }
 0x1e5   : > { %v1151_v52 = vadd.f32 1e-05, %v1143_v47  ;;  %v936_v6 = vadd.f32 %v935_v13, %v6859_v41  ;;  %v1260_v18 = vmul.f32 %v6897_v37, %v1224_v58  ;;  %vm1239_vm11 = vcmp.ge.f32.partialorder %v1223_v0, 0.0 }
 0x1e6   : > { %v1061_v24 = vmul.f32 %v6973_v8, %v6973_v8  ;;  %v1062_v11 = vmul.f32 %v6975_v56, %v6975_v56  ;;  %v1009_v53 = vsel %vm224_vm0, %v941_v48, 0.0  ;;  %v1259_v46 = vmul.f32 %v6897_v37, %v1223_v0 }
 0x1e7   : > { %6269 = vrsqrt.f32 %v1151_v52  ;;  %v1008_v26 = vsel %vm224_vm0, %v936_v6, 0.0  ;;  %v1276_v29 = vsel %vm1240_vm10, %v1224_v58, %v1260_v18 }
 0x1e8   : > { %v1112_v20 = vsel %vm224_vm0, %v1061_v24, 0.0  ;;  %v1113_v10 = vsel %vm224_vm0, %v1062_v11, 0.0  ;;  %v1010_v49 = vadd.f32 %v1009_v53, %v1008_v26  ;;  %1315 = vrot.lane.b32.xlu1 %v1276_v29, %s6355_s14  ;;  %v1275_v25 = vsel %vm1239_vm11, %v1223_v0, %v1259_v46 }
 0x1e9   : > { %v1114_v28 = vadd.f32 %v1113_v10, %v1112_v20  ;;  %1313 = vrot.lane.b32.xlu0 %v1275_v25, %s6355_s14 }
 0x1ea   : > { %v1011_v60 = vrot.slane %v1010_v49, 4 }
 0x1eb   : > { %v1115_v33 = vrot.slane %v1114_v28, 4 }
 0x1ec   : > { %v1012_v34 = vadd.f32 %v1011_v60, %v1010_v49 }
 0x1ed   : > { %v1116_v35 = vadd.f32 %v1115_v33, %v1114_v28 }
 0x1ee   : > { %v1013_v21 = vrot.slane %v1012_v34, 2 }
 0x1ef   : > { %v1117_v7 = vrot.slane %v1116_v35, 2 }
 0x1f0   : > { %v1014_v9 = vadd.f32 %v1013_v21, %v1012_v34 }
 0x1f1   : > { %v6270_v12 = vpop.eup %6269  ;;  %v1118_v44 = vadd.f32 %v1117_v7, %v1116_v35 }
 0x1f2   : > { %v1171_v40 = vmul.f32 %v6270_v12, %v6949_v61  ;;  %v1172_v54 = vmul.f32 %v6270_v12, %v6951_v45  ;;  %v1015_v51 = vrot.slane %v1014_v9, 1 }
 0x1f3   : > { %v1119_v5 = vrot.slane %v1118_v44, 1 }
 0x1f4   : > { %v1198_v57 = vmul.f32 %v6887_v4, %v1171_v40  ;;  %v1016_v55 = vadd.f32 %v1015_v51, %v1014_v9  ;;  %v5870_v58 = vpop.f32.mrb[14].mxu0  ;;  %v1199_v0 = vmul.f32 %v6885_v50, %v1172_v54 }
 0x1f5   : > { %v1120_v47 = vadd.f32 %v1119_v5, %v1118_v44  ;;  %v951_v3 = vadd.f32 %v5870_v58, %v6859_v41  ;;  %v945_v13 = vpop.f32.mrb[15].mxu0 }
 0x1f6   : > { %v1033_v52 = vmul.f32 0.0625, %v1016_v55  ;;  %v946_v18 = vadd.f32 %v945_v13, %v6859_v41  ;;  %v1226_v24 = vadd.f32 %v6889_v27, %v1199_v0  ;;  %v1225_v61 = vadd.f32 %v6891_v30, %v1198_v57 }
 0x1f7   : > { %v1144_v45 = vmul.f32 0.0625, %v1120_v47  ;;  %v1018_v11 = vsel %vm224_vm0, %v951_v3, 0.0 }
 0x1f8   : > { %v7000_v53 = vsub.f32 %v936_v6, %v1033_v52  ;;  %v7002_v46 = vsub.f32 %v941_v48, %v1033_v52  ;;  %v1017_v26 = vsel %vm224_vm0, %v946_v18, 0.0  ;;  %vm1242_vm12 = vcmp.ge.f32.partialorder %v1226_v24, 0.0 }
 0x1f9   : > { %v1152_v29 = vadd.f32 1e-05, %v1144_v45  ;;  %v1019_v20 = vadd.f32 %v1018_v11, %v1017_v26  ;;  %v1262_v10 = vmul.f32 %v6897_v37, %v1226_v24  ;;  %vm1241_vm13 = vcmp.ge.f32.partialorder %v1225_v61, 0.0 }
 0x1fa   : > { %v1063_v41 = vmul.f32 %v7000_v53, %v7000_v53  ;;  %v1064_v49 = vmul.f32 %v7002_v46, %v7002_v46  ;;  %v1261_v25 = vmul.f32 %v6897_v37, %v1225_v61 }
 0x1fb   : > { %6271 = vrsqrt.f32 %v1152_v29  ;;  %v1020_v6 = vrot.slane %v1019_v20, 4  ;;  %v1278_v48 = vsel %vm1242_vm12, %v1226_v24, %v1262_v10  ;;  %vm1365_vm12 = vcmask 64512  }
 0x1fc   : > { %v1121_v28 = vsel %vm224_vm0, %v1063_v41, 0.0  ;;  %v1122_v60 = vsel %vm224_vm0, %v1064_v49, 0.0  ;;  %1319 = vrot.lane.b32.xlu1 %v1278_v48, %s6355_s14  ;;  %v1277_v33 = vsel %vm1241_vm13, %v1225_v61, %v1261_v25 }
 0x1fd   : > { %v1123_v34 = vadd.f32 %v1122_v60, %v1121_v28  ;;  %v1021_v35 = vadd.f32 %v1020_v6, %v1019_v20  ;;  %1317 = vrot.lane.b32.xlu0 %v1277_v33, %s6355_s14  ;;  %v5534_v33 = vld [vmem:[%s9386_s1 + $0x78] sm:$0xff] }
 0x1ff   : > { %v1124_v21 = vrot.slane %v1123_v34, 4  ;;  %v1022_v7 = vrot.slane %v1021_v35, 2 }
 0x201   : > { %v1125_v9 = vadd.f32 %v1124_v21, %v1123_v34  ;;  %v1023_v12 = vadd.f32 %v1022_v7, %v1021_v35  ;;  %v5535_v34 = vld [vmem:[%s9386_s1 + $0x80] sm:$0xff] }
 0x202   : > { %v6115_v21 = vpack.c.bf16 %v5535_v34, %v5534_v33  ;;  %v5545_v33 = vld [vmem:[%s9386_s1 + $0xd0] sm:$0xff] }
 0x203   : > { %v1126_v44 = vrot.slane %v1125_v9, 2  ;;  %v1024_v40 = vrot.slane %v1023_v12, 1 }
 0x204   : > { %6116 = vmatprep.subr.bf16.mxu1 %v6115_v21 }
 0x205   : > { %v6272_v54 = vpop.eup %6271  ;;  %v1127_v51 = vadd.f32 %v1126_v44, %v1125_v9  ;;  %v1025_v5 = vadd.f32 %v1024_v40, %v1023_v12  ;;  %6118 = vmatpush3.bf16.msra.mxu1 %v6115_v21  ;;  %v5536_v40 = vld [vmem:[%s9386_s1 + $0x88] sm:$0xff] }
 0x206   : > { %v1173_v57 = vmul.f32 %v6272_v54, %v6973_v8  ;;  %v1174_v55 = vmul.f32 %v6272_v54, %v6975_v56  ;;  %v5537_v54 = vld [vmem:[%s9386_s1 + $0x90] sm:$0xff] }
 0x207   : > { %v1128_v58 = vrot.slane %v1127_v51, 1  ;;  %v1034_v0 = vmul.f32 0.0625, %v1025_v5 }
 0x208   : > { %v1200_v47 = vmul.f32 %v6887_v4, %v1173_v57  ;;  %v1201_v13 = vmul.f32 %v6885_v50, %v1174_v55  ;;  %v6119_v55 = vpack.c.bf16 %v5537_v54, %v5536_v40  ;;  %v5548_v54 = vld [vmem:[%s9386_s1 + $0xe8] sm:$0xff] }
 0x209   : > { %v1129_v52 = vadd.f32 %v1128_v58, %v1127_v51  ;;  %v7019_v24 = vsub.f32 %v946_v18, %v1034_v0  ;;  %v7021_v61 = vsub.f32 %v951_v3, %v1034_v0 }
 0x20a   : > { %v1228_v45 = vadd.f32 %v6889_v27, %v1201_v13  ;;  %v1227_v11 = vadd.f32 %v6891_v30, %v1200_v47  ;;  %6120 = vmatprep.subr.bf16.mxu1 %v6119_v55 }
 0x20b   : > { %v1145_v26 = vmul.f32 0.0625, %v1129_v52  ;;  %v1065_v8 = vmul.f32 %v7019_v24, %v7019_v24  ;;  %v1066_v56 = vmul.f32 %v7021_v61, %v7021_v61  ;;  %6122 = vmatpush3.bf16.msra.mxu1 %v6119_v55  ;;  %v5540_v52 = vld [vmem:[%s9386_s1 + $0xa8] sm:$0xff] }
 0x20c   : > { %vm1244_vm14 = vcmp.ge.f32.partialorder %v1228_v45, 0.0  ;;  %v1264_v29 = vmul.f32 %v6897_v37, %v1228_v45  ;;  %vm1243_vm15 = vcmp.ge.f32.partialorder %v1227_v11, 0.0  ;;  %v1263_v18 = vmul.f32 %v6897_v37, %v1227_v11 }
 0x20d   : > { %v1153_v20 = vadd.f32 1e-05, %v1145_v26  ;;  %v1130_v3 = vsel %vm224_vm0, %v1065_v8, 0.0  ;;  %v1131_v10 = vsel %vm224_vm0, %v1066_v56, 0.0 }
 0x20e   : > { %v1132_v41 = vadd.f32 %v1131_v10, %v1130_v3  ;;  %v1280_v49 = vsel %vm1244_vm14, %v1228_v45, %v1264_v29  ;;  %v1279_v25 = vsel %vm1243_vm15, %v1227_v11, %v1263_v18  ;;  %v5541_v45 = vld [vmem:[%s9386_s1 + $0xb0] sm:$0xff]  ;;  %v5542_v3 = vld [vmem:[%s9386_s1 + $0xb8] sm:$0xff]  ;;  %v5543_v10 = vld [vmem:[%s9386_s1 + $0xc0] sm:$0xff] }
 0x20f   : > { %6273 = vrsqrt.f32 %v1153_v20  ;;  %1323 = vrot.lane.b32.xlu1 %v1280_v49, %s6355_s14  ;;  %1321 = vrot.lane.b32.xlu0 %v1279_v25, %s6355_s14  ;;  %v6127_v8 = vpack.c.bf16 %v5541_v45, %v5540_v52 }
 0x210   : > { %v1133_v6 = vrot.slane %v1132_v41, 4 }
 0x212   : > { %v1134_v48 = vadd.f32 %v1133_v6, %v1132_v41  ;;  %v6131_v41 = vpack.c.bf16 %v5543_v10, %v5542_v3 }
 0x214   : > { %v1135_v28 = vrot.slane %v1134_v48, 2 }
 0x216   : > { %v1136_v60 = vadd.f32 %v1135_v28, %v1134_v48 }
 0x218   : > { %v1137_v35 = vrot.slane %v1136_v60, 1 }
 0x219   : > { %v6274_v7 = vpop.eup %6273 }
 0x21a   : > { %v1175_v9 = vmul.f32 %v6274_v7, %v7000_v53  ;;  %v1176_v12 = vmul.f32 %v6274_v7, %v7002_v46  ;;  %v1138_v44 = vadd.f32 %v1137_v35, %v1136_v60  ;;  %v5538_v53 = vld [vmem:[%s9386_s1 + $0x98] sm:$0xff]  ;;  %v5539_v46 = vld [vmem:[%s9386_s1 + $0xa0] sm:$0xff]  ;;  %v5544_v60 = vld [vmem:[%s9386_s1 + $0xc8] sm:$0xff] }
 0x21b   : > { %v6123_v58 = vpack.c.bf16 %v5539_v46, %v5538_v53  ;;  %v6135_v34 = vpack.c.bf16 %v5545_v33, %v5544_v60 }
 0x21c   : > { %v1202_v51 = vmul.f32 %v6887_v4, %v1175_v9  ;;  %v1146_v5 = vmul.f32 0.0625, %v1138_v44  ;;  %v1203_v57 = vmul.f32 %v6885_v50, %v1176_v12 }
 0x21d   : > { %6124 = vmatprep.subr.bf16.mxu1 %v6123_v58 }
 0x21e   : > { %v1154_v0 = vadd.f32 1e-05, %v1146_v5  ;;  %v1230_v47 = vadd.f32 %v6889_v27, %v1203_v57  ;;  %v1229_v13 = vadd.f32 %v6891_v30, %v1202_v51  ;;  %6126 = vmatpush3.bf16.msra.mxu1 %v6123_v58  ;;  %v1304_v18 = vpop.permute.xlu1 %1303 }
 0x21f   : > { %6128 = vmatprep.subr.bf16.mxu1 %v6127_v8  ;;  %v1302_v20 = vpop.permute.xlu0 %1301  ;;  %v1350_v25 = vsel %vm224_vm0, %v6428_v15, %v1304_v18 }
 0x220   : > { %6275 = vrsqrt.f32 %v1154_v0  ;;  %vm1246_vm10 = vcmp.ge.f32.partialorder %v1230_v47, 0.0  ;;  %v1266_v11 = vmul.f32 %v6897_v37, %v1230_v47  ;;  %vm1245_vm11 = vcmp.ge.f32.partialorder %v1229_v13, 0.0 }
 0x221   : > { %v1265_v26 = vmul.f32 %v6897_v37, %v1229_v13  ;;  %v1349_v6 = vsel %vm224_vm0, %v6425_v14, %v1302_v20  ;;  %v7090_v21 = vsel %vm1365_vm12, %v1350_v25, %v6428_v15  ;;  %v5547_v15 = vld [vmem:[%s9386_s1 + $0xe0] sm:$0xff] }
 0x222   : > { %v1282_v56 = vsel %vm1246_vm10, %v1230_v47, %v1266_v11  ;;  %6130 = vmatpush3.bf16.msra.mxu1 %v6127_v8  ;;  %v1399_v12 = vrot.slane %v7090_v21, 7 }
 0x223   : > { %1327 = vrot.lane.b32.xlu1 %v1282_v56, %s6355_s14  ;;  %v1281_v29 = vsel %vm1245_vm11, %v1229_v13, %v1265_v26  ;;  %6132 = vmatprep.subr.bf16.mxu1 %v6131_v41 }
 0x224   : > { %1325 = vrot.lane.b32.xlu0 %v1281_v29, %s6355_s14  ;;  %v1452_v51 = vsel %vm257_vm1, %v1399_v12, 0.0 }
 0x225   : > { %v1475_v58 = vrot.slane %v1452_v51, 1  ;;  %v1541_v26 = vrot.slane %v1452_v51, 2 }
 0x226   : > { %6134 = vmatpush3.bf16.msra.mxu1 %v6131_v41 }
 0x227   : > { %6136 = vmatprep.subr.bf16.mxu1 %v6135_v34 }
 0x22a   : > { %v6276_v49 = vpop.eup %6275  ;;  %6138 = vmatpush3.bf16.msra.mxu1 %v6135_v34 }
 0x22b   : > { %v1177_v48 = vmul.f32 %v6276_v49, %v7019_v24  ;;  %v1178_v28 = vmul.f32 %v6276_v49, %v7021_v61  ;;  %v7094_v24 = vsel %vm1365_vm12, %v1349_v6, %v6425_v14 }
 0x22c   : > { %v1398_v14 = vrot.slane %v7094_v24, 7 }
 0x22d   : > { %v1204_v35 = vmul.f32 %v6887_v4, %v1177_v48  ;;  %v1205_v61 = vmul.f32 %v6885_v50, %v1178_v28  ;;  %v5546_v4 = vld [vmem:[%s9386_s1 + $0xd8] sm:$0xff] }
 0x22e   : > { %v6139_v44 = vpack.c.bf16 %v5547_v15, %v5546_v4  ;;  %v7116_v5 = vsel %vm257_vm1, 0.0, %v1398_v14  ;;  %v7119_v57 = vsel %vm257_vm1, %v1398_v14, %v1399_v12 }
 0x22f   : > { %v1232_v7 = vadd.f32 %v6889_v27, %v1205_v61  ;;  %v1231_v9 = vadd.f32 %v6891_v30, %v1204_v35  ;;  %v1472_v53 = vrot.slane %v7116_v5, 1  ;;  %v1473_v46 = vrot.slane %v7119_v57, 1 }
 0x230   : > { %6140 = vmatprep.subr.bf16.mxu1 %v6139_v44  ;;  %v1538_v13 = vrot.slane %v7116_v5, 2  ;;  %v1539_v52 = vrot.slane %v7119_v57, 2 }
 0x231   : > { %vm1248_vm13 = vcmp.ge.f32.partialorder %v1232_v7, 0.0  ;;  %v1268_v50 = vmul.f32 %v6897_v37, %v1232_v7  ;;  %vm1247_vm14 = vcmp.ge.f32.partialorder %v1231_v9, 0.0  ;;  %v1267_v27 = vmul.f32 %v6897_v37, %v1231_v9  ;;  %6142 = vmatpush3.bf16.msra.mxu1 %v6139_v44 }
 0x232   : > { %5899 = vmatprep.subr.mxu1 %v5548_v54  ;;  %v1308_v37 = vpop.permute.xlu1 %1307  ;;  %v1476_v45 = vsel %vm336_vm2, %v1473_v46, %v1475_v58  ;;  %v1474_v11 = vsel %vm336_vm2, %v1472_v53, %v1473_v46  ;;  %v1542_v29 = vsel %vm419_vm3, %v1539_v52, %v1541_v26  ;;  %v1540_v18 = vsel %vm419_vm3, %v1538_v13, %v1539_v52 }
 0x233   : > { %v1284_v30 = vsel %vm1248_vm13, %v1232_v7, %v1268_v50  ;;  %v1283_v40 = vsel %vm1247_vm14, %v1231_v9, %v1267_v27  ;;  %v1306_v55 = vpop.permute.xlu0 %1305  ;;  %v1352_v0 = vsel %vm224_vm0, %v6474_v39, %v1308_v37 }
 0x234   : > { %1331 = vrot.lane.b32.xlu1 %v1284_v30, %s6355_s14  ;;  %1329 = vrot.lane.b32.xlu0 %v1283_v40, %s6355_s14  ;;  %v1351_v47 = vsel %vm224_vm0, %v6471_v38, %v1306_v55  ;;  %v7139_v8 = vsel %vm1365_vm12, %v1352_v0, %v6474_v39 }
 0x235   : > { %5900 = vmatpush3.msra.mxu1 %v5548_v54  ;;  %v7143_v56 = vsel %vm1365_vm12, %v1351_v47, %v6471_v38  ;;  %v1402_v20 = vrot.slane %v7139_v8, 7 }
 0x236   : > { %v1401_v3 = vrot.slane %v7143_v56, 7 }
 0x237   : > { %v1453_v49 = vsel %vm257_vm1, %v1402_v20, 0.0 }
 0x238   : > { %1606 = vrot.lane.b32.xlu0 %v7116_v5, %s6352_s13  ;;  %1608 = vrot.lane.b32.xlu1 %v7119_v57, %s6352_s13  ;;  %v7154_v39 = vsel %vm257_vm1, 0.0, %v1401_v3  ;;  %v7157_v38 = vsel %vm257_vm1, %v1401_v3, %v1402_v20  ;;  %v1480_v28 = vrot.slane %v1453_v49, 1  ;;  %v1546_v7 = vrot.slane %v1453_v49, 2 }
 0x239   : > { %v1477_v10 = vrot.slane %v7154_v39, 1  ;;  %v1478_v41 = vrot.slane %v7157_v38, 1  ;;  %v1543_v34 = vrot.slane %v7154_v39, 2  ;;  %v1544_v61 = vrot.slane %v7157_v38, 2 }
 0x23b   : > { %v1479_v48 = vsel %vm336_vm2, %v1477_v10, %v1478_v41  ;;  %v1481_v35 = vsel %vm336_vm2, %v1478_v41, %v1480_v28  ;;  %v1545_v15 = vsel %vm419_vm3, %v1543_v34, %v1544_v61  ;;  %v1547_v12 = vsel %vm419_vm3, %v1544_v61, %v1546_v7 }
 0x23c   : > { %1668 = vrot.lane.b32.xlu1 %v1476_v45, %s6353_s20  ;;  %1666 = vrot.lane.b32.xlu0 %v1474_v11, %s6353_s20 }
 0x240   : > { %1726 = vrot.lane.b32.xlu1 %v1542_v29, %s6354_s5  ;;  %1724 = vrot.lane.b32.xlu0 %v1540_v18, %s6354_s5 }
 0x244   : > { %1502 = vrot.lane.b32.xlu1 %v1474_v11, %s6350_s25  ;;  %1504 = vrot.lane.b32.xlu0 %v1476_v45, %s6350_s25 }
 0x246   : > { %v1312_v25 = vpop.permute.xlu1 %1311 }
 0x247   : > { %v1310_v6 = vpop.permute.xlu0 %1309  ;;  %v1354_v60 = vsel %vm224_vm0, %v6520_v63, %v1312_v25 }
 0x248   : > { %1568 = vrot.lane.b32.xlu1 %v1540_v18, %s6351_s8  ;;  %1610 = vrot.lane.b32.xlu0 %v7154_v39, %s6352_s13  ;;  %v1353_v33 = vsel %vm224_vm0, %v6517_v62, %v1310_v6  ;;  %v7180_v9 = vsel %vm1365_vm12, %v1354_v60, %v6520_v63 }
 0x249   : > { %v7184_v4 = vsel %vm1365_vm12, %v1353_v33, %v6517_v62  ;;  %v1405_v14 = vrot.slane %v7180_v9, 7 }
 0x24a   : > { %v1404_v44 = vrot.slane %v7184_v4, 7 }
 0x24b   : > { %v1454_v30 = vsel %vm257_vm1, %v1405_v14, 0.0 }
 0x24c   : > { %1570 = vrot.lane.b32.xlu1 %v1542_v29, %s6351_s8  ;;  %1670 = vrot.lane.b32.xlu0 %v1479_v48, %s6353_s20  ;;  %v7195_v63 = vsel %vm257_vm1, 0.0, %v1404_v44  ;;  %v7198_v62 = vsel %vm257_vm1, %v1404_v44, %v1405_v14  ;;  %v1485_v37 = vrot.slane %v1454_v30, 1  ;;  %v1551_v47 = vrot.slane %v1454_v30, 2 }
 0x24d   : > { %v1482_v50 = vrot.slane %v7195_v63, 1  ;;  %v1483_v27 = vrot.slane %v7198_v62, 1  ;;  %v1548_v46 = vrot.slane %v7195_v63, 2  ;;  %v1549_v0 = vrot.slane %v7198_v62, 2 }
 0x24f   : > { %v1484_v51 = vsel %vm336_vm2, %v1482_v50, %v1483_v27  ;;  %v1486_v58 = vsel %vm336_vm2, %v1483_v27, %v1485_v37  ;;  %v1550_v45 = vsel %vm419_vm3, %v1548_v46, %v1549_v0  ;;  %v1552_v11 = vsel %vm419_vm3, %v1549_v0, %v1551_v47 }
 0x250   : > { %1612 = vrot.lane.b32.xlu1 %v7157_v38, %s6352_s13  ;;  %1672 = vrot.lane.b32.xlu0 %v1481_v35, %s6353_s20 }
 0x254   : > { %1728 = vrot.lane.b32.xlu1 %v1545_v15, %s6354_s5  ;;  %1730 = vrot.lane.b32.xlu0 %v1547_v12, %s6354_s5 }
 0x258   : > { %1506 = vrot.lane.b32.xlu1 %v1479_v48, %s6350_s25  ;;  %1508 = vrot.lane.b32.xlu0 %v1481_v35, %s6350_s25 }
 0x25a   : > { %v1316_v40 = vpop.permute.xlu1 %1315 }
 0x25b   : > { %v1314_v54 = vpop.permute.xlu0 %1313  ;;  %v1356_v55 = vsel %vm224_vm0, %v6557_v22, %v1316_v40 }
 0x25c   : > { %1572 = vrot.lane.b32.xlu1 %v1545_v15, %s6351_s8  ;;  %1614 = vrot.lane.b32.xlu0 %v7195_v63, %s6352_s13  ;;  %v1355_v53 = vsel %vm224_vm0, %v6554_v19, %v1314_v54  ;;  %v7221_v13 = vsel %vm1365_vm12, %v1356_v55, %v6557_v22 }
 0x25d   : > { %v7225_v52 = vsel %vm1365_vm12, %v1355_v53, %v6554_v19  ;;  %v1408_v26 = vrot.slane %v7221_v13, 7 }
 0x25e   : > { %v1407_v29 = vrot.slane %v7225_v52, 7 }
 0x25f   : > { %v1455_v3 = vsel %vm257_vm1, %v1408_v26, 0.0 }
 0x260   : > { %1574 = vrot.lane.b32.xlu1 %v1547_v12, %s6351_s8  ;;  %1674 = vrot.lane.b32.xlu0 %v1484_v51, %s6353_s20  ;;  %v7236_v22 = vsel %vm257_vm1, 0.0, %v1407_v29  ;;  %v7239_v19 = vsel %vm257_vm1, %v1407_v29, %v1408_v26  ;;  %v1490_v25 = vrot.slane %v1455_v3, 1  ;;  %v1556_v34 = vrot.slane %v1455_v3, 2 }
 0x261   : > { %v1487_v18 = vrot.slane %v7236_v22, 1  ;;  %v1488_v20 = vrot.slane %v7239_v19, 1  ;;  %v1553_v28 = vrot.slane %v7236_v22, 2  ;;  %v1554_v33 = vrot.slane %v7239_v19, 2 }
 0x263   : > { %v1489_v49 = vsel %vm336_vm2, %v1487_v18, %v1488_v20  ;;  %v1491_v60 = vsel %vm336_vm2, %v1488_v20, %v1490_v25  ;;  %v1555_v7 = vsel %vm419_vm3, %v1553_v28, %v1554_v33  ;;  %v1557_v15 = vsel %vm419_vm3, %v1554_v33, %v1556_v34 }
 0x264   : > { %1616 = vrot.lane.b32.xlu1 %v7198_v62, %s6352_s13  ;;  %1676 = vrot.lane.b32.xlu0 %v1486_v58, %s6353_s20 }
 0x268   : > { %1732 = vrot.lane.b32.xlu1 %v1550_v45, %s6354_s5  ;;  %1734 = vrot.lane.b32.xlu0 %v1552_v11, %s6354_s5 }
 0x26c   : > { %1510 = vrot.lane.b32.xlu1 %v1484_v51, %s6350_s25  ;;  %1512 = vrot.lane.b32.xlu0 %v1486_v58, %s6350_s25 }
 0x26e   : > { %v1320_v10 = vpop.permute.xlu1 %1319 }
 0x26f   : > { %v1318_v41 = vpop.permute.xlu0 %1317  ;;  %v1358_v6 = vsel %vm224_vm0, %v6594_v43, %v1320_v10 }
 0x270   : > { %1576 = vrot.lane.b32.xlu1 %v1550_v45, %s6351_s8  ;;  %1618 = vrot.lane.b32.xlu0 %v7236_v22, %s6352_s13  ;;  %v1357_v48 = vsel %vm224_vm0, %v6591_v42, %v1318_v41  ;;  %v7262_v35 = vsel %vm1365_vm12, %v1358_v6, %v6594_v43 }
 0x271   : > { %v7266_v61 = vsel %vm1365_vm12, %v1357_v48, %v6591_v42  ;;  %v1411_v12 = vrot.slane %v7262_v35, 7 }
 0x272   : > { %v1410_v14 = vrot.slane %v7266_v61, 7 }
 0x273   : > { %v1456_v27 = vsel %vm257_vm1, %v1411_v12, 0.0 }
 0x274   : > { %1578 = vrot.lane.b32.xlu1 %v1552_v11, %s6351_s8  ;;  %1678 = vrot.lane.b32.xlu0 %v1489_v49, %s6353_s20  ;;  %v7277_v43 = vsel %vm257_vm1, 0.0, %v1410_v14  ;;  %v7280_v42 = vsel %vm257_vm1, %v1410_v14, %v1411_v12  ;;  %v1495_v51 = vrot.slane %v1456_v27, 1  ;;  %v1561_v0 = vrot.slane %v1456_v27, 2 }
 0x275   : > { %v1492_v44 = vrot.slane %v7277_v43, 1  ;;  %v1493_v50 = vrot.slane %v7280_v42, 1  ;;  %v1558_v53 = vrot.slane %v7277_v43, 2  ;;  %v1559_v58 = vrot.slane %v7280_v42, 2 }
 0x277   : > { %v1494_v54 = vsel %vm336_vm2, %v1492_v44, %v1493_v50  ;;  %v1496_v46 = vsel %vm336_vm2, %v1493_v50, %v1495_v51  ;;  %v1560_v11 = vsel %vm419_vm3, %v1558_v53, %v1559_v58  ;;  %v1562_v26 = vsel %vm419_vm3, %v1559_v58, %v1561_v0 }
 0x278   : > { %1620 = vrot.lane.b32.xlu1 %v7239_v19, %s6352_s13  ;;  %1680 = vrot.lane.b32.xlu0 %v1491_v60, %s6353_s20 }
 0x27c   : > { %1736 = vrot.lane.b32.xlu1 %v1555_v7, %s6354_s5  ;;  %1738 = vrot.lane.b32.xlu0 %v1557_v15, %s6354_s5 }
 0x280   : > { %1514 = vrot.lane.b32.xlu1 %v1489_v49, %s6350_s25  ;;  %1516 = vrot.lane.b32.xlu0 %v1491_v60, %s6350_s25 }
 0x281   : > { %v1324_v30 = vpop.permute.xlu1 %1323  ;;  %v1322_v40 = vpop.permute.xlu0 %1321 }
 0x282   : > { %v1360_v37 = vsel %vm224_vm0, %v6631_v2, %v1324_v30  ;;  %v1359_v55 = vsel %vm224_vm0, %v6628_v1, %v1322_v40 }
 0x283   : > { %v7303_v47 = vsel %vm1365_vm12, %v1360_v37, %v6631_v2  ;;  %v7307_v45 = vsel %vm1365_vm12, %v1359_v55, %v6628_v1 }
 0x284   : > { %1580 = vrot.lane.b32.xlu1 %v1555_v7, %s6351_s8  ;;  %1622 = vrot.lane.b32.xlu0 %v7277_v43, %s6352_s13  ;;  %v1414_v29 = vrot.slane %v7303_v47, 7  ;;  %v1413_v18 = vrot.slane %v7307_v45, 7 }
 0x286   : > { %v7318_v2 = vsel %vm257_vm1, 0.0, %v1413_v18  ;;  %v7321_v1 = vsel %vm257_vm1, %v1413_v18, %v1414_v29  ;;  %v1457_v10 = vsel %vm257_vm1, %v1414_v29, 0.0 }
 0x287   : > { %v1497_v20 = vrot.slane %v7318_v2, 1  ;;  %v1498_v3 = vrot.slane %v7321_v1, 1  ;;  %v1500_v6 = vrot.slane %v1457_v10, 1  ;;  %v1563_v60 = vrot.slane %v7318_v2, 2 }
 0x288   : > { %1582 = vrot.lane.b32.xlu1 %v1557_v15, %s6351_s8  ;;  %1682 = vrot.lane.b32.xlu0 %v1494_v54, %s6353_s20  ;;  %v1564_v34 = vrot.slane %v7321_v1, 2  ;;  %v1566_v7 = vrot.slane %v1457_v10, 2 }
 0x289   : > { %v1499_v25 = vsel %vm336_vm2, %v1497_v20, %v1498_v3  ;;  %v1501_v33 = vsel %vm336_vm2, %v1498_v3, %v1500_v6 }
 0x28a   : > { %v1565_v14 = vsel %vm419_vm3, %v1563_v60, %v1564_v34  ;;  %v1567_v44 = vsel %vm419_vm3, %v1564_v34, %v1566_v7 }
 0x28c   : > { %1624 = vrot.lane.b32.xlu1 %v7280_v42, %s6352_s13  ;;  %1684 = vrot.lane.b32.xlu0 %v1496_v46, %s6353_s20 }
 0x290   : > { %1740 = vrot.lane.b32.xlu1 %v1560_v11, %s6354_s5  ;;  %1742 = vrot.lane.b32.xlu0 %v1562_v26, %s6354_s5 }
 0x294   : > { %1518 = vrot.lane.b32.xlu1 %v1494_v54, %s6350_s25  ;;  %1520 = vrot.lane.b32.xlu0 %v1496_v46, %s6350_s25 }
 0x295   : > { %v1328_v41 = vpop.permute.xlu1 %1327 }
 0x296   : > { %v1326_v49 = vpop.permute.xlu0 %1325  ;;  %v1362_v48 = vsel %vm224_vm0, %v6668_v32, %v1328_v41 }
 0x297   : > { %v1361_v28 = vsel %vm224_vm0, %v6665_v31, %v1326_v49  ;;  %v7344_v15 = vsel %vm1365_vm12, %v1362_v48, %v6668_v32 }
 0x298   : > { %1584 = vrot.lane.b32.xlu1 %v1560_v11, %s6351_s8  ;;  %1626 = vrot.lane.b32.xlu0 %v7318_v2, %s6352_s13  ;;  %v7348_v12 = vsel %vm1365_vm12, %v1361_v28, %v6665_v31  ;;  %v1417_v50 = vrot.slane %v7344_v15, 7 }
 0x299   : > { %v1416_v27 = vrot.slane %v7348_v12, 7 }
 0x29a   : > { %v1458_v53 = vsel %vm257_vm1, %v1417_v50, 0.0 }
 0x29b   : > { %v1450_v31 = vsel %vm257_vm1, 0.0, %v1416_v27  ;;  %v1418_v32 = vsel %vm257_vm1, %v1416_v27, %v1417_v50  ;;  %v1659_v29 = vrot.slane %v1458_v53, 1  ;;  %v1717_v28 = vrot.slane %v1458_v53, 2 }
 0x29c   : > { %1586 = vrot.lane.b32.xlu1 %v1562_v26, %s6351_s8  ;;  %1686 = vrot.lane.b32.xlu0 %v1499_v25, %s6353_s20  ;;  %v1656_v37 = vrot.slane %v1450_v31, 1  ;;  %v1657_v55 = vrot.slane %v1418_v32, 1  ;;  %v1714_v41 = vrot.slane %v1450_v31, 2 }
 0x29e   : > { %v1658_v26 = vsel %vm336_vm2, %v1656_v37, %v1657_v55  ;;  %v1660_v60 = vsel %vm336_vm2, %v1657_v55, %v1659_v29 }
 0x2a0   : > { %1628 = vrot.lane.b32.xlu1 %v7321_v1, %s6352_s13  ;;  %1688 = vrot.lane.b32.xlu0 %v1501_v33, %s6353_s20 }
 0x2a4   : > { %1744 = vrot.lane.b32.xlu1 %v1565_v14, %s6354_s5  ;;  %1746 = vrot.lane.b32.xlu0 %v1567_v44, %s6354_s5 }
 0x2a6   : > { %v1332_v30 = vpop.permute.xlu1 %1331  ;;  %v1330_v40 = vpop.permute.xlu0 %1329 }
 0x2a7   : > { %v1364_v46 = vsel %vm224_vm0, %v6712_v17, %v1332_v30  ;;  %v1363_v58 = vsel %vm224_vm0, %v6709_v16, %v1330_v40 }
 0x2a8   : > { %1522 = vrot.lane.b32.xlu1 %v1499_v25, %s6350_s25  ;;  %1524 = vrot.lane.b32.xlu0 %v1501_v33, %s6350_s25  ;;  %v7372_v18 = vsel %vm1365_vm12, %v1364_v46, %v6712_v17  ;;  %v7376_v20 = vsel %vm1365_vm12, %v1363_v58, %v6709_v16  ;;  %v1715_v33 = vrot.slane %v1418_v32, 2 }
 0x2a9   : > { %v1420_v34 = vrot.slane %v7372_v18, 7  ;;  %v1419_v7 = vrot.slane %v7376_v20, 7 }
 0x2aa   : > { %v1609_v54 = vpop.permute.xlu1 %1608  ;;  %v1607_v51 = vpop.permute.xlu0 %1606  ;;  %v1716_v50 = vsel %vm419_vm3, %v1714_v41, %v1715_v33  ;;  %v1718_v27 = vsel %vm419_vm3, %v1715_v33, %v1717_v28 }
 0x2ab   : > { %v1797_v3 = vsel %vm690_vm6, %v6695_v59, %v1609_v54  ;;  %v1796_v10 = vsel %vm690_vm6, %v6695_v59, %v1607_v51  ;;  %v1459_v30 = vsel %vm257_vm1, %v1420_v34, 0.0  ;;  %v1451_v40 = vsel %vm257_vm1, 0.0, %v1419_v7 }
 0x2ac   : > { %1588 = vrot.lane.b32.xlu1 %v1565_v14, %s6351_s8  ;;  %1630 = vrot.lane.b32.xlu0 %v1450_v31, %s6352_s13  ;;  %v1421_v31 = vsel %vm257_vm1, %v1419_v7, %v1420_v34  ;;  %v1661_v51 = vrot.slane %v1451_v40, 1  ;;  %v1664_v55 = vrot.slane %v1459_v30, 1  ;;  %v1719_v53 = vrot.slane %v1451_v40, 2 }
 0x2ad   : > { %v1662_v37 = vrot.slane %v1421_v31, 1  ;;  %v1722_v29 = vrot.slane %v1459_v30, 2 }
 0x2ae   : > { %v1669_v0 = vpop.permute.xlu1 %1668  ;;  %v1667_v11 = vpop.permute.xlu0 %1666 }
 0x2af   : > { %v1813_v49 = vsel %vm707_vm7, %v1797_v3, %v1669_v0  ;;  %v1812_v25 = vsel %vm707_vm7, %v1796_v10, %v1667_v11  ;;  %v1720_v0 = vrot.slane %v1421_v31, 2  ;;  %v1665_v11 = vsel %vm336_vm2, %v1662_v37, %v1664_v55  ;;  %v220_v3 = vld [vmem:[%s9388_s3 + $0x2] sm:$0x3] }
 0x2b0   : > { %1590 = vrot.lane.b32.xlu1 %v1567_v44, %s6351_s8  ;;  %1690 = vrot.lane.b32.xlu0 %v1658_v26, %s6353_s20  ;;  %v1663_v26 = vsel %vm336_vm2, %v1661_v51, %v1662_v37 }
 0x2b2   : > { %v1727_v6 = vpop.permute.xlu1 %1726  ;;  %v1725_v48 = vpop.permute.xlu0 %1724 }
 0x2b3   : > { %v1829_v17 = vsel %vm724_vm8, %v1813_v49, %v1727_v6  ;;  %v1828_v16 = vsel %vm724_vm8, %v1812_v25, %v1725_v48  ;;  %v1723_v25 = vsel %vm419_vm3, %v1720_v0, %v1722_v29  ;;  %v1721_v6 = vsel %vm419_vm3, %v1719_v53, %v1720_v0 }
 0x2b4   : > { %1632 = vrot.lane.b32.xlu1 %v1418_v32, %s6352_s13  ;;  %1692 = vrot.lane.b32.xlu0 %v1660_v60, %s6353_s20  ;;  %v2284_v48 = vrot.slane %v220_v3, %v6746_v23 }
 0x2b5   : > { %5901 = vmatprep.mubr.msk.f32.mxu1 %vm760_vm9, %v1828_v16 }
 0x2b6   : > { %5902 = vmatmul.mubr.msk.f32.vlgmr.msra.gmra.mrb[0].mxu1 %vm760_vm9, %v1829_v17  ;;  %v1503_v14 = vpop.permute.xlu1 %1502  ;;  %v1505_v44 = vpop.permute.xlu0 %1504 }
 0x2b7   : > { %v1773_v37 = vsel %vm658_vm4, %v7119_v57, %v1505_v44  ;;  %v1772_v0 = vsel %vm658_vm4, %v7116_v5, %v1503_v14 }
 0x2b8   : > { %1748 = vrot.lane.b32.xlu1 %v1716_v50, %s6354_s5  ;;  %1750 = vrot.lane.b32.xlu0 %v1718_v27, %s6354_s5  ;;  %v2311_v50 = vrot.slane %v220_v3, %v6757_v36 }
 0x2ba   : > { %v1569_v32 = vpop.permute.xlu1 %1568  ;;  %v1611_v54 = vpop.permute.xlu0 %1610 }
 0x2bb   : > { %v1798_v28 = vsel %vm690_vm6, %v6695_v59, %v1611_v54 }
 0x2bc   : > { %1634 = vrot.lane.b32.xlu0 %v1451_v40, %s6352_s13  ;;  %1636 = vrot.lane.b32.xlu1 %v1421_v31, %s6352_s13 }
 0x2be   : > { %v1571_v46 = vpop.permute.xlu1 %1570  ;;  %v1671_v58 = vpop.permute.xlu0 %1670 }
 0x2bf   : > { %v1814_v17 = vsel %vm707_vm7, %v1798_v28, %v1671_v58  ;;  %v1785_v55 = vsel %vm674_vm5, %v1773_v37, %v1571_v46 }
 0x2c0   : > { %1696 = vrot.lane.b32.xlu1 %v1665_v11, %s6353_s20  ;;  %1694 = vrot.lane.b32.xlu0 %v1663_v26, %s6353_s20  ;;  %v1784_v26 = vsel %vm674_vm5, %v1772_v0, %v1569_v32 }
 0x2c2   : > { %v1613_v10 = vpop.permute.xlu1 %1612  ;;  %v1673_v41 = vpop.permute.xlu0 %1672 }
 0x2c3   : > { %v1799_v49 = vsel %vm690_vm6, %v6695_v59, %v1613_v10 }
 0x2c4   : > { %1754 = vrot.lane.b32.xlu1 %v1723_v25, %s6354_s5  ;;  %1752 = vrot.lane.b32.xlu0 %v1721_v6, %s6354_s5  ;;  %v1815_v60 = vsel %vm707_vm7, %v1799_v49, %v1673_v41 }
 0x2c6   : > { %v1729_v16 = vpop.permute.xlu1 %1728  ;;  %v1731_v33 = vpop.permute.xlu0 %1730 }
 0x2c7   : > { %v1830_v34 = vsel %vm724_vm8, %v1814_v17, %v1729_v16  ;;  %v1831_v7 = vsel %vm724_vm8, %v1815_v60, %v1731_v33 }
 0x2c8   : > { %5904 = vmatprep.mubr.msk.f32.mxu1 %vm760_vm9, %v1830_v34  ;;  %2290 = vbcast.lane.b32.xlu1 %v2284_v48, 264 }
 0x2c9   : > { %5905 = vmatmul.mubr.msk.f32.gmra.mrb[2].mxu1 %vm760_vm9, %v1831_v7  ;;  %2286 = vbcast.lane.b32.xlu0 %v2284_v48, 256 }
 0x2ca   : > { %v1507_v27 = vpop.permute.xlu1 %1506  ;;  %v1509_v30 = vpop.permute.xlu0 %1508 }
 0x2cb   : > { %v1775_v48 = vsel %vm658_vm4, %v7157_v38, %v1509_v30  ;;  %v1774_v16 = vsel %vm658_vm4, %v7154_v39, %v1507_v27 }
 0x2cc   : > { %2317 = vbcast.lane.b32.xlu1 %v2311_v50, 264 }
 0x2cd   : > { %2313 = vbcast.lane.b32.xlu0 %v2311_v50, 256 }
 0x2ce   : > { %v1573_v40 = vpop.permute.xlu1 %1572  ;;  %v1615_v31 = vpop.permute.xlu0 %1614 }
 0x2cf   : > { %v1800_v29 = vsel %vm690_vm6, %v1784_v26, %v1615_v31  ;;  %v1786_v34 = vsel %vm674_vm5, %v1774_v16, %v1573_v40 }
 0x2d2   : > { %v1575_v54 = vpop.permute.xlu1 %1574  ;;  %v1675_v51 = vpop.permute.xlu0 %1674 }
 0x2d3   : > { %v1816_v3 = vsel %vm707_vm7, %v1800_v29, %v1675_v51  ;;  %v1787_v28 = vsel %vm674_vm5, %v1775_v48, %v1575_v54 }
 0x2d6   : > { %v1617_v53 = vpop.permute.xlu1 %1616  ;;  %v1677_v58 = vpop.permute.xlu0 %1676 }
 0x2d7   : > { %v1801_v11 = vsel %vm690_vm6, %v1785_v55, %v1617_v53 }
 0x2d8   : > { %v1817_v10 = vsel %vm707_vm7, %v1801_v11, %v1677_v58 }
 0x2da   : > { %v1733_v41 = vpop.permute.xlu1 %1732  ;;  %v1735_v49 = vpop.permute.xlu0 %1734 }
 0x2db   : > { %v1832_v57 = vsel %vm724_vm8, %v1816_v3, %v1733_v41  ;;  %v1833_v44 = vsel %vm724_vm8, %v1817_v10, %v1735_v49 }
 0x2dc   : > { %5907 = vmatprep.mubr.msk.f32.mxu1 %vm760_vm9, %v1832_v57 }
 0x2dd   : > { %5908 = vmatmul.mubr.msk.f32.gmra.mrb[4].mxu1 %vm760_vm9, %v1833_v44 }
 0x2de   : > { %v1511_v5 = vpop.permute.xlu1 %1510  ;;  %v1513_v14 = vpop.permute.xlu0 %1512 }
 0x2df   : > { %v1777_v58 = vsel %vm658_vm4, %v7198_v62, %v1513_v14  ;;  %v1776_v29 = vsel %vm658_vm4, %v7195_v63, %v1511_v5 }
 0x2e2   : > { %v1577_v46 = vpop.permute.xlu1 %1576  ;;  %v1619_v32 = vpop.permute.xlu0 %1618 }
 0x2e3   : > { %v1802_v7 = vsel %vm690_vm6, %v1786_v34, %v1619_v32  ;;  %v1788_v10 = vsel %vm674_vm5, %v1776_v29, %v1577_v46 }
 0x2e6   : > { %v1579_v25 = vpop.permute.xlu1 %1578  ;;  %v1679_v6 = vpop.permute.xlu0 %1678 }
 0x2e7   : > { %v1818_v50 = vsel %vm707_vm7, %v1802_v7, %v1679_v6  ;;  %v1789_v0 = vsel %vm674_vm5, %v1777_v58, %v1579_v25 }
 0x2ea   : > { %v1621_v17 = vpop.permute.xlu1 %1620  ;;  %v1681_v60 = vpop.permute.xlu0 %1680 }
 0x2eb   : > { %v1803_v33 = vsel %vm690_vm6, %v1787_v28, %v1621_v17 }
 0x2ec   : > { %v1819_v31 = vsel %vm707_vm7, %v1803_v33, %v1681_v60 }
 0x2ee   : > { %v1737_v51 = vpop.permute.xlu1 %1736  ;;  %v1739_v37 = vpop.permute.xlu0 %1738 }
 0x2ef   : > { %v1834_v38 = vsel %vm724_vm8, %v1818_v50, %v1737_v51  ;;  %v1835_v30 = vsel %vm724_vm8, %v1819_v31, %v1739_v37 }
 0x2f0   : > { %5910 = vmatprep.mubr.msk.f32.mxu1 %vm760_vm9, %v1834_v38 }
 0x2f1   : > { %5911 = vmatmul.mubr.msk.f32.gmra.mrb[6].mxu1 %vm760_vm9, %v1835_v30 }
 0x2f2   : > { %v1515_v39 = vpop.permute.xlu1 %1514  ;;  %v1517_v27 = vpop.permute.xlu0 %1516 }
 0x2f3   : > { %v1779_v28 = vsel %vm658_vm4, %v7239_v19, %v1517_v27  ;;  %v1778_v33 = vsel %vm658_vm4, %v7236_v22, %v1515_v39 }
 0x2f6   : > { %v1581_v54 = vpop.permute.xlu1 %1580  ;;  %v1623_v40 = vpop.permute.xlu0 %1622 }
 0x2f7   : > { %v1804_v41 = vsel %vm690_vm6, %v1788_v10, %v1623_v40  ;;  %v1790_v7 = vsel %vm674_vm5, %v1778_v33, %v1581_v54 }
 0x2fa   : > { %v1583_v55 = vpop.permute.xlu1 %1582  ;;  %v1683_v53 = vpop.permute.xlu0 %1682 }
 0x2fb   : > { %v1820_v49 = vsel %vm707_vm7, %v1804_v41, %v1683_v53  ;;  %v1791_v17 = vsel %vm674_vm5, %v1779_v28, %v1583_v55 }
 0x2fe   : > { %v1625_v11 = vpop.permute.xlu1 %1624  ;;  %v1685_v26 = vpop.permute.xlu0 %1684 }
 0x2ff   : > { %v1805_v3 = vsel %vm690_vm6, %v1789_v0, %v1625_v11 }
 0x300   : > { %v1821_v57 = vsel %vm707_vm7, %v1805_v3, %v1685_v26 }
 0x302   : > { %v1741_v44 = vpop.permute.xlu1 %1740  ;;  %v1743_v32 = vpop.permute.xlu0 %1742 }
 0x303   : > { %v1836_v62 = vsel %vm724_vm8, %v1820_v49, %v1741_v44  ;;  %v1837_v14 = vsel %vm724_vm8, %v1821_v57, %v1743_v32 }
 0x304   : > { %5913 = vmatprep.mubr.msk.f32.mxu1 %vm760_vm9, %v1836_v62 }
 0x305   : > { %5914 = vmatmul.mubr.msk.f32.gmra.mrb[8].mxu1 %vm760_vm9, %v1837_v14 }
 0x306   : > { %v1519_v63 = vpop.permute.xlu1 %1518  ;;  %v1521_v5 = vpop.permute.xlu0 %1520 }
 0x307   : > { %v1781_v53 = vsel %vm658_vm4, %v7280_v42, %v1521_v5  ;;  %v1780_v26 = vsel %vm658_vm4, %v7277_v43, %v1519_v63 }
 0x30a   : > { %v1585_v25 = vpop.permute.xlu1 %1584  ;;  %v1627_v46 = vpop.permute.xlu0 %1626 }
 0x30b   : > { %v1806_v50 = vsel %vm690_vm6, %v1790_v7, %v1627_v46  ;;  %v1792_v3 = vsel %vm674_vm5, %v1780_v26, %v1585_v25 }
 0x30e   : > { %v1587_v6 = vpop.permute.xlu1 %1586  ;;  %v1687_v48 = vpop.permute.xlu0 %1686 }
 0x30f   : > { %v1822_v31 = vsel %vm707_vm7, %v1806_v50, %v1687_v48  ;;  %v1793_v58 = vsel %vm674_vm5, %v1781_v53, %v1587_v6 }
 0x312   : > { %v1629_v60 = vpop.permute.xlu1 %1628  ;;  %v1689_v16 = vpop.permute.xlu0 %1688 }
 0x313   : > { %v1807_v34 = vsel %vm690_vm6, %v1791_v17, %v1629_v60 }
 0x314   : > { %v1823_v51 = vsel %vm707_vm7, %v1807_v34, %v1689_v16 }
 0x316   : > { %v1745_v37 = vpop.permute.xlu1 %1744  ;;  %v1747_v38 = vpop.permute.xlu0 %1746 }
 0x317   : > { %v1838_v19 = vsel %vm724_vm8, %v1822_v31, %v1745_v37  ;;  %v1839_v30 = vsel %vm724_vm8, %v1823_v51, %v1747_v38 }
 0x318   : > { %5916 = vmatprep.mubr.msk.f32.mxu1 %vm760_vm9, %v1838_v19 }
 0x319   : > { %5917 = vmatmul.mubr.msk.f32.gmra.mrb[10].mxu1 %vm760_vm9, %v1839_v30 }
 0x31a   : > { %v1523_v22 = vpop.permute.xlu1 %1522  ;;  %v1525_v39 = vpop.permute.xlu0 %1524 }
 0x31b   : > { %v1782_v5 = vsel %vm658_vm4, %v7318_v2, %v1523_v22  ;;  %v1783_v25 = vsel %vm658_vm4, %v7321_v1, %v1525_v39  ;;  %v7512_v1 = vld [vmem:[%s9387_s2 + $0x2] sm:$0x3] }
 0x31c   : > { %v7516_v7 = vrot.slane %v7512_v1, %v6746_v23 }
 0x31e   : > { %v1589_v27 = vpop.permute.xlu1 %1588  ;;  %v1631_v54 = vpop.permute.xlu0 %1630 }
 0x31f   : > { %v1808_v10 = vsel %vm690_vm6, %v1792_v3, %v1631_v54  ;;  %v1794_v46 = vsel %vm674_vm5, %v1782_v5, %v1589_v27 }
 0x322   : > { %v1591_v40 = vpop.permute.xlu1 %1590  ;;  %v1691_v55 = vpop.permute.xlu0 %1690 }
 0x323   : > { %v1824_v41 = vsel %vm707_vm7, %v1808_v10, %v1691_v55  ;;  %v1795_v6 = vsel %vm674_vm5, %v1783_v25, %v1591_v40 }
 0x326   : > { %v1633_v0 = vpop.permute.xlu1 %1632  ;;  %v1693_v11 = vpop.permute.xlu0 %1692 }
 0x327   : > { %v1809_v29 = vsel %vm690_vm6, %v1793_v58, %v1633_v0 }
 0x328   : > { %v1825_v49 = vsel %vm707_vm7, %v1809_v29, %v1693_v11 }
 0x32a   : > { %v1749_v57 = vpop.permute.xlu1 %1748  ;;  %v1751_v44 = vpop.permute.xlu0 %1750 }
 0x32b   : > { %v1840_v42 = vsel %vm724_vm8, %v1824_v41, %v1749_v57  ;;  %v1841_v32 = vsel %vm724_vm8, %v1825_v49, %v1751_v44 }
 0x32c   : > { %5919 = vmatprep.mubr.msk.f32.mxu1 %vm760_vm9, %v1840_v42 }
 0x32d   : > { %5920 = vmatmul.mubr.msk.f32.gmra.mrb[12].mxu1 %vm760_vm9, %v1841_v32 }
 0x32e   : > { %v1637_v43 = vpop.permute.xlu1 %1636  ;;  %v1635_v62 = vpop.permute.xlu0 %1634 }
 0x32f   : > { %v1811_v48 = vsel %vm690_vm6, %v1795_v6, %v1637_v43  ;;  %v1810_v28 = vsel %vm690_vm6, %v1794_v46, %v1635_v62 }
 0x332   : > { %v1697_v14 = vpop.permute.xlu1 %1696  ;;  %v1695_v63 = vpop.permute.xlu0 %1694 }
 0x333   : > { %v1827_v17 = vsel %vm707_vm7, %v1811_v48, %v1697_v14  ;;  %v1826_v60 = vsel %vm707_vm7, %v1810_v28, %v1695_v63 }
 0x336   : > { %v1755_v16 = vpop.permute.xlu1 %1754  ;;  %v1753_v33 = vpop.permute.xlu0 %1752 }
 0x337   : > { %v1843_v34 = vsel %vm724_vm8, %v1827_v17, %v1755_v16  ;;  %v1842_v2 = vsel %vm724_vm8, %v1826_v60, %v1753_v33 }
 0x338   : > { %5922 = vmatprep.mubr.msk.f32.mxu1 %vm760_vm9, %v1842_v2 }
 0x339   : > { %5923 = vmatmul.mubr.msk.f32.gmra.mrb[14].mxu1 %vm760_vm9, %v1843_v34 }
 0x389   : > { %v5903_v50 = vpop.f32.mrb[0].mxu1 }
 0x38a   : > { %v1984_v31 = vadd.f32 %v5903_v50, %v7516_v7  ;;  %v1978_v51 = vpop.f32.mrb[1].mxu1 }
 0x38b   : > { %v1979_v37 = vadd.f32 %v1978_v51, %v7516_v7 }
 0x38c   : > { %v2058_v38 = vsel %vm224_vm0, %v1984_v31, 0.0 }
 0x38d   : > { %v2057_v19 = vsel %vm224_vm0, %v1979_v37, 0.0 }
 0x38e   : > { %v2059_v30 = vadd.f32 %v2058_v38, %v2057_v19 }
 0x390   : > { %v2060_v22 = vrot.slane %v2059_v30, 4 }
 0x392   : > { %v2061_v39 = vadd.f32 %v2060_v22, %v2059_v30 }
 0x394   : > { %v2062_v27 = vrot.slane %v2061_v39, 2 }
 0x396   : > { %v2063_v54 = vadd.f32 %v2062_v27, %v2061_v39 }
 0x398   : > { %v2064_v40 = vrot.slane %v2063_v54, 1 }
 0x39a   : > { %v2065_v55 = vadd.f32 %v2064_v40, %v2063_v54 }
 0x39c   : > { %v2129_v53 = vmul.f32 0.0625, %v2065_v55  ;;  %v5906_v58 = vpop.f32.mrb[2].mxu1 }
 0x39d   : > { %v1994_v0 = vadd.f32 %v5906_v58, %v7516_v7  ;;  %v1988_v11 = vpop.f32.mrb[3].mxu1 }
 0x39e   : > { %v2137_v26 = vsub.f32 %v1979_v37, %v2129_v53  ;;  %v2138_v29 = vsub.f32 %v1984_v31, %v2129_v53  ;;  %v1989_v3 = vadd.f32 %v1988_v11, %v7516_v7 }
 0x39f   : > { %v2067_v10 = vsel %vm224_vm0, %v1994_v0, 0.0 }
 0x3a0   : > { %v2153_v41 = vmul.f32 %v2137_v26, %v2137_v26  ;;  %v2154_v49 = vmul.f32 %v2138_v29, %v2138_v29  ;;  %v2066_v57 = vsel %vm224_vm0, %v1989_v3, 0.0 }
 0x3a1   : > { %v2068_v44 = vadd.f32 %v2067_v10, %v2066_v57 }
 0x3a2   : > { %v2169_v42 = vsel %vm224_vm0, %v2153_v41, 0.0  ;;  %v2170_v32 = vsel %vm224_vm0, %v2154_v49, 0.0  ;;  %v7542_v41 = vpop.permute.xlu1 %2290  ;;  %v7544_v49 = vpop.permute.xlu0 %2286 }
 0x3a3   : > { %v2171_v43 = vadd.f32 %v2170_v32, %v2169_v42  ;;  %v2069_v62 = vrot.slane %v2068_v44, 4 }
 0x3a5   : > { %v2172_v14 = vrot.slane %v2171_v43, 4  ;;  %v2070_v63 = vadd.f32 %v2069_v62, %v2068_v44 }
 0x3a7   : > { %v2173_v5 = vadd.f32 %v2172_v14, %v2171_v43  ;;  %v2071_v25 = vrot.slane %v2070_v63, 2 }
 0x3a9   : > { %v2174_v46 = vrot.slane %v2173_v5, 2  ;;  %v2072_v6 = vadd.f32 %v2071_v25, %v2070_v63  ;;  %v7546_v25 = vpop.permute.xlu1 %2317 }
 0x3ab   : > { %v2175_v48 = vadd.f32 %v2174_v46, %v2173_v5  ;;  %v2073_v28 = vrot.slane %v2072_v6, 1  ;;  %v7548_v46 = vpop.permute.xlu0 %2313 }
 0x3ad   : > { %v2176_v17 = vrot.slane %v2175_v48, 1  ;;  %v2074_v60 = vadd.f32 %v2073_v28, %v2072_v6  ;;  %v7552_v6 = vrot.slane %v7512_v1, %v6757_v36 }
 0x3af   : > { %v2177_v16 = vadd.f32 %v2176_v17, %v2175_v48  ;;  %v2130_v33 = vmul.f32 0.0625, %v2074_v60 }
 0x3b0   : > { %v5909_v34 = vpop.f32.mrb[4].mxu1 }
 0x3b1   : > { %v2241_v2 = vmul.f32 0.0625, %v2177_v16  ;;  %v7528_v50 = vsub.f32 %v1989_v3, %v2130_v33  ;;  %v7530_v31 = vsub.f32 %v1994_v0, %v2130_v33  ;;  %v2004_v51 = vadd.f32 %v5909_v34, %v7516_v7  ;;  %v1998_v37 = vpop.f32.mrb[5].mxu1 }
 0x3b2   : > { %v1999_v38 = vadd.f32 %v1998_v37, %v7516_v7 }
 0x3b3   : > { %v2249_v19 = vadd.f32 1e-05, %v2241_v2  ;;  %v2155_v30 = vmul.f32 %v7528_v50, %v7528_v50  ;;  %v2156_v22 = vmul.f32 %v7530_v31, %v7530_v31  ;;  %v2076_v39 = vsel %vm224_vm0, %v2004_v51, 0.0 }
 0x3b4   : > { %v2075_v27 = vsel %vm224_vm0, %v1999_v38, 0.0 }
 0x3b5   : > { %6277 = vrsqrt.f32 %v2249_v19  ;;  %v2178_v54 = vsel %vm224_vm0, %v2155_v30, 0.0  ;;  %v2179_v40 = vsel %vm224_vm0, %v2156_v22, 0.0  ;;  %v2077_v55 = vadd.f32 %v2076_v39, %v2075_v27 }
 0x3b6   : > { %v2180_v53 = vadd.f32 %v2179_v40, %v2178_v54 }
 0x3b7   : > { %v2078_v58 = vrot.slane %v2077_v55, 4 }
 0x3b8   : > { %v2181_v0 = vrot.slane %v2180_v53, 4 }
 0x3b9   : > { %v2079_v11 = vadd.f32 %v2078_v58, %v2077_v55 }
 0x3ba   : > { %v2182_v3 = vadd.f32 %v2181_v0, %v2180_v53 }
 0x3bb   : > { %v2080_v10 = vrot.slane %v2079_v11, 2 }
 0x3bc   : > { %v2183_v57 = vrot.slane %v2182_v3, 2 }
 0x3bd   : > { %v2081_v44 = vadd.f32 %v2080_v10, %v2079_v11 }
 0x3be   : > { %v2184_v42 = vadd.f32 %v2183_v57, %v2182_v3 }
 0x3bf   : > { %v6278_v32 = vpop.eup %6277  ;;  %v2082_v43 = vrot.slane %v2081_v44, 1 }
 0x3c0   : > { %v2265_v62 = vmul.f32 %v6278_v32, %v2137_v26  ;;  %v2266_v14 = vmul.f32 %v6278_v32, %v2138_v29  ;;  %v2185_v63 = vrot.slane %v2184_v42, 1 }
 0x3c1   : > { %v2083_v5 = vadd.f32 %v2082_v43, %v2081_v44 }
 0x3c2   : > { %v2186_v48 = vadd.f32 %v2185_v63, %v2184_v42  ;;  %v2293_v28 = vmul.f32 %v7542_v41, %v2266_v14  ;;  %v2292_v17 = vmul.f32 %v7544_v49, %v2265_v62 }
 0x3c3   : > { %v2131_v60 = vmul.f32 0.0625, %v2083_v5 }
 0x3c4   : > { %v2242_v16 = vmul.f32 0.0625, %v2186_v48  ;;  %v5912_v33 = vpop.f32.mrb[6].mxu1  ;;  %v2320_v26 = vadd.f32 %v7546_v25, %v2293_v28  ;;  %v2319_v29 = vadd.f32 %v7548_v46, %v2292_v17 }
 0x3c5   : > { %v7558_v34 = vsub.f32 %v1999_v38, %v2131_v60  ;;  %v7560_v2 = vsub.f32 %v2004_v51, %v2131_v60  ;;  %v2014_v37 = vadd.f32 %v5912_v33, %v7516_v7  ;;  %v2008_v1 = vpop.f32.mrb[7].mxu1 }
 0x3c6   : > { %v2250_v19 = vadd.f32 1e-05, %v2242_v16  ;;  %v2009_v30 = vadd.f32 %v2008_v1, %v7516_v7  ;;  %vm2336_vm15 = vcmp.ge.f32.partialorder %v2320_v26, 0.0  ;;  %v2356_v22 = vmul.f32 %v7552_v6, %v2320_v26 }
 0x3c7   : > { %v2157_v39 = vmul.f32 %v7558_v34, %v7558_v34  ;;  %v2158_v27 = vmul.f32 %v7560_v2, %v7560_v2  ;;  %v2085_v38 = vsel %vm224_vm0, %v2014_v37, 0.0  ;;  %vm2335_vm10 = vcmp.ge.f32.partialorder %v2319_v29, 0.0 }
 0x3c8   : > { %6279 = vrsqrt.f32 %v2250_v19  ;;  %v2084_v51 = vsel %vm224_vm0, %v2009_v30, 0.0  ;;  %v2372_v54 = vsel %vm2336_vm15, %v2320_v26, %v2356_v22  ;;  %v2355_v40 = vmul.f32 %v7552_v6, %v2319_v29 }
 0x3c9   : > { %v2187_v55 = vsel %vm224_vm0, %v2157_v39, 0.0  ;;  %v2188_v53 = vsel %vm224_vm0, %v2158_v27, 0.0  ;;  %v2086_v58 = vadd.f32 %v2085_v38, %v2084_v51  ;;  %2405 = vrot.lane.b32.xlu1 %v2372_v54, %s6356_s12 }
 0x3ca   : > { %v2189_v0 = vadd.f32 %v2188_v53, %v2187_v55  ;;  %v2371_v11 = vsel %vm2335_vm10, %v2319_v29, %v2355_v40 }
 0x3cb   : > { %v2087_v3 = vrot.slane %v2086_v58, 4  ;;  %2403 = vrot.lane.b32.xlu0 %v2371_v11, %s6356_s12 }
 0x3cc   : > { %v2190_v10 = vrot.slane %v2189_v0, 4 }
 0x3cd   : > { %v2088_v57 = vadd.f32 %v2087_v3, %v2086_v58 }
 0x3ce   : > { %v2191_v44 = vadd.f32 %v2190_v10, %v2189_v0 }
 0x3cf   : > { %v2089_v42 = vrot.slane %v2088_v57, 2 }
 0x3d0   : > { %v2192_v32 = vrot.slane %v2191_v44, 2 }
 0x3d1   : > { %v2090_v43 = vadd.f32 %v2089_v42, %v2088_v57 }
 0x3d2   : > { %v6280_v62 = vpop.eup %6279  ;;  %v2193_v14 = vadd.f32 %v2192_v32, %v2191_v44 }
 0x3d3   : > { %v2267_v63 = vmul.f32 %v6280_v62, %v7528_v50  ;;  %v2268_v5 = vmul.f32 %v6280_v62, %v7530_v31  ;;  %v2091_v48 = vrot.slane %v2090_v43, 1 }
 0x3d4   : > { %v2194_v28 = vrot.slane %v2193_v14, 1 }
 0x3d5   : > { %v2092_v17 = vadd.f32 %v2091_v48, %v2090_v43  ;;  %v2295_v60 = vmul.f32 %v7542_v41, %v2268_v5  ;;  %v2294_v16 = vmul.f32 %v7544_v49, %v2267_v63 }
 0x3d6   : > { %v2195_v33 = vadd.f32 %v2194_v28, %v2193_v14 }
 0x3d7   : > { %v2132_v26 = vmul.f32 0.0625, %v2092_v17  ;;  %v2322_v29 = vadd.f32 %v7546_v25, %v2295_v60  ;;  %v2321_v1 = vadd.f32 %v7548_v46, %v2294_v16 }
 0x3d8   : > { %v2243_v19 = vmul.f32 0.0625, %v2195_v33  ;;  %v5915_v22 = vpop.f32.mrb[8].mxu1 }
 0x3d9   : > { %v7582_v39 = vsub.f32 %v2009_v30, %v2132_v26  ;;  %v7584_v50 = vsub.f32 %v2014_v37, %v2132_v26  ;;  %v2024_v31 = vadd.f32 %v5915_v22, %v7516_v7  ;;  %v2018_v27 = vpop.f32.mrb[9].mxu1  ;;  %vm2338_vm11 = vcmp.ge.f32.partialorder %v2322_v29, 0.0 }
 0x3da   : > { %v2251_v38 = vadd.f32 1e-05, %v2243_v19  ;;  %v2019_v51 = vadd.f32 %v2018_v27, %v7516_v7  ;;  %v2358_v54 = vmul.f32 %v7552_v6, %v2322_v29  ;;  %vm2337_vm13 = vcmp.ge.f32.partialorder %v2321_v1, 0.0 }
 0x3db   : > { %v2159_v40 = vmul.f32 %v7582_v39, %v7582_v39  ;;  %v2160_v55 = vmul.f32 %v7584_v50, %v7584_v50  ;;  %v2094_v30 = vsel %vm224_vm0, %v2024_v31, 0.0  ;;  %v2357_v37 = vmul.f32 %v7552_v6, %v2321_v1 }
 0x3dc   : > { %6281 = vrsqrt.f32 %v2251_v38  ;;  %v2093_v53 = vsel %vm224_vm0, %v2019_v51, 0.0  ;;  %v2374_v58 = vsel %vm2338_vm11, %v2322_v29, %v2358_v54 }
 0x3dd   : > { %v2196_v0 = vsel %vm224_vm0, %v2159_v40, 0.0  ;;  %v2197_v11 = vsel %vm224_vm0, %v2160_v55, 0.0  ;;  %v2095_v3 = vadd.f32 %v2094_v30, %v2093_v53  ;;  %2409 = vrot.lane.b32.xlu1 %v2374_v58, %s6356_s12  ;;  %v2373_v10 = vsel %vm2337_vm13, %v2321_v1, %v2357_v37 }
 0x3de   : > { %v2198_v57 = vadd.f32 %v2197_v11, %v2196_v0  ;;  %2407 = vrot.lane.b32.xlu0 %v2373_v10, %s6356_s12 }
 0x3df   : > { %v2096_v44 = vrot.slane %v2095_v3, 4 }
 0x3e0   : > { %v2199_v42 = vrot.slane %v2198_v57, 4 }
 0x3e1   : > { %v2097_v32 = vadd.f32 %v2096_v44, %v2095_v3 }
 0x3e2   : > { %v2200_v43 = vadd.f32 %v2199_v42, %v2198_v57 }
 0x3e3   : > { %v2098_v62 = vrot.slane %v2097_v32, 2 }
 0x3e4   : > { %v2201_v14 = vrot.slane %v2200_v43, 2 }
 0x3e5   : > { %v2099_v63 = vadd.f32 %v2098_v62, %v2097_v32 }
 0x3e6   : > { %v6282_v5 = vpop.eup %6281  ;;  %v2202_v48 = vadd.f32 %v2201_v14, %v2200_v43 }
 0x3e7   : > { %v2269_v28 = vmul.f32 %v6282_v5, %v7558_v34  ;;  %v2270_v17 = vmul.f32 %v6282_v5, %v7560_v2  ;;  %v2100_v60 = vrot.slane %v2099_v63, 1 }
 0x3e8   : > { %v2203_v16 = vrot.slane %v2202_v48, 1 }
 0x3e9   : > { %v2101_v33 = vadd.f32 %v2100_v60, %v2099_v63  ;;  %v2297_v26 = vmul.f32 %v7542_v41, %v2270_v17  ;;  %v2296_v29 = vmul.f32 %v7544_v49, %v2269_v28 }
 0x3ea   : > { %v2204_v1 = vadd.f32 %v2203_v16, %v2202_v48 }
 0x3eb   : > { %v2133_v19 = vmul.f32 0.0625, %v2101_v33  ;;  %v2324_v22 = vadd.f32 %v7546_v25, %v2297_v26  ;;  %v2323_v27 = vadd.f32 %v7548_v46, %v2296_v29 }
 0x3ec   : > { %v2244_v38 = vmul.f32 0.0625, %v2204_v1  ;;  %v5918_v54 = vpop.f32.mrb[10].mxu1 }
 0x3ed   : > { %v7606_v40 = vsub.f32 %v2019_v51, %v2133_v19  ;;  %v7608_v34 = vsub.f32 %v2024_v31, %v2133_v19  ;;  %v2034_v2 = vadd.f32 %v5918_v54, %v7516_v7  ;;  %v2028_v55 = vpop.f32.mrb[11].mxu1  ;;  %vm2340_vm14 = vcmp.ge.f32.partialorder %v2324_v22, 0.0 }
 0x3ee   : > { %v2252_v30 = vadd.f32 1e-05, %v2244_v38  ;;  %v2029_v37 = vadd.f32 %v2028_v55, %v7516_v7  ;;  %v2360_v53 = vmul.f32 %v7552_v6, %v2324_v22  ;;  %vm2339_vm15 = vcmp.ge.f32.partialorder %v2323_v27, 0.0 }
 0x3ef   : > { %v2161_v58 = vmul.f32 %v7606_v40, %v7606_v40  ;;  %v2162_v0 = vmul.f32 %v7608_v34, %v7608_v34  ;;  %v2103_v51 = vsel %vm224_vm0, %v2034_v2, 0.0  ;;  %v2359_v31 = vmul.f32 %v7552_v6, %v2323_v27 }
 0x3f0   : > { %6283 = vrsqrt.f32 %v2252_v30  ;;  %v2102_v11 = vsel %vm224_vm0, %v2029_v37, 0.0  ;;  %v2376_v3 = vsel %vm2340_vm14, %v2324_v22, %v2360_v53 }
 0x3f1   : > { %v2205_v10 = vsel %vm224_vm0, %v2161_v58, 0.0  ;;  %v2206_v57 = vsel %vm224_vm0, %v2162_v0, 0.0  ;;  %v2104_v44 = vadd.f32 %v2103_v51, %v2102_v11  ;;  %2413 = vrot.lane.b32.xlu1 %v2376_v3, %s6356_s12  ;;  %v2375_v42 = vsel %vm2339_vm15, %v2323_v27, %v2359_v31 }
 0x3f2   : > { %v2207_v32 = vadd.f32 %v2206_v57, %v2205_v10  ;;  %2411 = vrot.lane.b32.xlu0 %v2375_v42, %s6356_s12 }
 0x3f3   : > { %v2105_v43 = vrot.slane %v2104_v44, 4 }
 0x3f4   : > { %v2208_v62 = vrot.slane %v2207_v32, 4 }
 0x3f5   : > { %v2106_v14 = vadd.f32 %v2105_v43, %v2104_v44 }
 0x3f6   : > { %v2209_v63 = vadd.f32 %v2208_v62, %v2207_v32 }
 0x3f7   : > { %v2107_v5 = vrot.slane %v2106_v14, 2 }
 0x3f8   : > { %v2210_v48 = vrot.slane %v2209_v63, 2 }
 0x3f9   : > { %v2108_v28 = vadd.f32 %v2107_v5, %v2106_v14 }
 0x3fa   : > { %v6284_v17 = vpop.eup %6283  ;;  %v2211_v60 = vadd.f32 %v2210_v48, %v2209_v63 }
 0x3fb   : > { %v2271_v16 = vmul.f32 %v6284_v17, %v7582_v39  ;;  %v2272_v33 = vmul.f32 %v6284_v17, %v7584_v50  ;;  %v2109_v26 = vrot.slane %v2108_v28, 1 }
 0x3fc   : > { %v2212_v29 = vrot.slane %v2211_v60, 1 }
 0x3fd   : > { %v2298_v1 = vmul.f32 %v7544_v49, %v2271_v16  ;;  %v2110_v19 = vadd.f32 %v2109_v26, %v2108_v28  ;;  %v2299_v22 = vmul.f32 %v7542_v41, %v2272_v33 }
 0x3fe   : > { %v2213_v27 = vadd.f32 %v2212_v29, %v2211_v60 }
 0x3ff   : > { %v2134_v38 = vmul.f32 0.0625, %v2110_v19  ;;  %v2326_v54 = vadd.f32 %v7546_v25, %v2299_v22  ;;  %v2325_v55 = vadd.f32 %v7548_v46, %v2298_v1 }
 0x400   : > { %v2245_v30 = vmul.f32 0.0625, %v2213_v27  ;;  %v5921_v53 = vpop.f32.mrb[12].mxu1 }
 0x401   : > { %v7630_v58 = vsub.f32 %v2029_v37, %v2134_v38  ;;  %v7632_v39 = vsub.f32 %v2034_v2, %v2134_v38  ;;  %v2044_v50 = vadd.f32 %v5921_v53, %v7516_v7  ;;  %v2038_v0 = vpop.f32.mrb[13].mxu1  ;;  %vm2342_vm10 = vcmp.ge.f32.partialorder %v2326_v54, 0.0 }
 0x402   : > { %v2253_v51 = vadd.f32 1e-05, %v2245_v30  ;;  %v2039_v31 = vadd.f32 %v2038_v0, %v7516_v7  ;;  %v2362_v11 = vmul.f32 %v7552_v6, %v2326_v54  ;;  %vm2341_vm11 = vcmp.ge.f32.partialorder %v2325_v55, 0.0 }
 0x403   : > { %v2163_v3 = vmul.f32 %v7630_v58, %v7630_v58  ;;  %v2164_v10 = vmul.f32 %v7632_v39, %v7632_v39  ;;  %v2112_v37 = vsel %vm224_vm0, %v2044_v50, 0.0  ;;  %v2361_v2 = vmul.f32 %v7552_v6, %v2325_v55 }
 0x404   : > { %6285 = vrsqrt.f32 %v2253_v51  ;;  %v2111_v57 = vsel %vm224_vm0, %v2039_v31, 0.0  ;;  %v2378_v44 = vsel %vm2342_vm10, %v2326_v54, %v2362_v11 }
 0x405   : > { %v2214_v42 = vsel %vm224_vm0, %v2163_v3, 0.0  ;;  %v2215_v32 = vsel %vm224_vm0, %v2164_v10, 0.0  ;;  %v2113_v43 = vadd.f32 %v2112_v37, %v2111_v57  ;;  %2417 = vrot.lane.b32.xlu1 %v2378_v44, %s6356_s12  ;;  %v2377_v62 = vsel %vm2341_vm11, %v2325_v55, %v2361_v2 }
 0x406   : > { %v2216_v14 = vadd.f32 %v2215_v32, %v2214_v42  ;;  %2415 = vrot.lane.b32.xlu0 %v2377_v62, %s6356_s12 }
 0x407   : > { %v2114_v63 = vrot.slane %v2113_v43, 4 }
 0x408   : > { %v2217_v5 = vrot.slane %v2216_v14, 4 }
 0x409   : > { %v2115_v48 = vadd.f32 %v2114_v63, %v2113_v43 }
 0x40a   : > { %v2218_v28 = vadd.f32 %v2217_v5, %v2216_v14 }
 0x40b   : > { %v2116_v17 = vrot.slane %v2115_v48, 2 }
 0x40c   : > { %v2219_v60 = vrot.slane %v2218_v28, 2  ;;  %v5924_v16 = vpop.f32.mrb[14].mxu1 }
 0x40d   : > { %v2117_v33 = vadd.f32 %v2116_v17, %v2115_v48  ;;  %v2054_v26 = vadd.f32 %v5924_v16, %v7516_v7  ;;  %v2048_v29 = vpop.f32.mrb[15].mxu1 }
 0x40e   : > { %v6286_v1 = vpop.eup %6285  ;;  %v2220_v19 = vadd.f32 %v2219_v60, %v2218_v28  ;;  %v2049_v22 = vadd.f32 %v2048_v29, %v7516_v7 }
 0x40f   : > { %v2273_v27 = vmul.f32 %v6286_v1, %v7606_v40  ;;  %v2274_v38 = vmul.f32 %v6286_v1, %v7608_v34  ;;  %v2118_v54 = vrot.slane %v2117_v33, 1  ;;  %v2121_v55 = vsel %vm224_vm0, %v2054_v26, 0.0 }
 0x410   : > { %v2221_v30 = vrot.slane %v2220_v19, 1  ;;  %v2120_v53 = vsel %vm224_vm0, %v2049_v22, 0.0 }
 0x411   : > { %v2300_v0 = vmul.f32 %v7544_v49, %v2273_v27  ;;  %v2119_v51 = vadd.f32 %v2118_v54, %v2117_v33  ;;  %v2122_v11 = vadd.f32 %v2121_v55, %v2120_v53  ;;  %v2301_v3 = vmul.f32 %v7542_v41, %v2274_v38 }
 0x412   : > { %v2222_v10 = vadd.f32 %v2221_v30, %v2220_v19 }
 0x413   : > { %v2135_v37 = vmul.f32 0.0625, %v2119_v51  ;;  %v2123_v2 = vrot.slane %v2122_v11, 4  ;;  %v2328_v7 = vadd.f32 %v7546_v25, %v2301_v3  ;;  %v2327_v40 = vadd.f32 %v7548_v46, %v2300_v0 }
 0x414   : > { %v2246_v34 = vmul.f32 0.0625, %v2222_v10 }
 0x415   : > { %v7658_v57 = vsub.f32 %v2039_v31, %v2135_v37  ;;  %v7660_v44 = vsub.f32 %v2044_v50, %v2135_v37  ;;  %v2124_v42 = vadd.f32 %v2123_v2, %v2122_v11  ;;  %vm2344_vm13 = vcmp.ge.f32.partialorder %v2328_v7, 0.0 }
 0x416   : > { %v2254_v32 = vadd.f32 1e-05, %v2246_v34  ;;  %v2364_v43 = vmul.f32 %v7552_v6, %v2328_v7  ;;  %vm2343_vm14 = vcmp.ge.f32.partialorder %v2327_v40, 0.0  ;;  %v2363_v62 = vmul.f32 %v7552_v6, %v2327_v40 }
 0x417   : > { %v2165_v14 = vmul.f32 %v7658_v57, %v7658_v57  ;;  %v2166_v63 = vmul.f32 %v7660_v44, %v7660_v44  ;;  %v2125_v5 = vrot.slane %v2124_v42, 2 }
 0x418   : > { %6287 = vrsqrt.f32 %v2254_v32  ;;  %v2380_v31 = vsel %vm2344_vm13, %v2328_v7, %v2364_v43  ;;  %v2379_v48 = vsel %vm2343_vm14, %v2327_v40, %v2363_v62  ;;  %vm2467_vm14 = vcmask 97280  }
 0x419   : > { %v2223_v50 = vsel %vm224_vm0, %v2165_v14, 0.0  ;;  %v2224_v28 = vsel %vm224_vm0, %v2166_v63, 0.0  ;;  %v2126_v17 = vadd.f32 %v2125_v5, %v2124_v42  ;;  %2421 = vrot.lane.b32.xlu1 %v2380_v31, %s6356_s12  ;;  %2419 = vrot.lane.b32.xlu0 %v2379_v48, %s6356_s12  ;;  %v5565_v31 = vld [vmem:[%s9386_s1 + $0xf0] sm:$0xff]  ;;  %v5566_v48 = vld [vmem:[%s9386_s1 + $0xf8] sm:$0xff] }
 0x41a   : > { %v2225_v60 = vadd.f32 %v2224_v28, %v2223_v50  ;;  %v6143_v50 = vpack.c.bf16 %v5566_v48, %v5565_v31  ;;  %v5575_v31 = vld [vmem:[%s9386_s1 + $0x140] sm:$0xff]  ;;  %v5576_v48 = vld [vmem:[%s9386_s1 + $0x148] sm:$0xff] }
 0x41b   : > { %v2127_v16 = vrot.slane %v2126_v17, 1 }
 0x41c   : > { %v2226_v33 = vrot.slane %v2225_v60, 4  ;;  %6144 = vmatprep.subr.bf16.mxu0 %v6143_v50 }
 0x41d   : > { %v2128_v29 = vadd.f32 %v2127_v16, %v2126_v17  ;;  %6146 = vmatpush3.bf16.msra.mxu0 %v6143_v50  ;;  %v6163_v50 = vpack.c.bf16 %v5576_v48, %v5575_v31 }
 0x41e   : > { %v2227_v1 = vadd.f32 %v2226_v33, %v2225_v60  ;;  %v5567_v33 = vld [vmem:[%s9386_s1 + $0x100] sm:$0xff] }
 0x41f   : > { %v2136_v19 = vmul.f32 0.0625, %v2128_v29  ;;  %v5568_v29 = vld [vmem:[%s9386_s1 + $0x108] sm:$0xff] }
 0x420   : > { %v2228_v27 = vrot.slane %v2227_v1, 2 }
 0x421   : > { %v7672_v38 = vsub.f32 %v2049_v22, %v2136_v19  ;;  %v7674_v54 = vsub.f32 %v2054_v26, %v2136_v19 }
 0x422   : > { %v6288_v55 = vpop.eup %6287  ;;  %v2229_v30 = vadd.f32 %v2228_v27, %v2227_v1  ;;  %v6147_v1 = vpack.c.bf16 %v5568_v29, %v5567_v33  ;;  %v5577_v33 = vld [vmem:[%s9386_s1 + $0x150] sm:$0xff] }
 0x423   : > { %v2275_v53 = vmul.f32 %v6288_v55, %v7630_v58  ;;  %v2276_v0 = vmul.f32 %v6288_v55, %v7632_v39  ;;  %v2167_v51 = vmul.f32 %v7672_v38, %v7672_v38  ;;  %v2168_v11 = vmul.f32 %v7674_v54, %v7674_v54 }
 0x424   : > { %v2230_v3 = vrot.slane %v2229_v30, 1  ;;  %6148 = vmatprep.subr.bf16.mxu0 %v6147_v1 }
 0x425   : > { %v2302_v10 = vmul.f32 %v7544_v49, %v2275_v53  ;;  %v2232_v22 = vsel %vm224_vm0, %v2167_v51, 0.0  ;;  %v2233_v26 = vsel %vm224_vm0, %v2168_v11, 0.0  ;;  %v2303_v37 = vmul.f32 %v7542_v41, %v2276_v0  ;;  %v5569_v53 = vld [vmem:[%s9386_s1 + $0x110] sm:$0xff]  ;;  %v5570_v0 = vld [vmem:[%s9386_s1 + $0x118] sm:$0xff]  ;;  %6150 = vmatpush3.bf16.msra.mxu0 %v6147_v1 }
 0x426   : > { %v2231_v2 = vadd.f32 %v2230_v3, %v2229_v30  ;;  %v2234_v7 = vadd.f32 %v2233_v26, %v2232_v22  ;;  %v6151_v51 = vpack.c.bf16 %v5570_v0, %v5569_v53 }
 0x427   : > { %v2330_v58 = vadd.f32 %v7546_v25, %v2303_v37  ;;  %v2329_v39 = vadd.f32 %v7548_v46, %v2302_v10 }
 0x428   : > { %v2247_v40 = vmul.f32 0.0625, %v2231_v2  ;;  %v2235_v34 = vrot.slane %v2234_v7, 4  ;;  %6152 = vmatprep.subr.bf16.mxu0 %v6151_v51 }
 0x429   : > { %vm2346_vm15 = vcmp.ge.f32.partialorder %v2330_v58, 0.0  ;;  %v2366_v42 = vmul.f32 %v7552_v6, %v2330_v58  ;;  %vm2345_vm10 = vcmp.ge.f32.partialorder %v2329_v39, 0.0  ;;  %v2365_v32 = vmul.f32 %v7552_v6, %v2329_v39  ;;  %6154 = vmatpush3.bf16.msra.mxu0 %v6151_v51 }
 0x42a   : > { %v2255_v43 = vadd.f32 1e-05, %v2247_v40  ;;  %v2236_v62 = vadd.f32 %v2235_v34, %v2234_v7  ;;  %v5573_v34 = vld [vmem:[%s9386_s1 + $0x130] sm:$0xff] }
 0x42b   : > { %v2382_v14 = vsel %vm2346_vm15, %v2330_v58, %v2366_v42  ;;  %v2381_v63 = vsel %vm2345_vm10, %v2329_v39, %v2365_v32  ;;  %v5574_v42 = vld [vmem:[%s9386_s1 + $0x138] sm:$0xff] }
 0x42c   : > { %6289 = vrsqrt.f32 %v2255_v43  ;;  %v2237_v5 = vrot.slane %v2236_v62, 2  ;;  %2425 = vrot.lane.b32.xlu1 %v2382_v14, %s6356_s12  ;;  %2423 = vrot.lane.b32.xlu0 %v2381_v63, %s6356_s12  ;;  %v6159_v32 = vpack.c.bf16 %v5574_v42, %v5573_v34 }
 0x42e   : > { %v2238_v28 = vadd.f32 %v2237_v5, %v2236_v62 }
 0x430   : > { %v2239_v17 = vrot.slane %v2238_v28, 1 }
 0x432   : > { %v2240_v60 = vadd.f32 %v2239_v17, %v2238_v28 }
 0x434   : > { %v2248_v16 = vmul.f32 0.0625, %v2240_v60 }
 0x436   : > { %v6290_v19 = vpop.eup %6289  ;;  %v2256_v27 = vadd.f32 1e-05, %v2248_v16 }
 0x437   : > { %v2277_v55 = vmul.f32 %v6290_v19, %v7658_v57  ;;  %v2278_v30 = vmul.f32 %v6290_v19, %v7660_v44  ;;  %v5571_v57 = vld [vmem:[%s9386_s1 + $0x120] sm:$0xff]  ;;  %v5572_v44 = vld [vmem:[%s9386_s1 + $0x128] sm:$0xff] }
 0x438   : > { %6291 = vrsqrt.f32 %v2256_v27  ;;  %v6155_v10 = vpack.c.bf16 %v5572_v44, %v5571_v57  ;;  %v5579_v19 = vld [vmem:[%s9386_s1 + $0x160] sm:$0xff] }
 0x439   : > { %v2304_v11 = vmul.f32 %v7544_v49, %v2277_v55  ;;  %v2305_v3 = vmul.f32 %v7542_v41, %v2278_v30 }
 0x43a   : > { %6156 = vmatprep.subr.bf16.mxu0 %v6155_v10 }
 0x43b   : > { %v2332_v22 = vadd.f32 %v7546_v25, %v2305_v3  ;;  %v2331_v26 = vadd.f32 %v7548_v46, %v2304_v11  ;;  %v2406_v7 = vpop.permute.xlu1 %2405  ;;  %6158 = vmatpush3.bf16.msra.mxu0 %v6155_v10 }
 0x43c   : > { %v2452_v62 = vsel %vm1365_vm12, %v7090_v21, %v2406_v7  ;;  %6160 = vmatprep.subr.bf16.mxu0 %v6159_v32 }
 0x43d   : > { %vm2348_vm11 = vcmp.ge.f32.partialorder %v2332_v22, 0.0  ;;  %v2368_v37 = vmul.f32 %v7552_v6, %v2332_v22  ;;  %vm2347_vm13 = vcmp.ge.f32.partialorder %v2331_v26, 0.0  ;;  %v2367_v2 = vmul.f32 %v7552_v6, %v2331_v26  ;;  %v2404_v58 = vpop.permute.xlu0 %2403 }
 0x43e   : > { %v2451_v14 = vsel %vm1365_vm12, %v7094_v24, %v2404_v58  ;;  %v7747_v17 = vsel %vm2467_vm14, %v2452_v62, %v7090_v21  ;;  %v5578_v21 = vld [vmem:[%s9386_s1 + $0x158] sm:$0xff] }
 0x43f   : > { %v2384_v39 = vsel %vm2348_vm11, %v2332_v22, %v2368_v37  ;;  %v2383_v40 = vsel %vm2347_vm13, %v2331_v26, %v2367_v2  ;;  %6162 = vmatpush3.bf16.msra.mxu0 %v6159_v32  ;;  %v6167_v29 = vpack.c.bf16 %v5578_v21, %v5577_v33 }
 0x440   : > { %2429 = vrot.lane.b32.xlu1 %v2384_v39, %s6356_s12  ;;  %2427 = vrot.lane.b32.xlu0 %v2383_v40, %s6356_s12 }
 0x441   : > { %6164 = vmatprep.subr.bf16.mxu0 %v6163_v50 }
 0x442   : > { %v6292_v43 = vpop.eup %6291 }
 0x443   : > { %v2279_v63 = vmul.f32 %v6292_v43, %v7672_v38  ;;  %v2280_v5 = vmul.f32 %v6292_v43, %v7674_v54  ;;  %v7751_v38 = vsel %vm2467_vm14, %v2451_v14, %v7094_v24  ;;  %6166 = vmatpush3.bf16.msra.mxu0 %v6163_v50 }
 0x444   : > { %v2500_v24 = vrot.slane %v7751_v38, 7  ;;  %6168 = vmatprep.subr.bf16.mxu0 %v6167_v29 }
 0x445   : > { %v2306_v28 = vmul.f32 %v7544_v49, %v2279_v63  ;;  %v2307_v54 = vmul.f32 %v7542_v41, %v2280_v5  ;;  %v2501_v49 = vrot.slane %v7747_v17, 7 }
 0x446   : > { %v7773_v55 = vsel %vm257_vm1, 0.0, %v2500_v24 }
 0x447   : > { %v2334_v60 = vadd.f32 %v7546_v25, %v2307_v54  ;;  %v2333_v16 = vadd.f32 %v7548_v46, %v2306_v28  ;;  %v2552_v27 = vsel %vm257_vm1, %v2501_v49, 0.0  ;;  %v7776_v30 = vsel %vm257_vm1, %v2500_v24, %v2501_v49  ;;  %6170 = vmatpush3.bf16.msra.mxu0 %v6167_v29 }
 0x448   : > { %5953 = vmatprep.subr.mxu0 %v5579_v19  ;;  %v2568_v53 = vrot.slane %v7773_v55, 1  ;;  %v2569_v0 = vrot.slane %v7776_v30, 1  ;;  %v2571_v51 = vrot.slane %v2552_v27, 1  ;;  %v2615_v44 = vrot.slane %v2552_v27, 2 }
 0x449   : > { %vm2350_vm15 = vcmp.ge.f32.partialorder %v2334_v60, 0.0  ;;  %v2370_v41 = vmul.f32 %v7552_v6, %v2334_v60  ;;  %vm2349_vm10 = vcmp.ge.f32.partialorder %v2333_v16, 0.0  ;;  %v2369_v25 = vmul.f32 %v7552_v6, %v2333_v16 }
 0x44a   : > { %v2612_v10 = vrot.slane %v7773_v55, 2  ;;  %v2613_v22 = vrot.slane %v7776_v30, 2  ;;  %v2572_v26 = vsel %vm336_vm2, %v2569_v0, %v2571_v51  ;;  %v2570_v37 = vsel %vm336_vm2, %v2568_v53, %v2569_v0 }
 0x44b   : > { %v2386_v46 = vsel %vm2350_vm15, %v2334_v60, %v2370_v41  ;;  %v2385_v1 = vsel %vm2349_vm10, %v2333_v16, %v2369_v25  ;;  %5954 = vmatpush3.msra.mxu0 %v5579_v19 }
 0x44c   : > { %2433 = vrot.lane.b32.xlu1 %v2386_v46, %s6356_s12  ;;  %2431 = vrot.lane.b32.xlu0 %v2385_v1, %s6356_s12  ;;  %v2616_v58 = vsel %vm419_vm3, %v2613_v22, %v2615_v44  ;;  %v2614_v39 = vsel %vm419_vm3, %v2612_v10, %v2613_v22 }
 0x44f   : > { %v2410_v6 = vpop.permute.xlu1 %2409 }
 0x450   : > { %v2408_v11 = vpop.permute.xlu0 %2407  ;;  %2660 = vrot.lane.b32.xlu0 %v7773_v55, %s6352_s13  ;;  %2662 = vrot.lane.b32.xlu1 %v7776_v30, %s6352_s13  ;;  %v2454_v3 = vsel %vm1365_vm12, %v7139_v8, %v2410_v6 }
 0x451   : > { %v2453_v57 = vsel %vm1365_vm12, %v7143_v56, %v2408_v11  ;;  %v7796_v2 = vsel %vm2467_vm14, %v2454_v3, %v7139_v8 }
 0x452   : > { %v7800_v7 = vsel %vm2467_vm14, %v2453_v57, %v7143_v56  ;;  %v2504_v40 = vrot.slane %v7796_v2, 7 }
 0x453   : > { %v2503_v34 = vrot.slane %v7800_v7, 7 }
 0x454   : > { %2734 = vrot.lane.b32.xlu1 %v2572_v26, %s6353_s20  ;;  %2732 = vrot.lane.b32.xlu0 %v2570_v37, %s6353_s20  ;;  %v2553_v5 = vsel %vm257_vm1, %v2504_v40, 0.0 }
 0x455   : > { %v7811_v8 = vsel %vm257_vm1, 0.0, %v2503_v34  ;;  %v7814_v56 = vsel %vm257_vm1, %v2503_v34, %v2504_v40  ;;  %v2576_v16 = vrot.slane %v2553_v5, 1  ;;  %v2620_v49 = vrot.slane %v2553_v5, 2 }
 0x456   : > { %v2573_v42 = vrot.slane %v7811_v8, 1  ;;  %v2574_v32 = vrot.slane %v7814_v56, 1  ;;  %v2617_v43 = vrot.slane %v7811_v8, 2  ;;  %v2618_v63 = vrot.slane %v7814_v56, 2 }
 0x458   : > { %2802 = vrot.lane.b32.xlu1 %v2616_v58, %s6354_s5  ;;  %2800 = vrot.lane.b32.xlu0 %v2614_v39, %s6354_s5  ;;  %v2575_v14 = vsel %vm336_vm2, %v2573_v42, %v2574_v32  ;;  %v2619_v60 = vsel %vm419_vm3, %v2617_v43, %v2618_v63  ;;  %v2577_v21 = vsel %vm336_vm2, %v2574_v32, %v2576_v16 }
 0x459   : > { %v2621_v29 = vsel %vm419_vm3, %v2618_v63, %v2620_v49 }
 0x45c   : > { %2588 = vrot.lane.b32.xlu1 %v2570_v37, %s6350_s25  ;;  %2590 = vrot.lane.b32.xlu0 %v2572_v26, %s6350_s25 }
 0x460   : > { %2632 = vrot.lane.b32.xlu1 %v2614_v39, %s6351_s8  ;;  %2664 = vrot.lane.b32.xlu0 %v7811_v8, %s6352_s13 }
 0x463   : > { %v2414_v62 = vpop.permute.xlu1 %2413 }
 0x464   : > { %v2456_v31 = vsel %vm1365_vm12, %v7180_v9, %v2414_v62  ;;  %v2412_v48 = vpop.permute.xlu0 %2411  ;;  %2634 = vrot.lane.b32.xlu1 %v2616_v58, %s6351_s8  ;;  %2736 = vrot.lane.b32.xlu0 %v2575_v14, %s6353_s20 }
 0x465   : > { %v7831_v50 = vsel %vm2467_vm14, %v2456_v31, %v7180_v9  ;;  %v2455_v28 = vsel %vm1365_vm12, %v7184_v4, %v2412_v48 }
 0x466   : > { %v7837_v54 = vsel %vm2467_vm14, %v2455_v28, %v7184_v4  ;;  %v2507_v33 = vrot.slane %v7831_v50, 7 }
 0x467   : > { %v2506_v9 = vrot.slane %v7837_v54, 7 }
 0x468   : > { %2666 = vrot.lane.b32.xlu1 %v7814_v56, %s6352_s13  ;;  %2804 = vrot.lane.b32.xlu0 %v2619_v60, %s6354_s5  ;;  %v2554_v27 = vsel %vm257_vm1, %v2507_v33, 0.0 }
 0x469   : > { %v7849_v4 = vsel %vm257_vm1, 0.0, %v2506_v9  ;;  %v7852_v24 = vsel %vm257_vm1, %v2506_v9, %v2507_v33  ;;  %v2581_v0 = vrot.slane %v2554_v27, 1  ;;  %v2625_v34 = vrot.slane %v2554_v27, 2 }
 0x46a   : > { %v2578_v41 = vrot.slane %v7849_v4, 1  ;;  %v2579_v25 = vrot.slane %v7852_v24, 1  ;;  %v2622_v46 = vrot.slane %v7849_v4, 2  ;;  %v2623_v19 = vrot.slane %v7852_v24, 2 }
 0x46c   : > { %2738 = vrot.lane.b32.xlu1 %v2577_v21, %s6353_s20  ;;  %2594 = vrot.lane.b32.xlu0 %v2577_v21, %s6350_s25  ;;  %v2580_v1 = vsel %vm336_vm2, %v2578_v41, %v2579_v25  ;;  %v2624_v53 = vsel %vm419_vm3, %v2622_v46, %v2623_v19  ;;  %v2582_v22 = vsel %vm336_vm2, %v2579_v25, %v2581_v0 }
 0x46d   : > { %v2626_v32 = vsel %vm419_vm3, %v2623_v19, %v2625_v34 }
 0x470   : > { %2806 = vrot.lane.b32.xlu1 %v2621_v29, %s6354_s5  ;;  %2668 = vrot.lane.b32.xlu0 %v7849_v4, %s6352_s13 }
 0x474   : > { %2592 = vrot.lane.b32.xlu1 %v2575_v14, %s6350_s25  ;;  %2740 = vrot.lane.b32.xlu0 %v2580_v1, %s6353_s20 }
 0x477   : > { %v2418_v6 = vpop.permute.xlu1 %2417 }
 0x478   : > { %v2458_v51 = vsel %vm1365_vm12, %v7221_v13, %v2418_v6  ;;  %v2416_v11 = vpop.permute.xlu0 %2415  ;;  %2636 = vrot.lane.b32.xlu1 %v2619_v60, %s6351_s8  ;;  %2808 = vrot.lane.b32.xlu0 %v2624_v53, %s6354_s5 }
 0x479   : > { %v7873_v3 = vsel %vm2467_vm14, %v2458_v51, %v7221_v13  ;;  %v2457_v57 = vsel %vm1365_vm12, %v7225_v52, %v2416_v11 }
 0x47a   : > { %v2510_v44 = vrot.slane %v7873_v3, 7  ;;  %v7880_v10 = vsel %vm2467_vm14, %v2457_v57, %v7225_v52 }
 0x47b   : > { %v2509_v26 = vrot.slane %v7880_v10, 7 }
 0x47c   : > { %2638 = vrot.lane.b32.xlu1 %v2621_v29, %s6351_s8  ;;  %2598 = vrot.lane.b32.xlu0 %v2582_v22, %s6350_s25  ;;  %v2555_v52 = vsel %vm257_vm1, %v2510_v44, 0.0 }
 0x47d   : > { %v7887_v13 = vsel %vm257_vm1, 0.0, %v2509_v26  ;;  %v7890_v37 = vsel %vm257_vm1, %v2509_v26, %v2510_v44  ;;  %v2586_v42 = vrot.slane %v2555_v52, 1  ;;  %v2630_v14 = vrot.slane %v2555_v52, 2 }
 0x47e   : > { %v2583_v58 = vrot.slane %v7887_v13, 1  ;;  %v2584_v39 = vrot.slane %v7890_v37, 1  ;;  %v2628_v62 = vrot.slane %v7890_v37, 2 }
 0x480   : > { %2670 = vrot.lane.b32.xlu1 %v7852_v24, %s6352_s13  ;;  %2672 = vrot.lane.b32.xlu0 %v7887_v13, %s6352_s13  ;;  %v2585_v40 = vsel %vm336_vm2, %v2583_v58, %v2584_v39  ;;  %v2587_v43 = vsel %vm336_vm2, %v2584_v39, %v2586_v42  ;;  %v2631_v31 = vsel %vm419_vm3, %v2628_v62, %v2630_v14 }
 0x484   : > { %2742 = vrot.lane.b32.xlu1 %v2582_v22, %s6353_s20  ;;  %2744 = vrot.lane.b32.xlu0 %v2585_v40, %s6353_s20 }
 0x488   : > { %2810 = vrot.lane.b32.xlu1 %v2626_v32, %s6354_s5  ;;  %2746 = vrot.lane.b32.xlu0 %v2587_v43, %s6353_s20 }
 0x48b   : > { %v2422_v63 = vpop.permute.xlu1 %2421  ;;  %v2420_v5 = vpop.permute.xlu0 %2419 }
 0x48c   : > { %v2460_v48 = vsel %vm1365_vm12, %v7262_v35, %v2422_v63  ;;  %v2459_v28 = vsel %vm1365_vm12, %v7266_v61, %v2420_v5  ;;  %2596 = vrot.lane.b32.xlu1 %v2580_v1, %s6350_s25  ;;  %2814 = vrot.lane.b32.xlu0 %v2631_v31, %s6354_s5 }
 0x48d   : > { %v7916_v60 = vsel %vm2467_vm14, %v2460_v48, %v7262_v35  ;;  %v7920_v16 = vsel %vm2467_vm14, %v2459_v28, %v7266_v61  ;;  %v2627_v61 = vrot.slane %v7887_v13, 2 }
 0x48e   : > { %v2513_v33 = vrot.slane %v7916_v60, 7  ;;  %v2512_v9 = vrot.slane %v7920_v16, 7 }
 0x48f   : > { %v2629_v1 = vsel %vm419_vm3, %v2627_v61, %v2628_v62 }
 0x490   : > { %2640 = vrot.lane.b32.xlu1 %v2624_v53, %s6351_s8  ;;  %2602 = vrot.lane.b32.xlu0 %v2587_v43, %s6350_s25  ;;  %v2548_v21 = vsel %vm257_vm1, 0.0, %v2512_v9  ;;  %v2514_v49 = vsel %vm257_vm1, %v2512_v9, %v2513_v33  ;;  %v2556_v35 = vsel %vm257_vm1, %v2513_v33, 0.0 }
 0x491   : > { %v2712_v29 = vrot.slane %v2548_v21, 1  ;;  %v2713_v41 = vrot.slane %v2514_v49, 1  ;;  %v2715_v46 = vrot.slane %v2556_v35, 1  ;;  %v2781_v27 = vrot.slane %v2514_v49, 2 }
 0x492   : > { %v2783_v6 = vrot.slane %v2556_v35, 2 }
 0x493   : > { %v2714_v25 = vsel %vm336_vm2, %v2712_v29, %v2713_v41  ;;  %v2716_v19 = vsel %vm336_vm2, %v2713_v41, %v2715_v46 }
 0x494   : > { %2642 = vrot.lane.b32.xlu1 %v2626_v32, %s6351_s8  ;;  %2676 = vrot.lane.b32.xlu0 %v2548_v21, %s6352_s13  ;;  %v2784_v57 = vsel %vm419_vm3, %v2781_v27, %v2783_v6  ;;  %v2780_v32 = vrot.slane %v2548_v21, 2 }
 0x496   : > { %v2782_v63 = vsel %vm419_vm3, %v2780_v32, %v2781_v27 }
 0x498   : > { %2674 = vrot.lane.b32.xlu1 %v7890_v37, %s6352_s13  ;;  %2748 = vrot.lane.b32.xlu0 %v2714_v25, %s6353_s20 }
 0x49c   : > { %2812 = vrot.lane.b32.xlu1 %v2629_v1, %s6354_s5  ;;  %2750 = vrot.lane.b32.xlu0 %v2716_v19, %s6353_s20 }
 0x49e   : > { %v2426_v53 = vpop.permute.xlu1 %2425  ;;  %v2424_v0 = vpop.permute.xlu0 %2423 }
 0x49f   : > { %v2462_v51 = vsel %vm1365_vm12, %v7303_v47, %v2426_v53  ;;  %v2461_v11 = vsel %vm1365_vm12, %v7307_v45, %v2424_v0 }
 0x4a0   : > { %v7947_v44 = vsel %vm2467_vm14, %v2462_v51, %v7303_v47  ;;  %v7951_v22 = vsel %vm2467_vm14, %v2461_v11, %v7307_v45  ;;  %2600 = vrot.lane.b32.xlu1 %v2585_v40, %s6350_s25  ;;  %2818 = vrot.lane.b32.xlu0 %v2784_v57, %s6354_s5 }
 0x4a1   : > { %v2516_v26 = vrot.slane %v7947_v44, 7  ;;  %v2515_v58 = vrot.slane %v7951_v22, 7 }
 0x4a3   : > { %v2549_v39 = vsel %vm257_vm1, 0.0, %v2515_v58  ;;  %v2517_v52 = vsel %vm257_vm1, %v2515_v58, %v2516_v26  ;;  %v2557_v34 = vsel %vm257_vm1, %v2516_v26, 0.0 }
 0x4a4   : > { %2644 = vrot.lane.b32.xlu1 %v2629_v1, %s6351_s8  ;;  %2680 = vrot.lane.b32.xlu0 %v2549_v39, %s6352_s13  ;;  %v2717_v47 = vrot.slane %v2549_v39, 1  ;;  %v2718_v45 = vrot.slane %v2517_v52, 1  ;;  %v2720_v42 = vrot.slane %v2557_v34, 1  ;;  %v2786_v62 = vrot.slane %v2517_v52, 2 }
 0x4a5   : > { %v2788_v14 = vrot.slane %v2557_v34, 2  ;;  %v2785_v48 = vrot.slane %v2549_v39, 2 }
 0x4a6   : > { %v2719_v40 = vsel %vm336_vm2, %v2717_v47, %v2718_v45  ;;  %v2721_v43 = vsel %vm336_vm2, %v2718_v45, %v2720_v42 }
 0x4a7   : > { %v2789_v5 = vsel %vm419_vm3, %v2786_v62, %v2788_v14  ;;  %v2787_v35 = vsel %vm419_vm3, %v2785_v48, %v2786_v62 }
 0x4a8   : > { %2646 = vrot.lane.b32.xlu1 %v2631_v31, %s6351_s8  ;;  %2752 = vrot.lane.b32.xlu0 %v2719_v40, %s6353_s20 }
 0x4ac   : > { %2678 = vrot.lane.b32.xlu1 %v2514_v49, %s6352_s13  ;;  %2754 = vrot.lane.b32.xlu0 %v2721_v43, %s6353_s20 }
 0x4b0   : > { %2816 = vrot.lane.b32.xlu1 %v2782_v63, %s6354_s5  ;;  %2822 = vrot.lane.b32.xlu0 %v2789_v5, %s6354_s5 }
 0x4b2   : > { %v2430_v31 = vpop.permute.xlu1 %2429  ;;  %v2428_v33 = vpop.permute.xlu0 %2427 }
 0x4b3   : > { %v2464_v28 = vsel %vm1365_vm12, %v7344_v15, %v2430_v31  ;;  %v2463_v21 = vsel %vm1365_vm12, %v7348_v12, %v2428_v33 }
 0x4b4   : > { %v7976_v9 = vsel %vm2467_vm14, %v2464_v28, %v7344_v15  ;;  %2682 = vrot.lane.b32.xlu1 %v2517_v52, %s6352_s13  ;;  %v7984_v29 = vsel %vm2467_vm14, %v2463_v21, %v7348_v12 }
 0x4b5   : > { %v2519_v49 = vrot.slane %v7976_v9, 7  ;;  %v2518_v41 = vrot.slane %v7984_v29, 7 }
 0x4b7   : > { %v2550_v15 = vsel %vm257_vm1, 0.0, %v2518_v41  ;;  %v2520_v61 = vsel %vm257_vm1, %v2518_v41, %v2519_v49  ;;  %v2558_v25 = vsel %vm257_vm1, %v2519_v49, 0.0  ;;  %v221_v49 = vld [vmem:[%s9388_s3 + $0x4] sm:$0x3] }
 0x4b8   : > { %2820 = vrot.lane.b32.xlu1 %v2787_v35, %s6354_s5  ;;  %2684 = vrot.lane.b32.xlu0 %v2550_v15, %s6352_s13  ;;  %v2722_v46 = vrot.slane %v2550_v15, 1  ;;  %v2723_v1 = vrot.slane %v2520_v61, 1  ;;  %v2790_v19 = vrot.slane %v2550_v15, 2  ;;  %v2791_v27 = vrot.slane %v2520_v61, 2 }
 0x4b9   : > { %v2725_v6 = vrot.slane %v2558_v25, 1  ;;  %v2793_v52 = vrot.slane %v2558_v25, 2 }
 0x4ba   : > { %v2724_v12 = vsel %vm336_vm2, %v2722_v46, %v2723_v1  ;;  %v2792_v57 = vsel %vm419_vm3, %v2790_v19, %v2791_v27 }
 0x4bb   : > { %v2726_v39 = vsel %vm336_vm2, %v2723_v1, %v2725_v6 }
 0x4bc   : > { %2686 = vrot.lane.b32.xlu1 %v2520_v61, %s6352_s13  ;;  %2756 = vrot.lane.b32.xlu0 %v2724_v12, %s6353_s20  ;;  %v3352_v12 = vrot.slane %v221_v49, %v6746_v23 }
 0x4be   : > { %v2434_v53 = vpop.permute.xlu1 %2433  ;;  %v2432_v0 = vpop.permute.xlu0 %2431 }
 0x4bf   : > { %v2466_v51 = vsel %vm1365_vm12, %v7372_v18, %v2434_v53  ;;  %v2465_v11 = vsel %vm1365_vm12, %v7376_v20, %v2432_v0 }
 0x4c0   : > { %v8003_v26 = vsel %vm2467_vm14, %v2466_v51, %v7372_v18  ;;  %v8007_v58 = vsel %vm2467_vm14, %v2465_v11, %v7376_v20  ;;  %2824 = vrot.lane.b32.xlu1 %v2792_v57, %s6354_s5  ;;  %2758 = vrot.lane.b32.xlu0 %v2726_v39, %s6353_s20  ;;  %v2794_v20 = vsel %vm419_vm3, %v2791_v27, %v2793_v52 }
 0x4c1   : > { %v2522_v34 = vrot.slane %v8003_v26, 7  ;;  %v2521_v47 = vrot.slane %v8007_v58, 7  ;;  %v3379_v51 = vrot.slane %v221_v49, %v6757_v36 }
 0x4c2   : > { %v2663_v45 = vpop.permute.xlu1 %2662  ;;  %v2661_v40 = vpop.permute.xlu0 %2660 }
 0x4c3   : > { %v2559_v18 = vsel %vm257_vm1, %v2522_v34, 0.0  ;;  %v2523_v42 = vsel %vm257_vm1, %v2521_v47, %v2522_v34  ;;  %v2551_v62 = vsel %vm257_vm1, 0.0, %v2521_v47  ;;  %v2865_v33 = vsel %vm690_vm6, %v6695_v59, %v2663_v45 }
 0x4c4   : > { %2690 = vrot.lane.b32.xlu1 %v2523_v42, %s6352_s13  ;;  %v2728_v32 = vrot.slane %v2523_v42, 1  ;;  %v2730_v43 = vrot.slane %v2559_v18, 1  ;;  %2826 = vrot.lane.b32.xlu0 %v2794_v20, %s6354_s5  ;;  %v2796_v31 = vrot.slane %v2523_v42, 2  ;;  %v2798_v48 = vrot.slane %v2559_v18, 2 }
 0x4c5   : > { %v2727_v28 = vrot.slane %v2551_v62, 1  ;;  %v2864_v21 = vsel %vm690_vm6, %v6695_v59, %v2661_v40  ;;  %v2795_v19 = vrot.slane %v2551_v62, 2 }
 0x4c6   : > { %v2735_v14 = vpop.permute.xlu1 %2734  ;;  %v2733_v63 = vpop.permute.xlu0 %2732  ;;  %v2731_v5 = vsel %vm336_vm2, %v2728_v32, %v2730_v43  ;;  %v2799_v1 = vsel %vm419_vm3, %v2796_v31, %v2798_v48 }
 0x4c7   : > { %v2881_v41 = vsel %vm707_vm7, %v2865_v33, %v2735_v14  ;;  %v2880_v35 = vsel %vm707_vm7, %v2864_v21, %v2733_v63  ;;  %v2729_v27 = vsel %vm336_vm2, %v2727_v28, %v2728_v32  ;;  %v2797_v0 = vsel %vm419_vm3, %v2795_v19, %v2796_v31 }
 0x4c8   : > { %2762 = vrot.lane.b32.xlu1 %v2731_v5, %s6353_s20  ;;  %2688 = vrot.lane.b32.xlu0 %v2551_v62, %s6352_s13 }
 0x4ca   : > { %v2803_v15 = vpop.permute.xlu1 %2802  ;;  %v2801_v61 = vpop.permute.xlu0 %2800 }
 0x4cb   : > { %v2897_v25 = vsel %vm724_vm8, %v2881_v41, %v2803_v15  ;;  %v2896_v46 = vsel %vm724_vm8, %v2880_v35, %v2801_v61 }
 0x4cc   : > { %2830 = vrot.lane.b32.xlu1 %v2799_v1, %s6354_s5  ;;  %5955 = vmatprep.mubr.msk.f32.mxu0 %vm760_vm9, %v2896_v46 }
 0x4cd   : > { %2760 = vrot.lane.b32.xlu0 %v2729_v27, %s6353_s20  ;;  %5956 = vmatmul.mubr.msk.f32.vlgmr.msra.gmra.mrb[16].mxu0 %vm760_vm9, %v2897_v25 }
 0x4ce   : > { %v8041_v6 = vpop.permute.xlu1 %2588  ;;  %v8043_v53 = vpop.permute.xlu0 %2590 }
 0x4d0   : > { %3358 = vbcast.lane.b32.xlu1 %v3352_v12, 264 }
 0x4d1   : > { %2828 = vrot.lane.b32.xlu0 %v2797_v0, %s6354_s5 }
 0x4d2   : > { %v8048_v11 = vpop.permute.xlu1 %2632  ;;  %v2665_v57 = vpop.permute.xlu0 %2664 }
 0x4d3   : > { %v2866_v34 = vsel %vm690_vm6, %v6695_v59, %v2665_v57 }
 0x4d4   : > { %3385 = vbcast.lane.b32.xlu1 %v3379_v51, 264 }
 0x4d5   : > { %3354 = vbcast.lane.b32.xlu0 %v3352_v12, 256 }
 0x4d6   : > { %v8050_v39 = vpop.permute.xlu1 %2634  ;;  %v2737_v52 = vpop.permute.xlu0 %2736 }
 0x4d7   : > { %v2882_v47 = vsel %vm707_vm7, %v2866_v34, %v2737_v52 }
 0x4d9   : > { %3381 = vbcast.lane.b32.xlu0 %v3379_v51, 256 }
 0x4da   : > { %v2667_v45 = vpop.permute.xlu1 %2666  ;;  %v2805_v40 = vpop.permute.xlu0 %2804 }
 0x4db   : > { %v2898_v18 = vsel %vm724_vm8, %v2882_v47, %v2805_v40  ;;  %v2867_v32 = vsel %vm690_vm6, %v6695_v59, %v2667_v45 }
 0x4dc   : > { %5958 = vmatprep.mubr.msk.f32.mxu0 %vm760_vm9, %v2898_v18 }
 0x4de   : > { %v2739_v42 = vpop.permute.xlu1 %2738  ;;  %v8057_v20 = vpop.permute.xlu0 %2594 }
 0x4df   : > { %v2883_v43 = vsel %vm707_vm7, %v2867_v32, %v2739_v42 }
 0x4e2   : > { %v2807_v62 = vpop.permute.xlu1 %2806  ;;  %v2669_v14 = vpop.permute.xlu0 %2668 }
 0x4e3   : > { %v2899_v63 = vsel %vm724_vm8, %v2883_v43, %v2807_v62  ;;  %v2868_v48 = vsel %vm690_vm6, %v6695_v59, %v2669_v14 }
 0x4e4   : > { %5959 = vmatmul.mubr.msk.f32.gmra.mrb[18].mxu0 %vm760_vm9, %v2899_v63 }
 0x4e6   : > { %v8064_v5 = vpop.permute.xlu1 %2592  ;;  %v2741_v31 = vpop.permute.xlu0 %2740 }
 0x4e7   : > { %v2884_v28 = vsel %vm707_vm7, %v2868_v48, %v2741_v31 }
 0x4ea   : > { %v2637_v33 = vpop.permute.xlu1 %2636  ;;  %v2809_v21 = vpop.permute.xlu0 %2808 }
 0x4eb   : > { %v2900_v49 = vsel %vm724_vm8, %v2884_v28, %v2809_v21 }
 0x4ec   : > { %5961 = vmatprep.mubr.msk.f32.mxu0 %vm760_vm9, %v2900_v49 }
 0x4ee   : > { %v2639_v41 = vpop.permute.xlu1 %2638  ;;  %v8071_v35 = vpop.permute.xlu0 %2598 }
 0x4f2   : > { %v2671_v15 = vpop.permute.xlu1 %2670  ;;  %v2673_v61 = vpop.permute.xlu0 %2672 }
 0x4f3   : > { %v2869_v1 = vsel %vm690_vm6, %v6695_v59, %v2671_v15  ;;  %v2870_v32 = vsel %vm690_vm6, %v6695_v59, %v2673_v61 }
 0x4f6   : > { %v2743_v25 = vpop.permute.xlu1 %2742  ;;  %v2745_v46 = vpop.permute.xlu0 %2744 }
 0x4f7   : > { %v2885_v19 = vsel %vm707_vm7, %v2869_v1, %v2743_v25  ;;  %v2886_v62 = vsel %vm707_vm7, %v2870_v32, %v2745_v46  ;;  %v2849_v46 = vsel %vm658_vm4, %v7776_v30, %v8043_v53 }
 0x4f8   : > { %v2857_v1 = vsel %vm674_vm5, %v2849_v46, %v8050_v39 }
 0x4fa   : > { %v2811_v27 = vpop.permute.xlu1 %2810  ;;  %v2747_v12 = vpop.permute.xlu0 %2746 }
 0x4fb   : > { %v2901_v0 = vsel %vm724_vm8, %v2885_v19, %v2811_v27  ;;  %v2848_v27 = vsel %vm658_vm4, %v7773_v55, %v8041_v6  ;;  %v2851_v55 = vsel %vm658_vm4, %v7814_v56, %v8057_v20 }
 0x4fc   : > { %5962 = vmatmul.mubr.msk.f32.gmra.mrb[20].mxu0 %vm760_vm9, %v2901_v0  ;;  %v2856_v0 = vsel %vm674_vm5, %v2848_v27, %v8048_v11  ;;  %v2859_v6 = vsel %vm674_vm5, %v2851_v55, %v2639_v41  ;;  %v2853_v27 = vsel %vm658_vm4, %v7852_v24, %v8071_v35 }
 0x4fe   : > { %v2597_v51 = vpop.permute.xlu1 %2596  ;;  %v2815_v57 = vpop.permute.xlu0 %2814 }
 0x502   : > { %v2641_v52 = vpop.permute.xlu1 %2640  ;;  %v8078_v34 = vpop.permute.xlu0 %2602 }
 0x503   : > { %v2855_v35 = vsel %vm658_vm4, %v7890_v37, %v8078_v34  ;;  %v8160_v37 = vld [vmem:[%s9387_s2 + $0x4] sm:$0x3] }
 0x504   : > { %v8164_v34 = vrot.slane %v8160_v37, %v6746_v23 }
 0x506   : > { %v8080_v47 = vpop.permute.xlu1 %2642  ;;  %v2677_v45 = vpop.permute.xlu0 %2676 }
 0x50a   : > { %v2675_v40 = vpop.permute.xlu1 %2674  ;;  %v2749_v18 = vpop.permute.xlu0 %2748 }
 0x50b   : > { %v2871_v42 = vsel %vm690_vm6, %v6695_v59, %v2675_v40 }
 0x50c   : > { %v2887_v43 = vsel %vm707_vm7, %v2871_v42, %v2747_v12 }
 0x50d   : > { %v2903_v48 = vsel %vm724_vm8, %v2887_v43, %v2815_v57  ;;  %v2872_v57 = vsel %vm690_vm6, %v2856_v0, %v2677_v45  ;;  %v2850_v45 = vsel %vm658_vm4, %v7811_v8, %v8064_v5  ;;  %v2852_v5 = vsel %vm658_vm4, %v7849_v4, %v2597_v51 }
 0x50e   : > { %v2813_v14 = vpop.permute.xlu1 %2812  ;;  %v2751_v63 = vpop.permute.xlu0 %2750  ;;  %v2888_v30 = vsel %vm707_vm7, %v2872_v57, %v2749_v18  ;;  %v2861_v4 = vsel %vm674_vm5, %v2853_v27, %v8080_v47 }
 0x50f   : > { %v2902_v31 = vsel %vm724_vm8, %v2886_v62, %v2813_v14  ;;  %v2858_v62 = vsel %vm674_vm5, %v2850_v45, %v2637_v33 }
 0x510   : > { %5964 = vmatprep.mubr.msk.f32.mxu0 %vm760_vm9, %v2902_v31 }
 0x511   : > { %5965 = vmatmul.mubr.msk.f32.gmra.mrb[22].mxu0 %vm760_vm9, %v2903_v48 }
 0x512   : > { %v2601_v28 = vpop.permute.xlu1 %2600  ;;  %v2819_v21 = vpop.permute.xlu0 %2818 }
 0x513   : > { %v2854_v24 = vsel %vm658_vm4, %v7887_v13, %v2601_v28 }
 0x516   : > { %v2645_v49 = vpop.permute.xlu1 %2644  ;;  %v2681_v15 = vpop.permute.xlu0 %2680 }
 0x517   : > { %v2874_v14 = vsel %vm690_vm6, %v2858_v62, %v2681_v15  ;;  %v2862_v47 = vsel %vm674_vm5, %v2854_v24, %v2645_v49 }
 0x51a   : > { %v2647_v25 = vpop.permute.xlu1 %2646  ;;  %v2753_v61 = vpop.permute.xlu0 %2752 }
 0x51b   : > { %v2890_v56 = vsel %vm707_vm7, %v2874_v14, %v2753_v61 }
 0x51e   : > { %v2679_v19 = vpop.permute.xlu1 %2678  ;;  %v2755_v42 = vpop.permute.xlu0 %2754 }
 0x51f   : > { %v2873_v12 = vsel %vm690_vm6, %v2857_v1, %v2679_v19 }
 0x520   : > { %v2889_v40 = vsel %vm707_vm7, %v2873_v12, %v2751_v63 }
 0x521   : > { %v2905_v32 = vsel %vm724_vm8, %v2889_v40, %v2819_v21  ;;  %v2860_v21 = vsel %vm674_vm5, %v2852_v5, %v2641_v52 }
 0x522   : > { %v2817_v53 = vpop.permute.xlu1 %2816  ;;  %v2823_v18 = vpop.permute.xlu0 %2822 }
 0x523   : > { %v2904_v39 = vsel %vm724_vm8, %v2888_v30, %v2817_v53  ;;  %v2863_v53 = vsel %vm674_vm5, %v2855_v35, %v2647_v25 }
 0x524   : > { %5967 = vmatprep.mubr.msk.f32.mxu0 %vm760_vm9, %v2904_v39 }
 0x525   : > { %5968 = vmatmul.mubr.msk.f32.gmra.mrb[24].mxu0 %vm760_vm9, %v2905_v32 }
 0x526   : > { %v2683_v11 = vpop.permute.xlu1 %2682 }
 0x527   : > { %v2875_v43 = vsel %vm690_vm6, %v2859_v6, %v2683_v11 }
 0x528   : > { %v2891_v63 = vsel %vm707_vm7, %v2875_v43, %v2755_v42 }
 0x529   : > { %v2907_v48 = vsel %vm724_vm8, %v2891_v63, %v2823_v18 }
 0x52a   : > { %v2821_v20 = vpop.permute.xlu1 %2820  ;;  %v2685_v41 = vpop.permute.xlu0 %2684 }
 0x52b   : > { %v2906_v31 = vsel %vm724_vm8, %v2890_v56, %v2821_v20  ;;  %v2876_v15 = vsel %vm690_vm6, %v2860_v21, %v2685_v41 }
 0x52c   : > { %5970 = vmatprep.mubr.msk.f32.mxu0 %vm760_vm9, %v2906_v31 }
 0x52d   : > { %5971 = vmatmul.mubr.msk.f32.gmra.mrb[26].mxu0 %vm760_vm9, %v2907_v48 }
 0x52e   : > { %v2687_v8 = vpop.permute.xlu1 %2686  ;;  %v2757_v33 = vpop.permute.xlu0 %2756 }
 0x52f   : > { %v2892_v61 = vsel %vm707_vm7, %v2876_v15, %v2757_v33  ;;  %v2877_v51 = vsel %vm690_vm6, %v2861_v4, %v2687_v8 }
 0x532   : > { %v2825_v46 = vpop.permute.xlu1 %2824  ;;  %v2759_v19 = vpop.permute.xlu0 %2758 }
 0x533   : > { %v2908_v1 = vsel %vm724_vm8, %v2892_v61, %v2825_v46  ;;  %v2893_v12 = vsel %vm707_vm7, %v2877_v51, %v2759_v19 }
 0x534   : > { %5973 = vmatprep.mubr.msk.f32.mxu0 %vm760_vm9, %v2908_v1 }
 0x536   : > { %v2691_v52 = vpop.permute.xlu1 %2690  ;;  %v2827_v0 = vpop.permute.xlu0 %2826 }
 0x537   : > { %v2909_v57 = vsel %vm724_vm8, %v2893_v12, %v2827_v0  ;;  %v2879_v55 = vsel %vm690_vm6, %v2863_v53, %v2691_v52 }
 0x538   : > { %5974 = vmatmul.mubr.msk.f32.gmra.mrb[28].mxu0 %vm760_vm9, %v2909_v57 }
 0x53a   : > { %v2689_v40 = vpop.permute.xlu0 %2688  ;;  %v2763_v42 = vpop.permute.xlu1 %2762 }
 0x53b   : > { %v2878_v39 = vsel %vm690_vm6, %v2862_v47, %v2689_v40  ;;  %v2895_v45 = vsel %vm707_vm7, %v2879_v55, %v2763_v42 }
 0x53e   : > { %v2831_v32 = vpop.permute.xlu1 %2830 }
 0x53f   : > { %v2761_v30 = vpop.permute.xlu0 %2760  ;;  %v2911_v28 = vsel %vm724_vm8, %v2895_v45, %v2831_v32 }
 0x540   : > { %v2894_v6 = vsel %vm707_vm7, %v2878_v39, %v2761_v30 }
 0x543   : > { %v2829_v11 = vpop.permute.xlu0 %2828 }
 0x544   : > { %v2910_v13 = vsel %vm724_vm8, %v2894_v6, %v2829_v11 }
 0x545   : > { %5976 = vmatprep.mubr.msk.f32.mxu0 %vm760_vm9, %v2910_v13 }
 0x546   : > { %5977 = vmatmul.mubr.msk.f32.gmra.mrb[30].mxu0 %vm760_vm9, %v2911_v28 }
 0x5a0   : > { %v5957_v49 = vpop.f32.mrb[16].mxu0 }
 0x5a1   : > { %v3052_v25 = vadd.f32 %v5957_v49, %v8164_v34  ;;  %v3046_v18 = vpop.f32.mrb[17].mxu0 }
 0x5a2   : > { %v3047_v43 = vadd.f32 %v3046_v18, %v8164_v34 }
 0x5a3   : > { %v3126_v62 = vsel %vm224_vm0, %v3052_v25, 0.0 }
 0x5a4   : > { %v3125_v14 = vsel %vm224_vm0, %v3047_v43, 0.0 }
 0x5a5   : > { %v3127_v63 = vadd.f32 %v3126_v62, %v3125_v14 }
 0x5a7   : > { %v3128_v56 = vrot.slane %v3127_v63, 4 }
 0x5a9   : > { %v3129_v20 = vadd.f32 %v3128_v56, %v3127_v63 }
 0x5ab   : > { %v3130_v31 = vrot.slane %v3129_v20, 2 }
 0x5ad   : > { %v3131_v41 = vadd.f32 %v3130_v31, %v3129_v20 }
 0x5af   : > { %v3132_v48 = vrot.slane %v3131_v41, 1 }
 0x5b1   : > { %v3133_v8 = vadd.f32 %v3132_v48, %v3131_v41 }
 0x5b3   : > { %v3197_v5 = vmul.f32 0.0625, %v3133_v8  ;;  %v8189_v8 = vpop.permute.xlu1 %3358 }
 0x5b5   : > { %v3205_v33 = vsub.f32 %v3047_v43, %v3197_v5  ;;  %v3206_v21 = vsub.f32 %v3052_v25, %v3197_v5  ;;  %v8191_v5 = vpop.permute.xlu0 %3354 }
 0x5b7   : > { %v3221_v15 = vmul.f32 %v3205_v33, %v3205_v33  ;;  %v3222_v61 = vmul.f32 %v3206_v21, %v3206_v21  ;;  %v5960_v46 = vpop.f32.mrb[18].mxu0 }
 0x5b8   : > { %v3062_v1 = vadd.f32 %v5960_v46, %v8164_v34  ;;  %v3056_v19 = vpop.f32.mrb[19].mxu0 }
 0x5b9   : > { %v3237_v27 = vsel %vm224_vm0, %v3221_v15, 0.0  ;;  %v3238_v4 = vsel %vm224_vm0, %v3222_v61, 0.0  ;;  %v3057_v51 = vadd.f32 %v3056_v19, %v8164_v34 }
 0x5ba   : > { %v3239_v52 = vadd.f32 %v3238_v4, %v3237_v27  ;;  %v3135_v12 = vsel %vm224_vm0, %v3062_v1, 0.0 }
 0x5bb   : > { %v3134_v0 = vsel %vm224_vm0, %v3057_v51, 0.0 }
 0x5bc   : > { %v3240_v57 = vrot.slane %v3239_v52, 4  ;;  %v3136_v40 = vadd.f32 %v3135_v12, %v3134_v0  ;;  %v8194_v0 = vpop.permute.xlu1 %3385 }
 0x5be   : > { %v3241_v42 = vadd.f32 %v3240_v57, %v3239_v52  ;;  %v3137_v30 = vrot.slane %v3136_v40, 4  ;;  %v8196_v57 = vpop.permute.xlu0 %3381 }
 0x5c0   : > { %v3242_v24 = vrot.slane %v3241_v42, 2  ;;  %v3138_v35 = vadd.f32 %v3137_v30, %v3136_v40  ;;  %v8200_v40 = vrot.slane %v8160_v37, %v6757_v36 }
 0x5c2   : > { %v3243_v47 = vadd.f32 %v3242_v24, %v3241_v42  ;;  %v3139_v53 = vrot.slane %v3138_v35, 2 }
 0x5c4   : > { %v3244_v39 = vrot.slane %v3243_v47, 1  ;;  %v3140_v32 = vadd.f32 %v3139_v53, %v3138_v35 }
 0x5c6   : > { %v3245_v55 = vadd.f32 %v3244_v39, %v3243_v47  ;;  %v3141_v6 = vrot.slane %v3140_v32, 1 }
 0x5c8   : > { %v3309_v11 = vmul.f32 0.0625, %v3245_v55  ;;  %v3142_v45 = vadd.f32 %v3141_v6, %v3140_v32 }
 0x5ca   : > { %v3317_v13 = vadd.f32 1e-05, %v3309_v11  ;;  %v3198_v28 = vmul.f32 0.0625, %v3142_v45 }
 0x5cc   : > { %6293 = vrsqrt.f32 %v3317_v13  ;;  %v8176_v49 = vsub.f32 %v3057_v51, %v3198_v28  ;;  %v8178_v25 = vsub.f32 %v3062_v1, %v3198_v28 }
 0x5ce   : > { %v3223_v18 = vmul.f32 %v8176_v49, %v8176_v49  ;;  %v3224_v43 = vmul.f32 %v8178_v25, %v8178_v25 }
 0x5cf   : > { %v5963_v62 = vpop.f32.mrb[20].mxu0 }
 0x5d0   : > { %v3246_v14 = vsel %vm224_vm0, %v3223_v18, 0.0  ;;  %v3247_v63 = vsel %vm224_vm0, %v3224_v43, 0.0  ;;  %v3072_v56 = vadd.f32 %v5963_v62, %v8164_v34  ;;  %v3066_v20 = vpop.f32.mrb[21].mxu0 }
 0x5d1   : > { %v3248_v31 = vadd.f32 %v3247_v63, %v3246_v14  ;;  %v3067_v41 = vadd.f32 %v3066_v20, %v8164_v34 }
 0x5d2   : > { %v3144_v48 = vsel %vm224_vm0, %v3072_v56, 0.0 }
 0x5d3   : > { %v3249_v15 = vrot.slane %v3248_v31, 4  ;;  %v3143_v61 = vsel %vm224_vm0, %v3067_v41, 0.0 }
 0x5d4   : > { %v3145_v46 = vadd.f32 %v3144_v48, %v3143_v61 }
 0x5d5   : > { %v3250_v1 = vadd.f32 %v3249_v15, %v3248_v31 }
 0x5d6   : > { %v6294_v19 = vpop.eup %6293  ;;  %v3146_v27 = vrot.slane %v3145_v46, 4 }
 0x5d7   : > { %v3333_v4 = vmul.f32 %v6294_v19, %v3205_v33  ;;  %v3334_v51 = vmul.f32 %v6294_v19, %v3206_v21  ;;  %v3251_v52 = vrot.slane %v3250_v1, 2 }
 0x5d8   : > { %v3147_v12 = vadd.f32 %v3146_v27, %v3145_v46 }
 0x5d9   : > { %v3252_v42 = vadd.f32 %v3251_v52, %v3250_v1  ;;  %v3361_v30 = vmul.f32 %v8189_v8, %v3334_v51  ;;  %v3360_v24 = vmul.f32 %v8191_v5, %v3333_v4 }
 0x5da   : > { %v3148_v35 = vrot.slane %v3147_v12, 2 }
 0x5db   : > { %v3253_v47 = vrot.slane %v3252_v42, 1  ;;  %v3388_v33 = vadd.f32 %v8194_v0, %v3361_v30  ;;  %v3387_v21 = vadd.f32 %v8196_v57, %v3360_v24 }
 0x5dc   : > { %v3149_v53 = vadd.f32 %v3148_v35, %v3147_v12 }
 0x5dd   : > { %v3254_v39 = vadd.f32 %v3253_v47, %v3252_v42  ;;  %vm3404_vm4 = vcmp.ge.f32.partialorder %v3388_v33, 0.0  ;;  %v3424_v32 = vmul.f32 %v8200_v40, %v3388_v33  ;;  %vm3403_vm5 = vcmp.ge.f32.partialorder %v3387_v21, 0.0 }
 0x5de   : > { %v3150_v55 = vrot.slane %v3149_v53, 1  ;;  %v3423_v37 = vmul.f32 %v8200_v40, %v3387_v21 }
 0x5df   : > { %v3310_v6 = vmul.f32 0.0625, %v3254_v39  ;;  %v3440_v11 = vsel %vm3404_vm4, %v3388_v33, %v3424_v32 }
 0x5e0   : > { %v3151_v45 = vadd.f32 %v3150_v55, %v3149_v53  ;;  %3473 = vrot.lane.b32.xlu1 %v3440_v11, %s6357_s7  ;;  %v3439_v13 = vsel %vm3403_vm5, %v3387_v21, %v3423_v37 }
 0x5e1   : > { %v3318_v28 = vadd.f32 1e-05, %v3310_v6  ;;  %3471 = vrot.lane.b32.xlu0 %v3439_v13, %s6357_s7 }
 0x5e2   : > { %v3199_v18 = vmul.f32 0.0625, %v3151_v45 }
 0x5e3   : > { %6295 = vrsqrt.f32 %v3318_v28 }
 0x5e4   : > { %v8210_v43 = vsub.f32 %v3067_v41, %v3199_v18  ;;  %v8212_v62 = vsub.f32 %v3072_v56, %v3199_v18  ;;  %v5966_v14 = vpop.f32.mrb[22].mxu0 }
 0x5e5   : > { %v3082_v63 = vadd.f32 %v5966_v14, %v8164_v34  ;;  %v3076_v20 = vpop.f32.mrb[23].mxu0 }
 0x5e6   : > { %v3225_v31 = vmul.f32 %v8210_v43, %v8210_v43  ;;  %v3226_v48 = vmul.f32 %v8212_v62, %v8212_v62  ;;  %v3077_v15 = vadd.f32 %v3076_v20, %v8164_v34 }
 0x5e7   : > { %v3153_v61 = vsel %vm224_vm0, %v3082_v63, 0.0 }
 0x5e8   : > { %v3255_v46 = vsel %vm224_vm0, %v3225_v31, 0.0  ;;  %v3256_v41 = vsel %vm224_vm0, %v3226_v48, 0.0  ;;  %v3152_v56 = vsel %vm224_vm0, %v3077_v15, 0.0 }
 0x5e9   : > { %v3257_v1 = vadd.f32 %v3256_v41, %v3255_v46  ;;  %v3154_v19 = vadd.f32 %v3153_v61, %v3152_v56 }
 0x5eb   : > { %v3258_v27 = vrot.slane %v3257_v1, 4  ;;  %v3155_v4 = vrot.slane %v3154_v19, 4 }
 0x5ed   : > { %v6296_v51 = vpop.eup %6295  ;;  %v3259_v52 = vadd.f32 %v3258_v27, %v3257_v1  ;;  %v3156_v12 = vadd.f32 %v3155_v4, %v3154_v19 }
 0x5ee   : > { %v3335_v42 = vmul.f32 %v6296_v51, %v8176_v49  ;;  %v3336_v30 = vmul.f32 %v6296_v51, %v8178_v25 }
 0x5ef   : > { %v3260_v24 = vrot.slane %v3259_v52, 2  ;;  %v3157_v35 = vrot.slane %v3156_v12, 2 }
 0x5f0   : > { %v3363_v47 = vmul.f32 %v8189_v8, %v3336_v30  ;;  %v3362_v33 = vmul.f32 %v8191_v5, %v3335_v42 }
 0x5f1   : > { %v3261_v21 = vadd.f32 %v3260_v24, %v3259_v52  ;;  %v3158_v53 = vadd.f32 %v3157_v35, %v3156_v12 }
 0x5f2   : > { %v3390_v39 = vadd.f32 %v8194_v0, %v3363_v47  ;;  %v3389_v32 = vadd.f32 %v8196_v57, %v3362_v33 }
 0x5f3   : > { %v3262_v55 = vrot.slane %v3261_v21, 1  ;;  %v3159_v37 = vrot.slane %v3158_v53, 1 }
 0x5f4   : > { %vm3406_vm12 = vcmp.ge.f32.partialorder %v3390_v39, 0.0  ;;  %v3426_v6 = vmul.f32 %v8200_v40, %v3390_v39  ;;  %vm3405_vm11 = vcmp.ge.f32.partialorder %v3389_v32, 0.0  ;;  %v3425_v49 = vmul.f32 %v8200_v40, %v3389_v32 }
 0x5f5   : > { %v3263_v25 = vadd.f32 %v3262_v55, %v3261_v21  ;;  %v3160_v11 = vadd.f32 %v3159_v37, %v3158_v53 }
 0x5f6   : > { %v3442_v45 = vsel %vm3406_vm12, %v3390_v39, %v3426_v6  ;;  %v3441_v13 = vsel %vm3405_vm11, %v3389_v32, %v3425_v49 }
 0x5f7   : > { %v3311_v28 = vmul.f32 0.0625, %v3263_v25  ;;  %v3200_v18 = vmul.f32 0.0625, %v3160_v11  ;;  %3477 = vrot.lane.b32.xlu1 %v3442_v45, %s6357_s7  ;;  %3475 = vrot.lane.b32.xlu0 %v3441_v13, %s6357_s7 }
 0x5f8   : > { %v5969_v14 = vpop.f32.mrb[24].mxu0 }
 0x5f9   : > { %v3319_v20 = vadd.f32 1e-05, %v3311_v28  ;;  %v8234_v31 = vsub.f32 %v3077_v15, %v3200_v18  ;;  %v8236_v48 = vsub.f32 %v3082_v63, %v3200_v18  ;;  %v3092_v61 = vadd.f32 %v5969_v14, %v8164_v34  ;;  %v3086_v46 = vpop.f32.mrb[25].mxu0 }
 0x5fa   : > { %v3087_v41 = vadd.f32 %v3086_v46, %v8164_v34 }
 0x5fb   : > { %6297 = vrsqrt.f32 %v3319_v20  ;;  %v3227_v56 = vmul.f32 %v8234_v31, %v8234_v31  ;;  %v3228_v1 = vmul.f32 %v8236_v48, %v8236_v48  ;;  %v3162_v19 = vsel %vm224_vm0, %v3092_v61, 0.0 }
 0x5fc   : > { %v3161_v27 = vsel %vm224_vm0, %v3087_v41, 0.0 }
 0x5fd   : > { %v3264_v15 = vsel %vm224_vm0, %v3227_v56, 0.0  ;;  %v3265_v63 = vsel %vm224_vm0, %v3228_v1, 0.0  ;;  %v3163_v4 = vadd.f32 %v3162_v19, %v3161_v27 }
 0x5fe   : > { %v3266_v51 = vadd.f32 %v3265_v63, %v3264_v15 }
 0x5ff   : > { %v3164_v52 = vrot.slane %v3163_v4, 4 }
 0x600   : > { %v3267_v12 = vrot.slane %v3266_v51, 4  ;;  %v5972_v42 = vpop.f32.mrb[26].mxu0 }
 0x601   : > { %v3165_v30 = vadd.f32 %v3164_v52, %v3163_v4  ;;  %v3102_v24 = vadd.f32 %v5972_v42, %v8164_v34  ;;  %v3096_v35 = vpop.f32.mrb[27].mxu0 }
 0x602   : > { %v3268_v47 = vadd.f32 %v3267_v12, %v3266_v51  ;;  %v3097_v33 = vadd.f32 %v3096_v35, %v8164_v34 }
 0x603   : > { %v3166_v21 = vrot.slane %v3165_v30, 2  ;;  %v3171_v53 = vsel %vm224_vm0, %v3102_v24, 0.0 }
 0x604   : > { %v3269_v39 = vrot.slane %v3268_v47, 2  ;;  %v3170_v32 = vsel %vm224_vm0, %v3097_v33, 0.0 }
 0x605   : > { %v6298_v55 = vpop.eup %6297  ;;  %v3167_v37 = vadd.f32 %v3166_v21, %v3165_v30  ;;  %v3172_v6 = vadd.f32 %v3171_v53, %v3170_v32 }
 0x606   : > { %v3337_v49 = vmul.f32 %v6298_v55, %v8210_v43  ;;  %v3338_v25 = vmul.f32 %v6298_v55, %v8212_v62  ;;  %v3270_v11 = vadd.f32 %v3269_v39, %v3268_v47 }
 0x607   : > { %v3168_v45 = vrot.slane %v3167_v37, 1  ;;  %v3173_v13 = vrot.slane %v3172_v6, 4 }
 0x608   : > { %v3271_v28 = vrot.slane %v3270_v11, 1  ;;  %v3365_v18 = vmul.f32 %v8189_v8, %v3338_v25  ;;  %v3364_v14 = vmul.f32 %v8191_v5, %v3337_v49 }
 0x609   : > { %v3169_v20 = vadd.f32 %v3168_v45, %v3167_v37  ;;  %v3174_v46 = vadd.f32 %v3173_v13, %v3172_v6 }
 0x60a   : > { %v3272_v56 = vadd.f32 %v3271_v28, %v3270_v11  ;;  %v3392_v1 = vadd.f32 %v8194_v0, %v3365_v18  ;;  %v3391_v19 = vadd.f32 %v8196_v57, %v3364_v14 }
 0x60b   : > { %v3201_v27 = vmul.f32 0.0625, %v3169_v20  ;;  %v3175_v15 = vrot.slane %v3174_v46, 2  ;;  %v5975_v63 = vpop.f32.mrb[28].mxu0 }
 0x60c   : > { %v3312_v43 = vmul.f32 0.0625, %v3272_v56  ;;  %vm3408_vm13 = vcmp.ge.f32.partialorder %v3392_v1, 0.0  ;;  %v3428_v62 = vmul.f32 %v8200_v40, %v3392_v1  ;;  %vm3407_vm15 = vcmp.ge.f32.partialorder %v3391_v19, 0.0  ;;  %v3106_v42 = vpop.f32.mrb[29].mxu0 }
 0x60d   : > { %v8259_v4 = vsub.f32 %v3087_v41, %v3201_v27  ;;  %v8261_v51 = vsub.f32 %v3092_v61, %v3201_v27  ;;  %v3176_v52 = vadd.f32 %v3175_v15, %v3174_v46  ;;  %v3112_v12 = vadd.f32 %v5975_v63, %v8164_v34 }
 0x60e   : > { %v3320_v30 = vadd.f32 1e-05, %v3312_v43  ;;  %v3107_v35 = vadd.f32 %v3106_v42, %v8164_v34  ;;  %v3444_v47 = vsel %vm3408_vm13, %v3392_v1, %v3428_v62  ;;  %v3427_v21 = vmul.f32 %v8200_v40, %v3391_v19 }
 0x60f   : > { %v3229_v53 = vmul.f32 %v8259_v4, %v8259_v4  ;;  %v3230_v39 = vmul.f32 %v8261_v51, %v8261_v51  ;;  %v3177_v41 = vrot.slane %v3176_v52, 1  ;;  %v3180_v61 = vsel %vm224_vm0, %v3112_v12, 0.0  ;;  %3481 = vrot.lane.b32.xlu1 %v3444_v47, %s6357_s7 }
 0x610   : > { %6299 = vrsqrt.f32 %v3320_v30  ;;  %v3179_v32 = vsel %vm224_vm0, %v3107_v35, 0.0  ;;  %v3443_v55 = vsel %vm3407_vm15, %v3391_v19, %v3427_v21 }
 0x611   : > { %v3273_v37 = vsel %vm224_vm0, %v3229_v53, 0.0  ;;  %v3274_v6 = vsel %vm224_vm0, %v3230_v39, 0.0  ;;  %v3178_v49 = vadd.f32 %v3177_v41, %v3176_v52  ;;  %v3181_v25 = vadd.f32 %v3180_v61, %v3179_v32  ;;  %3479 = vrot.lane.b32.xlu0 %v3443_v55, %s6357_s7 }
 0x612   : > { %v3275_v11 = vadd.f32 %v3274_v6, %v3273_v37 }
 0x613   : > { %v3202_v45 = vmul.f32 0.0625, %v3178_v49  ;;  %v3182_v13 = vrot.slane %v3181_v25, 4 }
 0x614   : > { %v3276_v28 = vrot.slane %v3275_v11, 4 }
 0x615   : > { %v8277_v18 = vsub.f32 %v3097_v33, %v3202_v45  ;;  %v8279_v14 = vsub.f32 %v3102_v24, %v3202_v45  ;;  %v3183_v20 = vadd.f32 %v3182_v13, %v3181_v25 }
 0x616   : > { %v3277_v46 = vadd.f32 %v3276_v28, %v3275_v11 }
 0x617   : > { %v3231_v56 = vmul.f32 %v8277_v18, %v8277_v18  ;;  %v3232_v1 = vmul.f32 %v8279_v14, %v8279_v14  ;;  %v3184_v19 = vrot.slane %v3183_v20, 2 }
 0x618   : > { %v3278_v27 = vrot.slane %v3277_v46, 2 }
 0x619   : > { %v3282_v15 = vsel %vm224_vm0, %v3231_v56, 0.0  ;;  %v3283_v43 = vsel %vm224_vm0, %v3232_v1, 0.0  ;;  %v3185_v63 = vadd.f32 %v3184_v19, %v3183_v20  ;;  %v5978_v62 = vpop.f32.mrb[30].mxu0 }
 0x61a   : > { %v6300_v33 = vpop.eup %6299  ;;  %v3279_v52 = vadd.f32 %v3278_v27, %v3277_v46  ;;  %v3284_v24 = vadd.f32 %v3283_v43, %v3282_v15  ;;  %v3122_v42 = vadd.f32 %v5978_v62, %v8164_v34  ;;  %v3116_v30 = vpop.f32.mrb[31].mxu0 }
 0x61b   : > { %v3339_v47 = vmul.f32 %v6300_v33, %v8234_v31  ;;  %v3340_v21 = vmul.f32 %v6300_v33, %v8236_v48  ;;  %v3186_v53 = vrot.slane %v3185_v63, 1  ;;  %v3117_v39 = vadd.f32 %v3116_v30, %v8164_v34 }
 0x61c   : > { %v3280_v41 = vrot.slane %v3279_v52, 1  ;;  %v3285_v61 = vrot.slane %v3284_v24, 4  ;;  %v3189_v32 = vsel %vm224_vm0, %v3122_v42, 0.0 }
 0x61d   : > { %v3366_v55 = vmul.f32 %v8191_v5, %v3339_v47  ;;  %v3187_v37 = vadd.f32 %v3186_v53, %v3185_v63  ;;  %v3188_v6 = vsel %vm224_vm0, %v3117_v39, 0.0  ;;  %v3367_v49 = vmul.f32 %v8189_v8, %v3340_v21 }
 0x61e   : > { %v3281_v25 = vadd.f32 %v3280_v41, %v3279_v52  ;;  %v3286_v11 = vadd.f32 %v3285_v61, %v3284_v24  ;;  %v3190_v45 = vadd.f32 %v3189_v32, %v3188_v6 }
 0x61f   : > { %v3203_v31 = vmul.f32 0.0625, %v3187_v37  ;;  %v3394_v48 = vadd.f32 %v8194_v0, %v3367_v49  ;;  %v3393_v13 = vadd.f32 %v8196_v57, %v3366_v55 }
 0x620   : > { %v3313_v34 = vmul.f32 0.0625, %v3281_v25  ;;  %v3287_v28 = vrot.slane %v3286_v11, 2  ;;  %v3191_v20 = vrot.slane %v3190_v45, 4 }
 0x621   : > { %v8297_v46 = vsub.f32 %v3107_v35, %v3203_v31  ;;  %v8299_v56 = vsub.f32 %v3112_v12, %v3203_v31  ;;  %vm3410_vm10 = vcmp.ge.f32.partialorder %v3394_v48, 0.0  ;;  %v3430_v1 = vmul.f32 %v8200_v40, %v3394_v48 }
 0x622   : > { %v3321_v19 = vadd.f32 1e-05, %v3313_v34  ;;  %v3288_v27 = vadd.f32 %v3287_v28, %v3286_v11  ;;  %v3192_v15 = vadd.f32 %v3191_v20, %v3190_v45  ;;  %vm3409_vm4 = vcmp.ge.f32.partialorder %v3393_v13, 0.0 }
 0x623   : > { %v3233_v43 = vmul.f32 %v8297_v46, %v8297_v46  ;;  %v3234_v63 = vmul.f32 %v8299_v56, %v8299_v56  ;;  %v3446_v62 = vsel %vm3410_vm10, %v3394_v48, %v3430_v1  ;;  %v3429_v33 = vmul.f32 %v8200_v40, %v3393_v13 }
 0x624   : > { %6301 = vrsqrt.f32 %v3321_v19  ;;  %v3289_v35 = vrot.slane %v3288_v27, 1  ;;  %v3193_v12 = vrot.slane %v3192_v15, 2  ;;  %3485 = vrot.lane.b32.xlu1 %v3446_v62, %s6357_s7 }
 0x625   : > { %v3291_v52 = vsel %vm224_vm0, %v3233_v43, 0.0  ;;  %v3292_v24 = vsel %vm224_vm0, %v3234_v63, 0.0  ;;  %v3445_v30 = vsel %vm3409_vm4, %v3393_v13, %v3429_v33  ;;  %vm3535_vm4 = vcmask 130048  }
 0x626   : > { %v3290_v47 = vadd.f32 %v3289_v35, %v3288_v27  ;;  %v3293_v21 = vadd.f32 %v3292_v24, %v3291_v52  ;;  %v3194_v53 = vadd.f32 %v3193_v12, %v3192_v15  ;;  %3483 = vrot.lane.b32.xlu0 %v3445_v30, %s6357_s7 }
 0x628   : > { %v3314_v41 = vmul.f32 0.0625, %v3290_v47  ;;  %v3294_v61 = vrot.slane %v3293_v21, 4  ;;  %v3195_v32 = vrot.slane %v3194_v53, 1 }
 0x62a   : > { %v3322_v55 = vadd.f32 1e-05, %v3314_v41  ;;  %v3295_v37 = vadd.f32 %v3294_v61, %v3293_v21  ;;  %v3196_v6 = vadd.f32 %v3195_v32, %v3194_v53 }
 0x62c   : > { %6303 = vrsqrt.f32 %v3322_v55  ;;  %v3296_v49 = vrot.slane %v3295_v37, 2  ;;  %v3204_v25 = vmul.f32 0.0625, %v3196_v6  ;;  %v5596_v55 = vld [vmem:[%s9386_s1 + $0x168] sm:$0xff] }
 0x62e   : > { %v6302_v11 = vpop.eup %6301  ;;  %v3297_v45 = vadd.f32 %v3296_v49, %v3295_v37  ;;  %v8311_v31 = vsub.f32 %v3117_v39, %v3204_v25  ;;  %v8313_v48 = vsub.f32 %v3122_v42, %v3204_v25 }
 0x62f   : > { %v3341_v13 = vmul.f32 %v6302_v11, %v8259_v4  ;;  %v3342_v34 = vmul.f32 %v6302_v11, %v8261_v51 }
 0x630   : > { %v3298_v28 = vrot.slane %v3297_v45, 1  ;;  %v3235_v20 = vmul.f32 %v8311_v31, %v8311_v31  ;;  %v3236_v1 = vmul.f32 %v8313_v48, %v8313_v48 }
 0x631   : > { %v3368_v19 = vmul.f32 %v8191_v5, %v3341_v13  ;;  %v3369_v27 = vmul.f32 %v8189_v8, %v3342_v34 }
 0x632   : > { %v3299_v15 = vadd.f32 %v3298_v28, %v3297_v45  ;;  %v3300_v39 = vsel %vm224_vm0, %v3235_v20, 0.0  ;;  %v3301_v42 = vsel %vm224_vm0, %v3236_v1, 0.0  ;;  %v5598_v20 = vld [vmem:[%s9386_s1 + $0x178] sm:$0xff]  ;;  %v5599_v1 = vld [vmem:[%s9386_s1 + $0x180] sm:$0xff] }
 0x633   : > { %v3302_v43 = vadd.f32 %v3301_v42, %v3300_v39  ;;  %v3396_v4 = vadd.f32 %v8194_v0, %v3369_v27  ;;  %v3395_v51 = vadd.f32 %v8196_v57, %v3368_v19  ;;  %v6175_v27 = vpack.c.bf16 %v5599_v1, %v5598_v20 }
 0x634   : > { %v3315_v63 = vmul.f32 0.0625, %v3299_v15 }
 0x635   : > { %v3303_v62 = vrot.slane %v3302_v43, 4  ;;  %vm3412_vm5 = vcmp.ge.f32.partialorder %v3396_v4, 0.0  ;;  %v3432_v33 = vmul.f32 %v8200_v40, %v3396_v4  ;;  %vm3411_vm12 = vcmp.ge.f32.partialorder %v3395_v51, 0.0 }
 0x636   : > { %v6304_v35 = vpop.eup %6303  ;;  %v3323_v12 = vadd.f32 1e-05, %v3315_v63  ;;  %v3431_v52 = vmul.f32 %v8200_v40, %v3395_v51 }
 0x637   : > { %v3343_v24 = vmul.f32 %v6304_v35, %v8277_v18  ;;  %v3344_v30 = vmul.f32 %v6304_v35, %v8279_v14  ;;  %v3304_v47 = vadd.f32 %v3303_v62, %v3302_v43  ;;  %v3448_v21 = vsel %vm3412_vm5, %v3396_v4, %v3432_v33  ;;  %v5597_v18 = vld [vmem:[%s9386_s1 + $0x170] sm:$0xff]  ;;  %v5600_v4 = vld [vmem:[%s9386_s1 + $0x188] sm:$0xff] }
 0x638   : > { %6305 = vrsqrt.f32 %v3323_v12  ;;  %3489 = vrot.lane.b32.xlu1 %v3448_v21, %s6357_s7  ;;  %v3447_v53 = vsel %vm3411_vm12, %v3395_v51, %v3431_v52  ;;  %v6171_v14 = vpack.c.bf16 %v5597_v18, %v5596_v55  ;;  %v5601_v51 = vld [vmem:[%s9386_s1 + $0x190] sm:$0xff] }
 0x639   : > { %v3370_v41 = vmul.f32 %v8191_v5, %v3343_v24  ;;  %v3305_v61 = vrot.slane %v3304_v47, 2  ;;  %3487 = vrot.lane.b32.xlu0 %v3447_v53, %s6357_s7  ;;  %v3371_v32 = vmul.f32 %v8189_v8, %v3344_v30  ;;  %v6179_v63 = vpack.c.bf16 %v5601_v51, %v5600_v4  ;;  %v5604_v53 = vld [vmem:[%s9386_s1 + $0x1a8] sm:$0xff] }
 0x63a   : > { %6172 = vmatprep.subr.bf16.mxu1 %v6171_v14 }
 0x63b   : > { %v3306_v37 = vadd.f32 %v3305_v61, %v3304_v47  ;;  %v3398_v6 = vadd.f32 %v8194_v0, %v3371_v32  ;;  %v3397_v49 = vadd.f32 %v8196_v57, %v3370_v41  ;;  %6174 = vmatpush3.bf16.msra.mxu1 %v6171_v14  ;;  %v5605_v41 = vld [vmem:[%s9386_s1 + $0x1b0] sm:$0xff]  ;;  %v5606_v14 = vld [vmem:[%s9386_s1 + $0x1b8] sm:$0xff] }
 0x63c   : > { %6176 = vmatprep.subr.bf16.mxu1 %v6175_v27  ;;  %v6187_v61 = vpack.c.bf16 %v5605_v41, %v5604_v53 }
 0x63d   : > { %v3307_v25 = vrot.slane %v3306_v37, 1  ;;  %vm3414_vm11 = vcmp.ge.f32.partialorder %v3398_v6, 0.0  ;;  %v3434_v11 = vmul.f32 %v8200_v40, %v3398_v6  ;;  %vm3413_vm13 = vcmp.ge.f32.partialorder %v3397_v49, 0.0 }
 0x63e   : > { %v3433_v45 = vmul.f32 %v8200_v40, %v3397_v49 }
 0x63f   : > { %v3308_v13 = vadd.f32 %v3307_v25, %v3306_v37  ;;  %v3450_v34 = vsel %vm3414_vm11, %v3398_v6, %v3434_v11  ;;  %6178 = vmatpush3.bf16.msra.mxu1 %v6175_v27  ;;  %v5607_v37 = vld [vmem:[%s9386_s1 + $0x1c0] sm:$0xff] }
 0x640   : > { %3493 = vrot.lane.b32.xlu1 %v3450_v34, %s6357_s7  ;;  %v3449_v28 = vsel %vm3413_vm13, %v3397_v49, %v3433_v45  ;;  %6180 = vmatprep.subr.bf16.mxu1 %v6179_v63  ;;  %v6191_v6 = vpack.c.bf16 %v5607_v37, %v5606_v14 }
 0x641   : > { %v3316_v19 = vmul.f32 0.0625, %v3308_v13  ;;  %3491 = vrot.lane.b32.xlu0 %v3449_v28, %s6357_s7 }
 0x642   : > { %v6306_v15 = vpop.eup %6305 }
 0x643   : > { %v3345_v39 = vmul.f32 %v6306_v15, %v8297_v46  ;;  %v3346_v42 = vmul.f32 %v6306_v15, %v8299_v56  ;;  %v3324_v43 = vadd.f32 1e-05, %v3316_v19  ;;  %v5602_v46 = vld [vmem:[%s9386_s1 + $0x198] sm:$0xff]  ;;  %v5603_v56 = vld [vmem:[%s9386_s1 + $0x1a0] sm:$0xff]  ;;  %6182 = vmatpush3.bf16.msra.mxu1 %v6179_v63 }
 0x644   : > { %v6183_v35 = vpack.c.bf16 %v5603_v56, %v5602_v46 }
 0x645   : > { %v3372_v62 = vmul.f32 %v8191_v5, %v3345_v39  ;;  %6307 = vrsqrt.f32 %v3324_v43  ;;  %v3373_v33 = vmul.f32 %v8189_v8, %v3346_v42  ;;  %v5610_v42 = vld [vmem:[%s9386_s1 + $0x1d8] sm:$0xff] }
 0x646   : > { %6184 = vmatprep.subr.bf16.mxu1 %v6183_v35 }
 0x647   : > { %v3400_v12 = vadd.f32 %v8194_v0, %v3373_v33  ;;  %v3399_v52 = vadd.f32 %v8196_v57, %v3372_v62  ;;  %6186 = vmatpush3.bf16.msra.mxu1 %v6183_v35 }
 0x648   : > { %6188 = vmatprep.subr.bf16.mxu1 %v6187_v61 }
 0x649   : > { %vm3416_vm15 = vcmp.ge.f32.partialorder %v3400_v12, 0.0  ;;  %v3436_v24 = vmul.f32 %v8200_v40, %v3400_v12  ;;  %vm3415_vm10 = vcmp.ge.f32.partialorder %v3399_v52, 0.0  ;;  %v3435_v30 = vmul.f32 %v8200_v40, %v3399_v52 }
 0x64b   : > { %v3452_v47 = vsel %vm3416_vm15, %v3400_v12, %v3436_v24  ;;  %v3451_v21 = vsel %vm3415_vm10, %v3399_v52, %v3435_v30  ;;  %6190 = vmatpush3.bf16.msra.mxu1 %v6187_v61 }
 0x64c   : > { %3497 = vrot.lane.b32.xlu1 %v3452_v47, %s6357_s7  ;;  %3495 = vrot.lane.b32.xlu0 %v3451_v21, %s6357_s7 }
 0x64d   : > { %6192 = vmatprep.subr.bf16.mxu1 %v6191_v6 }
 0x64f   : > { %v6308_v32 = vpop.eup %6307  ;;  %6194 = vmatpush3.bf16.msra.mxu1 %v6191_v6 }
 0x650   : > { %v3347_v55 = vmul.f32 %v6308_v32, %v8311_v31  ;;  %v3348_v18 = vmul.f32 %v6308_v32, %v8313_v48 }
 0x652   : > { %v3374_v49 = vmul.f32 %v8191_v5, %v3347_v55  ;;  %v3474_v25 = vpop.permute.xlu1 %3473  ;;  %v3375_v11 = vmul.f32 %v8189_v8, %v3348_v18  ;;  %v5608_v8 = vld [vmem:[%s9386_s1 + $0x1c8] sm:$0xff]  ;;  %v5609_v5 = vld [vmem:[%s9386_s1 + $0x1d0] sm:$0xff] }
 0x653   : > { %v3520_v31 = vsel %vm2467_vm14, %v7747_v17, %v3474_v25  ;;  %v3472_v48 = vpop.permute.xlu0 %3471  ;;  %v6195_v1 = vpack.c.bf16 %v5609_v5, %v5608_v8 }
 0x654   : > { %v8395_v45 = vsel %vm3535_vm4, %v3520_v31, %v7747_v17  ;;  %v3519_v13 = vsel %vm2467_vm14, %v7751_v38, %v3472_v48  ;;  %v3402_v34 = vadd.f32 %v8194_v0, %v3375_v11  ;;  %v3401_v28 = vadd.f32 %v8196_v57, %v3374_v49 }
 0x655   : > { %v3569_v20 = vrot.slane %v8395_v45, 7  ;;  %v8410_v17 = vsel %vm3535_vm4, %v3519_v13, %v7751_v38  ;;  %6196 = vmatprep.subr.bf16.mxu1 %v6195_v1 }
 0x656   : > { %v3568_v0 = vrot.slane %v8410_v17, 7  ;;  %vm3418_vm5 = vcmp.ge.f32.partialorder %v3402_v34, 0.0  ;;  %v3438_v57 = vmul.f32 %v8200_v40, %v3402_v34  ;;  %vm3417_vm12 = vcmp.ge.f32.partialorder %v3401_v28, 0.0  ;;  %6198 = vmatpush3.bf16.msra.mxu1 %v6195_v1 }
 0x657   : > { %v3437_v19 = vmul.f32 %v8200_v40, %v3401_v28  ;;  %v3616_v15 = vsel %vm257_vm1, %v3569_v20, 0.0  ;;  %6007 = vmatprep.subr.mxu1 %v5610_v42 }
 0x658   : > { %v3454_v27 = vsel %vm3418_vm5, %v3402_v34, %v3438_v57  ;;  %v3570_v38 = vsel %vm257_vm1, %v3568_v0, %v3569_v20  ;;  %v3608_v43 = vsel %vm257_vm1, 0.0, %v3568_v0  ;;  %v3691_v4 = vrot.slane %v3616_v15, 1 }
 0x659   : > { %3501 = vrot.lane.b32.xlu1 %v3454_v27, %s6357_s7  ;;  %v3453_v39 = vsel %vm3417_vm12, %v3401_v28, %v3437_v19  ;;  %v3689_v40 = vrot.slane %v3570_v38, 1  ;;  %v3688_v51 = vrot.slane %v3608_v43, 1  ;;  %v3777_v63 = vrot.slane %v3570_v38, 2 }
 0x65a   : > { %3499 = vrot.lane.b32.xlu0 %v3453_v39, %s6357_s7  ;;  %6008 = vmatpush3.msra.mxu1 %v5610_v42  ;;  %v3779_v33 = vrot.slane %v3616_v15, 2  ;;  %v3776_v46 = vrot.slane %v3608_v43, 2 }
 0x65b   : > { %v3692_v62 = vsel %vm336_vm2, %v3689_v40, %v3691_v4  ;;  %v3690_v56 = vsel %vm336_vm2, %v3688_v51, %v3689_v40 }
 0x65c   : > { %v3780_v35 = vsel %vm419_vm3, %v3777_v63, %v3779_v33  ;;  %v3778_v12 = vsel %vm419_vm3, %v3776_v46, %v3777_v63 }
 0x65d   : > { %3634 = vrot.lane.b32.xlu1 %v3570_v38, %s6352_s13 }
 0x65e   : > { %3632 = vrot.lane.b32.xlu0 %v3608_v43, %s6352_s13 }
 0x661   : > { %3730 = vrot.lane.b32.xlu1 %v3692_v62, %s6353_s20 }
 0x662   : > { %3728 = vrot.lane.b32.xlu0 %v3690_v56, %s6353_s20 }
 0x665   : > { %3818 = vrot.lane.b32.xlu1 %v3780_v35, %s6354_s5 }
 0x666   : > { %3816 = vrot.lane.b32.xlu0 %v3778_v12, %s6354_s5 }
 0x669   : > { %v3478_v52 = vpop.permute.xlu1 %3477  ;;  %v3476_v24 = vpop.permute.xlu0 %3475 }
 0x66a   : > { %v3522_v30 = vsel %vm2467_vm14, %v7796_v2, %v3478_v52  ;;  %v3521_v47 = vsel %vm2467_vm14, %v7800_v7, %v3476_v24 }
 0x66b   : > { %v8439_v21 = vsel %vm3535_vm4, %v3522_v30, %v7796_v2  ;;  %v8443_v53 = vsel %vm3535_vm4, %v3521_v47, %v7800_v7 }
 0x66c   : > { %v3572_v41 = vrot.slane %v8439_v21, 7  ;;  %v3571_v61 = vrot.slane %v8443_v53, 7 }
 0x66e   : > { %v3617_v32 = vsel %vm257_vm1, %v3572_v41, 0.0  ;;  %v3609_v55 = vsel %vm257_vm1, 0.0, %v3571_v61  ;;  %v3573_v18 = vsel %vm257_vm1, %v3571_v61, %v3572_v41 }
 0x66f   : > { %3636 = vrot.lane.b32.xlu0 %v3609_v55, %s6352_s13  ;;  %v3693_v14 = vrot.slane %v3609_v55, 1  ;;  %3638 = vrot.lane.b32.xlu1 %v3573_v18, %s6352_s13  ;;  %v3694_v2 = vrot.slane %v3573_v18, 1  ;;  %v3696_v37 = vrot.slane %v3617_v32, 1  ;;  %v3781_v6 = vrot.slane %v3609_v55, 2 }
 0x670   : > { %v3782_v49 = vrot.slane %v3573_v18, 2  ;;  %v3784_v11 = vrot.slane %v3617_v32, 2 }
 0x671   : > { %v3695_v7 = vsel %vm336_vm2, %v3693_v14, %v3694_v2  ;;  %v3697_v25 = vsel %vm336_vm2, %v3694_v2, %v3696_v37 }
 0x672   : > { %v3785_v31 = vsel %vm419_vm3, %v3782_v49, %v3784_v11  ;;  %v3783_v48 = vsel %vm419_vm3, %v3781_v6, %v3782_v49 }
 0x673   : > { %3734 = vrot.lane.b32.xlu1 %v3697_v25, %s6353_s20  ;;  %3732 = vrot.lane.b32.xlu0 %v3695_v7, %s6353_s20 }
 0x677   : > { %3822 = vrot.lane.b32.xlu1 %v3785_v31, %s6354_s5  ;;  %3820 = vrot.lane.b32.xlu0 %v3783_v48, %s6354_s5 }
 0x681   : > { %v3482_v13 = vpop.permute.xlu1 %3481 }
 0x682   : > { %v3524_v34 = vsel %vm2467_vm14, %v7831_v50, %v3482_v13 }
 0x683   : > { %v8464_v28 = vsel %vm3535_vm4, %v3524_v34, %v7831_v50  ;;  %v3480_v8 = vpop.permute.xlu0 %3479 }
 0x684   : > { %v3575_v5 = vrot.slane %v8464_v28, 7  ;;  %v3523_v20 = vsel %vm2467_vm14, %v7837_v54, %v3480_v8 }
 0x685   : > { %v8471_v1 = vsel %vm3535_vm4, %v3523_v20, %v7837_v54 }
 0x686   : > { %v3618_v0 = vsel %vm257_vm1, %v3575_v5, 0.0  ;;  %v3574_v57 = vrot.slane %v8471_v1, 7 }
 0x687   : > { %v3701_v19 = vrot.slane %v3618_v0, 1  ;;  %v3789_v40 = vrot.slane %v3618_v0, 2 }
 0x688   : > { %v3610_v27 = vsel %vm257_vm1, 0.0, %v3574_v57  ;;  %v3576_v50 = vsel %vm257_vm1, %v3574_v57, %v3575_v5 }
 0x689   : > { %3640 = vrot.lane.b32.xlu0 %v3610_v27, %s6352_s13  ;;  %v3698_v15 = vrot.slane %v3610_v27, 1  ;;  %3642 = vrot.lane.b32.xlu1 %v3576_v50, %s6352_s13  ;;  %v3699_v39 = vrot.slane %v3576_v50, 1  ;;  %v3786_v42 = vrot.slane %v3610_v27, 2  ;;  %v3787_v43 = vrot.slane %v3576_v50, 2 }
 0x68b   : > { %v3702_v38 = vsel %vm336_vm2, %v3699_v39, %v3701_v19  ;;  %v3700_v54 = vsel %vm336_vm2, %v3698_v15, %v3699_v39  ;;  %v3790_v4 = vsel %vm419_vm3, %v3787_v43, %v3789_v40  ;;  %v3788_v51 = vsel %vm419_vm3, %v3786_v42, %v3787_v43 }
 0x68d   : > { %3738 = vrot.lane.b32.xlu1 %v3702_v38, %s6353_s20  ;;  %3736 = vrot.lane.b32.xlu0 %v3700_v54, %s6353_s20 }
 0x691   : > { %3826 = vrot.lane.b32.xlu1 %v3790_v4, %s6354_s5  ;;  %3824 = vrot.lane.b32.xlu0 %v3788_v51, %s6354_s5 }
 0x696   : > { %v3486_v63 = vpop.permute.xlu1 %3485 }
 0x697   : > { %v3526_v62 = vsel %vm2467_vm14, %v7873_v3, %v3486_v63 }
 0x698   : > { %v8491_v33 = vsel %vm3535_vm4, %v3526_v62, %v7873_v3  ;;  %v3484_v46 = vpop.permute.xlu0 %3483 }
 0x699   : > { %v3578_v56 = vrot.slane %v8491_v33, 7  ;;  %v3525_v35 = vsel %vm2467_vm14, %v7880_v10, %v3484_v46 }
 0x69a   : > { %v8498_v12 = vsel %vm3535_vm4, %v3525_v35, %v7880_v10 }
 0x69b   : > { %v3619_v52 = vsel %vm257_vm1, %v3578_v56, 0.0  ;;  %v3577_v24 = vrot.slane %v8498_v12, 7 }
 0x69c   : > { %v3706_v30 = vrot.slane %v3619_v52, 1  ;;  %v3794_v14 = vrot.slane %v3619_v52, 2 }
 0x69d   : > { %v3611_v47 = vsel %vm257_vm1, 0.0, %v3577_v24  ;;  %v3579_v3 = vsel %vm257_vm1, %v3577_v24, %v3578_v56 }
 0x69e   : > { %3644 = vrot.lane.b32.xlu0 %v3611_v47, %s6352_s13  ;;  %v3703_v41 = vrot.slane %v3611_v47, 1  ;;  %3646 = vrot.lane.b32.xlu1 %v3579_v3, %s6352_s13  ;;  %v3704_v61 = vrot.slane %v3579_v3, 1  ;;  %v3791_v55 = vrot.slane %v3611_v47, 2  ;;  %v3792_v18 = vrot.slane %v3579_v3, 2 }
 0x6a0   : > { %v3707_v32 = vsel %vm336_vm2, %v3704_v61, %v3706_v30  ;;  %v3705_v10 = vsel %vm336_vm2, %v3703_v41, %v3704_v61  ;;  %v3795_v2 = vsel %vm419_vm3, %v3792_v18, %v3794_v14  ;;  %v3793_v37 = vsel %vm419_vm3, %v3791_v55, %v3792_v18 }
 0x6a2   : > { %3742 = vrot.lane.b32.xlu1 %v3707_v32, %s6353_s20  ;;  %3740 = vrot.lane.b32.xlu0 %v3705_v10, %s6353_s20 }
 0x6a6   : > { %3830 = vrot.lane.b32.xlu1 %v3795_v2, %s6354_s5  ;;  %3828 = vrot.lane.b32.xlu0 %v3793_v37, %s6354_s5 }
 0x6aa   : > { %v3490_v7 = vpop.permute.xlu1 %3489 }
 0x6ab   : > { %v3528_v6 = vsel %vm2467_vm14, %v7916_v60, %v3490_v7  ;;  %v3488_v49 = vpop.permute.xlu0 %3487 }
 0x6ac   : > { %v8518_v25 = vsel %vm3535_vm4, %v3528_v6, %v7916_v60  ;;  %v3527_v11 = vsel %vm2467_vm14, %v7920_v16, %v3488_v49 }
 0x6ad   : > { %v3581_v31 = vrot.slane %v8518_v25, 7  ;;  %v8525_v48 = vsel %vm3535_vm4, %v3527_v11, %v7920_v16 }
 0x6ae   : > { %v3580_v13 = vrot.slane %v8525_v48, 7 }
 0x6af   : > { %v3620_v34 = vsel %vm257_vm1, %v3581_v31, 0.0 }
 0x6b0   : > { %v3612_v8 = vsel %vm257_vm1, 0.0, %v3580_v13  ;;  %v3582_v5 = vsel %vm257_vm1, %v3580_v13, %v3581_v31  ;;  %v3711_v20 = vrot.slane %v3620_v34, 1  ;;  %v3799_v15 = vrot.slane %v3620_v34, 2 }
 0x6b1   : > { %3648 = vrot.lane.b32.xlu0 %v3612_v8, %s6352_s13  ;;  %v3708_v60 = vrot.slane %v3612_v8, 1  ;;  %3650 = vrot.lane.b32.xlu1 %v3582_v5, %s6352_s13  ;;  %v3709_v0 = vrot.slane %v3582_v5, 1  ;;  %v3796_v39 = vrot.slane %v3612_v8, 2  ;;  %v3797_v38 = vrot.slane %v3582_v5, 2 }
 0x6b2   : > { %v3494_v57 = vpop.permute.xlu1 %3493 }
 0x6b3   : > { %v3530_v16 = vsel %vm2467_vm14, %v7947_v44, %v3494_v57  ;;  %v3492_v19 = vpop.permute.xlu0 %3491  ;;  %v3712_v27 = vsel %vm336_vm2, %v3709_v0, %v3711_v20  ;;  %v3710_v50 = vsel %vm336_vm2, %v3708_v60, %v3709_v0  ;;  %v3800_v51 = vsel %vm419_vm3, %v3797_v38, %v3799_v15 }
 0x6b4   : > { %v8539_v54 = vsel %vm3535_vm4, %v3530_v16, %v7947_v44  ;;  %v3529_v42 = vsel %vm2467_vm14, %v7951_v22, %v3492_v19  ;;  %v3798_v44 = vsel %vm419_vm3, %v3796_v39, %v3797_v38 }
 0x6b5   : > { %v3584_v43 = vrot.slane %v8539_v54, 7  ;;  %v8546_v40 = vsel %vm3535_vm4, %v3529_v42, %v7951_v22  ;;  %3746 = vrot.lane.b32.xlu1 %v3712_v27, %s6353_s20  ;;  %3744 = vrot.lane.b32.xlu0 %v3710_v50, %s6353_s20 }
 0x6b6   : > { %v3583_v4 = vrot.slane %v8546_v40, 7 }
 0x6b7   : > { %v3621_v63 = vsel %vm257_vm1, %v3584_v43, 0.0 }
 0x6b8   : > { %v3613_v62 = vsel %vm257_vm1, 0.0, %v3583_v4  ;;  %v3585_v22 = vsel %vm257_vm1, %v3583_v4, %v3584_v43  ;;  %v3716_v35 = vrot.slane %v3621_v63, 1  ;;  %v3804_v30 = vrot.slane %v3621_v63, 2 }
 0x6b9   : > { %3834 = vrot.lane.b32.xlu1 %v3800_v51, %s6354_s5  ;;  %3832 = vrot.lane.b32.xlu0 %v3798_v44, %s6354_s5  ;;  %v3713_v46 = vrot.slane %v3613_v62, 1  ;;  %v3714_v56 = vrot.slane %v3585_v22, 1  ;;  %v3801_v47 = vrot.slane %v3613_v62, 2  ;;  %v3802_v3 = vrot.slane %v3585_v22, 2 }
 0x6bb   : > { %v3717_v55 = vsel %vm336_vm2, %v3714_v56, %v3716_v35  ;;  %v3715_v18 = vsel %vm336_vm2, %v3713_v46, %v3714_v56  ;;  %v3805_v37 = vsel %vm419_vm3, %v3802_v3, %v3804_v30 }
 0x6bd   : > { %3652 = vrot.lane.b32.xlu0 %v3613_v62, %s6352_s13  ;;  %3654 = vrot.lane.b32.xlu1 %v3585_v22, %s6352_s13 }
 0x6be   : > { %v3498_v52 = vpop.permute.xlu1 %3497  ;;  %v3496_v24 = vpop.permute.xlu0 %3495 }
 0x6bf   : > { %v3532_v41 = vsel %vm2467_vm14, %v7976_v9, %v3498_v52  ;;  %v3531_v61 = vsel %vm2467_vm14, %v7984_v29, %v3496_v24 }
 0x6c0   : > { %v8566_v32 = vsel %vm3535_vm4, %v3532_v41, %v7976_v9  ;;  %v8570_v10 = vsel %vm3535_vm4, %v3531_v61, %v7984_v29  ;;  %v3803_v9 = vsel %vm419_vm3, %v3801_v47, %v3802_v3 }
 0x6c1   : > { %v3587_v14 = vrot.slane %v8566_v32, 7  ;;  %v3586_v2 = vrot.slane %v8570_v10, 7  ;;  %3750 = vrot.lane.b32.xlu1 %v3717_v55, %s6353_s20  ;;  %3748 = vrot.lane.b32.xlu0 %v3715_v18, %s6353_s20 }
 0x6c3   : > { %v3622_v7 = vsel %vm257_vm1, %v3587_v14, 0.0  ;;  %v3614_v29 = vsel %vm257_vm1, 0.0, %v3586_v2  ;;  %v3588_v6 = vsel %vm257_vm1, %v3586_v2, %v3587_v14  ;;  %v222_v2 = vld [vmem:[%s9388_s3 + $0x6] sm:$0x3] }
 0x6c4   : > { %v3718_v49 = vrot.slane %v3614_v29, 1  ;;  %v3719_v11 = vrot.slane %v3588_v6, 1  ;;  %v3721_v31 = vrot.slane %v3622_v7, 1  ;;  %v3806_v13 = vrot.slane %v3614_v29, 2 }
 0x6c5   : > { %3838 = vrot.lane.b32.xlu1 %v3805_v37, %s6354_s5  ;;  %3836 = vrot.lane.b32.xlu0 %v3803_v9, %s6354_s5  ;;  %v3807_v34 = vrot.slane %v3588_v6, 2  ;;  %v3809_v57 = vrot.slane %v3622_v7, 2  ;;  %v4352_v7 = vrot.slane %v222_v2, %v6746_v23 }
 0x6c6   : > { %v3722_v60 = vsel %vm336_vm2, %v3719_v11, %v3721_v31  ;;  %v3720_v0 = vsel %vm336_vm2, %v3718_v49, %v3719_v11  ;;  %v4379_v49 = vrot.slane %v222_v2, %v6757_v36 }
 0x6c7   : > { %v3808_v42 = vsel %vm419_vm3, %v3806_v13, %v3807_v34 }
 0x6c9   : > { %3656 = vrot.lane.b32.xlu0 %v3614_v29, %s6352_s13  ;;  %3658 = vrot.lane.b32.xlu1 %v3588_v6, %s6352_s13 }
 0x6cb   : > { %v3502_v8 = vpop.permute.xlu1 %3501 }
 0x6cc   : > { %v3534_v5 = vsel %vm2467_vm14, %v8003_v26, %v3502_v8  ;;  %v3500_v20 = vpop.permute.xlu0 %3499 }
 0x6cd   : > { %v8593_v16 = vsel %vm3535_vm4, %v3534_v5, %v8003_v26  ;;  %v3533_v19 = vsel %vm2467_vm14, %v8007_v58, %v3500_v20  ;;  %3754 = vrot.lane.b32.xlu1 %v3722_v60, %s6353_s20  ;;  %3752 = vrot.lane.b32.xlu0 %v3720_v0, %s6353_s20  ;;  %v3810_v26 = vsel %vm419_vm3, %v3807_v34, %v3809_v57 }
 0x6ce   : > { %v3590_v27 = vrot.slane %v8593_v16, 7  ;;  %v8602_v50 = vsel %vm3535_vm4, %v3533_v19, %v8007_v58 }
 0x6cf   : > { %v3589_v15 = vrot.slane %v8602_v50, 7  ;;  %v3635_v39 = vpop.permute.xlu1 %3634 }
 0x6d0   : > { %v3633_v38 = vpop.permute.xlu0 %3632  ;;  %v3623_v43 = vsel %vm257_vm1, %v3590_v27, 0.0  ;;  %v3865_v46 = vsel %vm690_vm6, %v6695_v59, %v3635_v39 }
 0x6d1   : > { %3842 = vrot.lane.b32.xlu1 %v3810_v26, %s6354_s5  ;;  %3840 = vrot.lane.b32.xlu0 %v3808_v42, %s6354_s5  ;;  %v3615_v4 = vsel %vm257_vm1, 0.0, %v3589_v15  ;;  %v3591_v51 = vsel %vm257_vm1, %v3589_v15, %v3590_v27  ;;  %v3726_v22 = vrot.slane %v3623_v43, 1  ;;  %v3864_v56 = vsel %vm690_vm6, %v6695_v59, %v3633_v38 }
 0x6d2   : > { %v3723_v63 = vrot.slane %v3615_v4, 1  ;;  %v3724_v62 = vrot.slane %v3591_v51, 1  ;;  %v3811_v52 = vrot.slane %v3615_v4, 2  ;;  %v3812_v24 = vrot.slane %v3591_v51, 2 }
 0x6d3   : > { %v3731_v58 = vpop.permute.xlu1 %3730  ;;  %v3814_v47 = vrot.slane %v3623_v43, 2 }
 0x6d4   : > { %v3729_v44 = vpop.permute.xlu0 %3728  ;;  %v3881_v35 = vsel %vm707_vm7, %v3865_v46, %v3731_v58  ;;  %v3727_v55 = vsel %vm336_vm2, %v3724_v62, %v3726_v22  ;;  %v3725_v18 = vsel %vm336_vm2, %v3723_v63, %v3724_v62  ;;  %v3813_v9 = vsel %vm419_vm3, %v3811_v52, %v3812_v24 }
 0x6d5   : > { %3660 = vrot.lane.b32.xlu0 %v3615_v4, %s6352_s13  ;;  %3662 = vrot.lane.b32.xlu1 %v3591_v51, %s6352_s13  ;;  %v3880_v3 = vsel %vm707_vm7, %v3864_v56, %v3729_v44  ;;  %v3815_v37 = vsel %vm419_vm3, %v3812_v24, %v3814_v47 }
 0x6d7   : > { %v3819_v30 = vpop.permute.xlu1 %3818 }
 0x6d8   : > { %v3897_v41 = vsel %vm724_vm8, %v3881_v35, %v3819_v30  ;;  %v3817_v61 = vpop.permute.xlu0 %3816 }
 0x6d9   : > { %v3896_v14 = vsel %vm724_vm8, %v3880_v3, %v3817_v61  ;;  %3758 = vrot.lane.b32.xlu1 %v3727_v55, %s6353_s20  ;;  %3756 = vrot.lane.b32.xlu0 %v3725_v18, %s6353_s20 }
 0x6da   : > { %6009 = vmatprep.mubr.msk.f32.mxu1 %vm760_vm9, %v3896_v14 }
 0x6db   : > { %6010 = vmatmul.mubr.msk.f32.vlgmr.msra.gmra.mrb[16].mxu1 %vm760_vm9, %v3897_v41 }
 0x6dd   : > { %3846 = vrot.lane.b32.xlu1 %v3815_v37, %s6354_s5  ;;  %3844 = vrot.lane.b32.xlu0 %v3813_v9, %s6354_s5 }
 0x6e1   : > { %v3639_v29 = vpop.permute.xlu1 %3638  ;;  %v3637_v6 = vpop.permute.xlu0 %3636  ;;  %4358 = vbcast.lane.b32.xlu1 %v4352_v7, 264  ;;  %4354 = vbcast.lane.b32.xlu0 %v4352_v7, 256 }
 0x6e2   : > { %v3867_v13 = vsel %vm690_vm6, %v6695_v59, %v3639_v29  ;;  %v3866_v34 = vsel %vm690_vm6, %v6695_v59, %v3637_v6 }
 0x6e5   : > { %v3735_v11 = vpop.permute.xlu1 %3734  ;;  %v3733_v31 = vpop.permute.xlu0 %3732  ;;  %4385 = vbcast.lane.b32.xlu1 %v4379_v49, 264  ;;  %4381 = vbcast.lane.b32.xlu0 %v4379_v49, 256 }
 0x6e6   : > { %v3883_v8 = vsel %vm707_vm7, %v3867_v13, %v3735_v11  ;;  %v3882_v5 = vsel %vm707_vm7, %v3866_v34, %v3733_v31 }
 0x6e9   : > { %v3823_v20 = vpop.permute.xlu1 %3822  ;;  %v3821_v60 = vpop.permute.xlu0 %3820 }
 0x6ea   : > { %v3899_v0 = vsel %vm724_vm8, %v3883_v8, %v3823_v20  ;;  %v3898_v57 = vsel %vm724_vm8, %v3882_v5, %v3821_v60 }
 0x6eb   : > { %6012 = vmatprep.mubr.msk.f32.mxu1 %vm760_vm9, %v3898_v57 }
 0x6ec   : > { %6013 = vmatmul.mubr.msk.f32.gmra.mrb[18].mxu1 %vm760_vm9, %v3899_v0 }
 0x6fb   : > { %v3643_v19 = vpop.permute.xlu1 %3642  ;;  %v3641_v27 = vpop.permute.xlu0 %3640 }
 0x6fc   : > { %v3869_v38 = vsel %vm690_vm6, %v6695_v59, %v3643_v19  ;;  %v3868_v26 = vsel %vm690_vm6, %v6695_v59, %v3641_v27 }
 0x6ff   : > { %v3739_v15 = vpop.permute.xlu1 %3738  ;;  %v3737_v39 = vpop.permute.xlu0 %3736 }
 0x700   : > { %v3885_v42 = vsel %vm707_vm7, %v3869_v38, %v3739_v15  ;;  %v3884_v43 = vsel %vm707_vm7, %v3868_v26, %v3737_v39 }
 0x703   : > { %v3827_v4 = vpop.permute.xlu1 %3826  ;;  %v3825_v51 = vpop.permute.xlu0 %3824 }
 0x704   : > { %v3901_v58 = vsel %vm724_vm8, %v3885_v42, %v3827_v4  ;;  %v3900_v44 = vsel %vm724_vm8, %v3884_v43, %v3825_v51 }
 0x705   : > { %6015 = vmatprep.mubr.msk.f32.mxu1 %vm760_vm9, %v3900_v44 }
 0x706   : > { %6016 = vmatmul.mubr.msk.f32.gmra.mrb[20].mxu1 %vm760_vm9, %v3901_v58 }
 0x710   : > { %v3647_v63 = vpop.permute.xlu1 %3646  ;;  %v3645_v62 = vpop.permute.xlu0 %3644 }
 0x711   : > { %v3871_v56 = vsel %vm690_vm6, %v6695_v59, %v3647_v63  ;;  %v3870_v35 = vsel %vm690_vm6, %v6695_v59, %v3645_v62 }
 0x714   : > { %v3743_v22 = vpop.permute.xlu1 %3742  ;;  %v3741_v46 = vpop.permute.xlu0 %3740 }
 0x715   : > { %v3887_v52 = vsel %vm707_vm7, %v3871_v56, %v3743_v22  ;;  %v3886_v24 = vsel %vm707_vm7, %v3870_v35, %v3741_v46 }
 0x718   : > { %v3831_v30 = vpop.permute.xlu1 %3830  ;;  %v3829_v47 = vpop.permute.xlu0 %3828 }
 0x719   : > { %v3903_v3 = vsel %vm724_vm8, %v3887_v52, %v3831_v30  ;;  %v3902_v41 = vsel %vm724_vm8, %v3886_v24, %v3829_v47 }
 0x71a   : > { %6018 = vmatprep.mubr.msk.f32.mxu1 %vm760_vm9, %v3902_v41 }
 0x71b   : > { %6019 = vmatmul.mubr.msk.f32.gmra.mrb[22].mxu1 %vm760_vm9, %v3903_v3 }
 0x723   : > { %v3651_v61 = vpop.permute.xlu1 %3650  ;;  %v3649_v55 = vpop.permute.xlu0 %3648 }
 0x724   : > { %v3873_v2 = vsel %vm690_vm6, %v6695_v59, %v3651_v61  ;;  %v3872_v37 = vsel %vm690_vm6, %v6695_v59, %v3649_v55 }
 0x727   : > { %v3747_v18 = vpop.permute.xlu1 %3746  ;;  %v3745_v14 = vpop.permute.xlu0 %3744 }
 0x728   : > { %v3889_v9 = vsel %vm707_vm7, %v3873_v2, %v3747_v18  ;;  %v3888_v7 = vsel %vm707_vm7, %v3872_v37, %v3745_v14  ;;  %v8710_v14 = vld [vmem:[%s9387_s2 + $0x6] sm:$0x3] }
 0x729   : > { %v8714_v2 = vrot.slane %v8710_v14, %v6746_v23 }
 0x72b   : > { %v3835_v29 = vpop.permute.xlu1 %3834  ;;  %v3833_v6 = vpop.permute.xlu0 %3832 }
 0x72c   : > { %v3905_v49 = vsel %vm724_vm8, %v3889_v9, %v3835_v29  ;;  %v3904_v11 = vsel %vm724_vm8, %v3888_v7, %v3833_v6 }
 0x72d   : > { %6021 = vmatprep.mubr.msk.f32.mxu1 %vm760_vm9, %v3904_v11 }
 0x72e   : > { %6022 = vmatmul.mubr.msk.f32.gmra.mrb[24].mxu1 %vm760_vm9, %v3905_v49 }
 0x72f   : > { %v3655_v31 = vpop.permute.xlu1 %3654  ;;  %v3653_v13 = vpop.permute.xlu0 %3652 }
 0x730   : > { %v3875_v5 = vsel %vm690_vm6, %v6695_v59, %v3655_v31  ;;  %v3874_v20 = vsel %vm690_vm6, %v6695_v59, %v3653_v13 }
 0x733   : > { %v3751_v34 = vpop.permute.xlu1 %3750  ;;  %v3749_v8 = vpop.permute.xlu0 %3748 }
 0x734   : > { %v3891_v60 = vsel %vm707_vm7, %v3875_v5, %v3751_v34  ;;  %v3890_v0 = vsel %vm707_vm7, %v3874_v20, %v3749_v8 }
 0x737   : > { %v3839_v57 = vpop.permute.xlu1 %3838  ;;  %v3837_v19 = vpop.permute.xlu0 %3836 }
 0x738   : > { %v3907_v27 = vsel %vm724_vm8, %v3891_v60, %v3839_v57  ;;  %v3906_v15 = vsel %vm724_vm8, %v3890_v0, %v3837_v19 }
 0x739   : > { %6024 = vmatprep.mubr.msk.f32.mxu1 %vm760_vm9, %v3906_v15 }
 0x73a   : > { %6025 = vmatmul.mubr.msk.f32.gmra.mrb[26].mxu1 %vm760_vm9, %v3907_v27 }
 0x73b   : > { %v3659_v39 = vpop.permute.xlu1 %3658  ;;  %v3657_v38 = vpop.permute.xlu0 %3656 }
 0x73c   : > { %v3877_v43 = vsel %vm690_vm6, %v6695_v59, %v3659_v39  ;;  %v3876_v4 = vsel %vm690_vm6, %v6695_v59, %v3657_v38 }
 0x73f   : > { %v3755_v26 = vpop.permute.xlu1 %3754  ;;  %v3753_v42 = vpop.permute.xlu0 %3752 }
 0x740   : > { %v3893_v51 = vsel %vm707_vm7, %v3877_v43, %v3755_v26  ;;  %v3892_v58 = vsel %vm707_vm7, %v3876_v4, %v3753_v42 }
 0x743   : > { %v3843_v44 = vpop.permute.xlu1 %3842  ;;  %v3841_v63 = vpop.permute.xlu0 %3840 }
 0x744   : > { %v3909_v62 = vsel %vm724_vm8, %v3893_v51, %v3843_v44  ;;  %v3908_v22 = vsel %vm724_vm8, %v3892_v58, %v3841_v63 }
 0x745   : > { %6027 = vmatprep.mubr.msk.f32.mxu1 %vm760_vm9, %v3908_v22 }
 0x746   : > { %6028 = vmatmul.mubr.msk.f32.gmra.mrb[28].mxu1 %vm760_vm9, %v3909_v62 }
 0x747   : > { %v3663_v46 = vpop.permute.xlu1 %3662  ;;  %v3661_v56 = vpop.permute.xlu0 %3660 }
 0x748   : > { %v3879_v24 = vsel %vm690_vm6, %v6695_v59, %v3663_v46  ;;  %v3878_v30 = vsel %vm690_vm6, %v6695_v59, %v3661_v56 }
 0x74b   : > { %v3759_v35 = vpop.permute.xlu1 %3758  ;;  %v3757_v52 = vpop.permute.xlu0 %3756 }
 0x74c   : > { %v3895_v47 = vsel %vm707_vm7, %v3879_v24, %v3759_v35  ;;  %v3894_v3 = vsel %vm707_vm7, %v3878_v30, %v3757_v52 }
 0x74f   : > { %v3847_v41 = vpop.permute.xlu1 %3846  ;;  %v3845_v61 = vpop.permute.xlu0 %3844 }
 0x750   : > { %v3911_v55 = vsel %vm724_vm8, %v3895_v47, %v3847_v41  ;;  %v3910_v18 = vsel %vm724_vm8, %v3894_v3, %v3845_v61 }
 0x751   : > { %6030 = vmatprep.mubr.msk.f32.mxu1 %vm760_vm9, %v3910_v18 }
 0x752   : > { %6031 = vmatmul.mubr.msk.f32.gmra.mrb[30].mxu1 %vm760_vm9, %v3911_v55 }
 0x7ae   : > { %v6011_v37 = vpop.f32.mrb[16].mxu1 }
 0x7af   : > { %v4052_v9 = vadd.f32 %v6011_v37, %v8714_v2  ;;  %v4046_v7 = vpop.f32.mrb[17].mxu1 }
 0x7b0   : > { %v4047_v29 = vadd.f32 %v4046_v7, %v8714_v2 }
 0x7b1   : > { %v4126_v6 = vsel %vm224_vm0, %v4052_v9, 0.0 }
 0x7b2   : > { %v4125_v49 = vsel %vm224_vm0, %v4047_v29, 0.0 }
 0x7b3   : > { %v4127_v11 = vadd.f32 %v4126_v6, %v4125_v49 }
 0x7b5   : > { %v4128_v31 = vrot.slane %v4127_v11, 4 }
 0x7b7   : > { %v4129_v13 = vadd.f32 %v4128_v31, %v4127_v11 }
 0x7b9   : > { %v4130_v34 = vrot.slane %v4129_v13, 2 }
 0x7bb   : > { %v4131_v8 = vadd.f32 %v4130_v34, %v4129_v13 }
 0x7bd   : > { %v4132_v5 = vrot.slane %v4131_v8, 1 }
 0x7bf   : > { %v4133_v20 = vadd.f32 %v4132_v5, %v4131_v8  ;;  %v6014_v60 = vpop.f32.mrb[18].mxu1 }
 0x7c0   : > { %v4062_v0 = vadd.f32 %v6014_v60, %v8714_v2  ;;  %v4056_v57 = vpop.f32.mrb[19].mxu1 }
 0x7c1   : > { %v4197_v19 = vmul.f32 0.0625, %v4133_v20  ;;  %v4057_v27 = vadd.f32 %v4056_v57, %v8714_v2 }
 0x7c2   : > { %v4135_v15 = vsel %vm224_vm0, %v4062_v0, 0.0 }
 0x7c3   : > { %v4205_v39 = vsub.f32 %v4047_v29, %v4197_v19  ;;  %v4206_v38 = vsub.f32 %v4052_v9, %v4197_v19  ;;  %v4134_v26 = vsel %vm224_vm0, %v4057_v27, 0.0 }
 0x7c4   : > { %v4136_v42 = vadd.f32 %v4135_v15, %v4134_v26  ;;  %v8740_v15 = vpop.permute.xlu1 %4358  ;;  %v8742_v26 = vpop.permute.xlu0 %4354 }
 0x7c5   : > { %v4221_v43 = vmul.f32 %v4205_v39, %v4205_v39  ;;  %v4222_v4 = vmul.f32 %v4206_v38, %v4206_v38 }
 0x7c6   : > { %v4137_v51 = vrot.slane %v4136_v42, 4 }
 0x7c7   : > { %v4237_v58 = vsel %vm224_vm0, %v4221_v43, 0.0  ;;  %v4238_v44 = vsel %vm224_vm0, %v4222_v4, 0.0 }
 0x7c8   : > { %v4239_v63 = vadd.f32 %v4238_v44, %v4237_v58  ;;  %v4138_v62 = vadd.f32 %v4137_v51, %v4136_v42 }
 0x7ca   : > { %v4240_v22 = vrot.slane %v4239_v63, 4  ;;  %v4139_v46 = vrot.slane %v4138_v62, 2 }
 0x7cc   : > { %v4241_v56 = vadd.f32 %v4240_v22, %v4239_v63  ;;  %v4140_v35 = vadd.f32 %v4139_v46, %v4138_v62  ;;  %v8744_v46 = vpop.permute.xlu1 %4385 }
 0x7ce   : > { %v4242_v52 = vrot.slane %v4241_v56, 2  ;;  %v4141_v24 = vrot.slane %v4140_v35, 1 }
 0x7d0   : > { %v4243_v30 = vadd.f32 %v4242_v52, %v4241_v56  ;;  %v4142_v47 = vadd.f32 %v4141_v24, %v4140_v35  ;;  %v8746_v56 = vpop.permute.xlu0 %4381  ;;  %v8750_v35 = vrot.slane %v8710_v14, %v6757_v36 }
 0x7d2   : > { %v4244_v3 = vrot.slane %v4243_v30, 1  ;;  %v4198_v41 = vmul.f32 0.0625, %v4142_v47 }
 0x7d4   : > { %v4245_v61 = vadd.f32 %v4244_v3, %v4243_v30  ;;  %v8726_v55 = vsub.f32 %v4057_v27, %v4198_v41  ;;  %v8728_v18 = vsub.f32 %v4062_v0, %v4198_v41 }
 0x7d6   : > { %v4309_v37 = vmul.f32 0.0625, %v4245_v61  ;;  %v4223_v9 = vmul.f32 %v8726_v55, %v8726_v55  ;;  %v4224_v7 = vmul.f32 %v8728_v18, %v8728_v18 }
 0x7d8   : > { %v4317_v29 = vadd.f32 1e-05, %v4309_v37  ;;  %v4246_v6 = vsel %vm224_vm0, %v4223_v9, 0.0  ;;  %v4247_v49 = vsel %vm224_vm0, %v4224_v7, 0.0 }
 0x7d9   : > { %v4248_v11 = vadd.f32 %v4247_v49, %v4246_v6  ;;  %v6017_v31 = vpop.f32.mrb[20].mxu1 }
 0x7da   : > { %6309 = vrsqrt.f32 %v4317_v29  ;;  %v4072_v13 = vadd.f32 %v6017_v31, %v8714_v2  ;;  %v4066_v34 = vpop.f32.mrb[21].mxu1 }
 0x7db   : > { %v4249_v8 = vrot.slane %v4248_v11, 4  ;;  %v4067_v5 = vadd.f32 %v4066_v34, %v8714_v2 }
 0x7dc   : > { %v4144_v20 = vsel %vm224_vm0, %v4072_v13, 0.0 }
 0x7dd   : > { %v4250_v60 = vadd.f32 %v4249_v8, %v4248_v11  ;;  %v4143_v0 = vsel %vm224_vm0, %v4067_v5, 0.0 }
 0x7de   : > { %v4145_v57 = vadd.f32 %v4144_v20, %v4143_v0 }
 0x7df   : > { %v4251_v19 = vrot.slane %v4250_v60, 2 }
 0x7e0   : > { %v4146_v27 = vrot.slane %v4145_v57, 4 }
 0x7e1   : > { %v4252_v42 = vadd.f32 %v4251_v19, %v4250_v60 }
 0x7e2   : > { %v4147_v43 = vadd.f32 %v4146_v27, %v4145_v57 }
 0x7e3   : > { %v4253_v4 = vrot.slane %v4252_v42, 1 }
 0x7e4   : > { %v6310_v51 = vpop.eup %6309  ;;  %v4148_v58 = vrot.slane %v4147_v43, 2 }
 0x7e5   : > { %v4333_v44 = vmul.f32 %v6310_v51, %v4205_v39  ;;  %v4334_v63 = vmul.f32 %v6310_v51, %v4206_v38  ;;  %v4254_v62 = vadd.f32 %v4253_v4, %v4252_v42 }
 0x7e6   : > { %v4149_v22 = vadd.f32 %v4148_v58, %v4147_v43 }
 0x7e7   : > { %v4310_v52 = vmul.f32 0.0625, %v4254_v62  ;;  %v4361_v24 = vmul.f32 %v8740_v15, %v4334_v63  ;;  %v4360_v30 = vmul.f32 %v8742_v26, %v4333_v44 }
 0x7e8   : > { %v4150_v47 = vrot.slane %v4149_v22, 1 }
 0x7e9   : > { %v4318_v3 = vadd.f32 1e-05, %v4310_v52  ;;  %v4388_v39 = vadd.f32 %v8744_v46, %v4361_v24  ;;  %v4387_v38 = vadd.f32 %v8746_v56, %v4360_v30 }
 0x7ea   : > { %v4151_v41 = vadd.f32 %v4150_v47, %v4149_v22 }
 0x7eb   : > { %6311 = vrsqrt.f32 %v4318_v3  ;;  %vm4404_vm14 = vcmp.ge.f32.partialorder %v4388_v39, 0.0  ;;  %v4424_v61 = vmul.f32 %v8750_v35, %v4388_v39  ;;  %vm4403_vm11 = vcmp.ge.f32.partialorder %v4387_v38, 0.0 }
 0x7ec   : > { %v4199_v37 = vmul.f32 0.0625, %v4151_v41  ;;  %v4423_v14 = vmul.f32 %v8750_v35, %v4387_v38 }
 0x7ed   : > { %v4440_v9 = vsel %vm4404_vm14, %v4388_v39, %v4424_v61 }
 0x7ee   : > { %v8758_v7 = vsub.f32 %v4067_v5, %v4199_v37  ;;  %v8760_v29 = vsub.f32 %v4072_v13, %v4199_v37  ;;  %4473 = vrot.lane.b32.xlu1 %v4440_v9, %s6358_s9  ;;  %v6020_v6 = vpop.f32.mrb[22].mxu1  ;;  %v4439_v49 = vsel %vm4403_vm11, %v4387_v38, %v4423_v14 }
 0x7ef   : > { %v4082_v11 = vadd.f32 %v6020_v6, %v8714_v2  ;;  %4471 = vrot.lane.b32.xlu0 %v4439_v49, %s6358_s9  ;;  %v4076_v31 = vpop.f32.mrb[23].mxu1 }
 0x7f0   : > { %v4225_v34 = vmul.f32 %v8758_v7, %v8758_v7  ;;  %v4226_v8 = vmul.f32 %v8760_v29, %v8760_v29  ;;  %v4077_v5 = vadd.f32 %v4076_v31, %v8714_v2 }
 0x7f1   : > { %v4153_v13 = vsel %vm224_vm0, %v4082_v11, 0.0 }
 0x7f2   : > { %v4255_v20 = vsel %vm224_vm0, %v4225_v34, 0.0  ;;  %v4256_v60 = vsel %vm224_vm0, %v4226_v8, 0.0  ;;  %v4152_v0 = vsel %vm224_vm0, %v4077_v5, 0.0 }
 0x7f3   : > { %v4257_v57 = vadd.f32 %v4256_v60, %v4255_v20  ;;  %v4154_v19 = vadd.f32 %v4153_v13, %v4152_v0 }
 0x7f5   : > { %v6312_v27 = vpop.eup %6311  ;;  %v4258_v42 = vrot.slane %v4257_v57, 4  ;;  %v4155_v43 = vrot.slane %v4154_v19, 4 }
 0x7f6   : > { %v4335_v4 = vmul.f32 %v6312_v27, %v8726_v55  ;;  %v4336_v51 = vmul.f32 %v6312_v27, %v8728_v18 }
 0x7f7   : > { %v4259_v58 = vadd.f32 %v4258_v42, %v4257_v57  ;;  %v4156_v44 = vadd.f32 %v4155_v43, %v4154_v19 }
 0x7f8   : > { %v4363_v63 = vmul.f32 %v8740_v15, %v4336_v51  ;;  %v4362_v62 = vmul.f32 %v8742_v26, %v4335_v4 }
 0x7f9   : > { %v4260_v22 = vrot.slane %v4259_v58, 2  ;;  %v4157_v52 = vrot.slane %v4156_v44, 2 }
 0x7fa   : > { %v4390_v24 = vadd.f32 %v8744_v46, %v4363_v63  ;;  %v4389_v30 = vadd.f32 %v8746_v56, %v4362_v62 }
 0x7fb   : > { %v4261_v47 = vadd.f32 %v4260_v22, %v4259_v58  ;;  %v4158_v3 = vadd.f32 %v4157_v52, %v4156_v44 }
 0x7fc   : > { %vm4406_vm13 = vcmp.ge.f32.partialorder %v4390_v24, 0.0  ;;  %v4426_v39 = vmul.f32 %v8750_v35, %v4390_v24  ;;  %vm4405_vm15 = vcmp.ge.f32.partialorder %v4389_v30, 0.0  ;;  %v4425_v55 = vmul.f32 %v8750_v35, %v4389_v30 }
 0x7fd   : > { %v4262_v18 = vrot.slane %v4261_v47, 1  ;;  %v4159_v38 = vrot.slane %v4158_v3, 1 }
 0x7fe   : > { %v4442_v41 = vsel %vm4406_vm13, %v4390_v24, %v4426_v39  ;;  %v4441_v61 = vsel %vm4405_vm15, %v4389_v30, %v4425_v55 }
 0x7ff   : > { %v4263_v37 = vadd.f32 %v4262_v18, %v4261_v47  ;;  %v4160_v14 = vadd.f32 %v4159_v38, %v4158_v3  ;;  %4477 = vrot.lane.b32.xlu1 %v4442_v41, %s6358_s9  ;;  %4475 = vrot.lane.b32.xlu0 %v4441_v61, %s6358_s9 }
 0x801   : > { %v4311_v9 = vmul.f32 0.0625, %v4263_v37  ;;  %v4200_v6 = vmul.f32 0.0625, %v4160_v14  ;;  %v6023_v49 = vpop.f32.mrb[24].mxu1 }
 0x802   : > { %v4092_v31 = vadd.f32 %v6023_v49, %v8714_v2  ;;  %v4086_v34 = vpop.f32.mrb[25].mxu1 }
 0x803   : > { %v4319_v8 = vadd.f32 1e-05, %v4311_v9  ;;  %v8785_v13 = vsub.f32 %v4077_v5, %v4200_v6  ;;  %v8787_v20 = vsub.f32 %v4082_v11, %v4200_v6  ;;  %v4087_v60 = vadd.f32 %v4086_v34, %v8714_v2 }
 0x804   : > { %v4162_v0 = vsel %vm224_vm0, %v4092_v31, 0.0 }
 0x805   : > { %6313 = vrsqrt.f32 %v4319_v8  ;;  %v4227_v57 = vmul.f32 %v8785_v13, %v8785_v13  ;;  %v4228_v19 = vmul.f32 %v8787_v20, %v8787_v20  ;;  %v4161_v27 = vsel %vm224_vm0, %v4087_v60, 0.0 }
 0x806   : > { %v4163_v42 = vadd.f32 %v4162_v0, %v4161_v27 }
 0x807   : > { %v4264_v43 = vsel %vm224_vm0, %v4227_v57, 0.0  ;;  %v4265_v5 = vsel %vm224_vm0, %v4228_v19, 0.0 }
 0x808   : > { %v4266_v11 = vadd.f32 %v4265_v5, %v4264_v43  ;;  %v4164_v4 = vrot.slane %v4163_v42, 4 }
 0x80a   : > { %v4267_v51 = vrot.slane %v4266_v11, 4  ;;  %v4165_v58 = vadd.f32 %v4164_v4, %v4163_v42 }
 0x80c   : > { %v4268_v44 = vadd.f32 %v4267_v51, %v4266_v11  ;;  %v4166_v63 = vrot.slane %v4165_v58, 2 }
 0x80d   : > { %v6026_v62 = vpop.f32.mrb[26].mxu1 }
 0x80e   : > { %v4269_v22 = vrot.slane %v4268_v44, 2  ;;  %v4167_v52 = vadd.f32 %v4166_v63, %v4165_v58  ;;  %v4102_v24 = vadd.f32 %v6026_v62, %v8714_v2  ;;  %v4096_v30 = vpop.f32.mrb[27].mxu1 }
 0x80f   : > { %v6314_v47 = vpop.eup %6313  ;;  %v4097_v3 = vadd.f32 %v4096_v30, %v8714_v2 }
 0x810   : > { %v4337_v39 = vmul.f32 %v6314_v47, %v8758_v7  ;;  %v4338_v55 = vmul.f32 %v6314_v47, %v8760_v29  ;;  %v4270_v18 = vadd.f32 %v4269_v22, %v4268_v44  ;;  %v4168_v38 = vrot.slane %v4167_v52, 1 }
 0x811   : > { %v4171_v41 = vsel %vm224_vm0, %v4102_v24, 0.0  ;;  %v4170_v61 = vsel %vm224_vm0, %v4097_v3, 0.0 }
 0x812   : > { %v4271_v37 = vrot.slane %v4270_v18, 1  ;;  %v4169_v14 = vadd.f32 %v4168_v38, %v4167_v52  ;;  %v4172_v9 = vadd.f32 %v4171_v41, %v4170_v61  ;;  %v4365_v6 = vmul.f32 %v8740_v15, %v4338_v55 }
 0x813   : > { %v4364_v49 = vmul.f32 %v8742_v26, %v4337_v39 }
 0x814   : > { %v4272_v34 = vadd.f32 %v4271_v37, %v4270_v18  ;;  %v4201_v8 = vmul.f32 0.0625, %v4169_v14  ;;  %v4173_v0 = vrot.slane %v4172_v9, 4  ;;  %v4392_v7 = vadd.f32 %v8744_v46, %v4365_v6 }
 0x815   : > { %v4391_v29 = vadd.f32 %v8746_v56, %v4364_v49 }
 0x816   : > { %v4312_v57 = vmul.f32 0.0625, %v4272_v34  ;;  %v8808_v19 = vsub.f32 %v4087_v60, %v4201_v8  ;;  %v8810_v27 = vsub.f32 %v4092_v31, %v4201_v8  ;;  %v4174_v42 = vadd.f32 %v4173_v0, %v4172_v9 }
 0x817   : > { %vm4408_vm10 = vcmp.ge.f32.partialorder %v4392_v7, 0.0  ;;  %v4428_v43 = vmul.f32 %v8750_v35, %v4392_v7  ;;  %vm4407_vm5 = vcmp.ge.f32.partialorder %v4391_v29, 0.0  ;;  %v4427_v5 = vmul.f32 %v8750_v35, %v4391_v29 }
 0x818   : > { %v4320_v11 = vadd.f32 1e-05, %v4312_v57  ;;  %v4229_v4 = vmul.f32 %v8808_v19, %v8808_v19  ;;  %v4230_v51 = vmul.f32 %v8810_v27, %v8810_v27  ;;  %v4175_v58 = vrot.slane %v4174_v42, 2 }
 0x819   : > { %v4444_v44 = vsel %vm4408_vm10, %v4392_v7, %v4428_v43  ;;  %v4443_v60 = vsel %vm4407_vm5, %v4391_v29, %v4427_v5  ;;  %v6029_v63 = vpop.f32.mrb[28].mxu1 }
 0x81a   : > { %6315 = vrsqrt.f32 %v4320_v11  ;;  %v4273_v31 = vsel %vm224_vm0, %v4229_v4, 0.0  ;;  %v4274_v62 = vsel %vm224_vm0, %v4230_v51, 0.0  ;;  %v4176_v22 = vadd.f32 %v4175_v58, %v4174_v42  ;;  %4481 = vrot.lane.b32.xlu1 %v4444_v44, %s6358_s9  ;;  %4479 = vrot.lane.b32.xlu0 %v4443_v60, %s6358_s9  ;;  %v4106_v52 = vpop.f32.mrb[29].mxu1 }
 0x81b   : > { %v4275_v30 = vadd.f32 %v4274_v62, %v4273_v31  ;;  %v4112_v47 = vadd.f32 %v6029_v63, %v8714_v2  ;;  %v4107_v39 = vadd.f32 %v4106_v52, %v8714_v2 }
 0x81c   : > { %v4177_v55 = vrot.slane %v4176_v22, 1 }
 0x81d   : > { %v4276_v18 = vrot.slane %v4275_v30, 4  ;;  %v4180_v38 = vsel %vm224_vm0, %v4112_v47, 0.0  ;;  %v4179_v41 = vsel %vm224_vm0, %v4107_v39, 0.0 }
 0x81e   : > { %v4178_v61 = vadd.f32 %v4177_v55, %v4176_v22  ;;  %v4181_v37 = vadd.f32 %v4180_v38, %v4179_v41 }
 0x81f   : > { %v4277_v14 = vadd.f32 %v4276_v18, %v4275_v30 }
 0x820   : > { %v4202_v9 = vmul.f32 0.0625, %v4178_v61  ;;  %v4182_v6 = vrot.slane %v4181_v37, 4 }
 0x821   : > { %v4278_v49 = vrot.slane %v4277_v14, 2 }
 0x822   : > { %v8826_v34 = vsub.f32 %v4097_v3, %v4202_v9  ;;  %v8828_v8 = vsub.f32 %v4102_v24, %v4202_v9  ;;  %v4183_v0 = vadd.f32 %v4182_v6, %v4181_v37 }
 0x823   : > { %v4279_v7 = vadd.f32 %v4278_v49, %v4277_v14 }
 0x824   : > { %v6316_v29 = vpop.eup %6315  ;;  %v4231_v57 = vmul.f32 %v8826_v34, %v8826_v34  ;;  %v4232_v42 = vmul.f32 %v8828_v8, %v8828_v8  ;;  %v4184_v43 = vrot.slane %v4183_v0, 2 }
 0x825   : > { %v4339_v5 = vmul.f32 %v6316_v29, %v8785_v13  ;;  %v4340_v11 = vmul.f32 %v6316_v29, %v8787_v20  ;;  %v4280_v4 = vrot.slane %v4279_v7, 1  ;;  %v6032_v51 = vpop.f32.mrb[30].mxu1 }
 0x826   : > { %v4282_v3 = vsel %vm224_vm0, %v4231_v57, 0.0  ;;  %v4283_v24 = vsel %vm224_vm0, %v4232_v42, 0.0  ;;  %v4185_v58 = vadd.f32 %v4184_v43, %v4183_v0  ;;  %v4122_v44 = vadd.f32 %v6032_v51, %v8714_v2  ;;  %v4116_v60 = vpop.f32.mrb[31].mxu1 }
 0x827   : > { %v4366_v63 = vmul.f32 %v8742_v26, %v4339_v5  ;;  %v4281_v31 = vadd.f32 %v4280_v4, %v4279_v7  ;;  %v4284_v62 = vadd.f32 %v4283_v24, %v4282_v3  ;;  %v4117_v22 = vadd.f32 %v4116_v60, %v8714_v2 }
 0x828   : > { %v4186_v52 = vrot.slane %v4185_v58, 1  ;;  %v4189_v13 = vsel %vm224_vm0, %v4122_v44, 0.0  ;;  %v4367_v20 = vmul.f32 %v8740_v15, %v4340_v11 }
 0x829   : > { %v4313_v30 = vmul.f32 0.0625, %v4281_v31  ;;  %v4285_v55 = vrot.slane %v4284_v62, 4  ;;  %v4188_v18 = vsel %vm224_vm0, %v4117_v22, 0.0  ;;  %v4393_v38 = vadd.f32 %v8746_v56, %v4366_v63 }
 0x82a   : > { %v4187_v41 = vadd.f32 %v4186_v52, %v4185_v58  ;;  %v4190_v61 = vadd.f32 %v4189_v13, %v4188_v18  ;;  %v4394_v37 = vadd.f32 %v8744_v46, %v4367_v20 }
 0x82b   : > { %v4321_v14 = vadd.f32 1e-05, %v4313_v30  ;;  %v4286_v9 = vadd.f32 %v4285_v55, %v4284_v62  ;;  %vm4409_vm12 = vcmp.ge.f32.partialorder %v4393_v38, 0.0  ;;  %v4429_v2 = vmul.f32 %v8750_v35, %v4393_v38 }
 0x82c   : > { %v4203_v6 = vmul.f32 0.0625, %v4187_v41  ;;  %v4191_v49 = vrot.slane %v4190_v61, 4  ;;  %vm4410_vm14 = vcmp.ge.f32.partialorder %v4394_v37, 0.0  ;;  %v4430_v0 = vmul.f32 %v8750_v35, %v4394_v37 }
 0x82d   : > { %6317 = vrsqrt.f32 %v4321_v14  ;;  %v4287_v7 = vrot.slane %v4286_v9, 2  ;;  %v4445_v29 = vsel %vm4409_vm12, %v4393_v38, %v4429_v2 }
 0x82e   : > { %v8848_v57 = vsub.f32 %v4107_v39, %v4203_v6  ;;  %v8850_v42 = vsub.f32 %v4112_v47, %v4203_v6  ;;  %v4192_v43 = vadd.f32 %v4191_v49, %v4190_v61  ;;  %v4446_v5 = vsel %vm4410_vm14, %v4394_v37, %v4430_v0  ;;  %4483 = vrot.lane.b32.xlu0 %v4445_v29, %s6358_s9 }
 0x82f   : > { %v4288_v11 = vadd.f32 %v4287_v7, %v4286_v9  ;;  %4485 = vrot.lane.b32.xlu1 %v4446_v5, %s6358_s9 }
 0x830   : > { %v4233_v4 = vmul.f32 %v8848_v57, %v8848_v57  ;;  %v4234_v51 = vmul.f32 %v8850_v42, %v8850_v42  ;;  %v4193_v3 = vrot.slane %v4192_v43, 2 }
 0x831   : > { %v4289_v24 = vrot.slane %v4288_v11, 1 }
 0x832   : > { %v4291_v39 = vsel %vm224_vm0, %v4233_v4, 0.0  ;;  %v4292_v47 = vsel %vm224_vm0, %v4234_v51, 0.0  ;;  %v4194_v58 = vadd.f32 %v4193_v3, %v4192_v43 }
 0x833   : > { %v4290_v60 = vadd.f32 %v4289_v24, %v4288_v11  ;;  %v4293_v63 = vadd.f32 %v4292_v47, %v4291_v39 }
 0x834   : > { %v4195_v31 = vrot.slane %v4194_v58, 1 }
 0x835   : > { %v4314_v62 = vmul.f32 0.0625, %v4290_v60  ;;  %v4294_v52 = vrot.slane %v4293_v63, 4 }
 0x836   : > { %v4196_v13 = vadd.f32 %v4195_v31, %v4194_v58 }
 0x837   : > { %v6318_v20 = vpop.eup %6317  ;;  %v4322_v30 = vadd.f32 1e-05, %v4314_v62  ;;  %v4295_v55 = vadd.f32 %v4294_v52, %v4293_v63 }
 0x838   : > { %v4341_v18 = vmul.f32 %v6318_v20, %v8808_v19  ;;  %v4342_v38 = vmul.f32 %v6318_v20, %v8810_v27  ;;  %v4204_v41 = vmul.f32 0.0625, %v4196_v13 }
 0x839   : > { %6319 = vrsqrt.f32 %v4322_v30  ;;  %v4296_v61 = vrot.slane %v4295_v55, 2 }
 0x83a   : > { %v4368_v37 = vmul.f32 %v8742_v26, %v4341_v18  ;;  %v8863_v14 = vsub.f32 %v4117_v22, %v4204_v41  ;;  %v8865_v9 = vsub.f32 %v4122_v44, %v4204_v41  ;;  %v4369_v2 = vmul.f32 %v8740_v15, %v4342_v38 }
 0x83b   : > { %v4297_v6 = vadd.f32 %v4296_v61, %v4295_v55 }
 0x83c   : > { %v4235_v49 = vmul.f32 %v8863_v14, %v8863_v14  ;;  %v4236_v19 = vmul.f32 %v8865_v9, %v8865_v9  ;;  %v4396_v27 = vadd.f32 %v8744_v46, %v4369_v2  ;;  %v4395_v0 = vadd.f32 %v8746_v56, %v4368_v37 }
 0x83d   : > { %v4298_v7 = vrot.slane %v4297_v6, 1 }
 0x83e   : > { %v4300_v29 = vsel %vm224_vm0, %v4235_v49, 0.0  ;;  %v4301_v22 = vsel %vm224_vm0, %v4236_v19, 0.0  ;;  %vm4412_vm11 = vcmp.ge.f32.partialorder %v4396_v27, 0.0  ;;  %v4432_v44 = vmul.f32 %v8750_v35, %v4396_v27  ;;  %v5627_v19 = vld [vmem:[%s9386_s1 + $0x1e0] sm:$0xff] }
 0x83f   : > { %v4299_v43 = vadd.f32 %v4298_v7, %v4297_v6  ;;  %v4302_v5 = vadd.f32 %v4301_v22, %v4300_v29  ;;  %vm4411_vm13 = vcmp.ge.f32.partialorder %v4395_v0, 0.0  ;;  %v4431_v11 = vmul.f32 %v8750_v35, %v4395_v0 }
 0x840   : > { %v4448_v4 = vsel %vm4412_vm11, %v4396_v27, %v4432_v44  ;;  %v5628_v27 = vld [vmem:[%s9386_s1 + $0x1e8] sm:$0xff]  ;;  %v5630_v44 = vld [vmem:[%s9386_s1 + $0x1f8] sm:$0xff] }
 0x841   : > { %v4315_v51 = vmul.f32 0.0625, %v4299_v43  ;;  %v4303_v3 = vrot.slane %v4302_v5, 4  ;;  %4489 = vrot.lane.b32.xlu1 %v4448_v4, %s6358_s9  ;;  %v4447_v24 = vsel %vm4411_vm13, %v4395_v0, %v4431_v11  ;;  %v6199_v29 = vpack.c.bf16 %v5628_v27, %v5627_v19 }
 0x842   : > { %4487 = vrot.lane.b32.xlu0 %v4447_v24, %s6358_s9  ;;  %v5631_v24 = vld [vmem:[%s9386_s1 + $0x200] sm:$0xff] }
 0x843   : > { %v6320_v39 = vpop.eup %6319  ;;  %v4323_v47 = vadd.f32 1e-05, %v4315_v51  ;;  %v4304_v58 = vadd.f32 %v4303_v3, %v4302_v5  ;;  %6200 = vmatprep.subr.bf16.mxu0 %v6199_v29  ;;  %6227 = vmatprep.subr.bf16.mxu1 %v6199_v29 }
 0x844   : > { %v4343_v60 = vmul.f32 %v6320_v39, %v8826_v34  ;;  %v4344_v63 = vmul.f32 %v6320_v39, %v8828_v8  ;;  %6202 = vmatpush3.bf16.msra.mxu0 %v6199_v29  ;;  %6235 = vmatpush3.bf16.msra.mxu1 %v6199_v29  ;;  %v5632_v39 = vld [vmem:[%s9386_s1 + $0x208] sm:$0xff]  ;;  %v5641_v29 = vld [vmem:[%s9386_s1 + $0x250] sm:$0xff] }
 0x845   : > { %6321 = vrsqrt.f32 %v4323_v47  ;;  %v4305_v31 = vrot.slane %v4304_v58, 2 }
 0x846   : > { %v4370_v62 = vmul.f32 %v8742_v26, %v4343_v60  ;;  %v4371_v52 = vmul.f32 %v8740_v15, %v4344_v63  ;;  %v6207_v60 = vpack.c.bf16 %v5632_v39, %v5631_v24  ;;  %v5633_v63 = vld [vmem:[%s9386_s1 + $0x210] sm:$0xff] }
 0x847   : > { %v4306_v13 = vadd.f32 %v4305_v31, %v4304_v58  ;;  %v5634_v31 = vld [vmem:[%s9386_s1 + $0x218] sm:$0xff] }
 0x848   : > { %v4398_v20 = vadd.f32 %v8744_v46, %v4371_v52  ;;  %v4397_v30 = vadd.f32 %v8746_v56, %v4370_v62 }
 0x849   : > { %v4307_v55 = vrot.slane %v4306_v13, 1 }
 0x84a   : > { %vm4414_vm15 = vcmp.ge.f32.partialorder %v4398_v20, 0.0  ;;  %v4434_v18 = vmul.f32 %v8750_v35, %v4398_v20  ;;  %vm4413_vm10 = vcmp.ge.f32.partialorder %v4397_v30, 0.0  ;;  %v4433_v34 = vmul.f32 %v8750_v35, %v4397_v30 }
 0x84b   : > { %v4308_v38 = vadd.f32 %v4307_v55, %v4306_v13  ;;  %v6211_v13 = vpack.c.bf16 %v5634_v31, %v5633_v63  ;;  %v5635_v55 = vld [vmem:[%s9386_s1 + $0x220] sm:$0xff] }
 0x84c   : > { %v4450_v8 = vsel %vm4414_vm15, %v4398_v20, %v4434_v18  ;;  %v4449_v41 = vsel %vm4413_vm10, %v4397_v30, %v4433_v34 }
 0x84d   : > { %v4316_v61 = vmul.f32 0.0625, %v4308_v38  ;;  %4493 = vrot.lane.b32.xlu1 %v4450_v8, %s6358_s9  ;;  %4491 = vrot.lane.b32.xlu0 %v4449_v41, %s6358_s9 }
 0x84f   : > { %v6322_v37 = vpop.eup %6321  ;;  %v4324_v2 = vadd.f32 1e-05, %v4316_v61 }
 0x850   : > { %v4345_v6 = vmul.f32 %v6322_v37, %v8848_v57  ;;  %v4346_v49 = vmul.f32 %v6322_v37, %v8850_v42  ;;  %v5629_v42 = vld [vmem:[%s9386_s1 + $0x1f0] sm:$0xff] }
 0x851   : > { %6323 = vrsqrt.f32 %v4324_v2  ;;  %v6203_v11 = vpack.c.bf16 %v5630_v44, %v5629_v42  ;;  %v5639_v2 = vld [vmem:[%s9386_s1 + $0x240] sm:$0xff] }
 0x852   : > { %v4372_v0 = vmul.f32 %v8742_v26, %v4345_v6  ;;  %v4373_v7 = vmul.f32 %v8740_v15, %v4346_v49  ;;  %v5640_v6 = vld [vmem:[%s9386_s1 + $0x248] sm:$0xff] }
 0x853   : > { %6204 = vmatprep.subr.bf16.mxu0 %v6203_v11  ;;  %6228 = vmatprep.subr.bf16.mxu1 %v6203_v11  ;;  %v6223_v19 = vpack.c.bf16 %v5640_v6, %v5639_v2 }
 0x854   : > { %v4400_v22 = vadd.f32 %v8744_v46, %v4373_v7  ;;  %v4399_v57 = vadd.f32 %v8746_v56, %v4372_v0  ;;  %6206 = vmatpush3.bf16.msra.mxu0 %v6203_v11  ;;  %6236 = vmatpush3.bf16.msra.mxu1 %v6203_v11 }
 0x855   : > { %6208 = vmatprep.subr.bf16.mxu0 %v6207_v60  ;;  %6229 = vmatprep.subr.bf16.mxu1 %v6207_v60 }
 0x856   : > { %vm4416_vm5 = vcmp.ge.f32.partialorder %v4400_v22, 0.0  ;;  %v4436_v43 = vmul.f32 %v8750_v35, %v4400_v22  ;;  %vm4415_vm12 = vcmp.ge.f32.partialorder %v4399_v57, 0.0  ;;  %v4435_v5 = vmul.f32 %v8750_v35, %v4399_v57 }
 0x858   : > { %v4452_v4 = vsel %vm4416_vm5, %v4400_v22, %v4436_v43  ;;  %v4451_v51 = vsel %vm4415_vm12, %v4399_v57, %v4435_v5  ;;  %6210 = vmatpush3.bf16.msra.mxu0 %v6207_v60  ;;  %6237 = vmatpush3.bf16.msra.mxu1 %v6207_v60 }
 0x859   : > { %4497 = vrot.lane.b32.xlu1 %v4452_v4, %s6358_s9  ;;  %4495 = vrot.lane.b32.xlu0 %v4451_v51, %s6358_s9 }
 0x85a   : > { %6212 = vmatprep.subr.bf16.mxu0 %v6211_v13  ;;  %6230 = vmatprep.subr.bf16.mxu1 %v6211_v13 }
 0x85b   : > { %v6324_v3 = vpop.eup %6323 }
 0x85c   : > { %v4347_v47 = vmul.f32 %v6324_v3, %v8863_v14  ;;  %v4348_v58 = vmul.f32 %v6324_v3, %v8865_v9  ;;  %6214 = vmatpush3.bf16.msra.mxu0 %v6211_v13  ;;  %6238 = vmatpush3.bf16.msra.mxu1 %v6211_v13 }
 0x85e   : > { %v4374_v62 = vmul.f32 %v8742_v26, %v4347_v47  ;;  %v4375_v52 = vmul.f32 %v8740_v15, %v4348_v58  ;;  %v5636_v15 = vld [vmem:[%s9386_s1 + $0x228] sm:$0xff] }
 0x85f   : > { %v6215_v34 = vpack.c.bf16 %v5636_v15, %v5635_v55 }
 0x860   : > { %v4474_v14 = vpop.permute.xlu1 %4473  ;;  %v4402_v9 = vadd.f32 %v8744_v46, %v4375_v52  ;;  %v4401_v20 = vadd.f32 %v8746_v56, %v4374_v62 }
 0x861   : > { %v4472_v30 = vpop.permute.xlu0 %4471  ;;  %v4520_v46 = vsel %vm3535_vm4, %v8395_v45, %v4474_v14  ;;  %6216 = vmatprep.subr.bf16.mxu0 %v6215_v34  ;;  %v5638_v45 = vld [vmem:[%s9386_s1 + $0x238] sm:$0xff]  ;;  %6231 = vmatprep.subr.bf16.mxu1 %v6215_v34 }
 0x862   : > { %v4519_v26 = vsel %vm3535_vm4, %v8410_v17, %v4472_v30  ;;  %vm4418_vm14 = vcmp.ge.f32.partialorder %v4402_v9, 0.0  ;;  %v4438_v18 = vmul.f32 %v8750_v35, %v4402_v9  ;;  %vm4417_vm11 = vcmp.ge.f32.partialorder %v4401_v20, 0.0  ;;  %v5637_v17 = vld [vmem:[%s9386_s1 + $0x230] sm:$0xff]  ;;  %6218 = vmatpush3.bf16.msra.mxu0 %v6215_v34  ;;  %6239 = vmatpush3.bf16.msra.mxu1 %v6215_v34 }
 0x863   : > { %v4437_v56 = vmul.f32 %v8750_v35, %v4401_v20  ;;  %v4551_v8 = vrot.slane %v4519_v26, 7  ;;  %v4552_v61 = vrot.slane %v4520_v46, 7  ;;  %v6219_v35 = vpack.c.bf16 %v5638_v45, %v5637_v17 }
 0x864   : > { %v4454_v38 = vsel %vm4418_vm14, %v4402_v9, %v4438_v18 }
 0x865   : > { %4501 = vrot.lane.b32.xlu1 %v4454_v38, %s6358_s9  ;;  %v4453_v41 = vsel %vm4417_vm11, %v4401_v20, %v4437_v56  ;;  %6220 = vmatprep.subr.bf16.mxu0 %v6219_v35  ;;  %v4591_v37 = vsel %vm257_vm1, 0.0, %v4551_v8  ;;  %v4553_v49 = vsel %vm257_vm1, %v4551_v8, %v4552_v61  ;;  %v4599_v7 = vsel %vm257_vm1, %v4552_v61, 0.0 }
 0x866   : > { %4499 = vrot.lane.b32.xlu0 %v4453_v41, %s6358_s9  ;;  %6232 = vmatprep.subr.bf16.mxu1 %v6219_v35  ;;  %v4671_v27 = vrot.slane %v4591_v37, 1  ;;  %v4672_v0 = vrot.slane %v4553_v49, 1  ;;  %v4674_v22 = vrot.slane %v4599_v7, 1  ;;  %v4759_v42 = vrot.slane %v4591_v37, 2 }
 0x867   : > { %6222 = vmatpush3.bf16.msra.mxu0 %v6219_v35  ;;  %6240 = vmatpush3.bf16.msra.mxu1 %v6219_v35  ;;  %v4760_v44 = vrot.slane %v4553_v49, 2  ;;  %v4762_v4 = vrot.slane %v4599_v7, 2 }
 0x868   : > { %6224 = vmatprep.subr.bf16.mxu0 %v6223_v19  ;;  %6233 = vmatprep.subr.bf16.mxu1 %v6223_v19  ;;  %v4673_v57 = vsel %vm336_vm2, %v4671_v27, %v4672_v0  ;;  %v4675_v43 = vsel %vm336_vm2, %v4672_v0, %v4674_v22 }
 0x869   : > { %v4761_v51 = vsel %vm419_vm3, %v4759_v42, %v4760_v44  ;;  %v4763_v47 = vsel %vm419_vm3, %v4760_v44, %v4762_v4 }
 0x86a   : > { %4615 = vrot.lane.b32.xlu0 %v4591_v37, %s6352_s13 }
 0x86b   : > { %6226 = vmatpush3.bf16.msra.mxu0 %v6223_v19  ;;  %6241 = vmatpush3.bf16.msra.mxu1 %v6223_v19 }
 0x86c   : > { %6061 = vmatprep.subr.mxu0 %v5641_v29  ;;  %6234 = vmatprep.subr.mxu1 %v5641_v29 }
 0x86e   : > { %4617 = vrot.lane.b32.xlu0 %v4553_v49, %s6352_s13 }
 0x86f   : > { %6062 = vmatpush3.msra.mxu0 %v5641_v29  ;;  %6242 = vmatpush3.msra.mxu1 %v5641_v29 }
 0x871   : > { %v4476_v5 = vpop.permute.xlu0 %4475  ;;  %v4478_v11 = vpop.permute.xlu1 %4477 }
 0x872   : > { %4711 = vrot.lane.b32.xlu0 %v4673_v57, %s6353_s20  ;;  %v4521_v3 = vsel %vm3535_vm4, %v8443_v53, %v4476_v5  ;;  %v4522_v24 = vsel %vm3535_vm4, %v8439_v21, %v4478_v11 }
 0x873   : > { %v4554_v39 = vrot.slane %v4521_v3, 7  ;;  %v4555_v58 = vrot.slane %v4522_v24, 7 }
 0x875   : > { %v4592_v60 = vsel %vm257_vm1, 0.0, %v4554_v39  ;;  %v4556_v63 = vsel %vm257_vm1, %v4554_v39, %v4555_v58  ;;  %v4600_v53 = vsel %vm257_vm1, %v4555_v58, 0.0 }
 0x876   : > { %4713 = vrot.lane.b32.xlu0 %v4675_v43, %s6353_s20  ;;  %v4676_v31 = vrot.slane %v4592_v60, 1  ;;  %v4677_v62 = vrot.slane %v4556_v63, 1  ;;  %v4679_v52 = vrot.slane %v4600_v53, 1  ;;  %v4764_v13 = vrot.slane %v4592_v60, 2 }
 0x877   : > { %v4765_v14 = vrot.slane %v4556_v63, 2  ;;  %v4767_v55 = vrot.slane %v4600_v53, 2 }
 0x878   : > { %v4678_v21 = vsel %vm336_vm2, %v4676_v31, %v4677_v62  ;;  %v4680_v9 = vsel %vm336_vm2, %v4677_v62, %v4679_v52 }
 0x879   : > { %v4766_v15 = vsel %vm419_vm3, %v4764_v13, %v4765_v14  ;;  %v4768_v56 = vsel %vm419_vm3, %v4765_v14, %v4767_v55 }
 0x87a   : > { %4799 = vrot.lane.b32.xlu0 %v4761_v51, %s6354_s5 }
 0x87e   : > { %4801 = vrot.lane.b32.xlu0 %v4763_v47, %s6354_s5 }
 0x882   : > { %4619 = vrot.lane.b32.xlu0 %v4592_v60, %s6352_s13 }
 0x886   : > { %4621 = vrot.lane.b32.xlu0 %v4556_v63, %s6352_s13 }
 0x88a   : > { %4715 = vrot.lane.b32.xlu0 %v4678_v21, %s6353_s20 }
 0x88c   : > { %v4480_v20 = vpop.permute.xlu0 %4479  ;;  %v4482_v30 = vpop.permute.xlu1 %4481 }
 0x88d   : > { %v4523_v26 = vsel %vm3535_vm4, %v8471_v1, %v4480_v20  ;;  %v4524_v18 = vsel %vm3535_vm4, %v8464_v28, %v4482_v30 }
 0x88e   : > { %4717 = vrot.lane.b32.xlu0 %v4680_v9, %s6353_s20  ;;  %v4557_v46 = vrot.slane %v4523_v26, 7  ;;  %v4558_v34 = vrot.slane %v4524_v18, 7 }
 0x890   : > { %v4593_v38 = vsel %vm257_vm1, 0.0, %v4557_v46  ;;  %v4559_v8 = vsel %vm257_vm1, %v4557_v46, %v4558_v34  ;;  %v4601_v1 = vsel %vm257_vm1, %v4558_v34, 0.0 }
 0x891   : > { %v4681_v41 = vrot.slane %v4593_v38, 1  ;;  %v4682_v17 = vrot.slane %v4559_v8, 1  ;;  %v4684_v45 = vrot.slane %v4601_v1, 1  ;;  %v4769_v61 = vrot.slane %v4593_v38, 2 }
 0x892   : > { %4803 = vrot.lane.b32.xlu0 %v4766_v15, %s6354_s5  ;;  %v4770_v35 = vrot.slane %v4559_v8, 2  ;;  %v4772_v49 = vrot.slane %v4601_v1, 2 }
 0x893   : > { %v4683_v28 = vsel %vm336_vm2, %v4681_v41, %v4682_v17  ;;  %v4685_v37 = vsel %vm336_vm2, %v4682_v17, %v4684_v45 }
 0x894   : > { %v4771_v19 = vsel %vm419_vm3, %v4769_v61, %v4770_v35  ;;  %v4773_v29 = vsel %vm419_vm3, %v4770_v35, %v4772_v49 }
 0x896   : > { %4805 = vrot.lane.b32.xlu0 %v4768_v56, %s6354_s5 }
 0x89a   : > { %4623 = vrot.lane.b32.xlu0 %v4593_v38, %s6352_s13 }
 0x89e   : > { %4625 = vrot.lane.b32.xlu0 %v4559_v8, %s6352_s13 }
 0x8a0   : > { %v4484_v2 = vpop.permute.xlu0 %4483 }
 0x8a1   : > { %v4486_v6 = vpop.permute.xlu1 %4485  ;;  %v4525_v27 = vsel %vm3535_vm4, %v8498_v12, %v4484_v2 }
 0x8a2   : > { %4719 = vrot.lane.b32.xlu0 %v4683_v28, %s6353_s20  ;;  %v4526_v0 = vsel %vm3535_vm4, %v8491_v33, %v4486_v6  ;;  %v4560_v7 = vrot.slane %v4525_v27, 7 }
 0x8a3   : > { %v4561_v22 = vrot.slane %v4526_v0, 7 }
 0x8a4   : > { %v4594_v57 = vsel %vm257_vm1, 0.0, %v4560_v7 }
 0x8a5   : > { %v4562_v42 = vsel %vm257_vm1, %v4560_v7, %v4561_v22  ;;  %v4686_v5 = vrot.slane %v4594_v57, 1  ;;  %v4602_v51 = vsel %vm257_vm1, %v4561_v22, 0.0 }
 0x8a6   : > { %4721 = vrot.lane.b32.xlu0 %v4685_v37, %s6353_s20  ;;  %v4687_v4 = vrot.slane %v4562_v42, 1  ;;  %v4689_v39 = vrot.slane %v4602_v51, 1  ;;  %v4775_v31 = vrot.slane %v4562_v42, 2  ;;  %v4777_v21 = vrot.slane %v4602_v51, 2 }
 0x8a8   : > { %v4688_v47 = vsel %vm336_vm2, %v4686_v5, %v4687_v4  ;;  %v4690_v62 = vsel %vm336_vm2, %v4687_v4, %v4689_v39  ;;  %v4778_v30 = vsel %vm419_vm3, %v4775_v31, %v4777_v21 }
 0x8aa   : > { %4807 = vrot.lane.b32.xlu0 %v4771_v19, %s6354_s5 }
 0x8ae   : > { %4809 = vrot.lane.b32.xlu0 %v4773_v29, %s6354_s5 }
 0x8b2   : > { %4627 = vrot.lane.b32.xlu0 %v4594_v57, %s6352_s13 }
 0x8b3   : > { %v4490_v44 = vpop.permute.xlu1 %4489 }
 0x8b4   : > { %v4528_v12 = vsel %vm3535_vm4, %v8518_v25, %v4490_v44  ;;  %v4488_v43 = vpop.permute.xlu0 %4487 }
 0x8b5   : > { %v4564_v11 = vrot.slane %v4528_v12, 7  ;;  %v4527_v33 = vsel %vm3535_vm4, %v8525_v48, %v4488_v43  ;;  %v4774_v48 = vrot.slane %v4594_v57, 2 }
 0x8b6   : > { %v4563_v3 = vrot.slane %v4527_v33, 7  ;;  %4629 = vrot.lane.b32.xlu0 %v4562_v42, %s6352_s13 }
 0x8b7   : > { %v4603_v63 = vsel %vm257_vm1, %v4564_v11, 0.0  ;;  %v4776_v13 = vsel %vm419_vm3, %v4774_v48, %v4775_v31 }
 0x8b8   : > { %v4595_v24 = vsel %vm257_vm1, 0.0, %v4563_v3  ;;  %v4565_v25 = vsel %vm257_vm1, %v4563_v3, %v4564_v11  ;;  %v4694_v53 = vrot.slane %v4603_v63, 1  ;;  %v4782_v26 = vrot.slane %v4603_v63, 2 }
 0x8b9   : > { %4631 = vrot.lane.b32.xlu1 %v4595_v24, %s6352_s13  ;;  %v4691_v58 = vrot.slane %v4595_v24, 1  ;;  %v4692_v60 = vrot.slane %v4565_v25, 1  ;;  %v4779_v14 = vrot.slane %v4595_v24, 2  ;;  %v4780_v9 = vrot.slane %v4565_v25, 2 }
 0x8ba   : > { %4723 = vrot.lane.b32.xlu0 %v4688_v47, %s6353_s20 }
 0x8bb   : > { %v4693_v52 = vsel %vm336_vm2, %v4691_v58, %v4692_v60  ;;  %v4695_v20 = vsel %vm336_vm2, %v4692_v60, %v4694_v53  ;;  %v4781_v18 = vsel %vm419_vm3, %v4779_v14, %v4780_v9  ;;  %v4783_v38 = vsel %vm419_vm3, %v4780_v9, %v4782_v26 }
 0x8bd   : > { %4633 = vrot.lane.b32.xlu1 %v4565_v25, %s6352_s13 }
 0x8be   : > { %4725 = vrot.lane.b32.xlu0 %v4690_v62, %s6353_s20 }
 0x8bf   : > { %v4492_v55 = vpop.permute.xlu0 %4491  ;;  %v4494_v15 = vpop.permute.xlu1 %4493 }
 0x8c0   : > { %v4529_v46 = vsel %vm3535_vm4, %v8546_v40, %v4492_v55  ;;  %v4530_v56 = vsel %vm3535_vm4, %v8539_v54, %v4494_v15 }
 0x8c1   : > { %4727 = vrot.lane.b32.xlu1 %v4693_v52, %s6353_s20  ;;  %v4566_v34 = vrot.slane %v4529_v46, 7  ;;  %v4567_v8 = vrot.slane %v4530_v56, 7 }
 0x8c2   : > { %4811 = vrot.lane.b32.xlu0 %v4776_v13, %s6354_s5 }
 0x8c3   : > { %v4596_v41 = vsel %vm257_vm1, 0.0, %v4566_v34  ;;  %v4568_v17 = vsel %vm257_vm1, %v4566_v34, %v4567_v8  ;;  %v4604_v28 = vsel %vm257_vm1, %v4567_v8, 0.0 }
 0x8c4   : > { %v4696_v45 = vrot.slane %v4596_v41, 1  ;;  %v4697_v40 = vrot.slane %v4568_v17, 1  ;;  %v4699_v54 = vrot.slane %v4604_v28, 1  ;;  %v4784_v37 = vrot.slane %v4596_v41, 2 }
 0x8c5   : > { %4729 = vrot.lane.b32.xlu1 %v4695_v20, %s6353_s20  ;;  %v4785_v2 = vrot.slane %v4568_v17, 2  ;;  %v4787_v27 = vrot.slane %v4604_v28, 2 }
 0x8c6   : > { %4813 = vrot.lane.b32.xlu0 %v4778_v30, %s6354_s5  ;;  %v4698_v35 = vsel %vm336_vm2, %v4696_v45, %v4697_v40  ;;  %v4700_v49 = vsel %vm336_vm2, %v4697_v40, %v4699_v54 }
 0x8c7   : > { %v4786_v7 = vsel %vm419_vm3, %v4784_v37, %v4785_v2  ;;  %v4788_v44 = vsel %vm419_vm3, %v4785_v2, %v4787_v27 }
 0x8c9   : > { %4815 = vrot.lane.b32.xlu1 %v4781_v18, %s6354_s5 }
 0x8cb   : > { %v4496_v1 = vpop.permute.xlu0 %4495  ;;  %v4498_v19 = vpop.permute.xlu1 %4497 }
 0x8cc   : > { %v4531_v29 = vsel %vm3535_vm4, %v8570_v10, %v4496_v1  ;;  %v4532_v22 = vsel %vm3535_vm4, %v8566_v32, %v4498_v19 }
 0x8cd   : > { %4817 = vrot.lane.b32.xlu1 %v4783_v38, %s6354_s5  ;;  %v4569_v57 = vrot.slane %v4531_v29, 7  ;;  %v4570_v12 = vrot.slane %v4532_v22, 7 }
 0x8cf   : > { %v4597_v5 = vsel %vm257_vm1, 0.0, %v4569_v57  ;;  %v4571_v11 = vsel %vm257_vm1, %v4569_v57, %v4570_v12  ;;  %v4605_v3 = vsel %vm257_vm1, %v4570_v12, 0.0 }
 0x8d0   : > { %v4701_v32 = vrot.slane %v4597_v5, 1  ;;  %v4702_v51 = vrot.slane %v4571_v11, 1  ;;  %v4704_v47 = vrot.slane %v4605_v3, 1  ;;  %v4789_v63 = vrot.slane %v4597_v5, 2 }
 0x8d1   : > { %4635 = vrot.lane.b32.xlu1 %v4596_v41, %s6352_s13  ;;  %v4790_v31 = vrot.slane %v4571_v11, 2  ;;  %v4792_v21 = vrot.slane %v4605_v3, 2 }
 0x8d2   : > { %v4703_v60 = vsel %vm336_vm2, %v4701_v32, %v4702_v51  ;;  %v4705_v53 = vsel %vm336_vm2, %v4702_v51, %v4704_v47 }
 0x8d3   : > { %v4791_v14 = vsel %vm419_vm3, %v4789_v63, %v4790_v31  ;;  %v4793_v15 = vsel %vm419_vm3, %v4790_v31, %v4792_v21 }
 0x8d5   : > { %4637 = vrot.lane.b32.xlu1 %v4568_v17, %s6352_s13 }
 0x8d7   : > { %v4502_v52 = vpop.permute.xlu1 %4501 }
 0x8d8   : > { %v4500_v61 = vpop.permute.xlu0 %4499  ;;  %v4534_v20 = vsel %vm3535_vm4, %v8593_v16, %v4502_v52 }
 0x8d9   : > { %4731 = vrot.lane.b32.xlu1 %v4698_v35, %s6353_s20  ;;  %v4533_v9 = vsel %vm3535_vm4, %v8602_v50, %v4500_v61  ;;  %v4573_v26 = vrot.slane %v4534_v20, 7  ;;  %v223_v61 = vld [vmem:[%s9388_s3 + $0x8] sm:$0x3] }
 0x8da   : > { %v4572_v30 = vrot.slane %v4533_v9, 7  ;;  %v5335_v37 = vrot.slane %v223_v61, %v6746_v23  ;;  %v5362_v2 = vrot.slane %v223_v61, %v6757_v36 }
 0x8db   : > { %v4606_v41 = vsel %vm257_vm1, %v4573_v26, 0.0 }
 0x8dc   : > { %v4616_v6 = vpop.permute.xlu0 %4615  ;;  %v4598_v46 = vsel %vm257_vm1, 0.0, %v4572_v30  ;;  %v4574_v56 = vsel %vm257_vm1, %v4572_v30, %v4573_v26  ;;  %v4709_v45 = vrot.slane %v4606_v41, 1  ;;  %5337 = vbcast.lane.b32.xlu0 %v5335_v37, 256 }
 0x8dd   : > { %4733 = vrot.lane.b32.xlu1 %v4700_v49, %s6353_s20  ;;  %v4847_v10 = vsel %vm690_vm6, %v6695_v59, %v4616_v6  ;;  %v4706_v16 = vrot.slane %v4598_v46, 1  ;;  %v4707_v8 = vrot.slane %v4574_v56, 1  ;;  %v4794_v6 = vrot.slane %v4598_v46, 2 }
 0x8de   : > { %v4795_v49 = vrot.slane %v4574_v56, 2 }
 0x8df   : > { %v4708_v54 = vsel %vm336_vm2, %v4706_v16, %v4707_v8  ;;  %v4710_v27 = vsel %vm336_vm2, %v4707_v8, %v4709_v45 }
 0x8e0   : > { %v4618_v0 = vpop.permute.xlu0 %4617  ;;  %5364 = vbcast.lane.b32.xlu0 %v5362_v2, 256  ;;  %v4796_v29 = vsel %vm419_vm3, %v4794_v6, %v4795_v49 }
 0x8e1   : > { %4819 = vrot.lane.b32.xlu1 %v4786_v7, %s6354_s5  ;;  %v4848_v39 = vsel %vm690_vm6, %v6695_v59, %v4618_v0  ;;  %v4797_v0 = vrot.slane %v4606_v41, 2 }
 0x8e3   : > { %v4798_v57 = vsel %vm419_vm3, %v4795_v49, %v4797_v0 }
 0x8e4   : > { %v4712_v42 = vpop.permute.xlu0 %4711 }
 0x8e5   : > { %4821 = vrot.lane.b32.xlu1 %v4788_v44, %s6354_s5  ;;  %v4863_v33 = vsel %vm707_vm7, %v4847_v10, %v4712_v42 }
 0x8e8   : > { %v4714_v43 = vpop.permute.xlu0 %4713 }
 0x8e9   : > { %4639 = vrot.lane.b32.xlu1 %v4597_v5, %s6352_s13  ;;  %v4864_v25 = vsel %vm707_vm7, %v4848_v39, %v4714_v43 }
 0x8ec   : > { %v4800_v4 = vpop.permute.xlu0 %4799 }
 0x8ed   : > { %v4879_v24 = vsel %vm724_vm8, %v4863_v33, %v4800_v4  ;;  %4641 = vrot.lane.b32.xlu1 %v4571_v11, %s6352_s13 }
 0x8ee   : > { %6063 = vmatprep.mubr.msk.f32.mxu0 %vm760_vm9, %v4879_v24 }
 0x8f0   : > { %v4802_v58 = vpop.permute.xlu0 %4801 }
 0x8f1   : > { %v4880_v48 = vsel %vm724_vm8, %v4864_v25, %v4802_v58  ;;  %4735 = vrot.lane.b32.xlu1 %v4703_v60, %s6353_s20 }
 0x8f2   : > { %6064 = vmatmul.mubr.msk.f32.vlgmr.msra.gmra.mrb[32].mxu0 %vm760_vm9, %v4880_v48 }
 0x8f4   : > { %v4620_v62 = vpop.permute.xlu0 %4619 }
 0x8f5   : > { %4737 = vrot.lane.b32.xlu1 %v4705_v53, %s6353_s20  ;;  %v4849_v50 = vsel %vm690_vm6, %v6695_v59, %v4620_v62 }
 0x8f8   : > { %v4622_v13 = vpop.permute.xlu0 %4621 }
 0x8f9   : > { %4823 = vrot.lane.b32.xlu1 %v4791_v14, %s6354_s5  ;;  %v4850_v1 = vsel %vm690_vm6, %v6695_v59, %v4622_v13 }
 0x8fc   : > { %v4716_v55 = vpop.permute.xlu0 %4715 }
 0x8fd   : > { %4825 = vrot.lane.b32.xlu1 %v4793_v15, %s6354_s5  ;;  %v4865_v34 = vsel %vm707_vm7, %v4849_v50, %v4716_v55 }
 0x900   : > { %v4718_v18 = vpop.permute.xlu0 %4717 }
 0x901   : > { %4643 = vrot.lane.b32.xlu1 %v4598_v46, %s6352_s13  ;;  %v4866_v40 = vsel %vm707_vm7, %v4850_v1, %v4718_v18 }
 0x904   : > { %v4804_v38 = vpop.permute.xlu0 %4803 }
 0x905   : > { %v4881_v17 = vsel %vm724_vm8, %v4865_v34, %v4804_v38  ;;  %4645 = vrot.lane.b32.xlu1 %v4574_v56, %s6352_s13 }
 0x906   : > { %6066 = vmatprep.mubr.msk.f32.mxu0 %vm760_vm9, %v4881_v17 }
 0x908   : > { %v4806_v28 = vpop.permute.xlu0 %4805 }
 0x909   : > { %v4882_v35 = vsel %vm724_vm8, %v4866_v40, %v4806_v28  ;;  %4739 = vrot.lane.b32.xlu1 %v4708_v54, %s6353_s20 }
 0x90a   : > { %6067 = vmatmul.mubr.msk.f32.gmra.mrb[34].mxu0 %vm760_vm9, %v4882_v35 }
 0x90c   : > { %v4624_v19 = vpop.permute.xlu0 %4623 }
 0x90d   : > { %4741 = vrot.lane.b32.xlu1 %v4710_v27, %s6353_s20  ;;  %v4851_v44 = vsel %vm690_vm6, %v6695_v59, %v4624_v19 }
 0x910   : > { %v4626_v7 = vpop.permute.xlu0 %4625 }
 0x911   : > { %4827 = vrot.lane.b32.xlu1 %v4796_v29, %s6354_s5  ;;  %v4852_v11 = vsel %vm690_vm6, %v6695_v59, %v4626_v7 }
 0x914   : > { %v4720_v22 = vpop.permute.xlu0 %4719 }
 0x915   : > { %4829 = vrot.lane.b32.xlu1 %v4798_v57, %s6354_s5  ;;  %v4867_v12 = vsel %vm707_vm7, %v4851_v44, %v4720_v22 }
 0x918   : > { %v4722_v42 = vpop.permute.xlu0 %4721 }
 0x919   : > { %5341 = vbcast.lane.b32.xlu1 %v5335_v37, 264  ;;  %v4868_v10 = vsel %vm707_vm7, %v4852_v11, %v4722_v42 }
 0x91c   : > { %v4808_v43 = vpop.permute.xlu0 %4807 }
 0x91d   : > { %v4883_v5 = vsel %vm724_vm8, %v4867_v12, %v4808_v43  ;;  %5368 = vbcast.lane.b32.xlu1 %v5362_v2, 264 }
 0x91e   : > { %6069 = vmatprep.mubr.msk.f32.mxu0 %vm760_vm9, %v4883_v5 }
 0x920   : > { %v4810_v33 = vpop.permute.xlu0 %4809 }
 0x921   : > { %v4884_v32 = vsel %vm724_vm8, %v4868_v10, %v4810_v33 }
 0x922   : > { %6070 = vmatmul.mubr.msk.f32.gmra.mrb[36].mxu0 %vm760_vm9, %v4884_v32  ;;  %v9179_v32 = vld [vmem:[%s9387_s2 + $0x8] sm:$0x3] }
 0x924   : > { %v4628_v4 = vpop.permute.xlu0 %4627 }
 0x925   : > { %v4853_v25 = vsel %vm690_vm6, %v6695_v59, %v4628_v4  ;;  %v9183_v4 = vrot.slane %v9179_v32, %v6746_v23 }
 0x928   : > { %v4630_v51 = vpop.permute.xlu0 %4629 }
 0x929   : > { %v4854_v31 = vsel %vm690_vm6, %v6695_v59, %v4630_v51 }
 0x92b   : > { %v4632_v3 = vpop.permute.xlu1 %4631 }
 0x92c   : > { %v4724_v24 = vpop.permute.xlu0 %4723  ;;  %v4855_v13 = vsel %vm690_vm6, %v6695_v59, %v4632_v3 }
 0x92d   : > { %v4869_v60 = vsel %vm707_vm7, %v4853_v25, %v4724_v24 }
 0x92f   : > { %v4634_v39 = vpop.permute.xlu1 %4633 }
 0x930   : > { %v4726_v47 = vpop.permute.xlu0 %4725  ;;  %v4856_v30 = vsel %vm690_vm6, %v6695_v59, %v4634_v39 }
 0x931   : > { %v4870_v53 = vsel %vm707_vm7, %v4854_v31, %v4726_v47 }
 0x933   : > { %v4728_v58 = vpop.permute.xlu1 %4727 }
 0x934   : > { %v4812_v48 = vpop.permute.xlu0 %4811  ;;  %v4871_v14 = vsel %vm707_vm7, %v4855_v13, %v4728_v58 }
 0x935   : > { %v4885_v63 = vsel %vm724_vm8, %v4869_v60, %v4812_v48 }
 0x936   : > { %6072 = vmatprep.mubr.msk.f32.mxu0 %vm760_vm9, %v4885_v63 }
 0x937   : > { %v4730_v62 = vpop.permute.xlu1 %4729 }
 0x938   : > { %v4814_v52 = vpop.permute.xlu0 %4813  ;;  %v4872_v55 = vsel %vm707_vm7, %v4856_v30, %v4730_v62 }
 0x939   : > { %v4886_v21 = vsel %vm724_vm8, %v4870_v53, %v4814_v52 }
 0x93a   : > { %6073 = vmatmul.mubr.msk.f32.gmra.mrb[38].mxu0 %vm760_vm9, %v4886_v21 }
 0x93b   : > { %v4816_v9 = vpop.permute.xlu1 %4815 }
 0x93c   : > { %v4887_v20 = vsel %vm724_vm8, %v4871_v14, %v4816_v9 }
 0x93d   : > { %6075 = vmatprep.mubr.msk.f32.mxu1 %vm760_vm9, %v4887_v20 }
 0x93f   : > { %v4818_v15 = vpop.permute.xlu1 %4817 }
 0x940   : > { %v4888_v26 = vsel %vm724_vm8, %v4872_v55, %v4818_v15 }
 0x941   : > { %6076 = vmatmul.mubr.msk.f32.vlgmr.msra.gmra.mrb[32].mxu1 %vm760_vm9, %v4888_v26 }
 0x943   : > { %v4636_v18 = vpop.permute.xlu1 %4635 }
 0x944   : > { %v4857_v34 = vsel %vm690_vm6, %v6695_v59, %v4636_v18 }
 0x947   : > { %v4638_v46 = vpop.permute.xlu1 %4637 }
 0x948   : > { %v4858_v41 = vsel %vm690_vm6, %v6695_v59, %v4638_v46 }
 0x94b   : > { %v4732_v56 = vpop.permute.xlu1 %4731 }
 0x94c   : > { %v4873_v16 = vsel %vm707_vm7, %v4857_v34, %v4732_v56 }
 0x94f   : > { %v4734_v50 = vpop.permute.xlu1 %4733 }
 0x950   : > { %v4874_v17 = vsel %vm707_vm7, %v4858_v41, %v4734_v50 }
 0x953   : > { %v4820_v38 = vpop.permute.xlu1 %4819 }
 0x954   : > { %v4889_v8 = vsel %vm724_vm8, %v4873_v16, %v4820_v38 }
 0x955   : > { %6078 = vmatprep.mubr.msk.f32.mxu1 %vm760_vm9, %v4889_v8 }
 0x957   : > { %v4822_v1 = vpop.permute.xlu1 %4821 }
 0x958   : > { %v4890_v45 = vsel %vm724_vm8, %v4874_v17, %v4822_v1 }
 0x959   : > { %6079 = vmatmul.mubr.msk.f32.gmra.mrb[34].mxu1 %vm760_vm9, %v4890_v45 }
 0x95b   : > { %v4640_v40 = vpop.permute.xlu1 %4639 }
 0x95c   : > { %v4859_v35 = vsel %vm690_vm6, %v6695_v59, %v4640_v40 }
 0x95f   : > { %v4642_v28 = vpop.permute.xlu1 %4641 }
 0x960   : > { %v4860_v49 = vsel %vm690_vm6, %v6695_v59, %v4642_v28 }
 0x963   : > { %v4736_v54 = vpop.permute.xlu1 %4735 }
 0x964   : > { %v4875_v37 = vsel %vm707_vm7, %v4859_v35, %v4736_v54 }
 0x967   : > { %v4738_v61 = vpop.permute.xlu1 %4737 }
 0x968   : > { %v4876_v19 = vsel %vm707_vm7, %v4860_v49, %v4738_v61 }
 0x96b   : > { %v4824_v2 = vpop.permute.xlu1 %4823 }
 0x96c   : > { %v4891_v6 = vsel %vm724_vm8, %v4875_v37, %v4824_v2 }
 0x96d   : > { %6081 = vmatprep.mubr.msk.f32.mxu1 %vm760_vm9, %v4891_v6 }
 0x96f   : > { %v4826_v27 = vpop.permute.xlu1 %4825 }
 0x970   : > { %v4892_v0 = vsel %vm724_vm8, %v4876_v19, %v4826_v27 }
 0x971   : > { %6082 = vmatmul.mubr.msk.f32.gmra.mrb[36].mxu1 %vm760_vm9, %v4892_v0 }
 0x973   : > { %v4644_v7 = vpop.permute.xlu1 %4643 }
 0x974   : > { %v4861_v42 = vsel %vm690_vm6, %v6695_v59, %v4644_v7 }
 0x977   : > { %v4646_v29 = vpop.permute.xlu1 %4645 }
 0x978   : > { %v4862_v5 = vsel %vm690_vm6, %v6695_v59, %v4646_v29 }
 0x97b   : > { %v4740_v22 = vpop.permute.xlu1 %4739 }
 0x97c   : > { %v4877_v44 = vsel %vm707_vm7, %v4861_v42, %v4740_v22 }
 0x97f   : > { %v4742_v57 = vpop.permute.xlu1 %4741 }
 0x980   : > { %v4878_v11 = vsel %vm707_vm7, %v4862_v5, %v4742_v57 }
 0x983   : > { %v4828_v12 = vpop.permute.xlu1 %4827 }
 0x984   : > { %v4893_v43 = vsel %vm724_vm8, %v4877_v44, %v4828_v12  ;;  %v9209_v12 = vpop.permute.xlu0 %5337 }
 0x985   : > { %6084 = vmatprep.mubr.msk.f32.mxu1 %vm760_vm9, %v4893_v43 }
 0x987   : > { %v4830_v10 = vpop.permute.xlu1 %4829 }
 0x988   : > { %v4894_v33 = vsel %vm724_vm8, %v4878_v11, %v4830_v10 }
 0x989   : > { %6085 = vmatmul.mubr.msk.f32.gmra.mrb[38].mxu1 %vm760_vm9, %v4894_v33 }
 0x98b   : > { %v9207_v44 = vpop.permute.xlu1 %5341 }
 0x9c5   : > { %v6065_v51 = vpop.f32.mrb[32].mxu0 }
 0x9c6   : > { %v5035_v3 = vadd.f32 %v6065_v51, %v9183_v4  ;;  %v5029_v59 = vpop.f32.mrb[33].mxu0 }
 0x9c7   : > { %v5030_v24 = vadd.f32 %v5029_v59, %v9183_v4 }
 0x9c8   : > { %v5109_v39 = vsel %vm224_vm0, %v5035_v3, 0.0 }
 0x9c9   : > { %v5108_v47 = vsel %vm224_vm0, %v5030_v24, 0.0 }
 0x9ca   : > { %v5110_v25 = vadd.f32 %v5109_v39, %v5108_v47  ;;  %v9213_v47 = vpop.permute.xlu1 %5368 }
 0x9cc   : > { %v5111_v58 = vrot.slane %v5110_v25, 4 }
 0x9ce   : > { %v5112_v60 = vadd.f32 %v5111_v58, %v5110_v25  ;;  %v9215_v25 = vpop.permute.xlu0 %5364  ;;  %v9219_v58 = vrot.slane %v9179_v32, %v6757_v36 }
 0x9d0   : > { %v5113_v48 = vrot.slane %v5112_v60, 2 }
 0x9d2   : > { %v5114_v63 = vadd.f32 %v5113_v48, %v5112_v60 }
 0x9d4   : > { %v5115_v31 = vrot.slane %v5114_v63, 1 }
 0x9d6   : > { %v5116_v62 = vadd.f32 %v5115_v31, %v5114_v63 }
 0x9d8   : > { %v5180_v53 = vmul.f32 0.0625, %v5116_v62 }
 0x9da   : > { %v5188_v23 = vsub.f32 %v5030_v24, %v5180_v53  ;;  %v5189_v52 = vsub.f32 %v5035_v3, %v5180_v53 }
 0x9dc   : > { %v5204_v21 = vmul.f32 %v5188_v23, %v5188_v23  ;;  %v5205_v13 = vmul.f32 %v5189_v52, %v5189_v52 }
 0x9dd   : > { %v6068_v14 = vpop.f32.mrb[34].mxu0 }
 0x9de   : > { %v5220_v9 = vsel %vm224_vm0, %v5204_v21, 0.0  ;;  %v5221_v20 = vsel %vm224_vm0, %v5205_v13, 0.0  ;;  %v5045_v30 = vadd.f32 %v6068_v14, %v9183_v4  ;;  %v5039_v55 = vpop.f32.mrb[35].mxu0 }
 0x9df   : > { %v5222_v15 = vadd.f32 %v5221_v20, %v5220_v9  ;;  %v5040_v26 = vadd.f32 %v5039_v55, %v9183_v4 }
 0x9e0   : > { %v5118_v18 = vsel %vm224_vm0, %v5045_v30, 0.0 }
 0x9e1   : > { %v5223_v46 = vrot.slane %v5222_v15, 4  ;;  %v5117_v56 = vsel %vm224_vm0, %v5040_v26, 0.0 }
 0x9e2   : > { %v5119_v50 = vadd.f32 %v5118_v18, %v5117_v56 }
 0x9e3   : > { %v5224_v34 = vadd.f32 %v5223_v46, %v5222_v15 }
 0x9e4   : > { %v5120_v16 = vrot.slane %v5119_v50, 4 }
 0x9e5   : > { %v5225_v38 = vrot.slane %v5224_v34, 2 }
 0x9e6   : > { %v5121_v8 = vadd.f32 %v5120_v16, %v5119_v50 }
 0x9e7   : > { %v5226_v41 = vadd.f32 %v5225_v38, %v5224_v34 }
 0x9e8   : > { %v5122_v17 = vrot.slane %v5121_v8, 2 }
 0x9e9   : > { %v5227_v1 = vrot.slane %v5226_v41, 1 }
 0x9ea   : > { %v5123_v45 = vadd.f32 %v5122_v17, %v5121_v8 }
 0x9eb   : > { %v5228_v40 = vadd.f32 %v5227_v1, %v5226_v41 }
 0x9ec   : > { %v5124_v28 = vrot.slane %v5123_v45, 1 }
 0x9ed   : > { %v5292_v54 = vmul.f32 0.0625, %v5228_v40 }
 0x9ee   : > { %v5125_v61 = vadd.f32 %v5124_v28, %v5123_v45 }
 0x9ef   : > { %v5300_v35 = vadd.f32 1e-05, %v5292_v54 }
 0x9f0   : > { %v5181_v37 = vmul.f32 0.0625, %v5125_v61 }
 0x9f1   : > { %6325 = vrsqrt.f32 %v5300_v35 }
 0x9f2   : > { %v9195_v2 = vsub.f32 %v5040_v26, %v5181_v37  ;;  %v9197_v6 = vsub.f32 %v5045_v30, %v5181_v37 }
 0x9f4   : > { %v5206_v49 = vmul.f32 %v9195_v2, %v9195_v2  ;;  %v5207_v19 = vmul.f32 %v9197_v6, %v9197_v6 }
 0x9f5   : > { %v6071_v27 = vpop.f32.mrb[36].mxu0 }
 0x9f6   : > { %v5229_v0 = vsel %vm224_vm0, %v5206_v49, 0.0  ;;  %v5230_v7 = vsel %vm224_vm0, %v5207_v19, 0.0  ;;  %v5055_v29 = vadd.f32 %v6071_v27, %v9183_v4  ;;  %v5049_v22 = vpop.f32.mrb[37].mxu0 }
 0x9f7   : > { %v5231_v57 = vadd.f32 %v5230_v7, %v5229_v0  ;;  %v5050_v42 = vadd.f32 %v5049_v22, %v9183_v4 }
 0x9f8   : > { %v5127_v43 = vsel %vm224_vm0, %v5055_v29, 0.0 }
 0x9f9   : > { %v5232_v5 = vrot.slane %v5231_v57, 4  ;;  %v5126_v11 = vsel %vm224_vm0, %v5050_v42, 0.0 }
 0x9fa   : > { %v5128_v10 = vadd.f32 %v5127_v43, %v5126_v11 }
 0x9fb   : > { %v6326_v33 = vpop.eup %6325  ;;  %v5233_v51 = vadd.f32 %v5232_v5, %v5231_v57 }
 0x9fc   : > { %v5316_v3 = vmul.f32 %v6326_v33, %v5188_v23  ;;  %v5317_v59 = vmul.f32 %v6326_v33, %v5189_v52  ;;  %v5129_v24 = vrot.slane %v5128_v10, 4 }
 0x9fd   : > { %v5234_v39 = vrot.slane %v5233_v51, 2 }
 0x9fe   : > { %v5130_v60 = vadd.f32 %v5129_v24, %v5128_v10  ;;  %v5344_v48 = vmul.f32 %v9207_v44, %v5317_v59  ;;  %v5343_v63 = vmul.f32 %v9209_v12, %v5316_v3 }
 0x9ff   : > { %v5235_v31 = vadd.f32 %v5234_v39, %v5233_v51 }
 0xa00   : > { %v5131_v62 = vrot.slane %v5130_v60, 2  ;;  %v5371_v53 = vadd.f32 %v9213_v47, %v5344_v48  ;;  %v5370_v23 = vadd.f32 %v9215_v25, %v5343_v63 }
 0xa01   : > { %v5236_v52 = vrot.slane %v5235_v31, 1 }
 0xa02   : > { %v5132_v36 = vadd.f32 %v5131_v62, %v5130_v60  ;;  %vm5387_vm1 = vcmp.ge.f32.partialorder %v5371_v53, 0.0  ;;  %v5407_v32 = vmul.f32 %v9219_v58, %v5371_v53  ;;  %vm5386_vm2 = vcmp.ge.f32.partialorder %v5370_v23, 0.0 }
 0xa03   : > { %v5237_v21 = vadd.f32 %v5236_v52, %v5235_v31  ;;  %v5406_v13 = vmul.f32 %v9219_v58, %v5370_v23 }
 0xa04   : > { %v5133_v14 = vrot.slane %v5132_v36, 1  ;;  %v5423_v9 = vsel %vm5387_vm1, %v5371_v53, %v5407_v32 }
 0xa05   : > { %v5293_v20 = vmul.f32 0.0625, %v5237_v21  ;;  %5439 = vst.msk [vmem:[%s9230_s26 + $0x8] sm:$0xff] %vm224_vm0, %v5423_v9  ;;  %v5422_v30 = vsel %vm5386_vm2, %v5370_v23, %v5406_v13 }
 0xa06   : > { %v5134_v55 = vadd.f32 %v5133_v14, %v5132_v36  ;;  %5438 = vst.msk [vmem:[%s9230_s26] sm:$0xff] %vm224_vm0, %v5422_v30 }
 0xa07   : > { %v5301_v15 = vadd.f32 1e-05, %v5293_v20 }
 0xa08   : > { %v5182_v26 = vmul.f32 0.0625, %v5134_v55 }
 0xa09   : > { %6327 = vrsqrt.f32 %v5301_v15 }
 0xa0a   : > { %v9238_v18 = vsub.f32 %v5050_v42, %v5182_v26  ;;  %v9240_v46 = vsub.f32 %v5055_v29, %v5182_v26 }
 0xa0c   : > { %v5208_v56 = vmul.f32 %v9238_v18, %v9238_v18  ;;  %v5209_v50 = vmul.f32 %v9240_v46, %v9240_v46 }
 0xa0d   : > { %v6074_v34 = vpop.f32.mrb[38].mxu0 }
 0xa0e   : > { %v5238_v16 = vsel %vm224_vm0, %v5208_v56, 0.0  ;;  %v5239_v38 = vsel %vm224_vm0, %v5209_v50, 0.0  ;;  %v5065_v8 = vadd.f32 %v6074_v34, %v9183_v4  ;;  %v5059_v41 = vpop.f32.mrb[39].mxu0 }
 0xa0f   : > { %v5240_v17 = vadd.f32 %v5239_v38, %v5238_v16  ;;  %v5060_v1 = vadd.f32 %v5059_v41, %v9183_v4 }
 0xa10   : > { %v5136_v45 = vsel %vm224_vm0, %v5065_v8, 0.0 }
 0xa11   : > { %v5241_v40 = vrot.slane %v5240_v17, 4  ;;  %v5135_v28 = vsel %vm224_vm0, %v5060_v1, 0.0 }
 0xa12   : > { %v5137_v54 = vadd.f32 %v5136_v45, %v5135_v28 }
 0xa13   : > { %v6328_v61 = vpop.eup %6327  ;;  %v5242_v35 = vadd.f32 %v5241_v40, %v5240_v17 }
 0xa14   : > { %v5318_v37 = vmul.f32 %v6328_v61, %v9195_v2  ;;  %v5319_v49 = vmul.f32 %v6328_v61, %v9197_v6  ;;  %v5138_v19 = vrot.slane %v5137_v54, 4  ;;  %v6077_v27 = vpop.f32.mrb[32].mxu1 }
 0xa15   : > { %v5243_v0 = vrot.slane %v5242_v35, 2  ;;  %v5075_v7 = vadd.f32 %v6077_v27, %v9183_v4  ;;  %v5069_v29 = vpop.f32.mrb[33].mxu1 }
 0xa16   : > { %v5346_v22 = vmul.f32 %v9207_v44, %v5319_v49  ;;  %v5345_v57 = vmul.f32 %v9209_v12, %v5318_v37  ;;  %v5139_v42 = vadd.f32 %v5138_v19, %v5137_v54  ;;  %v5070_v43 = vadd.f32 %v5069_v29, %v9183_v4 }
 0xa17   : > { %v5244_v5 = vadd.f32 %v5243_v0, %v5242_v35  ;;  %v5145_v11 = vsel %vm224_vm0, %v5075_v7, 0.0 }
 0xa18   : > { %v5373_v2 = vadd.f32 %v9213_v47, %v5346_v22  ;;  %v5372_v6 = vadd.f32 %v9215_v25, %v5345_v57  ;;  %v5140_v10 = vrot.slane %v5139_v42, 2  ;;  %v5144_v33 = vsel %vm224_vm0, %v5070_v43, 0.0 }
 0xa19   : > { %v5245_v51 = vrot.slane %v5244_v5, 1  ;;  %v5146_v3 = vadd.f32 %v5145_v11, %v5144_v33 }
 0xa1a   : > { %vm5389_vm3 = vcmp.ge.f32.partialorder %v5373_v2, 0.0  ;;  %v5409_v59 = vmul.f32 %v9219_v58, %v5373_v2  ;;  %vm5388_vm6 = vcmp.ge.f32.partialorder %v5372_v6, 0.0  ;;  %v5408_v24 = vmul.f32 %v9219_v58, %v5372_v6 }
 0xa1b   : > { %v5246_v39 = vadd.f32 %v5245_v51, %v5244_v5  ;;  %v5141_v60 = vadd.f32 %v5140_v10, %v5139_v42  ;;  %v5147_v48 = vrot.slane %v5146_v3, 4 }
 0xa1c   : > { %v5425_v63 = vsel %vm5389_vm3, %v5373_v2, %v5409_v59  ;;  %v5424_v31 = vsel %vm5388_vm6, %v5372_v6, %v5408_v24 }
 0xa1d   : > { %v5294_v62 = vmul.f32 0.0625, %v5246_v39  ;;  %5441 = vst.msk [vmem:[%s9230_s26 + $0x18] sm:$0xff] %vm224_vm0, %v5425_v63  ;;  %5440 = vst.msk [vmem:[%s9230_s26 + $0x10] sm:$0xff] %vm224_vm0, %v5424_v31  ;;  %v5142_v53 = vrot.slane %v5141_v60, 1  ;;  %v5148_v23 = vadd.f32 %v5147_v48, %v5146_v3 }
 0xa1f   : > { %v5302_v52 = vadd.f32 1e-05, %v5294_v62  ;;  %v5143_v36 = vadd.f32 %v5142_v53, %v5141_v60  ;;  %v5149_v32 = vrot.slane %v5148_v23, 2 }
 0xa21   : > { %6329 = vrsqrt.f32 %v5302_v52  ;;  %v5183_v21 = vmul.f32 0.0625, %v5143_v36  ;;  %v5150_v13 = vadd.f32 %v5149_v32, %v5148_v23 }
 0xa23   : > { %v9268_v14 = vsub.f32 %v5060_v1, %v5183_v21  ;;  %v9270_v9 = vsub.f32 %v5065_v8, %v5183_v21  ;;  %v5151_v20 = vrot.slane %v5150_v13, 1 }
 0xa25   : > { %v5210_v30 = vmul.f32 %v9268_v14, %v9268_v14  ;;  %v5211_v55 = vmul.f32 %v9270_v9, %v9270_v9  ;;  %v5152_v15 = vadd.f32 %v5151_v20, %v5150_v13 }
 0xa27   : > { %v5247_v26 = vsel %vm224_vm0, %v5210_v30, 0.0  ;;  %v5248_v56 = vsel %vm224_vm0, %v5211_v55, 0.0  ;;  %v5184_v50 = vmul.f32 0.0625, %v5152_v15 }
 0xa28   : > { %v5249_v34 = vadd.f32 %v5248_v56, %v5247_v26 }
 0xa29   : > { %v9278_v16 = vsub.f32 %v5070_v43, %v5184_v50  ;;  %v9280_v38 = vsub.f32 %v5075_v7, %v5184_v50 }
 0xa2a   : > { %v5250_v8 = vrot.slane %v5249_v34, 4 }
 0xa2b   : > { %v6330_v41 = vpop.eup %6329  ;;  %v5212_v17 = vmul.f32 %v9278_v16, %v9278_v16  ;;  %v5213_v1 = vmul.f32 %v9280_v38, %v9280_v38 }
 0xa2c   : > { %v5320_v45 = vmul.f32 %v6330_v41, %v9238_v18  ;;  %v5321_v40 = vmul.f32 %v6330_v41, %v9240_v46  ;;  %v5251_v28 = vadd.f32 %v5250_v8, %v5249_v34  ;;  %v6080_v54 = vpop.f32.mrb[34].mxu1 }
 0xa2d   : > { %v5256_v61 = vsel %vm224_vm0, %v5212_v17, 0.0  ;;  %v5257_v35 = vsel %vm224_vm0, %v5213_v1, 0.0  ;;  %v5085_v37 = vadd.f32 %v6080_v54, %v9183_v4  ;;  %v5079_v49 = vpop.f32.mrb[35].mxu1 }
 0xa2e   : > { %v5348_v19 = vmul.f32 %v9207_v44, %v5321_v40  ;;  %v5347_v27 = vmul.f32 %v9209_v12, %v5320_v45  ;;  %v5252_v0 = vrot.slane %v5251_v28, 2  ;;  %v5258_v7 = vadd.f32 %v5257_v35, %v5256_v61 }
 0xa2f   : > { %v5154_v29 = vsel %vm224_vm0, %v5085_v37, 0.0  ;;  %v5080_v18 = vadd.f32 %v5079_v49, %v9183_v4 }
 0xa30   : > { %v5375_v46 = vadd.f32 %v9213_v47, %v5348_v19  ;;  %v5374_v22 = vadd.f32 %v9215_v25, %v5347_v27  ;;  %v5253_v57 = vadd.f32 %v5252_v0, %v5251_v28  ;;  %v5259_v42 = vrot.slane %v5258_v7, 4 }
 0xa31   : > { %v5153_v43 = vsel %vm224_vm0, %v5080_v18, 0.0 }
 0xa32   : > { %vm5391_vm7 = vcmp.ge.f32.partialorder %v5375_v46, 0.0  ;;  %v5411_v5 = vmul.f32 %v9219_v58, %v5375_v46  ;;  %vm5390_vm8 = vcmp.ge.f32.partialorder %v5374_v22, 0.0  ;;  %v5410_v11 = vmul.f32 %v9219_v58, %v5374_v22 }
 0xa33   : > { %v5254_v2 = vrot.slane %v5253_v57, 1  ;;  %v5260_v6 = vadd.f32 %v5259_v42, %v5258_v7  ;;  %v5155_v10 = vadd.f32 %v5154_v29, %v5153_v43 }
 0xa34   : > { %v5427_v33 = vsel %vm5391_vm7, %v5375_v46, %v5411_v5  ;;  %v5426_v51 = vsel %vm5390_vm8, %v5374_v22, %v5410_v11 }
 0xa35   : > { %5443 = vst.msk [vmem:[%s9230_s26 + $0x28] sm:$0xff] %vm224_vm0, %v5427_v33  ;;  %5442 = vst.msk [vmem:[%s9230_s26 + $0x20] sm:$0xff] %vm224_vm0, %v5426_v51  ;;  %v5255_v3 = vadd.f32 %v5254_v2, %v5253_v57  ;;  %v5261_v59 = vrot.slane %v5260_v6, 2  ;;  %v5156_v24 = vrot.slane %v5155_v10, 4 }
 0xa37   : > { %v5295_v39 = vmul.f32 0.0625, %v5255_v3  ;;  %v5262_v60 = vadd.f32 %v5261_v59, %v5260_v6  ;;  %v5157_v48 = vadd.f32 %v5156_v24, %v5155_v10 }
 0xa39   : > { %v5303_v63 = vadd.f32 1e-05, %v5295_v39  ;;  %v5263_v31 = vrot.slane %v5262_v60, 1  ;;  %v5158_v62 = vrot.slane %v5157_v48, 2 }
 0xa3b   : > { %6331 = vrsqrt.f32 %v5303_v63  ;;  %v5264_v53 = vadd.f32 %v5263_v31, %v5262_v60  ;;  %v5159_v23 = vadd.f32 %v5158_v62, %v5157_v48 }
 0xa3d   : > { %v5296_v52 = vmul.f32 0.0625, %v5264_v53  ;;  %v5160_v36 = vrot.slane %v5159_v23, 1 }
 0xa3f   : > { %v5304_v32 = vadd.f32 1e-05, %v5296_v52  ;;  %v5161_v21 = vadd.f32 %v5160_v36, %v5159_v23 }
 0xa41   : > { %6333 = vrsqrt.f32 %v5304_v32  ;;  %v5185_v13 = vmul.f32 0.0625, %v5161_v21 }
 0xa43   : > { %v9304_v20 = vsub.f32 %v5080_v18, %v5185_v13  ;;  %v9306_v30 = vsub.f32 %v5085_v37, %v5185_v13 }
 0xa44   : > { %v6083_v55 = vpop.f32.mrb[36].mxu1 }
 0xa45   : > { %v6332_v15 = vpop.eup %6331  ;;  %v5214_v26 = vmul.f32 %v9304_v20, %v9304_v20  ;;  %v5215_v56 = vmul.f32 %v9306_v30, %v9306_v30  ;;  %v5095_v50 = vadd.f32 %v6083_v55, %v9183_v4  ;;  %v5089_v34 = vpop.f32.mrb[37].mxu1 }
 0xa46   : > { %v5322_v8 = vmul.f32 %v6332_v15, %v9268_v14  ;;  %v5323_v41 = vmul.f32 %v6332_v15, %v9270_v9  ;;  %v5090_v17 = vadd.f32 %v5089_v34, %v9183_v4 }
 0xa47   : > { %v5265_v1 = vsel %vm224_vm0, %v5214_v26, 0.0  ;;  %v5266_v45 = vsel %vm224_vm0, %v5215_v56, 0.0  ;;  %v5163_v40 = vsel %vm224_vm0, %v5095_v50, 0.0 }
 0xa48   : > { %v5349_v28 = vmul.f32 %v9209_v12, %v5322_v8  ;;  %v5350_v54 = vmul.f32 %v9207_v44, %v5323_v41  ;;  %v5267_v61 = vadd.f32 %v5266_v45, %v5265_v1  ;;  %v5162_v35 = vsel %vm224_vm0, %v5090_v17, 0.0 }
 0xa49   : > { %v5164_v37 = vadd.f32 %v5163_v40, %v5162_v35 }
 0xa4a   : > { %v5376_v14 = vadd.f32 %v9215_v25, %v5349_v28  ;;  %v5377_v9 = vadd.f32 %v9213_v47, %v5350_v54  ;;  %v5268_v49 = vrot.slane %v5267_v61, 4 }
 0xa4b   : > { %v6334_v19 = vpop.eup %6333  ;;  %v5165_v27 = vrot.slane %v5164_v37, 4 }
 0xa4c   : > { %vm5392_vm9 = vcmp.ge.f32.partialorder %v5376_v14, 0.0  ;;  %vm5393_vm4 = vcmp.ge.f32.partialorder %v5377_v9, 0.0  ;;  %v5412_v0 = vmul.f32 %v9219_v58, %v5376_v14  ;;  %v5413_v7 = vmul.f32 %v9219_v58, %v5377_v9 }
 0xa4d   : > { %v5324_v29 = vmul.f32 %v6334_v19, %v9278_v16  ;;  %v5325_v18 = vmul.f32 %v6334_v19, %v9280_v38  ;;  %v5269_v46 = vadd.f32 %v5268_v49, %v5267_v61  ;;  %v5166_v22 = vadd.f32 %v5165_v27, %v5164_v37 }
 0xa4e   : > { %v5428_v57 = vsel %vm5392_vm9, %v5376_v14, %v5412_v0  ;;  %v5429_v42 = vsel %vm5393_vm4, %v5377_v9, %v5413_v7 }
 0xa4f   : > { %5444 = vst.msk [vmem:[%s9230_s26 + $0x30] sm:$0xff] %vm224_vm0, %v5428_v57  ;;  %5445 = vst.msk [vmem:[%s9230_s26 + $0x38] sm:$0xff] %vm224_vm0, %v5429_v42  ;;  %v5351_v43 = vmul.f32 %v9209_v12, %v5324_v29  ;;  %v5352_v5 = vmul.f32 %v9207_v44, %v5325_v18  ;;  %v5270_v11 = vrot.slane %v5269_v46, 2  ;;  %v5167_v2 = vrot.slane %v5166_v22, 2 }
 0xa51   : > { %v5378_v16 = vadd.f32 %v9215_v25, %v5351_v43  ;;  %v5379_v38 = vadd.f32 %v9213_v47, %v5352_v5  ;;  %v5271_v6 = vadd.f32 %v5270_v11, %v5269_v46  ;;  %v5168_v10 = vadd.f32 %v5167_v2, %v5166_v22 }
 0xa53   : > { %vm5394_vm13 = vcmp.ge.f32.partialorder %v5378_v16, 0.0  ;;  %vm5395_vm15 = vcmp.ge.f32.partialorder %v5379_v38, 0.0  ;;  %v5414_v33 = vmul.f32 %v9219_v58, %v5378_v16  ;;  %v5415_v51 = vmul.f32 %v9219_v58, %v5379_v38 }
 0xa54   : > { %v5272_v3 = vrot.slane %v5271_v6, 1  ;;  %v5169_v59 = vrot.slane %v5168_v10, 1 }
 0xa55   : > { %v5430_v24 = vsel %vm5394_vm13, %v5378_v16, %v5414_v33  ;;  %v5431_v39 = vsel %vm5395_vm15, %v5379_v38, %v5415_v51 }
 0xa56   : > { %5446 = vst.msk [vmem:[%s9230_s26 + $0x40] sm:$0xff] %vm224_vm0, %v5430_v24  ;;  %5447 = vst.msk [vmem:[%s9230_s26 + $0x48] sm:$0xff] %vm224_vm0, %v5431_v39  ;;  %v5273_v60 = vadd.f32 %v5272_v3, %v5271_v6  ;;  %v5170_v48 = vadd.f32 %v5169_v59, %v5168_v10 }
 0xa58   : > { %v5297_v63 = vmul.f32 0.0625, %v5273_v60  ;;  %v5186_v31 = vmul.f32 0.0625, %v5170_v48 }
 0xa5a   : > { %v5305_v62 = vadd.f32 1e-05, %v5297_v63  ;;  %v5200_v53 = vsub.f32 %v5090_v17, %v5186_v31  ;;  %v5201_v23 = vsub.f32 %v5095_v50, %v5186_v31 }
 0xa5c   : > { %6335 = vrsqrt.f32 %v5305_v62  ;;  %v5216_v52 = vmul.f32 %v5200_v53, %v5200_v53  ;;  %v5217_v36 = vmul.f32 %v5201_v23, %v5201_v23  ;;  %v6086_v32 = vpop.f32.mrb[38].mxu1 }
 0xa5d   : > { %v5105_v21 = vadd.f32 %v6086_v32, %v9183_v4  ;;  %v5099_v13 = vpop.f32.mrb[39].mxu1 }
 0xa5e   : > { %v5274_v55 = vsel %vm224_vm0, %v5216_v52, 0.0  ;;  %v5275_v15 = vsel %vm224_vm0, %v5217_v36, 0.0  ;;  %v5100_v26 = vadd.f32 %v5099_v13, %v9183_v4 }
 0xa5f   : > { %v5276_v56 = vadd.f32 %v5275_v15, %v5274_v55  ;;  %v5172_v34 = vsel %vm224_vm0, %v5105_v21, 0.0 }
 0xa60   : > { %v5171_v8 = vsel %vm224_vm0, %v5100_v26, 0.0 }
 0xa61   : > { %v5277_v41 = vrot.slane %v5276_v56, 4  ;;  %v5173_v50 = vadd.f32 %v5172_v34, %v5171_v8 }
 0xa63   : > { %v5278_v17 = vadd.f32 %v5277_v41, %v5276_v56  ;;  %v5174_v1 = vrot.slane %v5173_v50, 4 }
 0xa65   : > { %v5279_v45 = vrot.slane %v5278_v17, 2  ;;  %v5175_v40 = vadd.f32 %v5174_v1, %v5173_v50 }
 0xa66   : > { %v6336_v28 = vpop.eup %6335 }
 0xa67   : > { %v5326_v54 = vmul.f32 %v6336_v28, %v9304_v20  ;;  %v5327_v61 = vmul.f32 %v6336_v28, %v9306_v30  ;;  %v5280_v35 = vadd.f32 %v5279_v45, %v5278_v17  ;;  %v5176_v37 = vrot.slane %v5175_v40, 2 }
 0xa69   : > { %v5353_v4 = vmul.f32 %v9209_v12, %v5326_v54  ;;  %v5354_v14 = vmul.f32 %v9207_v44, %v5327_v61  ;;  %v5281_v9 = vrot.slane %v5280_v35, 1  ;;  %v5177_v49 = vadd.f32 %v5176_v37, %v5175_v40 }
 0xa6b   : > { %v5380_v19 = vadd.f32 %v9215_v25, %v5353_v4  ;;  %v5381_v27 = vadd.f32 %v9213_v47, %v5354_v14  ;;  %v5282_v0 = vadd.f32 %v5281_v9, %v5280_v35  ;;  %v5178_v7 = vrot.slane %v5177_v49, 1 }
 0xa6d   : > { %vm5396_vm10 = vcmp.ge.f32.partialorder %v5380_v19, 0.0  ;;  %vm5397_vm5 = vcmp.ge.f32.partialorder %v5381_v27, 0.0  ;;  %v5416_v20 = vmul.f32 %v9219_v58, %v5380_v19  ;;  %v5417_v30 = vmul.f32 %v9219_v58, %v5381_v27 }
 0xa6e   : > { %v5298_v29 = vmul.f32 0.0625, %v5282_v0  ;;  %v5179_v18 = vadd.f32 %v5178_v7, %v5177_v49 }
 0xa6f   : > { %v5432_v46 = vsel %vm5396_vm10, %v5380_v19, %v5416_v20  ;;  %v5433_v22 = vsel %vm5397_vm5, %v5381_v27, %v5417_v30 }
 0xa70   : > { %5448 = vst.msk [vmem:[%s9230_s26 + $0x50] sm:$0xff] %vm224_vm0, %v5432_v46  ;;  %5449 = vst.msk [vmem:[%s9230_s26 + $0x58] sm:$0xff] %vm224_vm0, %v5433_v22  ;;  %v5306_v57 = vadd.f32 1e-05, %v5298_v29  ;;  %v5187_v42 = vmul.f32 0.0625, %v5179_v18 }
 0xa72   : > { %6337 = vrsqrt.f32 %v5306_v57  ;;  %v5202_v43 = vsub.f32 %v5100_v26, %v5187_v42  ;;  %v5203_v5 = vsub.f32 %v5105_v21, %v5187_v42 }
 0xa74   : > { %v5218_v11 = vmul.f32 %v5202_v43, %v5202_v43  ;;  %v5219_v2 = vmul.f32 %v5203_v5, %v5203_v5 }
 0xa76   : > { %v5283_v16 = vsel %vm224_vm0, %v5218_v11, 0.0  ;;  %v5284_v38 = vsel %vm224_vm0, %v5219_v2, 0.0 }
 0xa77   : > { %v5285_v6 = vadd.f32 %v5284_v38, %v5283_v16 }
 0xa79   : > { %v5286_v10 = vrot.slane %v5285_v6, 4 }
 0xa7b   : > { %v5287_v33 = vadd.f32 %v5286_v10, %v5285_v6 }
 0xa7c   : > { %v6338_v51 = vpop.eup %6337 }
 0xa7d   : > { %v5328_v3 = vmul.f32 %v6338_v51, %v5200_v53  ;;  %v5329_v59 = vmul.f32 %v6338_v51, %v5201_v23  ;;  %v5288_v24 = vrot.slane %v5287_v33, 2 }
 0xa7f   : > { %v5355_v39 = vmul.f32 %v9209_v12, %v5328_v3  ;;  %v5356_v60 = vmul.f32 %v9207_v44, %v5329_v59  ;;  %v5289_v48 = vadd.f32 %v5288_v24, %v5287_v33 }
 0xa81   : > { %v5382_v63 = vadd.f32 %v9215_v25, %v5355_v39  ;;  %v5383_v31 = vadd.f32 %v9213_v47, %v5356_v60  ;;  %v5290_v62 = vrot.slane %v5289_v48, 1 }
 0xa83   : > { %vm5398_vm12 = vcmp.ge.f32.partialorder %v5382_v63, 0.0  ;;  %vm5399_vm14 = vcmp.ge.f32.partialorder %v5383_v31, 0.0  ;;  %v5418_v52 = vmul.f32 %v9219_v58, %v5382_v63  ;;  %v5419_v53 = vmul.f32 %v9219_v58, %v5383_v31 }
 0xa84   : > { %v5291_v36 = vadd.f32 %v5290_v62, %v5289_v48 }
 0xa85   : > { %v5434_v23 = vsel %vm5398_vm12, %v5382_v63, %v5418_v52  ;;  %v5435_v32 = vsel %vm5399_vm14, %v5383_v31, %v5419_v53 }
 0xa86   : > { %5450 = vst.msk [vmem:[%s9230_s26 + $0x60] sm:$0xff] %vm224_vm0, %v5434_v23  ;;  %5451 = vst.msk [vmem:[%s9230_s26 + $0x68] sm:$0xff] %vm224_vm0, %v5435_v32  ;;  %v5299_v21 = vmul.f32 0.0625, %v5291_v36 }
 0xa88   : > { %v5307_v13 = vadd.f32 1e-05, %v5299_v21 }
 0xa8a   : > { %6339 = vrsqrt.f32 %v5307_v13 }
 0xa94   : > { %v6340_v55 = vpop.eup %6339 }
 0xa95   : > { %v5330_v15 = vmul.f32 %v6340_v55, %v5202_v43  ;;  %v5331_v26 = vmul.f32 %v6340_v55, %v5203_v5 }
 0xa97   : > { %v5357_v56 = vmul.f32 %v9209_v12, %v5330_v15  ;;  %v5358_v34 = vmul.f32 %v9207_v44, %v5331_v26 }
 0xa99   : > { %v5384_v8 = vadd.f32 %v9215_v25, %v5357_v56  ;;  %v5385_v41 = vadd.f32 %v9213_v47, %v5358_v34 }
 0xa9b   : > { %vm5400_vm11 = vcmp.ge.f32.partialorder %v5384_v8, 0.0  ;;  %vm5401_vm1 = vcmp.ge.f32.partialorder %v5385_v41, 0.0  ;;  %v5420_v50 = vmul.f32 %v9219_v58, %v5384_v8  ;;  %v5421_v17 = vmul.f32 %v9219_v58, %v5385_v41 }
 0xa9d   : > { %v5436_v1 = vsel %vm5400_vm11, %v5384_v8, %v5420_v50  ;;  %v5437_v45 = vsel %vm5401_vm1, %v5385_v41, %v5421_v17 }
 0xa9e   : > { %5452 = vst.msk [vmem:[%s9230_s26 + $0x70] sm:$0xff] %vm224_vm0, %v5436_v1  ;;  %5453 = vst.msk [vmem:[%s9230_s26 + $0x78] sm:$0xff] %vm224_vm0, %v5437_v45 }
 0xa9f PF: > { %s14_s15 = sadd.s32 1, %s6347_s15  }
 0xaa0   : > { %p11_p4 = scmp.ge.s32.totalorder %s14_s15, 4  }
 0xaa2   :  { %13 = sbr.rel (!%p11_p4) target bundleno = 1 (0x1), region = 70 }

</bundles_post_ra>
